<compile_context>
chip_gen: v7x
topology: tpu7x:2x2x1
jax: 0.10.0
libtpu: 0.0.40
codegen_flags: <defaults>
</compile_context>

<pallas_src>
import functools

import jax
import jax.numpy as jnp
from jax.experimental import pallas as pl
from jax.experimental.pallas import tpu as pltpu

EPS = 1e-5
_STATIC_UNROLL_MAX = 4


def _decoder_kernel(x_ref, w0_ref, wh_ref, gamma_ref, beta_ref,
                    wout_ref, bout_ref, out_ref, *, num_gn, act):
    bt, n, c = x_ref.shape
    hdim = w0_ref.shape[1]
    opad = wout_ref.shape[1]
    num_hidden = wh_ref.shape[0]
    group_size = hdim // num_gn
    inv_count = 1.0 / float(n * group_size)
    m = bt * n

    # Block-diagonal group projector P[i, j] = 1 iff channels i and j share a
    # group.  Built in-register from iota one-hots (no integer division, no
    # extra HBM inputs); the single Mg @ Mg^T dot runs once per grid step,
    # *off* the per-layer GroupNorm critical path.
    ch = jax.lax.broadcasted_iota(jnp.int32, (hdim, num_gn), 0)
    glo = jax.lax.broadcasted_iota(jnp.int32, (hdim, num_gn), 1) * group_size
    mg = jnp.where(jnp.logical_and(ch >= glo, ch < glo + group_size),
                   1.0, 0.0)                                    # [H, G]
    cht = jax.lax.broadcasted_iota(jnp.int32, (num_gn, hdim), 1)
    glot = jax.lax.broadcasted_iota(jnp.int32, (num_gn, hdim), 0) * group_size
    mgt = jnp.where(jnp.logical_and(cht >= glot, cht < glot + group_size),
                    1.0, 0.0)                                   # [G, H]
    proj = jnp.dot(mg, mgt, preferred_element_type=jnp.float32)  # [H, H]

    def gn_act(h2, gamma_row, beta_row):
        # h2: [M, H] f32.  GroupNorm stats per sample over (N, group_size).
        h3 = h2.reshape(bt, n, hdim)
        s = jnp.sum(h3, axis=1)                                 # [Bt, H]
        sq = jnp.sum(h3 * h3, axis=1)                           # [Bt, H]
        stats = jnp.concatenate([s, sq], axis=0)                # [2*Bt, H]
        # Single group-reduce + group->channel broadcast dot.  HIGHEST
        # precision keeps the f32 sums un-truncated before the E[x^2]-E[x]^2
        # cancellation below.
        expanded = jnp.dot(stats, proj,
                           preferred_element_type=jnp.float32,
                           precision=jax.lax.Precision.HIGHEST)  # [2*Bt, H]
        mean_c = expanded[:bt] * inv_count                      # [Bt, H]
        var_c = jnp.maximum(expanded[bt:] * inv_count - mean_c * mean_c, 0.0)
        istd_c = jax.lax.rsqrt(var_c + EPS)                     # [Bt, H]
        # fold gamma/beta: hn = h*scale + shift  (1 mul + 1 add on [M, H])
        scale = istd_c * gamma_row                              # [Bt, H]
        shift = beta_row - mean_c * scale                       # [Bt, H]
        h3n = h3 * scale[:, None, :] + shift[:, None, :]
        if act == "relu":
            h3n = jnp.maximum(h3n, 0.0)
        elif act == "lrelu":
            h3n = jnp.where(h3n >= 0.0, h3n, 0.01 * h3n)
        return h3n.reshape(m, hdim)

    # layer 0: in_dim -> hid_dim (no bias); x already bf16 (cast in wrapper),
    # f32 MXU accumulation.
    x = x_ref[...].reshape(m, c)
    h = jnp.dot(x, w0_ref[...], preferred_element_type=jnp.float32)
    h = gn_act(h, gamma_ref[0], beta_ref[0])

    if num_hidden <= _STATIC_UNROLL_MAX:
        # shallow decoder: static unroll (best scheduling visibility)
        for l in range(num_hidden):
            h = jnp.dot(h.astype(jnp.bfloat16), wh_ref[l],
                        preferred_element_type=jnp.float32)
            h = gn_act(h, gamma_ref[l + 1], beta_ref[l + 1])
    else:
        # deep decoder: keep a single layer's activations live, tight loop body
        def layer(l, hc):
            hn = jnp.dot(hc.astype(jnp.bfloat16), wh_ref[l],
                         preferred_element_type=jnp.float32)
            return gn_act(hn, gamma_ref[l + 1], beta_ref[l + 1])
        h = jax.lax.fori_loop(0, num_hidden, layer, h)

    # output projection (with bias), lane-dense padded to opad columns
    out = jnp.dot(h.astype(jnp.bfloat16), wout_ref[...],
                  preferred_element_type=jnp.float32) + bout_ref[...]
    out_ref[...] = out.reshape(bt, n, opad).astype(out_ref.dtype)


def _vmem_capacity_bytes():
    try:
        info = pltpu.get_tpu_info()
    except Exception:
        return None
    for name in ("vmem_capacity_bytes", "vmem_size_bytes", "vmem_bytes"):
        cap = getattr(info, name, None)
        if cap:
            return int(cap)
    return None


def _generation_params():
    """Generation-aware VMEM budget / target rows / vmem limit / min grid."""
    cap = _vmem_capacity_bytes()
    if cap is not None and cap >= 100 * (1 << 20):
        # v5e / v6e class: 128 MiB VMEM, single TensorCore -> big blocks,
        # fewer grid steps, M >= 512 rows to hide the GN latency chain.
        return dict(budget_bytes=96 << 20, target_rows=512,
                    vmem_limit_bytes=112 << 20, min_grid=1)
    # v7x class (64 MiB per TC) or unknown chip: leave headroom for compiler
    # scratch / pipelining and keep grid >= 2 so both TensorCores get work.
    return dict(budget_bytes=36 << 20, target_rows=256,
                vmem_limit_bytes=56 << 20, min_grid=2)


def _pick_block_b(B, N, C, H, O_pad, L, *, budget_bytes, target_rows, min_grid):
    """Largest divisor of B whose per-step working set fits the VMEM budget,
    keeps M = Bt*N near the target MXU row count, and leaves a grid of at
    least `min_grid` steps (both TensorCores fed on 2-TC chips)."""
    if N % 8 != 0:
        return 1  # keep per-sample blocks so in-kernel reshapes stay trivial
    max_bt = max(1, B // max(1, min_grid))
    # weights/params budgeted single-buffered (pipeline_mode=pl.Buffered(1))
    fixed = ((C * H + L * H * H + H * O_pad) * 2      # bf16 weights
             + (2 * (L + 1) * H + O_pad) * 4)         # f32 GN params + bias
    feasible = []
    for bt in range(1, max_bt + 1):
        if B % bt:
            continue
        m_rows = bt * N
        per_step = (2 * bt * N * C * 2          # x block, bf16, double-buffered
                    + 2 * bt * N * O_pad * 4    # out block, f32, double-buffered
                    + 4 * m_rows * H * 4)       # live activations (headroom)
        if m_rows <= max(target_rows, N) and fixed + per_step <= budget_bytes:
            feasible.append(bt)
    if not feasible:
        return 1
    # prefer M that is a multiple of 128 (full MXU / vreg rows), then largest
    return max(feasible, key=lambda bt: (((bt * N) % 128) == 0, bt))


def base_decoder_forward(x, w0, wh, gammas, betas, wout, bout, num_gn,
                         *, act="relu", block_b=None):
    """x: [B, N, in_dim] -> [B, N, out_shape]"""
    B, N, C = x.shape
    H = w0.shape[1]
    O = wout.shape[1]
    L = wh.shape[0]
    assert H % num_gn == 0, "hid_dim must be divisible by num_gn"

    gen = _generation_params()

    # lane-dense output: zero-pad the tiny projection to a multiple of 128
    O_pad = ((O + 127) // 128) * 128
    wout_p = jnp.zeros((H, O_pad), jnp.float32).at[:, :O].set(wout)
    bout_p = jnp.zeros((1, O_pad), jnp.float32).at[:, :O].set(bout.reshape(1, O))

    # bf16 operands for all big matmuls (halves weight/x DMA and VMEM);
    # GroupNorm parameters stay f32.
    x_bf = x.astype(jnp.bfloat16)
    w0_bf = w0.astype(jnp.bfloat16)
    wh_bf = wh.astype(jnp.bfloat16)
    wout_bf = wout_p.astype(jnp.bfloat16)
    gammas_r = gammas.reshape(L + 1, 1, H).astype(jnp.float32)
    betas_r = betas.reshape(L + 1, 1, H).astype(jnp.float32)

    if block_b is None:
        block_b = _pick_block_b(
            B, N, C, H, O_pad, L,
            budget_bytes=gen["budget_bytes"],
            target_rows=gen["target_rows"],
            min_grid=gen["min_grid"] if B >= 2 else 1)
    assert B % block_b == 0, "block_b must divide B"
    grid = (B // block_b,)

    kernel = functools.partial(_decoder_kernel, num_gn=num_gn, act=act)

    def make_call(single_buffer_weights):
        # constant-index operands: a second pipeline buffer is pure VMEM waste
        const = ({"pipeline_mode": pl.Buffered(1)}
                 if single_buffer_weights else {})
        return pl.pallas_call(
            kernel,
            out_shape=jax.ShapeDtypeStruct((B, N, O_pad), jnp.float32),
            grid_spec=pltpu.PrefetchScalarGridSpec(
                num_scalar_prefetch=0,
                grid=grid,
                in_specs=[
                    pl.BlockSpec((block_b, N, C), lambda b: (b, 0, 0)),        # x (bf16)
                    pl.BlockSpec((C, H), lambda b: (0, 0), **const),           # w0
                    pl.BlockSpec((L, H, H), lambda b: (0, 0, 0), **const),     # wh
                    pl.BlockSpec((L + 1, 1, H), lambda b: (0, 0, 0), **const),  # gammas
                    pl.BlockSpec((L + 1, 1, H), lambda b: (0, 0, 0), **const),  # betas
                    pl.BlockSpec((H, O_pad), lambda b: (0, 0), **const),       # wout
                    pl.BlockSpec((1, O_pad), lambda b: (0, 0), **const),       # bout
                ],
                out_specs=pl.BlockSpec((block_b, N, O_pad), lambda b: (b, 0, 0)),
            ),
            compiler_params=pltpu.CompilerParams(
                dimension_semantics=("parallel",),
                vmem_limit_bytes=gen["vmem_limit_bytes"]),
        )

    args = (x_bf, w0_bf, wh_bf, gammas_r, betas_r, wout_bf, bout_p)
    try:
        out = make_call(True)(*args)
    except Exception:
        # runtime rejected Buffered(1) single-buffering -> default 2-deep
        out = make_call(False)(*args)

    # TODO(synk): at production N, keep consumers on the padded layout (or emit
    # bf16 / masked O=9 stores) instead of this post-call slice.
    return out[:, :, :O]


def reference_forward(x, w0, wh, gammas, betas, wout, bout, num_gn):
    """Plain-JAX f32 reference mirroring the PyTorch module (act='relu')."""
    def gn_relu(h, g, b):
        B, N, H = h.shape
        gs = H // num_gn
        hr = h.reshape(B, N, num_gn, gs)
        mean = hr.mean(axis=(1, 3), keepdims=True)
        var = hr.var(axis=(1, 3), keepdims=True)      # biased, like torch GN
        hn = ((hr - mean) / jnp.sqrt(var + EPS)).reshape(B, N, H)
        return jnp.maximum(hn * g + b, 0.0)

    h = x @ w0
    h = gn_relu(h, gammas[0], betas[0])
    for l in range(wh.shape[0]):
        h = h @ wh[l]
        h = gn_relu(h, gammas[l + 1], betas[l + 1])
    return h @ wout + bout[0]


if __name__ == "__main__":
    # small, module-consistent shapes (hid_dim=128, num_gn=32, out_shape=9)
    B, N = 8, 64
    in_dim, hid_dim, num_gn, num_layer, out_shape = 16, 128, 32, 2, 9

    key = jax.random.PRNGKey(0)
    ks = jax.random.split(key, 8)
    x = jax.random.normal(ks[0], (B, N, in_dim), dtype=jnp.float32)

    # deterministic synthetic parameters (nn.Linear stored as [in, out] here)
    w0 = 0.2 * jax.random.normal(ks[1], (in_dim, hid_dim), dtype=jnp.float32)
    wh = 0.1 * jax.random.normal(ks[2], (num_layer, hid_dim, hid_dim), dtype=jnp.float32)
    gammas = 1.0 + 0.1 * jax.random.normal(ks[3], (num_layer + 1, hid_dim), dtype=jnp.float32)
    betas = 0.1 * jax.random.normal(ks[4], (num_layer + 1, hid_dim), dtype=jnp.float32)
    wout = 0.2 * jax.random.normal(ks[5], (hid_dim, out_shape), dtype=jnp.float32)
    bout = 0.1 * jax.random.normal(ks[6], (1, out_shape), dtype=jnp.float32)

    out = base_decoder_forward(x, w0, wh, gammas, betas, wout, bout, num_gn)
    out = jax.block_until_ready(out)

    ref = reference_forward(x, w0, wh, gammas, betas, wout, bout, num_gn)
    assert out.shape == (B, N, out_shape)
    # bf16 MXU operands with f32 accumulation vs. an f32 reference ->
    # correspondingly relaxed tolerance.
    err = jnp.max(jnp.abs(out - ref))
    assert jnp.allclose(out, ref, rtol=5e-2, atol=5e-2), f"max abs err {err}"

    print("KERNEL_OK")
</pallas_src>

<mosaic_0001>
module attributes {stable_mosaic.version = 11 : i64} {
  func.func @_decoder_kernel(%arg0: i32, %arg1: memref<4x64x16xbf16, #tpu.memory_space<vmem>>, %arg2: memref<16x128xbf16, #tpu.memory_space<vmem>>, %arg3: memref<2x128x128xbf16, #tpu.memory_space<vmem>>, %arg4: memref<3x1x128xf32, #tpu.memory_space<vmem>>, %arg5: memref<3x1x128xf32, #tpu.memory_space<vmem>>, %arg6: memref<128x128xbf16, #tpu.memory_space<vmem>>, %arg7: memref<1x128xf32, #tpu.memory_space<vmem>>, %arg8: memref<4x64x128xf32, #tpu.memory_space<vmem>>) attributes {dimension_semantics = [#tpu.dimension_semantics<parallel>], iteration_bounds = array<i64: 2>, scalar_prefetch = 0 : i64, scratch_operands = 0 : i64, tpu.core_type = #tpu.core_type<tc>, window_params = [{transform_indices = @transform_0, window_bounds = array<i64: 4, 64, 16>}, {pipeline_mode = #tpu.pipeline_mode<synchronous>, transform_indices = @transform_1, window_bounds = array<i64: 16, 128>}, {pipeline_mode = #tpu.pipeline_mode<synchronous>, transform_indices = @transform_2, window_bounds = array<i64: 2, 128, 128>}, {pipeline_mode = #tpu.pipeline_mode<synchronous>, transform_indices = @transform_3, window_bounds = array<i64: 3, 1, 128>}, {pipeline_mode = #tpu.pipeline_mode<synchronous>, transform_indices = @transform_4, window_bounds = array<i64: 3, 1, 128>}, {pipeline_mode = #tpu.pipeline_mode<synchronous>, transform_indices = @transform_5, window_bounds = array<i64: 128, 128>}, {pipeline_mode = #tpu.pipeline_mode<synchronous>, transform_indices = @transform_6, window_bounds = array<i64: 1, 128>}, {transform_indices = @transform_7, window_bounds = array<i64: 4, 64, 128>}]} {
    %0 = tpu.iota {dimensions = array<i32: 0>} : vector<128x32xi32>
    %1 = tpu.iota {dimensions = array<i32: 1>} : vector<128x32xi32>
    %c4_i32 = arith.constant 4 : i32
    %2 = vector.broadcast %c4_i32 : i32 to vector<128x32xi32>
    %3 = arith.muli %1, %2 : vector<128x32xi32>
    %4 = arith.cmpi sge, %0, %3 : vector<128x32xi32>
    %c4_i32_0 = arith.constant 4 : i32
    %5 = vector.broadcast %c4_i32_0 : i32 to vector<128x32xi32>
    %6 = arith.addi %3, %5 : vector<128x32xi32>
    %7 = arith.cmpi slt, %0, %6 : vector<128x32xi32>
    %8 = arith.andi %4, %7 : vector<128x32xi1>
    %cst = arith.constant 1.000000e+00 : f32
    %cst_1 = arith.constant 0.000000e+00 : f32
    %9 = vector.broadcast %cst : f32 to vector<128x32xf32>
    %10 = vector.broadcast %cst_1 : f32 to vector<128x32xf32>
    %11 = arith.select %8, %9, %10 : vector<128x32xi1>, vector<128x32xf32>
    %12 = tpu.iota {dimensions = array<i32: 1>} : vector<32x128xi32>
    %13 = tpu.iota {dimensions = array<i32: 0>} : vector<32x128xi32>
    %c4_i32_2 = arith.constant 4 : i32
    %14 = vector.broadcast %c4_i32_2 : i32 to vector<32x128xi32>
    %15 = arith.muli %13, %14 : vector<32x128xi32>
    %16 = arith.cmpi sge, %12, %15 : vector<32x128xi32>
    %c4_i32_3 = arith.constant 4 : i32
    %17 = vector.broadcast %c4_i32_3 : i32 to vector<32x128xi32>
    %18 = arith.addi %15, %17 : vector<32x128xi32>
    %19 = arith.cmpi slt, %12, %18 : vector<32x128xi32>
    %20 = arith.andi %16, %19 : vector<32x128xi1>
    %cst_4 = arith.constant 1.000000e+00 : f32
    %cst_5 = arith.constant 0.000000e+00 : f32
    %21 = vector.broadcast %cst_4 : f32 to vector<32x128xf32>
    %22 = vector.broadcast %cst_5 : f32 to vector<32x128xf32>
    %23 = arith.select %20, %21, %22 : vector<32x128xi1>, vector<32x128xf32>
    %cst_6 = arith.constant dense<0.000000e+00> : vector<128x128xf32>
    %24 = tpu.matmul %11, %23, %cst_6 {dimension_numbers = #tpu.dot_dimension_numbers<[1], [0], [0], [1], [0, 0, 1, 1], [], []>} : vector<128x32xf32>, vector<32x128xf32>, vector<128x128xf32> -> vector<128x128xf32>
    %c0 = arith.constant 0 : index
    %c0_7 = arith.constant 0 : index
    %c0_8 = arith.constant 0 : index
    %25 = vector.load %arg1[%c0, %c0_7, %c0_8] : memref<4x64x16xbf16, #tpu.memory_space<vmem>>, vector<4x64x16xbf16>
    %26 = vector.shape_cast %25 : vector<4x64x16xbf16> to vector<256x16xbf16>
    %c0_9 = arith.constant 0 : index
    %c0_10 = arith.constant 0 : index
    %27 = vector.load %arg2[%c0_9, %c0_10] : memref<16x128xbf16, #tpu.memory_space<vmem>>, vector<16x128xbf16>
    %cst_11 = arith.constant dense<0.000000e+00> : vector<256x128xf32>
    %28 = tpu.matmul %26, %27, %cst_11 {dimension_numbers = #tpu.dot_dimension_numbers<[1], [0], [0], [1], [0, 0, 1, 1], [], []>} : vector<256x16xbf16>, vector<16x128xbf16>, vector<256x128xf32> -> vector<256x128xf32>
    %c0_12 = arith.constant 0 : index
    %c0_13 = arith.constant 0 : index
    %c0_14 = arith.constant 0 : index
    %29 = vector.load %arg4[%c0_12, %c0_13, %c0_14] : memref<3x1x128xf32, #tpu.memory_space<vmem>>, vector<1x1x128xf32>
    %30 = vector.shape_cast %29 : vector<1x1x128xf32> to vector<1x128xf32>
    %c0_15 = arith.constant 0 : index
    %c0_16 = arith.constant 0 : index
    %c0_17 = arith.constant 0 : index
    %31 = vector.load %arg5[%c0_15, %c0_16, %c0_17] : memref<3x1x128xf32, #tpu.memory_space<vmem>>, vector<1x1x128xf32>
    %32 = vector.shape_cast %31 : vector<1x1x128xf32> to vector<1x128xf32>
    %33 = vector.shape_cast %28 : vector<256x128xf32> to vector<4x64x128xf32>
    %cst_18 = arith.constant dense<0.000000e+00> : vector<4x128xf32>
    %34 = vector.multi_reduction <add>, %33, %cst_18 [1] : vector<4x64x128xf32> to vector<4x128xf32>
    %35 = arith.mulf %33, %33 : vector<4x64x128xf32>
    %cst_19 = arith.constant dense<0.000000e+00> : vector<4x128xf32>
    %36 = vector.multi_reduction <add>, %35, %cst_19 [1] : vector<4x64x128xf32> to vector<4x128xf32>
    %37 = tpu.concatenate %34, %36 in 0 : vector<4x128xf32>, vector<4x128xf32> -> vector<8x128xf32>
    %cst_20 = arith.constant dense<0.000000e+00> : vector<8x128xf32>
    %38 = tpu.matmul %37, %24, %cst_20 {dimension_numbers = #tpu.dot_dimension_numbers<[1], [0], [0], [1], [0, 0, 1, 1], [], []>, precision = #tpu.contract_precision<fp32>} : vector<8x128xf32>, vector<128x128xf32>, vector<8x128xf32> -> vector<8x128xf32>
    %39 = vector.extract_strided_slice %38 {offsets = [0, 0], sizes = [4, 128], strides = [1, 1]} : vector<8x128xf32> to vector<4x128xf32>
    %cst_21 = arith.constant 3.906250e-03 : f32
    %40 = vector.broadcast %cst_21 : f32 to vector<4x128xf32>
    %41 = arith.mulf %39, %40 : vector<4x128xf32>
    %42 = vector.extract_strided_slice %38 {offsets = [4, 0], sizes = [4, 128], strides = [1, 1]} : vector<8x128xf32> to vector<4x128xf32>
    %cst_22 = arith.constant 3.906250e-03 : f32
    %43 = vector.broadcast %cst_22 : f32 to vector<4x128xf32>
    %44 = arith.mulf %42, %43 : vector<4x128xf32>
    %45 = arith.mulf %41, %41 : vector<4x128xf32>
    %46 = arith.subf %44, %45 : vector<4x128xf32>
    %cst_23 = arith.constant 0.000000e+00 : f32
    %47 = vector.broadcast %cst_23 : f32 to vector<4x128xf32>
    %48 = arith.maximumf %46, %47 : vector<4x128xf32>
    %cst_24 = arith.constant 9.99999974E-6 : f32
    %49 = vector.broadcast %cst_24 : f32 to vector<4x128xf32>
    %50 = arith.addf %48, %49 : vector<4x128xf32>
    %51 = math.rsqrt %50 : vector<4x128xf32>
    %52 = vector.broadcast %30 : vector<1x128xf32> to vector<4x128xf32>
    %53 = arith.mulf %51, %52 : vector<4x128xf32>
    %54 = arith.mulf %41, %53 : vector<4x128xf32>
    %55 = vector.broadcast %32 : vector<1x128xf32> to vector<4x128xf32>
    %56 = arith.subf %55, %54 : vector<4x128xf32>
    %57 = vector.shape_cast %53 : vector<4x128xf32> to vector<4x1x128xf32>
    %58 = vector.broadcast %57 : vector<4x1x128xf32> to vector<4x64x128xf32>
    %59 = arith.mulf %33, %58 : vector<4x64x128xf32>
    %60 = vector.shape_cast %56 : vector<4x128xf32> to vector<4x1x128xf32>
    %61 = vector.broadcast %60 : vector<4x1x128xf32> to vector<4x64x128xf32>
    %62 = arith.addf %59, %61 : vector<4x64x128xf32>
    %cst_25 = arith.constant 0.000000e+00 : f32
    %63 = vector.broadcast %cst_25 : f32 to vector<4x64x128xf32>
    %64 = arith.maximumf %62, %63 : vector<4x64x128xf32>
    %65 = vector.shape_cast %64 : vector<4x64x128xf32> to vector<256x128xf32>
    %66 = arith.truncf %65 : vector<256x128xf32> to vector<256x128xbf16>
    %c0_26 = arith.constant 0 : index
    %c0_27 = arith.constant 0 : index
    %c0_28 = arith.constant 0 : index
    %67 = vector.load %arg3[%c0_26, %c0_27, %c0_28] : memref<2x128x128xbf16, #tpu.memory_space<vmem>>, vector<1x128x128xbf16>
    %68 = vector.shape_cast %67 : vector<1x128x128xbf16> to vector<128x128xbf16>
    %cst_29 = arith.constant dense<0.000000e+00> : vector<256x128xf32>
    %69 = tpu.matmul %66, %68, %cst_29 {dimension_numbers = #tpu.dot_dimension_numbers<[1], [0], [0], [1], [0, 0, 1, 1], [], []>} : vector<256x128xbf16>, vector<128x128xbf16>, vector<256x128xf32> -> vector<256x128xf32>
    %c1 = arith.constant 1 : index
    %c0_30 = arith.constant 0 : index
    %c0_31 = arith.constant 0 : index
    %70 = vector.load %arg4[%c1, %c0_30, %c0_31] : memref<3x1x128xf32, #tpu.memory_space<vmem>>, vector<1x1x128xf32>
    %71 = vector.shape_cast %70 : vector<1x1x128xf32> to vector<1x128xf32>
    %c1_32 = arith.constant 1 : index
    %c0_33 = arith.constant 0 : index
    %c0_34 = arith.constant 0 : index
    %72 = vector.load %arg5[%c1_32, %c0_33, %c0_34] : memref<3x1x128xf32, #tpu.memory_space<vmem>>, vector<1x1x128xf32>
    %73 = vector.shape_cast %72 : vector<1x1x128xf32> to vector<1x128xf32>
    %74 = vector.shape_cast %69 : vector<256x128xf32> to vector<4x64x128xf32>
    %cst_35 = arith.constant dense<0.000000e+00> : vector<4x128xf32>
    %75 = vector.multi_reduction <add>, %74, %cst_35 [1] : vector<4x64x128xf32> to vector<4x128xf32>
    %76 = arith.mulf %74, %74 : vector<4x64x128xf32>
    %cst_36 = arith.constant dense<0.000000e+00> : vector<4x128xf32>
    %77 = vector.multi_reduction <add>, %76, %cst_36 [1] : vector<4x64x128xf32> to vector<4x128xf32>
    %78 = tpu.concatenate %75, %77 in 0 : vector<4x128xf32>, vector<4x128xf32> -> vector<8x128xf32>
    %cst_37 = arith.constant dense<0.000000e+00> : vector<8x128xf32>
    %79 = tpu.matmul %78, %24, %cst_37 {dimension_numbers = #tpu.dot_dimension_numbers<[1], [0], [0], [1], [0, 0, 1, 1], [], []>, precision = #tpu.contract_precision<fp32>} : vector<8x128xf32>, vector<128x128xf32>, vector<8x128xf32> -> vector<8x128xf32>
    %80 = vector.extract_strided_slice %79 {offsets = [0, 0], sizes = [4, 128], strides = [1, 1]} : vector<8x128xf32> to vector<4x128xf32>
    %cst_38 = arith.constant 3.906250e-03 : f32
    %81 = vector.broadcast %cst_38 : f32 to vector<4x128xf32>
    %82 = arith.mulf %80, %81 : vector<4x128xf32>
    %83 = vector.extract_strided_slice %79 {offsets = [4, 0], sizes = [4, 128], strides = [1, 1]} : vector<8x128xf32> to vector<4x128xf32>
    %cst_39 = arith.constant 3.906250e-03 : f32
    %84 = vector.broadcast %cst_39 : f32 to vector<4x128xf32>
    %85 = arith.mulf %83, %84 : vector<4x128xf32>
    %86 = arith.mulf %82, %82 : vector<4x128xf32>
    %87 = arith.subf %85, %86 : vector<4x128xf32>
    %cst_40 = arith.constant 0.000000e+00 : f32
    %88 = vector.broadcast %cst_40 : f32 to vector<4x128xf32>
    %89 = arith.maximumf %87, %88 : vector<4x128xf32>
    %cst_41 = arith.constant 9.99999974E-6 : f32
    %90 = vector.broadcast %cst_41 : f32 to vector<4x128xf32>
    %91 = arith.addf %89, %90 : vector<4x128xf32>
    %92 = math.rsqrt %91 : vector<4x128xf32>
    %93 = vector.broadcast %71 : vector<1x128xf32> to vector<4x128xf32>
    %94 = arith.mulf %92, %93 : vector<4x128xf32>
    %95 = arith.mulf %82, %94 : vector<4x128xf32>
    %96 = vector.broadcast %73 : vector<1x128xf32> to vector<4x128xf32>
    %97 = arith.subf %96, %95 : vector<4x128xf32>
    %98 = vector.shape_cast %94 : vector<4x128xf32> to vector<4x1x128xf32>
    %99 = vector.broadcast %98 : vector<4x1x128xf32> to vector<4x64x128xf32>
    %100 = arith.mulf %74, %99 : vector<4x64x128xf32>
    %101 = vector.shape_cast %97 : vector<4x128xf32> to vector<4x1x128xf32>
    %102 = vector.broadcast %101 : vector<4x1x128xf32> to vector<4x64x128xf32>
    %103 = arith.addf %100, %102 : vector<4x64x128xf32>
    %cst_42 = arith.constant 0.000000e+00 : f32
    %104 = vector.broadcast %cst_42 : f32 to vector<4x64x128xf32>
    %105 = arith.maximumf %103, %104 : vector<4x64x128xf32>
    %106 = vector.shape_cast %105 : vector<4x64x128xf32> to vector<256x128xf32>
    %107 = arith.truncf %106 : vector<256x128xf32> to vector<256x128xbf16>
    %c1_43 = arith.constant 1 : index
    %c0_44 = arith.constant 0 : index
    %c0_45 = arith.constant 0 : index
    %108 = vector.load %arg3[%c1_43, %c0_44, %c0_45] : memref<2x128x128xbf16, #tpu.memory_space<vmem>>, vector<1x128x128xbf16>
    %109 = vector.shape_cast %108 : vector<1x128x128xbf16> to vector<128x128xbf16>
    %cst_46 = arith.constant dense<0.000000e+00> : vector<256x128xf32>
    %110 = tpu.matmul %107, %109, %cst_46 {dimension_numbers = #tpu.dot_dimension_numbers<[1], [0], [0], [1], [0, 0, 1, 1], [], []>} : vector<256x128xbf16>, vector<128x128xbf16>, vector<256x128xf32> -> vector<256x128xf32>
    %c2 = arith.constant 2 : index
    %c0_47 = arith.constant 0 : index
    %c0_48 = arith.constant 0 : index
    %111 = vector.load %arg4[%c2, %c0_47, %c0_48] : memref<3x1x128xf32, #tpu.memory_space<vmem>>, vector<1x1x128xf32>
    %112 = vector.shape_cast %111 : vector<1x1x128xf32> to vector<1x128xf32>
    %c2_49 = arith.constant 2 : index
    %c0_50 = arith.constant 0 : index
    %c0_51 = arith.constant 0 : index
    %113 = vector.load %arg5[%c2_49, %c0_50, %c0_51] : memref<3x1x128xf32, #tpu.memory_space<vmem>>, vector<1x1x128xf32>
    %114 = vector.shape_cast %113 : vector<1x1x128xf32> to vector<1x128xf32>
    %115 = vector.shape_cast %110 : vector<256x128xf32> to vector<4x64x128xf32>
    %cst_52 = arith.constant dense<0.000000e+00> : vector<4x128xf32>
    %116 = vector.multi_reduction <add>, %115, %cst_52 [1] : vector<4x64x128xf32> to vector<4x128xf32>
    %117 = arith.mulf %115, %115 : vector<4x64x128xf32>
    %cst_53 = arith.constant dense<0.000000e+00> : vector<4x128xf32>
    %118 = vector.multi_reduction <add>, %117, %cst_53 [1] : vector<4x64x128xf32> to vector<4x128xf32>
    %119 = tpu.concatenate %116, %118 in 0 : vector<4x128xf32>, vector<4x128xf32> -> vector<8x128xf32>
    %cst_54 = arith.constant dense<0.000000e+00> : vector<8x128xf32>
    %120 = tpu.matmul %119, %24, %cst_54 {dimension_numbers = #tpu.dot_dimension_numbers<[1], [0], [0], [1], [0, 0, 1, 1], [], []>, precision = #tpu.contract_precision<fp32>} : vector<8x128xf32>, vector<128x128xf32>, vector<8x128xf32> -> vector<8x128xf32>
    %121 = vector.extract_strided_slice %120 {offsets = [0, 0], sizes = [4, 128], strides = [1, 1]} : vector<8x128xf32> to vector<4x128xf32>
    %cst_55 = arith.constant 3.906250e-03 : f32
    %122 = vector.broadcast %cst_55 : f32 to vector<4x128xf32>
    %123 = arith.mulf %121, %122 : vector<4x128xf32>
    %124 = vector.extract_strided_slice %120 {offsets = [4, 0], sizes = [4, 128], strides = [1, 1]} : vector<8x128xf32> to vector<4x128xf32>
    %cst_56 = arith.constant 3.906250e-03 : f32
    %125 = vector.broadcast %cst_56 : f32 to vector<4x128xf32>
    %126 = arith.mulf %124, %125 : vector<4x128xf32>
    %127 = arith.mulf %123, %123 : vector<4x128xf32>
    %128 = arith.subf %126, %127 : vector<4x128xf32>
    %cst_57 = arith.constant 0.000000e+00 : f32
    %129 = vector.broadcast %cst_57 : f32 to vector<4x128xf32>
    %130 = arith.maximumf %128, %129 : vector<4x128xf32>
    %cst_58 = arith.constant 9.99999974E-6 : f32
    %131 = vector.broadcast %cst_58 : f32 to vector<4x128xf32>
    %132 = arith.addf %130, %131 : vector<4x128xf32>
    %133 = math.rsqrt %132 : vector<4x128xf32>
    %134 = vector.broadcast %112 : vector<1x128xf32> to vector<4x128xf32>
    %135 = arith.mulf %133, %134 : vector<4x128xf32>
    %136 = arith.mulf %123, %135 : vector<4x128xf32>
    %137 = vector.broadcast %114 : vector<1x128xf32> to vector<4x128xf32>
    %138 = arith.subf %137, %136 : vector<4x128xf32>
    %139 = vector.shape_cast %135 : vector<4x128xf32> to vector<4x1x128xf32>
    %140 = vector.broadcast %139 : vector<4x1x128xf32> to vector<4x64x128xf32>
    %141 = arith.mulf %115, %140 : vector<4x64x128xf32>
    %142 = vector.shape_cast %138 : vector<4x128xf32> to vector<4x1x128xf32>
    %143 = vector.broadcast %142 : vector<4x1x128xf32> to vector<4x64x128xf32>
    %144 = arith.addf %141, %143 : vector<4x64x128xf32>
    %cst_59 = arith.constant 0.000000e+00 : f32
    %145 = vector.broadcast %cst_59 : f32 to vector<4x64x128xf32>
    %146 = arith.maximumf %144, %145 : vector<4x64x128xf32>
    %147 = vector.shape_cast %146 : vector<4x64x128xf32> to vector<256x128xf32>
    %148 = arith.truncf %147 : vector<256x128xf32> to vector<256x128xbf16>
    %c0_60 = arith.constant 0 : index
    %c0_61 = arith.constant 0 : index
    %149 = vector.load %arg6[%c0_60, %c0_61] : memref<128x128xbf16, #tpu.memory_space<vmem>>, vector<128x128xbf16>
    %cst_62 = arith.constant dense<0.000000e+00> : vector<256x128xf32>
    %150 = tpu.matmul %148, %149, %cst_62 {dimension_numbers = #tpu.dot_dimension_numbers<[1], [0], [0], [1], [0, 0, 1, 1], [], []>} : vector<256x128xbf16>, vector<128x128xbf16>, vector<256x128xf32> -> vector<256x128xf32>
    %c0_63 = arith.constant 0 : index
    %c0_64 = arith.constant 0 : index
    %151 = vector.load %arg7[%c0_63, %c0_64] : memref<1x128xf32, #tpu.memory_space<vmem>>, vector<1x128xf32>
    %152 = vector.broadcast %151 : vector<1x128xf32> to vector<256x128xf32>
    %153 = arith.addf %150, %152 : vector<256x128xf32>
    %154 = vector.shape_cast %153 : vector<256x128xf32> to vector<4x64x128xf32>
    %c0_65 = arith.constant 0 : index
    %c0_66 = arith.constant 0 : index
    %c0_67 = arith.constant 0 : index
    %155 = vector.load %arg8[%c0_65, %c0_66, %c0_67] : memref<4x64x128xf32, #tpu.memory_space<vmem>>, vector<4x64x128xf32>
    tpu.vector_store %arg8[%c0_65, %c0_66, %c0_67], %154 {strides = array<i32>} : memref<4x64x128xf32, #tpu.memory_space<vmem>>, vector<4x64x128xf32>,
    return
  }
  func.func @transform_0(%arg0: i32) -> (i32, i32, i32) {
    %c0_i32 = arith.constant 0 : i32
    %c0_i32_0 = arith.constant 0 : i32
    %c0_i32_1 = arith.constant 0 : i32
    return %arg0, %c0_i32, %c0_i32_0 : i32, i32, i32
  }
  func.func @transform_1(%arg0: i32) -> (i32, i32) {
    %c0_i32 = arith.constant 0 : i32
    %c0_i32_0 = arith.constant 0 : i32
    %c0_i32_1 = arith.constant 0 : i32
    return %c0_i32, %c0_i32_0 : i32, i32
  }
  func.func @transform_2(%arg0: i32) -> (i32, i32, i32) {
    %c0_i32 = arith.constant 0 : i32
    %c0_i32_0 = arith.constant 0 : i32
    %c0_i32_1 = arith.constant 0 : i32
    %c0_i32_2 = arith.constant 0 : i32
    return %c0_i32, %c0_i32_0, %c0_i32_1 : i32, i32, i32
  }
  func.func @transform_3(%arg0: i32) -> (i32, i32, i32) {
    %c0_i32 = arith.constant 0 : i32
    %c0_i32_0 = arith.constant 0 : i32
    %c0_i32_1 = arith.constant 0 : i32
    %c0_i32_2 = arith.constant 0 : i32
    return %c0_i32, %c0_i32_0, %c0_i32_1 : i32, i32, i32
  }
  func.func @transform_4(%arg0: i32) -> (i32, i32, i32) {
    %c0_i32 = arith.constant 0 : i32
    %c0_i32_0 = arith.constant 0 : i32
    %c0_i32_1 = arith.constant 0 : i32
    %c0_i32_2 = arith.constant 0 : i32
    return %c0_i32, %c0_i32_0, %c0_i32_1 : i32, i32, i32
  }
  func.func @transform_5(%arg0: i32) -> (i32, i32) {
    %c0_i32 = arith.constant 0 : i32
    %c0_i32_0 = arith.constant 0 : i32
    %c0_i32_1 = arith.constant 0 : i32
    return %c0_i32, %c0_i32_0 : i32, i32
  }
  func.func @transform_6(%arg0: i32) -> (i32, i32) {
    %c0_i32 = arith.constant 0 : i32
    %c0_i32_0 = arith.constant 0 : i32
    %c0_i32_1 = arith.constant 0 : i32
    return %c0_i32, %c0_i32_0 : i32, i32
  }
  func.func @transform_7(%arg0: i32) -> (i32, i32, i32) {
    %c0_i32 = arith.constant 0 : i32
    %c0_i32_0 = arith.constant 0 : i32
    %c0_i32_1 = arith.constant 0 : i32
    return %arg0, %c0_i32, %c0_i32_0 : i32, i32, i32
  }
}

module attributes {stable_mosaic.version = 11 : i64} {
  func.func @_decoder_kernel(%arg0: i32, %arg1: memref<4x64x16xbf16, #tpu.memory_space<vmem>>, %arg2: memref<16x128xbf16, #tpu.memory_space<vmem>>, %arg3: memref<2x128x128xbf16, #tpu.memory_space<vmem>>, %arg4: memref<3x1x128xf32, #tpu.memory_space<vmem>>, %arg5: memref<3x1x128xf32, #tpu.memory_space<vmem>>, %arg6: memref<128x128xbf16, #tpu.memory_space<vmem>>, %arg7: memref<1x128xf32, #tpu.memory_space<vmem>>, %arg8: memref<4x64x128xf32, #tpu.memory_space<vmem>>) attributes {dimension_semantics = [#tpu.dimension_semantics<parallel>], iteration_bounds = array<i64: 2>, scalar_prefetch = 0 : i64, scratch_operands = 0 : i64, tpu.core_type = #tpu.core_type<tc>, window_params = [{transform_indices = @transform_0, window_bounds = array<i64: 4, 64, 16>}, {pipeline_mode = #tpu.pipeline_mode<synchronous>, transform_indices = @transform_1, window_bounds = array<i64: 16, 128>}, {pipeline_mode = #tpu.pipeline_mode<synchronous>, transform_indices = @transform_2, window_bounds = array<i64: 2, 128, 128>}, {pipeline_mode = #tpu.pipeline_mode<synchronous>, transform_indices = @transform_3, window_bounds = array<i64: 3, 1, 128>}, {pipeline_mode = #tpu.pipeline_mode<synchronous>, transform_indices = @transform_4, window_bounds = array<i64: 3, 1, 128>}, {pipeline_mode = #tpu.pipeline_mode<synchronous>, transform_indices = @transform_5, window_bounds = array<i64: 128, 128>}, {pipeline_mode = #tpu.pipeline_mode<synchronous>, transform_indices = @transform_6, window_bounds = array<i64: 1, 128>}, {transform_indices = @transform_7, window_bounds = array<i64: 4, 64, 128>}]} {
    %0 = tpu.iota {dimensions = array<i32: 0>} : vector<128x32xi32>
    %1 = tpu.iota {dimensions = array<i32: 1>} : vector<128x32xi32>
    %c4_i32 = arith.constant 4 : i32
    %2 = vector.broadcast %c4_i32 : i32 to vector<128x32xi32>
    %3 = arith.muli %1, %2 : vector<128x32xi32>
    %4 = arith.cmpi sge, %0, %3 : vector<128x32xi32>
    %c4_i32_0 = arith.constant 4 : i32
    %5 = vector.broadcast %c4_i32_0 : i32 to vector<128x32xi32>
    %6 = arith.addi %3, %5 : vector<128x32xi32>
    %7 = arith.cmpi slt, %0, %6 : vector<128x32xi32>
    %8 = arith.andi %4, %7 : vector<128x32xi1>
    %cst = arith.constant 1.000000e+00 : f32
    %cst_1 = arith.constant 0.000000e+00 : f32
    %9 = vector.broadcast %cst : f32 to vector<128x32xf32>
    %10 = vector.broadcast %cst_1 : f32 to vector<128x32xf32>
    %11 = arith.select %8, %9, %10 : vector<128x32xi1>, vector<128x32xf32>
    %12 = tpu.iota {dimensions = array<i32: 1>} : vector<32x128xi32>
    %13 = tpu.iota {dimensions = array<i32: 0>} : vector<32x128xi32>
    %c4_i32_2 = arith.constant 4 : i32
    %14 = vector.broadcast %c4_i32_2 : i32 to vector<32x128xi32>
    %15 = arith.muli %13, %14 : vector<32x128xi32>
    %16 = arith.cmpi sge, %12, %15 : vector<32x128xi32>
    %c4_i32_3 = arith.constant 4 : i32
    %17 = vector.broadcast %c4_i32_3 : i32 to vector<32x128xi32>
    %18 = arith.addi %15, %17 : vector<32x128xi32>
    %19 = arith.cmpi slt, %12, %18 : vector<32x128xi32>
    %20 = arith.andi %16, %19 : vector<32x128xi1>
    %cst_4 = arith.constant 1.000000e+00 : f32
    %cst_5 = arith.constant 0.000000e+00 : f32
    %21 = vector.broadcast %cst_4 : f32 to vector<32x128xf32>
    %22 = vector.broadcast %cst_5 : f32 to vector<32x128xf32>
    %23 = arith.select %20, %21, %22 : vector<32x128xi1>, vector<32x128xf32>
    %cst_6 = arith.constant dense<0.000000e+00> : vector<128x128xf32>
    %24 = tpu.matmul %11, %23, %cst_6 {dimension_numbers = #tpu.dot_dimension_numbers<[1], [0], [0], [1], [0, 0, 1, 1], [], []>} : vector<128x32xf32>, vector<32x128xf32>, vector<128x128xf32> -> vector<128x128xf32>
    %c0 = arith.constant 0 : index
    %c0_7 = arith.constant 0 : index
    %c0_8 = arith.constant 0 : index
    %25 = vector.load %arg1[%c0, %c0_7, %c0_8] : memref<4x64x16xbf16, #tpu.memory_space<vmem>>, vector<4x64x16xbf16>
    %26 = vector.shape_cast %25 : vector<4x64x16xbf16> to vector<256x16xbf16>
    %c0_9 = arith.constant 0 : index
    %c0_10 = arith.constant 0 : index
    %27 = vector.load %arg2[%c0_9, %c0_10] : memref<16x128xbf16, #tpu.memory_space<vmem>>, vector<16x128xbf16>
    %cst_11 = arith.constant dense<0.000000e+00> : vector<256x128xf32>
    %28 = tpu.matmul %26, %27, %cst_11 {dimension_numbers = #tpu.dot_dimension_numbers<[1], [0], [0], [1], [0, 0, 1, 1], [], []>} : vector<256x16xbf16>, vector<16x128xbf16>, vector<256x128xf32> -> vector<256x128xf32>
    %c0_12 = arith.constant 0 : index
    %c0_13 = arith.constant 0 : index
    %c0_14 = arith.constant 0 : index
    %29 = vector.load %arg4[%c0_12, %c0_13, %c0_14] : memref<3x1x128xf32, #tpu.memory_space<vmem>>, vector<1x1x128xf32>
    %30 = vector.shape_cast %29 : vector<1x1x128xf32> to vector<1x128xf32>
    %c0_15 = arith.constant 0 : index
    %c0_16 = arith.constant 0 : index
    %c0_17 = arith.constant 0 : index
    %31 = vector.load %arg5[%c0_15, %c0_16, %c0_17] : memref<3x1x128xf32, #tpu.memory_space<vmem>>, vector<1x1x128xf32>
    %32 = vector.shape_cast %31 : vector<1x1x128xf32> to vector<1x128xf32>
    %33 = vector.shape_cast %28 : vector<256x128xf32> to vector<4x64x128xf32>
    %cst_18 = arith.constant dense<0.000000e+00> : vector<4x128xf32>
    %34 = vector.multi_reduction <add>, %33, %cst_18 [1] : vector<4x64x128xf32> to vector<4x128xf32>
    %35 = arith.mulf %33, %33 : vector<4x64x128xf32>
    %cst_19 = arith.constant dense<0.000000e+00> : vector<4x128xf32>
    %36 = vector.multi_reduction <add>, %35, %cst_19 [1] : vector<4x64x128xf32> to vector<4x128xf32>
    %37 = tpu.concatenate %34, %36 in 0 : vector<4x128xf32>, vector<4x128xf32> -> vector<8x128xf32>
    %cst_20 = arith.constant dense<0.000000e+00> : vector<8x128xf32>
    %38 = tpu.matmul %37, %24, %cst_20 {dimension_numbers = #tpu.dot_dimension_numbers<[1], [0], [0], [1], [0, 0, 1, 1], [], []>, precision = #tpu.contract_precision<fp32>} : vector<8x128xf32>, vector<128x128xf32>, vector<8x128xf32> -> vector<8x128xf32>
    %39 = vector.extract_strided_slice %38 {offsets = [0, 0], sizes = [4, 128], strides = [1, 1]} : vector<8x128xf32> to vector<4x128xf32>
    %cst_21 = arith.constant 3.906250e-03 : f32
    %40 = vector.broadcast %cst_21 : f32 to vector<4x128xf32>
    %41 = arith.mulf %39, %40 : vector<4x128xf32>
    %42 = vector.extract_strided_slice %38 {offsets = [4, 0], sizes = [4, 128], strides = [1, 1]} : vector<8x128xf32> to vector<4x128xf32>
    %cst_22 = arith.constant 3.906250e-03 : f32
    %43 = vector.broadcast %cst_22 : f32 to vector<4x128xf32>
    %44 = arith.mulf %42, %43 : vector<4x128xf32>
    %45 = arith.mulf %41, %41 : vector<4x128xf32>
    %46 = arith.subf %44, %45 : vector<4x128xf32>
    %cst_23 = arith.constant 0.000000e+00 : f32
    %47 = vector.broadcast %cst_23 : f32 to vector<4x128xf32>
    %48 = arith.maximumf %46, %47 : vector<4x128xf32>
    %cst_24 = arith.constant 9.99999974E-6 : f32
    %49 = vector.broadcast %cst_24 : f32 to vector<4x128xf32>
    %50 = arith.addf %48, %49 : vector<4x128xf32>
    %51 = math.rsqrt %50 : vector<4x128xf32>
    %52 = vector.broadcast %30 : vector<1x128xf32> to vector<4x128xf32>
    %53 = arith.mulf %51, %52 : vector<4x128xf32>
    %54 = arith.mulf %41, %53 : vector<4x128xf32>
    %55 = vector.broadcast %32 : vector<1x128xf32> to vector<4x128xf32>
    %56 = arith.subf %55, %54 : vector<4x128xf32>
    %57 = vector.shape_cast %53 : vector<4x128xf32> to vector<4x1x128xf32>
    %58 = vector.broadcast %57 : vector<4x1x128xf32> to vector<4x64x128xf32>
    %59 = arith.mulf %33, %58 : vector<4x64x128xf32>
    %60 = vector.shape_cast %56 : vector<4x128xf32> to vector<4x1x128xf32>
    %61 = vector.broadcast %60 : vector<4x1x128xf32> to vector<4x64x128xf32>
    %62 = arith.addf %59, %61 : vector<4x64x128xf32>
    %cst_25 = arith.constant 0.000000e+00 : f32
    %63 = vector.broadcast %cst_25 : f32 to vector<4x64x128xf32>
    %64 = arith.maximumf %62, %63 : vector<4x64x128xf32>
    %65 = vector.shape_cast %64 : vector<4x64x128xf32> to vector<256x128xf32>
    %66 = arith.truncf %65 : vector<256x128xf32> to vector<256x128xbf16>
    %c0_26 = arith.constant 0 : index
    %c0_27 = arith.constant 0 : index
    %c0_28 = arith.constant 0 : index
    %67 = vector.load %arg3[%c0_26, %c0_27, %c0_28] : memref<2x128x128xbf16, #tpu.memory_space<vmem>>, vector<1x128x128xbf16>
    %68 = vector.shape_cast %67 : vector<1x128x128xbf16> to vector<128x128xbf16>
    %cst_29 = arith.constant dense<0.000000e+00> : vector<256x128xf32>
    %69 = tpu.matmul %66, %68, %cst_29 {dimension_numbers = #tpu.dot_dimension_numbers<[1], [0], [0], [1], [0, 0, 1, 1], [], []>} : vector<256x128xbf16>, vector<128x128xbf16>, vector<256x128xf32> -> vector<256x128xf32>
    %c1 = arith.constant 1 : index
    %c0_30 = arith.constant 0 : index
    %c0_31 = arith.constant 0 : index
    %70 = vector.load %arg4[%c1, %c0_30, %c0_31] : memref<3x1x128xf32, #tpu.memory_space<vmem>>, vector<1x1x128xf32>
    %71 = vector.shape_cast %70 : vector<1x1x128xf32> to vector<1x128xf32>
    %c1_32 = arith.constant 1 : index
    %c0_33 = arith.constant 0 : index
    %c0_34 = arith.constant 0 : index
    %72 = vector.load %arg5[%c1_32, %c0_33, %c0_34] : memref<3x1x128xf32, #tpu.memory_space<vmem>>, vector<1x1x128xf32>
    %73 = vector.shape_cast %72 : vector<1x1x128xf32> to vector<1x128xf32>
    %74 = vector.shape_cast %69 : vector<256x128xf32> to vector<4x64x128xf32>
    %cst_35 = arith.constant dense<0.000000e+00> : vector<4x128xf32>
    %75 = vector.multi_reduction <add>, %74, %cst_35 [1] : vector<4x64x128xf32> to vector<4x128xf32>
    %76 = arith.mulf %74, %74 : vector<4x64x128xf32>
    %cst_36 = arith.constant dense<0.000000e+00> : vector<4x128xf32>
    %77 = vector.multi_reduction <add>, %76, %cst_36 [1] : vector<4x64x128xf32> to vector<4x128xf32>
    %78 = tpu.concatenate %75, %77 in 0 : vector<4x128xf32>, vector<4x128xf32> -> vector<8x128xf32>
    %cst_37 = arith.constant dense<0.000000e+00> : vector<8x128xf32>
    %79 = tpu.matmul %78, %24, %cst_37 {dimension_numbers = #tpu.dot_dimension_numbers<[1], [0], [0], [1], [0, 0, 1, 1], [], []>, precision = #tpu.contract_precision<fp32>} : vector<8x128xf32>, vector<128x128xf32>, vector<8x128xf32> -> vector<8x128xf32>
    %80 = vector.extract_strided_slice %79 {offsets = [0, 0], sizes = [4, 128], strides = [1, 1]} : vector<8x128xf32> to vector<4x128xf32>
    %cst_38 = arith.constant 3.906250e-03 : f32
    %81 = vector.broadcast %cst_38 : f32 to vector<4x128xf32>
    %82 = arith.mulf %80, %81 : vector<4x128xf32>
    %83 = vector.extract_strided_slice %79 {offsets = [4, 0], sizes = [4, 128], strides = [1, 1]} : vector<8x128xf32> to vector<4x128xf32>
    %cst_39 = arith.constant 3.906250e-03 : f32
    %84 = vector.broadcast %cst_39 : f32 to vector<4x128xf32>
    %85 = arith.mulf %83, %84 : vector<4x128xf32>
    %86 = arith.mulf %82, %82 : vector<4x128xf32>
    %87 = arith.subf %85, %86 : vector<4x128xf32>
    %cst_40 = arith.constant 0.000000e+00 : f32
    %88 = vector.broadcast %cst_40 : f32 to vector<4x128xf32>
    %89 = arith.maximumf %87, %88 : vector<4x128xf32>
    %cst_41 = arith.constant 9.99999974E-6 : f32
    %90 = vector.broadcast %cst_41 : f32 to vector<4x128xf32>
    %91 = arith.addf %89, %90 : vector<4x128xf32>
    %92 = math.rsqrt %91 : vector<4x128xf32>
    %93 = vector.broadcast %71 : vector<1x128xf32> to vector<4x128xf32>
    %94 = arith.mulf %92, %93 : vector<4x128xf32>
    %95 = arith.mulf %82, %94 : vector<4x128xf32>
    %96 = vector.broadcast %73 : vector<1x128xf32> to vector<4x128xf32>
    %97 = arith.subf %96, %95 : vector<4x128xf32>
    %98 = vector.shape_cast %94 : vector<4x128xf32> to vector<4x1x128xf32>
    %99 = vector.broadcast %98 : vector<4x1x128xf32> to vector<4x64x128xf32>
    %100 = arith.mulf %74, %99 : vector<4x64x128xf32>
    %101 = vector.shape_cast %97 : vector<4x128xf32> to vector<4x1x128xf32>
    %102 = vector.broadcast %101 : vector<4x1x128xf32> to vector<4x64x128xf32>
    %103 = arith.addf %100, %102 : vector<4x64x128xf32>
    %cst_42 = arith.constant 0.000000e+00 : f32
    %104 = vector.broadcast %cst_42 : f32 to vector<4x64x128xf32>
    %105 = arith.maximumf %103, %104 : vector<4x64x128xf32>
    %106 = vector.shape_cast %105 : vector<4x64x128xf32> to vector<256x128xf32>
    %107 = arith.truncf %106 : vector<256x128xf32> to vector<256x128xbf16>
    %c1_43 = arith.constant 1 : index
    %c0_44 = arith.constant 0 : index
    %c0_45 = arith.constant 0 : index
    %108 = vector.load %arg3[%c1_43, %c0_44, %c0_45] : memref<2x128x128xbf16, #tpu.memory_space<vmem>>, vector<1x128x128xbf16>
    %109 = vector.shape_cast %108 : vector<1x128x128xbf16> to vector<128x128xbf16>
    %cst_46 = arith.constant dense<0.000000e+00> : vector<256x128xf32>
    %110 = tpu.matmul %107, %109, %cst_46 {dimension_numbers = #tpu.dot_dimension_numbers<[1], [0], [0], [1], [0, 0, 1, 1], [], []>} : vector<256x128xbf16>, vector<128x128xbf16>, vector<256x128xf32> -> vector<256x128xf32>
    %c2 = arith.constant 2 : index
    %c0_47 = arith.constant 0 : index
    %c0_48 = arith.constant 0 : index
    %111 = vector.load %arg4[%c2, %c0_47, %c0_48] : memref<3x1x128xf32, #tpu.memory_space<vmem>>, vector<1x1x128xf32>
    %112 = vector.shape_cast %111 : vector<1x1x128xf32> to vector<1x128xf32>
    %c2_49 = arith.constant 2 : index
    %c0_50 = arith.constant 0 : index
    %c0_51 = arith.constant 0 : index
    %113 = vector.load %arg5[%c2_49, %c0_50, %c0_51] : memref<3x1x128xf32, #tpu.memory_space<vmem>>, vector<1x1x128xf32>
    %114 = vector.shape_cast %113 : vector<1x1x128xf32> to vector<1x128xf32>
    %115 = vector.shape_cast %110 : vector<256x128xf32> to vector<4x64x128xf32>
    %cst_52 = arith.constant dense<0.000000e+00> : vector<4x128xf32>
    %116 = vector.multi_reduction <add>, %115, %cst_52 [1] : vector<4x64x128xf32> to vector<4x128xf32>
    %117 = arith.mulf %115, %115 : vector<4x64x128xf32>
    %cst_53 = arith.constant dense<0.000000e+00> : vector<4x128xf32>
    %118 = vector.multi_reduction <add>, %117, %cst_53 [1] : vector<4x64x128xf32> to vector<4x128xf32>
    %119 = tpu.concatenate %116, %118 in 0 : vector<4x128xf32>, vector<4x128xf32> -> vector<8x128xf32>
    %cst_54 = arith.constant dense<0.000000e+00> : vector<8x128xf32>
    %120 = tpu.matmul %119, %24, %cst_54 {dimension_numbers = #tpu.dot_dimension_numbers<[1], [0], [0], [1], [0, 0, 1, 1], [], []>, precision = #tpu.contract_precision<fp32>} : vector<8x128xf32>, vector<128x128xf32>, vector<8x128xf32> -> vector<8x128xf32>
    %121 = vector.extract_strided_slice %120 {offsets = [0, 0], sizes = [4, 128], strides = [1, 1]} : vector<8x128xf32> to vector<4x128xf32>
    %cst_55 = arith.constant 3.906250e-03 : f32
    %122 = vector.broadcast %cst_55 : f32 to vector<4x128xf32>
    %123 = arith.mulf %121, %122 : vector<4x128xf32>
    %124 = vector.extract_strided_slice %120 {offsets = [4, 0], sizes = [4, 128], strides = [1, 1]} : vector<8x128xf32> to vector<4x128xf32>
    %cst_56 = arith.constant 3.906250e-03 : f32
    %125 = vector.broadcast %cst_56 : f32 to vector<4x128xf32>
    %126 = arith.mulf %124, %125 : vector<4x128xf32>
    %127 = arith.mulf %123, %123 : vector<4x128xf32>
    %128 = arith.subf %126, %127 : vector<4x128xf32>
    %cst_57 = arith.constant 0.000000e+00 : f32
    %129 = vector.broadcast %cst_57 : f32 to vector<4x128xf32>
    %130 = arith.maximumf %128, %129 : vector<4x128xf32>
    %cst_58 = arith.constant 9.99999974E-6 : f32
    %131 = vector.broadcast %cst_58 : f32 to vector<4x128xf32>
    %132 = arith.addf %130, %131 : vector<4x128xf32>
    %133 = math.rsqrt %132 : vector<4x128xf32>
    %134 = vector.broadcast %112 : vector<1x128xf32> to vector<4x128xf32>
    %135 = arith.mulf %133, %134 : vector<4x128xf32>
    %136 = arith.mulf %123, %135 : vector<4x128xf32>
    %137 = vector.broadcast %114 : vector<1x128xf32> to vector<4x128xf32>
    %138 = arith.subf %137, %136 : vector<4x128xf32>
    %139 = vector.shape_cast %135 : vector<4x128xf32> to vector<4x1x128xf32>
    %140 = vector.broadcast %139 : vector<4x1x128xf32> to vector<4x64x128xf32>
    %141 = arith.mulf %115, %140 : vector<4x64x128xf32>
    %142 = vector.shape_cast %138 : vector<4x128xf32> to vector<4x1x128xf32>
    %143 = vector.broadcast %142 : vector<4x1x128xf32> to vector<4x64x128xf32>
    %144 = arith.addf %141, %143 : vector<4x64x128xf32>
    %cst_59 = arith.constant 0.000000e+00 : f32
    %145 = vector.broadcast %cst_59 : f32 to vector<4x64x128xf32>
    %146 = arith.maximumf %144, %145 : vector<4x64x128xf32>
    %147 = vector.shape_cast %146 : vector<4x64x128xf32> to vector<256x128xf32>
    %148 = arith.truncf %147 : vector<256x128xf32> to vector<256x128xbf16>
    %c0_60 = arith.constant 0 : index
    %c0_61 = arith.constant 0 : index
    %149 = vector.load %arg6[%c0_60, %c0_61] : memref<128x128xbf16, #tpu.memory_space<vmem>>, vector<128x128xbf16>
    %cst_62 = arith.constant dense<0.000000e+00> : vector<256x128xf32>
    %150 = tpu.matmul %148, %149, %cst_62 {dimension_numbers = #tpu.dot_dimension_numbers<[1], [0], [0], [1], [0, 0, 1, 1], [], []>} : vector<256x128xbf16>, vector<128x128xbf16>, vector<256x128xf32> -> vector<256x128xf32>
    %c0_63 = arith.constant 0 : index
    %c0_64 = arith.constant 0 : index
    %151 = vector.load %arg7[%c0_63, %c0_64] : memref<1x128xf32, #tpu.memory_space<vmem>>, vector<1x128xf32>
    %152 = vector.broadcast %151 : vector<1x128xf32> to vector<256x128xf32>
    %153 = arith.addf %150, %152 : vector<256x128xf32>
    %154 = vector.shape_cast %153 : vector<256x128xf32> to vector<4x64x128xf32>
    %c0_65 = arith.constant 0 : index
    %c0_66 = arith.constant 0 : index
    %c0_67 = arith.constant 0 : index
    %155 = vector.load %arg8[%c0_65, %c0_66, %c0_67] : memref<4x64x128xf32, #tpu.memory_space<vmem>>, vector<4x64x128xf32>
    tpu.vector_store %arg8[%c0_65, %c0_66, %c0_67], %154 {strides = array<i32>} : memref<4x64x128xf32, #tpu.memory_space<vmem>>, vector<4x64x128xf32>,
    return
  }
  func.func @transform_0(%arg0: i32) -> (i32, i32, i32) {
    %c0_i32 = arith.constant 0 : i32
    %c0_i32_0 = arith.constant 0 : i32
    %c0_i32_1 = arith.constant 0 : i32
    return %arg0, %c0_i32, %c0_i32_0 : i32, i32, i32
  }
  func.func @transform_1(%arg0: i32) -> (i32, i32) {
    %c0_i32 = arith.constant 0 : i32
    %c0_i32_0 = arith.constant 0 : i32
    %c0_i32_1 = arith.constant 0 : i32
    return %c0_i32, %c0_i32_0 : i32, i32
  }
  func.func @transform_2(%arg0: i32) -> (i32, i32, i32) {
    %c0_i32 = arith.constant 0 : i32
    %c0_i32_0 = arith.constant 0 : i32
    %c0_i32_1 = arith.constant 0 : i32
    %c0_i32_2 = arith.constant 0 : i32
    return %c0_i32, %c0_i32_0, %c0_i32_1 : i32, i32, i32
  }
  func.func @transform_3(%arg0: i32) -> (i32, i32, i32) {
    %c0_i32 = arith.constant 0 : i32
    %c0_i32_0 = arith.constant 0 : i32
    %c0_i32_1 = arith.constant 0 : i32
    %c0_i32_2 = arith.constant 0 : i32
    return %c0_i32, %c0_i32_0, %c0_i32_1 : i32, i32, i32
  }
  func.func @transform_4(%arg0: i32) -> (i32, i32, i32) {
    %c0_i32 = arith.constant 0 : i32
    %c0_i32_0 = arith.constant 0 : i32
    %c0_i32_1 = arith.constant 0 : i32
    %c0_i32_2 = arith.constant 0 : i32
    return %c0_i32, %c0_i32_0, %c0_i32_1 : i32, i32, i32
  }
  func.func @transform_5(%arg0: i32) -> (i32, i32) {
    %c0_i32 = arith.constant 0 : i32
    %c0_i32_0 = arith.constant 0 : i32
    %c0_i32_1 = arith.constant 0 : i32
    return %c0_i32, %c0_i32_0 : i32, i32
  }
  func.func @transform_6(%arg0: i32) -> (i32, i32) {
    %c0_i32 = arith.constant 0 : i32
    %c0_i32_0 = arith.constant 0 : i32
    %c0_i32_1 = arith.constant 0 : i32
    return %c0_i32, %c0_i32_0 : i32, i32
  }
  func.func @transform_7(%arg0: i32) -> (i32, i32, i32) {
    %c0_i32 = arith.constant 0 : i32
    %c0_i32_0 = arith.constant 0 : i32
    %c0_i32_1 = arith.constant 0 : i32
    return %arg0, %c0_i32, %c0_i32_0 : i32, i32, i32
  }
}

</mosaic_0001>

<bundles_post_ra>
// kernel: tpu_custom_call.1
= control target key start
LH: loop header
LB: loop body
LE: loop exit
PB: predicated region body
PF: predicated region fallthrough
CT: control target
= control target key end

     0   :  { %12 = vsyncpa [#allocation3], 0  ;;  %s8701_s0 = inlined_call_operand.vmem [shape: bf16[8,64,16], index: 0, kind: input, shape index: {}]   ;;  %s8702_s1 = inlined_call_operand.vmem [shape: bf16[16,128], index: 1, kind: input, shape index: {}]   ;;  %s8703_s2 = inlined_call_operand.vmem [shape: bf16[2,128,128], index: 2, kind: input, shape index: {}]   ;;  %s8704_s3 = inlined_call_operand.vmem [shape: f32[3,1,128], index: 3, kind: input, shape index: {}]   ;;  %s8705_s4 = inlined_call_operand.vmem [shape: f32[3,1,128], index: 4, kind: input, shape index: {}]   ;;  %s8706_s5 = inlined_call_operand.vmem [shape: bf16[128,128], index: 5, kind: input, shape index: {}]   ;;  %s8707_s6 = inlined_call_operand.vmem [shape: f32[1,128], index: 6, kind: input, shape index: {}]   ;;  %s8708_s7 = inlined_call_operand.hbm [shape: f32[8,64,128], index: 7, kind: output, shape index: {}]  }
   0x1   :  { %14 = vsyncpa [#allocation3 + $0x1], 0  ;;  %s6845_s24 = smov 0   ;;  %s6847_s25 = smov 0  }
   0x2   :  { %s6849_s26 = smov 0   ;;  %s6851_s27 = smov 0  }
   0x3 LB: > { %s6866_s28 = sadd.s32 4294967295, %s6795_s27   ;;  %s4795_s29 = sadd.s32 4294967294, %s6795_s27   ;;  %s6795_s27 = sphi %s6851_s27, %s9026_s27   ;;  %s6791_s26 = sphi %s6849_s26, %s9025_s26   ;;  %s6787_s25 = sphi %s6847_s25, %s9024_s25   ;;  %s6783_s24 = sphi %s6845_s24, %s9023_s24  }
   0x4   : > { %s6870_s30 = sadd.s32 1, %s6795_s27   ;;  %s179_s8 = sadd.s32 1, %s6791_s26 }
   0x5   : > { %s176_s9 = ssub.s32 %s6795_s27, %s6870_s30  ;;  %p189_p0 = scmp.ne.s32.totalorder %s6791_s26, %s6787_s25 }
   0x6   : > { %p177_p1 = scmp.eq.s32.totalorder %s176_s9, 0  ;;  %p190_p2 = scmp.eq.s32.totalorder %s6866_s28, 1 }
   0x7   : > { %p195_p3 = scmp.ne.s32.totalorder %s6787_s25, %s6783_s24  ;;  %p196_p4 = scmp.eq.s32.totalorder %s4795_s29, 1 }
   0x8   : > { %s6881_s10 = scalar_select %p177_p1, %s6791_s26, %s179_s8  }
   0x9   : > { %p6883_p5 = por %p190_p2, %p189_p0  ;;  %p6887_p6 = por %p196_p4, %p195_p3 }
   0xa   : > { %p4798_p7 = scmp.ge.s32.totalorder %s6795_s27, 1  ;;  %p242_p8 = scmp.lt.s32.totalorder %s6795_s27, 3 }
   0xc   : > { %p243_p9 = pnand %p4798_p7, %p242_p8 }
   0xe   : > { %246 = sbr.rel (%p243_p9) target bundleno = 2446 (0x98e), region = 48 }
  0x15   : > { %v6686_v0 = vld [vmem:[%s8702_s1] sm:$0xff]   ;;  %s4800_s15 = sshll.u32 %s6866_s28, 2  ;;  %v284_v1 = vlaneseq  ;;  %vm8709_vm0 = vcmask 130048   ;;  %v6797_v23 = vmov 1.0|1.0   ;;  %v8710_v29 = vmov 0.0  }
  0x16   : > { %p276_p10 = scmp.lt.s32.totalorder %s4800_s15, 7  ;;  %5363 = vmatprep.subr.bf16.mxu1 %v6686_v0  ;;  %s272_s29 = sand.u32 1, %s6787_s25  }
  0x17   : > { %v6897_v2 = vshrl.u32 %v284_v1, 7  ;;  %5364 = vmatpush3.bf16.msra.mxu1 %v6686_v0  ;;  %v302_v5 = vand.u32 127, %v284_v1  ;;  %s4799_s8 = sshll.u32 %s272_s29, 8  ;;  %s6802_s21 = smov [#allocation2]  }
  0x18   : > { %s9028_s15 = smov (!%p276_p10, %s4800_s15), 7  ;;  %s8585_s14 = scalar_lea.vmem [#allocation2], %s4799_s8 }
  0x19   : > { %v286_v3 = vadd.s32 8, %v6897_v2  ;;  %v369_v4 = vmul.u32 4, %v6897_v2  ;;  %s4913_s16 = sshll.u32 %s9028_s15, 5  ;;  %v6902_v6 = vadd.s32 16, %v6897_v2  ;;  %v6905_v7 = vadd.s32 24, %v6897_v2  ;;  %s4915_s15 = sshll.u32 %s6866_s28, 12 }
  0x1a   : > { %s6910_s19 = scalar_lea.vmem %s8701_s0, %s4913_s16  ;;  %v6919_v16 = vmul.u32 4, %v302_v5  ;;  %v289_v25 = vadd.s32 32, %v6897_v2  ;;  %v290_v27 = vadd.s32 40, %v6897_v2  ;;  %v291_v31 = vadd.s32 48, %v6897_v2  ;;  %s4733_s16 = sshll.u32 %s8585_s14, 4  ;;  %s8652_s16 = int_to_ptr.vmem [resolvable:$true] %s4733_s16 }
  0x1b   : > { %v370_v8 = vmul.u32 4, %v286_v3  ;;  %v377_v9 = vadd.s32 4, %v369_v4  ;;  %v6687_v10 = vld [vmem:[%s6910_s19] sm:$0xff]   ;;  %v371_v11 = vmul.u32 4, %v6902_v6  ;;  %v6688_v12 = vld [vmem:[%s6910_s19 + $0x8] sm:$0xff]   ;;  %v6689_v14 = vld [vmem:[%s6910_s19 + $0x10] sm:$0xff]   ;;  %vm373_vm1 = vcmp.ge.s32.totalorder %v302_v5, %v369_v4 }
  0x1c   : > { %5365 = vmatprep.mubr.msk.bf16.mxu1 %vm8709_vm0, %v6687_v10  ;;  %v372_v15 = vmul.u32 4, %v6905_v7  ;;  %v6690_v19 = vld [vmem:[%s6910_s19 + $0x18] sm:$0xff]   ;;  %v6691_v20 = vld [vmem:[%s6910_s19 + $0x20] sm:$0xff]   ;;  %v6925_v21 = vadd.s32 4, %v6919_v16  ;;  %vm304_vm13 = vcmp.ge.s32.totalorder %v6897_v2, %v6919_v16  ;;  %v6692_v28 = vld [vmem:[%s6910_s19 + $0x28] sm:$0xff]   ;;  %v292_v34 = vadd.s32 56, %v6897_v2 }
  0x1d   : > { %v378_v13 = vadd.s32 4, %v370_v8  ;;  %5366 = vmatmul.mubr.msk.bf16.vlgmr.msra.gmra.mrb[0].mxu1 %vm8709_vm0, %v6688_v12  ;;  %v379_v17 = vadd.s32 4, %v371_v11  ;;  %vm381_vm2 = vcmp.lt.s32.totalorder %v302_v5, %v377_v9  ;;  %vm374_vm3 = vcmp.ge.s32.totalorder %v302_v5, %v370_v8  ;;  %v6693_v32 = vld [vmem:[%s6910_s19 + $0x30] sm:$0xff]   ;;  %v6694_v42 = vld [vmem:[%s6910_s19 + $0x38] sm:$0xff]   ;;  %v6695_v44 = vld [vmem:[%s6910_s19 + $0x40] sm:$0xff]   ;;  %s8660_s28 = scalar_lea.sflag [#allocation3], %s272_s29 }
  0x1e   : > { %5369 = vmatprep.mubr.msk.bf16.mxu1 %vm8709_vm0, %v6689_v14  ;;  %v380_v18 = vadd.s32 4, %v372_v15  ;;  %vm6927_vm5 = vmand %vm373_vm1, %vm381_vm2  ;;  %vm375_vm6 = vcmp.ge.s32.totalorder %v302_v5, %v371_v11  ;;  %vm376_vm9 = vcmp.ge.s32.totalorder %v302_v5, %v372_v15  ;;  %vm321_vm14 = vcmp.lt.s32.totalorder %v6897_v2, %v6925_v21  ;;  %v6696_v55 = vld [vmem:[%s6910_s19 + $0x48] sm:$0xff]   ;;  %v6697_v58 = vld [vmem:[%s6910_s19 + $0x50] sm:$0xff]   ;;  %s6733_s20 = scalar_lea.vmem %s8652_s16, 4096  ;;  %s6737_s22 = sshll.u32 %s6802_s21, 4  ;;  %s6738_s22 = int_to_ptr.vmem [resolvable:$false] %s6737_s22 }
  0x1f   : > { %vm382_vm4 = vcmp.lt.s32.totalorder %v302_v5, %v378_v13  ;;  %vm383_vm7 = vcmp.lt.s32.totalorder %v302_v5, %v379_v17  ;;  %vm305_vm1 = vcmp.ge.s32.totalorder %v286_v3, %v6919_v16  ;;  %vm322_vm2 = vcmp.lt.s32.totalorder %v286_v3, %v6925_v21  ;;  %v6698_v62 = vld [vmem:[%s6910_s19 + $0x58] sm:$0xff]   ;;  %v6699_v63 = vld [vmem:[%s6910_s19 + $0x60] sm:$0xff]   ;;  %v6700_v4 = vld [vmem:[%s6910_s19 + $0x68] sm:$0xff]   ;;  %p6734_p11 = scmp.ne.s32.totalorder %s8652_s16, %s6733_s20  ;;  %s6739_s23 = scalar_lea.vmem %s6738_s22, 8192 }
  0x20   : > { %vm386_vm8 = vmand %vm374_vm3, %vm382_vm4  ;;  %vm384_vm10 = vcmp.lt.s32.totalorder %v302_v5, %v380_v18  ;;  %vm393_vm4 = vcmask 261120   ;;  %v293_v36 = vadd.s32 64, %v6897_v2  ;;  %v294_v38 = vadd.s32 72, %v6897_v2  ;;  %v6701_v5 = vld [vmem:[%s6910_s19 + $0x70] sm:$0xff]   ;;  %p6740_p0 = scmp.lt.s32.totalorder %s8652_s16, %s6738_s22  ;;  %p6741_p1 = scmp.lt.s32.totalorder %s6739_s23, %s6733_s20 }
  0x21   : > { %vm6171_vm11 = vmpackc.low %vm386_vm8, %vm6927_vm5  ;;  %vm306_vm5 = vcmp.ge.s32.totalorder %v6902_v6, %v6919_v16  ;;  %vm307_vm8 = vcmp.ge.s32.totalorder %v6905_v7, %v6919_v16  ;;  %v295_v39 = vadd.s32 80, %v6897_v2  ;;  %v296_v41 = vadd.s32 88, %v6897_v2  ;;  %p6735_p12 = pnand %p6734_p11, %p6883_p5 }
  0x22   : > { %6172 = vmatprep.subr.msk.bf16.mxu0 %vm6171_vm11, %v6797_v23  ;;  %vm6934_vm12 = vmand %vm375_vm6, %vm383_vm7  ;;  %vm323_vm6 = vcmp.lt.s32.totalorder %v6902_v6, %v6925_v21  ;;  %v297_v46 = vadd.s32 96, %v6897_v2  ;;  %v298_v51 = vadd.s32 104, %v6897_v2  ;;  %v299_v52 = vadd.s32 112, %v6897_v2  ;;  %v6702_v6 = vld [vmem:[%s6910_s19 + $0x78] sm:$0xff]   ;;  %s8650_s19 = scalar_lea.hbm %s8708_s7, %s4915_s15  ;;  %p6742_p2 = por %p6741_p1, %p6740_p0 }
  0x23   : > { %6174 = vmatpush3.bf16.msk.msra.mxu0 %vm6171_vm11, %v6797_v23  ;;  %vm6944_vm15 = vmand %vm376_vm9, %vm384_vm10  ;;  %vm324_vm9 = vcmp.lt.s32.totalorder %v6905_v7, %v6925_v21  ;;  %vm308_vm11 = vcmp.ge.s32.totalorder %v289_v25, %v6919_v16  ;;  %v300_v54 = vadd.s32 120, %v6897_v2  ;;  %v8724_v7 = vmov 0.0|0.0   ;;  %p6736_p13 = pneg %p6735_p12 }
  0x24   : > { %vm6175_vm3 = vmpackc.low %vm6944_vm15, %vm6934_vm12  ;;  %vm309_vm15 = vcmp.ge.s32.totalorder %v290_v27, %v6919_v16  ;;  %6179 = vmatprep.subr.bf16.mxu1 %v8724_v7 }
  0x25   : > { %5370 = vmatmul.mubr.msk.bf16.gmra.mrb[4].mxu1 %vm8709_vm0, %v6690_v19  ;;  %6176 = vmatprep.subr.msk.bf16.mxu0 %vm6175_vm3, %v6797_v23  ;;  %vm337_vm7 = vmand %vm304_vm13, %vm321_vm14  ;;  %p6743_p3 = pnand %p6742_p2, %p6736_p13 }
  0x26   : > { %5373 = vmatprep.mubr.msk.bf16.mxu1 %vm8709_vm0, %v6691_v20  ;;  %v353_v30 = vsel %vm337_vm7, 1.0, %v8710_v29  ;;  %vm338_vm10 = vmand %vm305_vm1, %vm322_vm2  ;;  %vm325_vm0 = vcmp.lt.s32.totalorder %v289_v25, %v6925_v21  ;;  %vm326_vm1 = vcmp.lt.s32.totalorder %v290_v27, %v6925_v21  ;;  %vm8823_vm2 = vcmask 130048  }
  0x27   : > { %6178 = vmatpush3.bf16.msk.msra.mxu0 %vm6175_vm3, %v6797_v23  ;;  %5339 = vmatprep.mubr.msk.f32.mxu0 %vm393_vm4, %v353_v30  ;;  %v354_v33 = vsel %vm338_vm10, 1.0, %v8710_v29  ;;  %vm339_vm13 = vmand %vm306_vm5, %vm323_vm6  ;;  %vm310_vm3 = vcmp.ge.s32.totalorder %v291_v31, %v6919_v16  ;;  %vm327_vm5 = vcmp.lt.s32.totalorder %v291_v31, %v6925_v21  ;;  %vm311_vm6 = vcmp.ge.s32.totalorder %v292_v34, %v6919_v16 }
  0x28   : > { %v355_v35 = vsel %vm339_vm13, 1.0, %v8710_v29  ;;  %vm340_vm12 = vmand %vm307_vm8, %vm324_vm9  ;;  %vm328_vm7 = vcmp.lt.s32.totalorder %v292_v34, %v6925_v21  ;;  %vm312_vm9 = vcmp.ge.s32.totalorder %v293_v36, %v6919_v16  ;;  %vm329_vm10 = vcmp.lt.s32.totalorder %v293_v36, %v6925_v21  ;;  %6203 = vmatprep.subr.bf16.mxu0 %v8724_v7 }
  0x29   : > { %vm6996_vm14 = vmand %vm308_vm11, %vm325_vm0  ;;  %v356_v40 = vsel %vm340_vm12, 1.0, %v8710_v29  ;;  %vm313_vm13 = vcmp.ge.s32.totalorder %v294_v38, %v6919_v16  ;;  %vm330_vm12 = vcmp.lt.s32.totalorder %v294_v38, %v6925_v21 }
  0x2a   : > { %5340 = vmatmul.mubr.msk.f32.vlgmr.msra.gmra.mrb[0].mxu0 %vm393_vm4, %v354_v33  ;;  %vm8824_vm0 = vmmov %vm8823_vm2  ;;  %v357_v43 = vsel %vm6996_vm14, 1.0, %v8710_v29 }
  0x2b   : > { %5342 = vmatprep.mubr.msk.f32.mxu0 %vm393_vm4, %v355_v35  ;;  %vm342_vm8 = vmand %vm309_vm15, %vm326_vm1  ;;  %vm314_vm15 = vcmp.ge.s32.totalorder %v295_v39, %v6919_v16  ;;  %vm331_vm1 = vcmp.lt.s32.totalorder %v295_v39, %v6925_v21 }
  0x2c   : > { %vm343_vm11 = vmand %vm310_vm3, %vm327_vm5  ;;  %v358_v47 = vsel %vm342_vm8, 1.0, %v8710_v29  ;;  %vm315_vm3 = vcmp.ge.s32.totalorder %v296_v41, %v6919_v16  ;;  %vm332_vm5 = vcmp.lt.s32.totalorder %v296_v41, %v6925_v21 }
  0x2d   : > { %5374 = vmatmul.mubr.msk.bf16.gmra.mrb[8].mxu1 %vm8823_vm2, %v6692_v28  ;;  %vm7030_vm14 = vmand %vm311_vm6, %vm328_vm7  ;;  %v359_v49 = vsel %vm343_vm11, 1.0, %v8710_v29  ;;  %vm8831_vm7 = vcmask 130048  }
  0x2e   : > { %5377 = vmatprep.mubr.msk.bf16.mxu1 %vm8824_vm0, %v6693_v32  ;;  %5343 = vmatmul.mubr.msk.f32.gmra.mrb[2].mxu0 %vm393_vm4, %v356_v40  ;;  %vm7039_vm2 = vmand %vm312_vm9, %vm329_vm10  ;;  %vm316_vm9 = vcmp.ge.s32.totalorder %v297_v46, %v6919_v16  ;;  %vm333_vm10 = vcmp.lt.s32.totalorder %v297_v46, %v6925_v21  ;;  %v360_v53 = vsel %vm7030_vm14, 1.0, %v8710_v29  ;;  %vm334_vm14 = vcmp.lt.s32.totalorder %v298_v51, %v6925_v21 }
  0x2f   : > { %5345 = vmatprep.mubr.msk.f32.mxu0 %vm393_vm4, %v357_v43  ;;  %vm346_vm0 = vmand %vm313_vm13, %vm330_vm12  ;;  %v361_v56 = vsel %vm7039_vm2, 1.0, %v8710_v29  ;;  %vm317_vm12 = vcmp.ge.s32.totalorder %v298_v51, %v6919_v16  ;;  %vm335_vm2 = vcmp.lt.s32.totalorder %v299_v52, %v6925_v21 }
  0x30   : > { %vm7046_vm6 = vmand %vm314_vm15, %vm331_vm1  ;;  %v362_v57 = vsel %vm346_vm0, 1.0, %v8710_v29  ;;  %vm318_vm1 = vcmp.ge.s32.totalorder %v299_v52, %v6919_v16 }
  0x31   : > { %vm348_vm8 = vmand %vm315_vm3, %vm332_vm5  ;;  %v363_v59 = vsel %vm7046_vm6, 1.0, %v8710_v29  ;;  %vm319_vm6 = vcmp.ge.s32.totalorder %v300_v54, %v6919_v16 }
  0x32   : > { %5346 = vmatmul.mubr.msk.f32.gmra.mrb[4].mxu0 %vm393_vm4, %v358_v47  ;;  %vm8832_vm11 = vmmov %vm8831_vm7  ;;  %v364_v60 = vsel %vm348_vm8, 1.0, %v8710_v29 }
  0x33   : > { %5348 = vmatprep.mubr.msk.f32.mxu0 %vm393_vm4, %v359_v49  ;;  %vm349_vm13 = vmand %vm316_vm9, %vm333_vm10 }
  0x34   : > { %vm8833_vm15 = vmmov %vm8831_vm7  ;;  %v365_v61 = vsel %vm349_vm13, 1.0, %v8710_v29 }
  0x35   : > { %5378 = vmatmul.mubr.msk.bf16.gmra.mrb[12].mxu1 %vm8831_vm7, %v6694_v42  ;;  %vm8834_vm3 = vmmov %vm8831_vm7  ;;  %vm336_vm7 = vcmp.lt.s32.totalorder %v300_v54, %v6925_v21 }
  0x36   : > { %5381 = vmatprep.mubr.msk.bf16.mxu1 %vm8832_vm11, %v6695_v44  ;;  %5349 = vmatmul.mubr.msk.f32.gmra.mrb[6].mxu0 %vm393_vm4, %v360_v53  ;;  %vm350_vm5 = vmand %vm317_vm12, %vm334_vm14  ;;  %vm6800_vm14 = vmmov 0  }
  0x37   : > { %5351 = vmatprep.mubr.msk.f32.mxu0 %vm393_vm4, %v361_v56  ;;  %vm351_vm0 = vmand %vm318_vm1, %vm335_vm2  ;;  %v366_v0 = vsel %vm350_vm5, 1.0, %v8710_v29  ;;  %vm1070_vm1 = vcmask 1045509   ;;  %vm1072_vm2 = vcmask 1046534   ;;  %vm1074_vm5 = vcmask 1047559  }
  0x38   : > { %v367_v1 = vsel %vm351_vm0, 1.0, %v8710_v29  ;;  %vm352_vm8 = vmand %vm319_vm6, %vm336_vm7  ;;  %vm1077_vm0 = vcmask 1043456  }
  0x39   : > { %vm8835_vm9 = vmmov %vm8834_vm3  ;;  %v368_v3 = vsel %vm352_vm8, 1.0, %v8710_v29 }
  0x3a   : > { %5352 = vmatmul.mubr.msk.f32.gmra.mrb[8].mxu0 %vm393_vm4, %v362_v57  ;;  %vm8836_vm10 = vmmov %vm8834_vm3 }
  0x3b   : > { %5354 = vmatprep.mubr.msk.f32.mxu0 %vm393_vm4, %v363_v59  ;;  %vm8837_vm11 = vmmov %vm8834_vm3 }
  0x3c   : > { %vm8838_vm13 = vmmov %vm8834_vm3 }
  0x3d   : > { %5382 = vmatmul.mubr.msk.bf16.gmra.mrb[16].mxu1 %vm8833_vm15, %v6696_v55  ;;  %vm8839_vm12 = vmmov %vm8834_vm3  ;;  %vm1061_vm15 = vcmask 1042434  }
  0x3e   : > { %5385 = vmatprep.mubr.msk.bf16.mxu1 %vm8834_vm3, %v6697_v58  ;;  %5355 = vmatmul.mubr.msk.f32.gmra.mrb[10].mxu0 %vm393_vm4, %v364_v60  ;;  %vm1063_vm3 = vcmask 1043459  }
  0x3f   : > { %5357 = vmatprep.mubr.msk.f32.mxu0 %vm393_vm4, %v365_v61 }
  0x42   : > { %5358 = vmatmul.mubr.msk.f32.gmra.mrb[12].mxu0 %vm393_vm4, %v366_v0 }
  0x43   : > { %5360 = vmatprep.mubr.msk.f32.mxu0 %vm393_vm4, %v367_v1 }
  0x45   : > { %5386 = vmatmul.mubr.msk.bf16.gmra.mrb[20].mxu1 %vm8835_vm9, %v6698_v62 }
  0x46   : > { %5389 = vmatprep.mubr.msk.bf16.mxu1 %vm8836_vm10, %v6699_v63  ;;  %5361 = vmatmul.mubr.msk.f32.gmra.mrb[14].mxu0 %vm393_vm4, %v368_v3  ;;  %vm1059_vm4 = vcmask 1041409  }
  0x47   : > { %5464 = vmatprep.mubr.msk.f32.mxu0 %vm6800_vm14, %v8710_v29 }
  0x4d   : > { %5390 = vmatmul.mubr.msk.bf16.gmra.mrb[24].mxu1 %vm8837_vm11, %v6700_v4 }
  0x4e   : > { %5393 = vmatprep.mubr.msk.bf16.mxu1 %vm8838_vm13, %v6701_v5 }
  0x55   : > { %5394 = vmatmul.mubr.msk.bf16.gmra.mrb[28].mxu1 %vm8839_vm12, %v6702_v6 }
  0x56   : > { %5429 = vmatprep.mubr.msk.f32.mxu1 %vm6800_vm14, %v8710_v29 }
  0xf0   : > { %v7109_v8 = vpop.f32.mrb[0].mxu1 }
  0xf1   : > { %8840 = vst [vmem:[#allocation5_spill] sm:$0xff] %v7109_v8  ;;  %v7111_v9 = vpop.f32.mrb[1].mxu1  ;;  %v973_v15 = vmul.f32 %v7109_v8, %v7109_v8 }
  0xf2   : > { %v7113_v10 = vpop.f32.mrb[2].mxu1  ;;  %v971_v12 = vmul.f32 %v7111_v9, %v7111_v9 }
  0xf3   : > { %8841 = vst [vmem:[#allocation6_spill] sm:$0xff] %v7113_v10  ;;  %v7115_v11 = vpop.f32.mrb[3].mxu1  ;;  %v974_v18 = vmul.f32 %v7113_v10, %v7113_v10 }
  0xf4   : > { %8842 = vst [vmem:[#allocation7_spill] sm:$0xff] %v7115_v11  ;;  %v919_v13 = vadd.f32 %v7115_v11, %v7111_v9  ;;  %v972_v14 = vmul.f32 %v7115_v11, %v7115_v11 }
  0xf6   : > { %v920_v16 = vadd.f32 %v7109_v8, %v919_v13  ;;  %v1003_v17 = vadd.f32 %v972_v14, %v971_v12 }
  0xf8   : > { %v1004_v19 = vadd.f32 %v1003_v17, %v973_v15  ;;  %v7128_v20 = vpop.f32.mrb[4].mxu1  ;;  %v921_v21 = vadd.f32 %v7113_v10, %v920_v16 }
  0xf9   : > { %8843 = vst [vmem:[#allocation8_spill] sm:$0xff] %v7128_v20  ;;  %v7131_v22 = vpop.f32.mrb[5].mxu1  ;;  %v977_v32 = vmul.f32 %v7128_v20, %v7128_v20 }
  0xfa   : > { %8844 = vst [vmem:[#allocation9_spill] sm:$0xff] %v7131_v22  ;;  %v922_v23 = vadd.f32 %v921_v21, %v7131_v22  ;;  %v975_v24 = vmul.f32 %v7131_v22, %v7131_v22  ;;  %v1005_v25 = vadd.f32 %v1004_v19, %v974_v18  ;;  %v7136_v26 = vpop.f32.mrb[6].mxu1 }
  0xfb   : > { %8845 = vst [vmem:[#allocation10_spill] sm:$0xff] %v7136_v26  ;;  %v7138_v27 = vpop.f32.mrb[7].mxu1  ;;  %v978_v35 = vmul.f32 %v7136_v26, %v7136_v26 }
  0xfc   : > { %8846 = vst [vmem:[#allocation11_spill] sm:$0xff] %v7138_v27  ;;  %v1006_v28 = vadd.f32 %v1005_v25, %v975_v24  ;;  %v923_v30 = vadd.f32 %v922_v23, %v7138_v27  ;;  %v976_v31 = vmul.f32 %v7138_v27, %v7138_v27 }
  0xfd   : > { %v5341_v39 = vpop.f32.mrb[0].mxu0 }
  0xfe   : > { %v924_v33 = vadd.f32 %v7128_v20, %v923_v30  ;;  %v1007_v34 = vadd.f32 %v1006_v28, %v976_v31  ;;  %v1083_v41 = vand.u32 4294901760, %v5341_v39  ;;  %v508_v42 = vpop.f32.mrb[1].mxu0 }
  0xff   : > { %v1080_v46 = vand.u32 4294901760, %v508_v42 }
 0x100   : > { %v925_v36 = vadd.f32 %v7136_v26, %v924_v33  ;;  %v1008_v37 = vadd.f32 %v1007_v34, %v977_v32  ;;  %v7149_v38 = vpop.f32.mrb[8].mxu1  ;;  %v7163_v51 = vsub.f32 %v5341_v39, %v1083_v41 }
 0x101   : > { %8847 = vst [vmem:[#allocation12_spill] sm:$0xff] %v7149_v38  ;;  %v7151_v40 = vpop.f32.mrb[9].mxu1  ;;  %v981_v47 = vmul.f32 %v7149_v38, %v7149_v38  ;;  %v5344_v56 = vpop.f32.mrb[2].mxu0  ;;  %v7170_v58 = vpack.c.bf16 %v1083_v41, %v1080_v46  ;;  %v7172_v59 = vsub.f32 %v508_v42, %v1080_v46 }
 0x102   : > { %8848 = vst [vmem:[#allocation13_spill] sm:$0xff] %v7151_v40  ;;  %v926_v43 = vrot.slane %v925_v36, 4  ;;  %v1009_v44 = vadd.f32 %v1008_v37, %v978_v35  ;;  %v7153_v45 = vpop.f32.mrb[10].mxu1  ;;  %v979_v48 = vmul.f32 %v7151_v40, %v7151_v40  ;;  %v8714_v57 = vand.u32 4294901760, %v7163_v51  ;;  %v518_v61 = vpop.f32.mrb[3].mxu0 }
 0x103   : > { %8849 = vst [vmem:[#allocation14_spill] sm:$0xff] %v7153_v45  ;;  %v982_v49 = vmul.f32 %v7153_v45, %v7153_v45  ;;  %v7161_v50 = vpop.f32.mrb[11].mxu1  ;;  %v1089_v60 = vand.u32 4294901760, %v5344_v56  ;;  %v8715_v4 = vand.u32 4294901760, %v7172_v59  ;;  %v7183_v5 = vpack.c.bf16 %v7163_v51, %v7172_v59  ;;  %6181 = vmatpush3.bf16.msra.mxu1 %v7170_v58 }
 0x104   : > { %8850 = vst [vmem:[#allocation15_spill] sm:$0xff] %v7161_v50  ;;  %v927_v52 = vadd.f32 %v926_v43, %v925_v36  ;;  %v1010_v53 = vrot.slane %v1009_v44, 4  ;;  %v932_v54 = vadd.f32 %v7161_v50, %v7151_v40  ;;  %v980_v55 = vmul.f32 %v7161_v50, %v7161_v50  ;;  %6182 = vmatprep.subr.bf16.mxu1 %v8724_v7 }
 0x105   : > { %v7178_v3 = vsub.f32 %v7163_v51, %v8714_v57  ;;  %v7185_v6 = vsub.f32 %v5344_v56, %v1089_v60  ;;  %v5347_v17 = vpop.f32.mrb[4].mxu0  ;;  %v7200_v23 = vsub.f32 %v7172_v59, %v8715_v4 }
 0x106   : > { %v928_v62 = vrot.slane %v927_v52, 2  ;;  %v1011_v63 = vadd.f32 %v1010_v53, %v1009_v44  ;;  %v933_v0 = vadd.f32 %v7149_v38, %v932_v54  ;;  %v1016_v1 = vadd.f32 %v980_v55, %v979_v48  ;;  %v528_v25 = vpop.f32.mrb[5].mxu0 }
 0x107   : > { %v8712_v24 = vand.u32 4294901760, %v7185_v6  ;;  %v1092_v56 = vand.u32 4294901760, %v528_v25 }
 0x108   : > { %v929_v12 = vadd.f32 %v928_v62, %v927_v52  ;;  %v1012_v13 = vrot.slane %v1011_v63, 2  ;;  %v1017_v14 = vadd.f32 %v1016_v1, %v981_v47  ;;  %v7188_v15 = vpop.f32.mrb[12].mxu1  ;;  %v934_v16 = vadd.f32 %v7153_v45, %v933_v0 }
 0x109   : > { %8851 = vst [vmem:[#allocation16_spill] sm:$0xff] %v7188_v15  ;;  %v985_v18 = vmul.f32 %v7188_v15, %v7188_v15  ;;  %v7194_v19 = vpop.f32.mrb[13].mxu1  ;;  %v7216_v39 = vsub.f32 %v7185_v6, %v8712_v24  ;;  %v7223_v46 = vpop.f32.mrb[6].mxu0  ;;  %v1095_v52 = vand.u32 4294901760, %v5347_v17 }
 0x10a   : > { %8852 = vst [vmem:[#allocation17_spill] sm:$0xff] %v7194_v19  ;;  %v930_v28 = vrot.slane %v929_v12, 1  ;;  %v1013_v30 = vadd.f32 %v1012_v13, %v1011_v63  ;;  %v935_v31 = vadd.f32 %v934_v16, %v7194_v19  ;;  %v983_v32 = vmul.f32 %v7194_v19, %v7194_v19  ;;  %v7206_v33 = vpop.f32.mrb[14].mxu1  ;;  %v7226_v53 = vpop.f32.mrb[7].mxu0 }
 0x10b   : > { %8853 = vst [vmem:[#allocation18_spill] sm:$0xff] %v7206_v33  ;;  %v1018_v34 = vadd.f32 %v1017_v14, %v982_v49  ;;  %v986_v35 = vmul.f32 %v7206_v33, %v7206_v33  ;;  %v7210_v36 = vpop.f32.mrb[15].mxu1  ;;  %v1086_v49 = vand.u32 4294901760, %v518_v61  ;;  %v1101_v62 = vand.u32 4294901760, %v7223_v46 }
 0x10c   : > { %8854 = vst [vmem:[#allocation19_spill] sm:$0xff] %v7210_v36  ;;  %v7218_v41 = vadd.f32 %v930_v28, %v929_v12  ;;  %v1014_v42 = vrot.slane %v1013_v30, 1  ;;  %v936_v43 = vadd.f32 %v935_v31, %v7210_v36  ;;  %v984_v44 = vmul.f32 %v7210_v36, %v7210_v36 }
 0x10d   : > { %v1019_v47 = vadd.f32 %v1018_v34, %v983_v32  ;;  %v7232_v0 = vpack.c.bf16 %v1089_v60, %v1086_v49  ;;  %v7234_v1 = vsub.f32 %v518_v61, %v1086_v49  ;;  %v7236_v12 = vsub.f32 %v5347_v17, %v1095_v52  ;;  %v7248_v31 = vpop.f32.mrb[8].mxu0 }
 0x10e   : > { %v7228_v54 = vadd.f32 %v1014_v42, %v1013_v30  ;;  %v937_v55 = vadd.f32 %v7188_v15, %v936_v43  ;;  %v7241_v16 = vpack.c.bf16 %v1095_v52, %v1092_v56  ;;  %v7243_v28 = vsub.f32 %v528_v25, %v1092_v56  ;;  %v7260_v25 = vpop.f32.mrb[9].mxu0 }
 0x10f   : > { %v1020_v63 = vadd.f32 %v1019_v47, %v984_v44  ;;  %v7246_v30 = vsub.f32 %v7223_v46, %v1101_v62  ;;  %v8713_v17 = vand.u32 4294901760, %v7234_v1  ;;  %v7257_v34 = vpack.c.bf16 %v7185_v6, %v7234_v1  ;;  %6184 = vmatpush3.bf16.msra.mxu1 %v7232_v0 }
 0x110   : > { %v938_v13 = vadd.f32 %v7206_v33, %v937_v55  ;;  %v7239_v14 = vpop.f32.mrb[16].mxu1  ;;  %v8716_v44 = vand.u32 4294901760, %v7236_v12  ;;  %v8718_v46 = vand.u32 4294901760, %v7243_v28  ;;  %6185 = vmatprep.subr.bf16.mxu1 %v8724_v7  ;;  %v7280_v56 = vpack.c.bf16 %v7236_v12, %v7243_v28 }
 0x111   : > { %8855 = vst [vmem:[#allocation20_spill] sm:$0xff] %v7239_v14  ;;  %v1021_v32 = vadd.f32 %v1020_v63, %v985_v18  ;;  %v989_v60 = vmul.f32 %v7239_v14, %v7239_v14  ;;  %v7252_v61 = vpop.f32.mrb[17].mxu1  ;;  %v7276_v55 = vsub.f32 %v7234_v1, %v8713_v17  ;;  %v7291_v24 = vpop.f32.mrb[10].mxu0  ;;  %v8867_v45 = vand.u32 4294901760, %v7216_v39 }
 0x112   : > { %8856 = vst [vmem:[#allocation21_spill] sm:$0xff] %v7252_v61  ;;  %v939_v42 = vrot.slane %v938_v13, 4  ;;  %v987_v43 = vmul.f32 %v7252_v61, %v7252_v61  ;;  %v7264_v18 = vpop.f32.mrb[18].mxu1  ;;  %v7301_v4 = vpop.f32.mrb[11].mxu0  ;;  %v1113_v39 = vand.u32 4294901760, %v7291_v24 }
 0x113   : > { %8857 = vst [vmem:[#allocation22_spill] sm:$0xff] %v7264_v18  ;;  %v1022_v47 = vadd.f32 %v1021_v32, %v986_v35  ;;  %v990_v49 = vmul.f32 %v7264_v18, %v7264_v18  ;;  %v7271_v52 = vpop.f32.mrb[19].mxu1  ;;  %v7289_v32 = vsub.f32 %v7236_v12, %v8716_v44  ;;  %v1189_v57 = vand.u32 4294901760, %v7276_v55  ;;  %6187 = vmatpush3.bf16.msra.mxu1 %v7241_v16 }
 0x114   : > { %8858 = vst [vmem:[#allocation23_spill] sm:$0xff] %v7271_v52  ;;  %v940_v63 = vadd.f32 %v939_v42, %v938_v13  ;;  %v945_v29 = vadd.f32 %v7271_v52, %v7252_v61  ;;  %v988_v35 = vmul.f32 %v7271_v52, %v7271_v52  ;;  %v7297_v13 = vsub.f32 %v7243_v28, %v8718_v46 }
 0x115   : > { %v1023_v17 = vrot.slane %v1022_v47, 4  ;;  %v8723_v42 = vand.u32 4294901760, %v7246_v30  ;;  %6188 = vmatprep.subr.bf16.mxu1 %v8724_v7  ;;  %v1098_v61 = vand.u32 4294901760, %v7226_v53  ;;  %v7381_v38 = vpack.c.bf16 %v8867_v45, %v1189_v57 }
 0x116   : > { %v941_v48 = vrot.slane %v940_v63, 2  ;;  %v946_v44 = vadd.f32 %v7239_v14, %v945_v29  ;;  %v1029_v21 = vadd.f32 %v988_v35, %v987_v43  ;;  %v8860_v43 = vand.u32 4294901760, %v7200_v23 }
 0x117   : > { %v1024_v55 = vadd.f32 %v1023_v17, %v1022_v47  ;;  %v7310_v46 = vsub.f32 %v7246_v30, %v8723_v42  ;;  %v8861_v35 = vand.u32 4294901760, %v7178_v3  ;;  %v7322_v47 = vpop.f32.mrb[12].mxu0  ;;  %8868 = vst [vmem:[#allocation29_spill] sm:$0xff] %v7381_v38  ;;  %v8874_v40 = vand.u32 4294901760, %v7297_v13 }
 0x118   : > { %v942_v33 = vadd.f32 %v941_v48, %v940_v63  ;;  %v1030_v15 = vadd.f32 %v1029_v21, %v989_v60  ;;  %v7313_v36 = vpop.f32.mrb[20].mxu1  ;;  %v947_v29 = vadd.f32 %v7264_v18, %v946_v44  ;;  %v7329_v48 = vpack.c.bf16 %v1101_v62, %v1098_v61  ;;  %v7331_v60 = vpop.f32.mrb[13].mxu0 }
 0x119   : > { %8859 = vst [vmem:[#allocation24_spill] sm:$0xff] %v7313_v36  ;;  %v7320_v17 = vpack.c.bf16 %v8861_v35, %v8860_v43  ;;  %v1025_v37 = vrot.slane %v1024_v55, 2  ;;  %v993_v42 = vmul.f32 %v7313_v36, %v7313_v36  ;;  %v7326_v52 = vpop.f32.mrb[21].mxu1  ;;  %v7344_v62 = vsub.f32 %v7226_v53, %v1098_v61 }
 0x11a   : > { %8863 = vst [vmem:[#allocation26_spill] sm:$0xff] %v7326_v52  ;;  %v943_v44 = vrot.slane %v942_v33, 1  ;;  %v948_v23 = vadd.f32 %v947_v29, %v7326_v52  ;;  %v991_v3 = vmul.f32 %v7326_v52, %v7326_v52  ;;  %v1031_v63 = vadd.f32 %v1030_v15, %v990_v49  ;;  %v7336_v43 = vpop.f32.mrb[22].mxu1  ;;  %6190 = vmatpush3.bf16.msra.mxu1 %v7329_v48 }
 0x11b   : > { %8862 = vst [vmem:[#allocation25_spill] sm:$0xff] %v7320_v17  ;;  %8864 = vst [vmem:[#allocation27_spill] sm:$0xff] %v7336_v43  ;;  %6205 = vmatpush3.bf16.msra.mxu0 %v7320_v17  ;;  %v1026_v35 = vadd.f32 %v1025_v37, %v1024_v55  ;;  %v994_v7 = vmul.f32 %v7336_v43, %v7336_v43  ;;  %v7341_v21 = vpop.f32.mrb[23].mxu1  ;;  %v1107_v18 = vand.u32 4294901760, %v7248_v31  ;;  %v8866_v29 = vmov 0.0|0.0   ;;  %v7353_v55 = vpop.f32.mrb[14].mxu0 }
 0x11c   : > { %8865 = vst [vmem:[#allocation28_spill] sm:$0xff] %v7341_v21  ;;  %6206 = vmatprep.subr.bf16.mxu0 %v8866_v29  ;;  %v944_v15 = vadd.f32 %v943_v44, %v942_v33  ;;  %v1032_v49 = vadd.f32 %v1031_v63, %v991_v3  ;;  %v949_v52 = vadd.f32 %v948_v23, %v7341_v21  ;;  %v8736_v53 = vand.u32 4294901760, %v7344_v62  ;;  %v7363_v33 = vpop.f32.mrb[15].mxu0 }
 0x11d   : > { %v992_v37 = vmul.f32 %v7341_v21, %v7341_v21  ;;  %6191 = vmatprep.subr.bf16.mxu1 %v8866_v29  ;;  %v1027_v17 = vrot.slane %v1026_v35, 1  ;;  %v7358_v61 = vpack.c.bf16 %v7246_v30, %v7344_v62  ;;  %v7361_v14 = vsub.f32 %v7248_v31, %v1107_v18 }
 0x11e   : > { %v7367_v44 = vsel %vm1059_vm4, %v944_v15, %v7218_v41  ;;  %v950_v23 = vadd.f32 %v7313_v36, %v949_v52  ;;  %v1104_v63 = vand.u32 4294901760, %v7260_v25  ;;  %v7376_v19 = vsub.f32 %v7344_v62, %v8736_v53 }
 0x11f   : > { %v1033_v3 = vadd.f32 %v1032_v49, %v992_v37  ;;  %v7371_v21 = vadd.f32 %v1027_v17, %v1026_v35  ;;  %v8735_v31 = vand.u32 4294901760, %v7361_v14  ;;  %6208 = vmatpush3.bf16.msra.mxu0 %v7381_v38  ;;  %v7420_v53 = vsub.f32 %v7291_v24, %v1113_v39 }
 0x120   : > { %v951_v41 = vadd.f32 %v7336_v43, %v950_v23  ;;  %v7384_v52 = vpop.f32.mrb[24].mxu1  ;;  %v7386_v49 = vpack.c.bf16 %v1107_v18, %v1104_v63  ;;  %v7389_v17 = vsub.f32 %v7260_v25, %v1104_v63  ;;  %6209 = vmatprep.subr.bf16.mxu0 %v8866_v29  ;;  %v1110_v24 = vand.u32 4294901760, %v7301_v4 }
 0x121   : > { %v1034_v15 = vadd.f32 %v1033_v3, %v993_v42  ;;  %8869 = vst [vmem:[#allocation30_spill] sm:$0xff] %v7384_v52  ;;  %v997_v37 = vmul.f32 %v7384_v52, %v7384_v52  ;;  %v7397_v45 = vsub.f32 %v7361_v14, %v8735_v31  ;;  %v7399_v57 = vpop.f32.mrb[25].mxu1  ;;  %v8750_v50 = vand.u32 4294901760, %v7420_v53 }
 0x122   : > { %8870 = vst [vmem:[#allocation31_spill] sm:$0xff] %v7399_v57  ;;  %v952_v18 = vrot.slane %v951_v41, 4  ;;  %v995_v25 = vmul.f32 %v7399_v57, %v7399_v57  ;;  %v7406_v3 = vpop.f32.mrb[26].mxu1  ;;  %6193 = vmatpush3.bf16.msra.mxu1 %v7386_v49  ;;  %v7413_v31 = vpack.c.bf16 %v7361_v14, %v7389_v17  ;;  %v8873_v38 = vand.u32 4294901760, %v7389_v17 }
 0x123   : > { %v1035_v42 = vadd.f32 %v1034_v15, %v994_v7  ;;  %8871 = vst [vmem:[#allocation32_spill] sm:$0xff] %v7406_v3  ;;  %v998_v7 = vmul.f32 %v7406_v3, %v7406_v3  ;;  %v7417_v15 = vpop.f32.mrb[27].mxu1  ;;  %6194 = vmatprep.subr.bf16.mxu1 %v8866_v29  ;;  %v7445_v22 = vpack.c.bf16 %v1113_v39, %v1110_v24 }
 0x124   : > { %8872 = vst [vmem:[#allocation33_spill] sm:$0xff] %v7417_v15  ;;  %v953_v35 = vadd.f32 %v952_v18, %v951_v41  ;;  %v7426_v63 = vsub.f32 %v7389_v17, %v8873_v38  ;;  %v958_v43 = vadd.f32 %v7417_v15, %v7399_v57  ;;  %v996_v36 = vmul.f32 %v7417_v15, %v7417_v15 }
 0x125   : > { %v1036_v23 = vrot.slane %v1035_v42, 4  ;;  %v8875_v41 = vand.u32 4294901760, %v7289_v32  ;;  %v1251_v15 = vsub.f32 %v7420_v53, %v8750_v50  ;;  %v7448_v10 = vsub.f32 %v7301_v4, %v1110_v24 }
 0x126   : > { %v954_v26 = vrot.slane %v953_v35, 2  ;;  %v1231_v38 = vand.u32 4294901760, %v7426_v63  ;;  %v959_v27 = vadd.f32 %v7384_v52, %v958_v43  ;;  %v1042_v57 = vadd.f32 %v996_v36, %v995_v25  ;;  %6196 = vmatpush3.bf16.msra.mxu1 %v7445_v22 }
 0x127   : > { %v7438_v18 = vpack.c.bf16 %v8875_v41, %v8874_v40  ;;  %v1037_v20 = vadd.f32 %v1036_v23, %v1035_v42  ;;  %v1119_v42 = vand.u32 4294901760, %v7322_v47  ;;  %v1252_v25 = vand.u32 4294901760, %v1251_v15  ;;  %6197 = vmatprep.subr.bf16.mxu1 %v8866_v29 }
 0x128   : > { %v955_v40 = vadd.f32 %v954_v26, %v953_v35  ;;  %v7451_v13 = vpop.f32.mrb[28].mxu1  ;;  %v960_v43 = vadd.f32 %v7406_v3, %v959_v27  ;;  %v1043_v36 = vadd.f32 %v1042_v57, %v997_v37  ;;  %v8756_v39 = vand.u32 4294901760, %v7448_v10 }
 0x129   : > { %8876 = vst [vmem:[#allocation34_spill] sm:$0xff] %v7438_v18  ;;  %6211 = vmatpush3.bf16.msra.mxu0 %v7438_v18  ;;  %v1038_v32 = vrot.slane %v1037_v20, 2  ;;  %8877 = vst [vmem:[#allocation35_spill] sm:$0xff] %v7451_v13  ;;  %v7459_v4 = vpack.c.bf16 %v7420_v53, %v7448_v10  ;;  %v7461_v23 = vpop.f32.mrb[29].mxu1  ;;  %v1001_v27 = vmul.f32 %v7451_v13, %v7451_v13  ;;  %v1116_v18 = vand.u32 4294901760, %v7331_v60 }
 0x12a   : > { %6212 = vmatprep.subr.bf16.mxu0 %v8866_v29  ;;  %8879 = vst [vmem:[#allocation37_spill] sm:$0xff] %v7461_v23  ;;  %v956_v26 = vrot.slane %v955_v40, 1  ;;  %v7467_v63 = vsub.f32 %v7322_v47, %v1119_v42  ;;  %v7469_v37 = vpop.f32.mrb[30].mxu1  ;;  %v1244_v57 = vsub.f32 %v7448_v10, %v8756_v39  ;;  %v961_v15 = vadd.f32 %v960_v43, %v7461_v23 }
 0x12b   : > { %8878 = vst [vmem:[#allocation36_spill] sm:$0xff] %v7459_v4  ;;  %v1039_v35 = vadd.f32 %v1038_v32, %v1037_v20  ;;  %v999_v20 = vmul.f32 %v7461_v23, %v7461_v23  ;;  %v1044_v24 = vadd.f32 %v1043_v36, %v998_v7  ;;  %v7478_v41 = vpop.f32.mrb[31].mxu1  ;;  %v1002_v8 = vmul.f32 %v7469_v37, %v7469_v37 }
 0x12c   : > { %v957_v32 = vadd.f32 %v956_v26, %v955_v40  ;;  %v1264_v50 = vand.u32 4294901760, %v7467_v63  ;;  %v1245_v3 = vand.u32 4294901760, %v1244_v57  ;;  %v962_v39 = vadd.f32 %v961_v15, %v7478_v41 }
 0x12d   : > { %v1040_v47 = vrot.slane %v1039_v35, 1  ;;  %v1045_v52 = vadd.f32 %v1044_v24, %v999_v20  ;;  %v7486_v23 = vpack.c.bf16 %v1119_v42, %v1116_v18  ;;  %v1256_v7 = vsub.f32 %v7331_v60, %v1116_v18 }
 0x12e   : > { %v1265_v11 = vsub.f32 %v7467_v63, %v1264_v50  ;;  %v963_v40 = vadd.f32 %v7451_v13, %v962_v39  ;;  %v1000_v36 = vmul.f32 %v7478_v41, %v7478_v41  ;;  %v8880_v26 = vand.u32 4294901760, %v7376_v19 }
 0x12f   : > { %v1041_v43 = vadd.f32 %v1040_v47, %v1039_v35  ;;  %v8881_v57 = vand.u32 4294901760, %v7310_v46  ;;  %v1125_v15 = vand.u32 4294901760, %v7353_v55  ;;  %v1257_v24 = vand.u32 4294901760, %v1256_v7  ;;  %6199 = vmatpush3.bf16.msra.mxu1 %v7486_v23 }
 0x130   : > { %v1266_v35 = vand.u32 4294901760, %v1265_v11  ;;  %v7500_v42 = vpack.c.bf16 %v7467_v63, %v1256_v7  ;;  %v1122_v60 = vand.u32 4294901760, %v7363_v33  ;;  %v964_v18 = vadd.f32 %v7469_v37, %v963_v40  ;;  %6200 = vmatprep.subr.bf16.mxu1 %v8866_v29 }
 0x131   : > { %v7496_v20 = vpack.c.bf16 %v8881_v57, %v8880_v26  ;;  %v1046_v39 = vadd.f32 %v1045_v52, %v1000_v36  ;;  %v1277_v19 = vsub.f32 %v7353_v55, %v1125_v15  ;;  %v8883_v46 = vand.u32 4294901760, %v7397_v45 }
 0x132   : > { %8882 = vst [vmem:[#allocation38_spill] sm:$0xff] %v7500_v42  ;;  %v1258_v11 = vsub.f32 %v1256_v7, %v1257_v24  ;;  %v7511_v26 = vpack.c.bf16 %v1125_v15, %v1122_v60  ;;  %v1270_v63 = vsub.f32 %v7363_v33, %v1122_v60  ;;  %v7515_v57 = vpack.c.bf16 %v1252_v25, %v1245_v3 }
 0x133   : > { %6214 = vmatpush3.bf16.msra.mxu0 %v7496_v20  ;;  %v7509_v47 = vpack.c.bf16 %v8883_v46, %v1231_v38  ;;  %v965_v13 = vrot.slane %v964_v18, 4  ;;  %v1047_v40 = vadd.f32 %v1046_v39, %v1001_v27  ;;  %v1278_v52 = vand.u32 4294901760, %v1277_v19 }
 0x134   : > { %6215 = vmatprep.subr.bf16.mxu0 %v8866_v29  ;;  %v1062_v55 = vsel %vm1061_vm15, %v957_v32, %v7367_v44  ;;  %v1259_v45 = vand.u32 4294901760, %v1258_v11  ;;  %v1271_v38 = vand.u32 4294901760, %v1270_v63  ;;  %v7520_v36 = vpack.c.bf16 %v1277_v19, %v1270_v63  ;;  %6202 = vmatpush3.bf16.msra.mxu1 %v7511_v26 }
 0x135   : > { %v1071_v33 = vsel %vm1070_vm1, %v7371_v21, %v7228_v54  ;;  %v966_v3 = vadd.f32 %v965_v13, %v964_v18  ;;  %v1048_v25 = vadd.f32 %v1047_v40, %v1002_v8  ;;  %v1279_v7 = vsub.f32 %v1277_v19, %v1278_v52 }
 0x136   : > { %8884 = vst [vmem:[#allocation39_spill] sm:$0xff] %v7520_v36  ;;  %v1073_v27 = vsel %vm1072_vm2, %v1041_v43, %v1071_v33  ;;  %v1272_v15 = vsub.f32 %v1270_v63, %v1271_v38  ;;  %v7529_v44 = vpack.c.bf16 %v1266_v35, %v1259_v45  ;;  %v8885_v32 = vand.u32 4294901760, %v7172_v59 }
 0x137   : > { %6217 = vmatpush3.bf16.msra.mxu0 %v7509_v47  ;;  %v8886_v60 = vand.u32 4294901760, %v7163_v51  ;;  %v8888_v54 = vand.u32 4294901760, %v7234_v1  ;;  %v8889_v8 = vand.u32 4294901760, %v7185_v6  ;;  %v967_v13 = vrot.slane %v966_v3, 2 }
 0x138   : > { %6218 = vmatprep.subr.bf16.mxu0 %v8866_v29  ;;  %v1049_v18 = vrot.slane %v1048_v25, 4  ;;  %v1280_v43 = vand.u32 4294901760, %v1279_v7  ;;  %v8891_v19 = vand.u32 4294901760, %v7243_v28  ;;  %v8892_v35 = vand.u32 4294901760, %v7236_v12 }
 0x139   : > { %v7535_v39 = vpack.c.bf16 %v8886_v60, %v8885_v32  ;;  %v7541_v21 = vpack.c.bf16 %v8889_v8, %v8888_v54  ;;  %v1273_v59 = vand.u32 4294901760, %v1272_v15  ;;  %v8894_v51 = vand.u32 4294901760, %v7344_v62 }
 0x13a   : > { %v7547_v46 = vpack.c.bf16 %v8892_v35, %v8891_v19  ;;  %v8895_v11 = vand.u32 4294901760, %v7246_v30  ;;  %v8897_v6 = vand.u32 4294901760, %v7389_v17  ;;  %v8898_v1 = vand.u32 4294901760, %v7361_v14  ;;  %v6705_v19 = vld [vmem:[%s8703_s2 + $0x10] sm:$0xff]   ;;  %v6706_v35 = vld [vmem:[%s8703_s2 + $0x18] sm:$0xff]  }
 0x13b   : > { %8887 = vst [vmem:[#allocation40_spill] sm:$0xff] %v7535_v39  ;;  %8890 = vst [vmem:[#allocation41_spill] sm:$0xff] %v7541_v21  ;;  %v8900_v45 = vand.u32 4294901760, %v7448_v10  ;;  %v8901_v28 = vand.u32 4294901760, %v7420_v53  ;;  %v968_v33 = vadd.f32 %v967_v13, %v966_v3  ;;  %v1050_v7 = vadd.f32 %v1049_v18, %v1048_v25  ;;  %6220 = vmatpush3.bf16.msra.mxu0 %v7515_v57  ;;  %v6703_v18 = vld [vmem:[%s8703_s2] sm:$0xff]  }
 0x13c   : > { %8893 = vst [vmem:[#allocation42_spill] sm:$0xff] %v7547_v46  ;;  %v7553_v63 = vpack.c.bf16 %v8895_v11, %v8894_v51  ;;  %v7559_v40 = vpack.c.bf16 %v8898_v1, %v8897_v6  ;;  %v7568_v62 = vpack.c.bf16 %v1264_v50, %v1257_v24  ;;  %v7570_v30 = vpack.c.bf16 %v1278_v52, %v1271_v38  ;;  %v6708_v51 = vld [vmem:[%s8703_s2 + $0x28] sm:$0xff]   ;;  %v6709_v11 = vld [vmem:[%s8703_s2 + $0x30] sm:$0xff]   ;;  %v6710_v6 = vld [vmem:[%s8703_s2 + $0x38] sm:$0xff]  }
 0x13d   : > { %v7565_v12 = vpack.c.bf16 %v8901_v28, %v8900_v45  ;;  %6221 = vmatprep.subr.bf16.mxu0 %v8866_v29  ;;  %v7573_v17 = vpack.c.bf16 %v1280_v43, %v1273_v59  ;;  %v969_v14 = vrot.slane %v968_v33, 1  ;;  %v1051_v15 = vrot.slane %v1050_v7, 2  ;;  %5607 = vmatprep.subr.bf16.mxu1 %v6703_v18  ;;  %v6704_v43 = vld [vmem:[%s8703_s2 + $0x8] sm:$0xff]   ;;  %v6707_v59 = vld [vmem:[%s8703_s2 + $0x20] sm:$0xff]  }
 0x13e   : > { %8896 = vst [vmem:[#allocation43_spill] sm:$0xff] %v7553_v63  ;;  %8899 = vst [vmem:[#allocation44_spill] sm:$0xff] %v7559_v40 }
 0x13f   : > { %8902 = vst [vmem:[#allocation45_spill] sm:$0xff] %v7565_v12  ;;  %8903 = vst [vmem:[#allocation46_spill] sm:$0xff] %v7568_v62  ;;  %v970_v10 = vadd.f32 %v969_v14, %v968_v33  ;;  %v1052_v32 = vadd.f32 %v1051_v15, %v1050_v7  ;;  %6223 = vmatpush3.bf16.msra.mxu0 %v7529_v44 }
 0x140   : > { %8904 = vst [vmem:[#allocation47_spill] sm:$0xff] %v7570_v30  ;;  %6224 = vmatprep.subr.bf16.mxu0 %v8866_v29 }
 0x141   : > { %v1053_v53 = vrot.slane %v1052_v32, 1  ;;  %v1064_v3 = vsel %vm1063_vm3, %v970_v10, %v1062_v55  ;;  %v8905_v55 = vmov 0.0  }
 0x143   : > { %v1054_v50 = vadd.f32 %v1053_v53, %v1052_v32  ;;  %6226 = vmatpush3.bf16.msra.mxu0 %v7573_v17  ;;  %v6801_v53 = vmov 1966171168  }
 0x144   : > { %6227 = vmatprep.subr.bf16.mxu0 %v8866_v29 }
 0x145   : > { %v1075_v24 = vsel %vm1074_vm5, %v1054_v50, %v1073_v27 }
 0x146   : > { %v1078_v52 = vsel %vm1077_vm0, %v1064_v3, %v1075_v24  ;;  %v1749_v3 = vunpack.c.l.s4 %v6801_v53  ;;  %v4856_v24 = vld [vmem:[%s8704_s3] ss:$0 sm:$0xff] }
 0x147   : > { %v7582_v38 = vand.u32 4294901760, %v1078_v52 }
 0x148   : > { %v1750_v50 = vunpack.c.0.s8 %v1749_v3 }
 0x149   : > { %v1161_v25 = vsub.f32 %v1078_v52, %v7582_v38  ;;  %5465 = vmatmul.mubr.f32.vlgmr.msra.gmra.mrb[16].mxu0 %v7582_v38 }
 0x14a   : > { %6229 = vmatpush3.bf16.msra.mxu0 %v7183_v5  ;;  %5499 = vmatprep.mubr.msk.f32.mxu0 %vm6800_vm14, %v8905_v55 }
 0x14b   : > { %6230 = vmatprep.subr.bf16.mxu0 %v8866_v29  ;;  %v1162_v60 = vand.u32 4294901760, %v1161_v25 }
 0x14d   : > { %v1163_v54 = vsub.f32 %v1161_v25, %v1162_v60 }
 0x14e   : > { %6232 = vmatpush3.bf16.msra.mxu0 %v7257_v34 }
 0x14f   : > { %6233 = vmatprep.subr.bf16.mxu0 %v8866_v29  ;;  %v1164_v27 = vand.u32 4294901760, %v1163_v54 }
 0x151   : > { %5430 = vmatmul.mubr.f32.vlgmr.msra.gmra.mrb[32].mxu1 %v1164_v27  ;;  %v4857_v27 = vld [vmem:[%s8705_s4] ss:$0 sm:$0xff] }
 0x152   : > { %6235 = vmatpush3.bf16.msra.mxu0 %v7280_v56  ;;  %5608 = vmatpush3.bf16.msra.mxu1 %v6703_v18 }
 0x153   : > { %6236 = vmatprep.subr.bf16.mxu0 %v8866_v29  ;;  %5609 = vmatprep.subr.bf16.mxu1 %v6704_v43 }
 0x156   : > { %6238 = vmatpush3.bf16.msra.mxu0 %v7358_v61  ;;  %5610 = vmatpush3.bf16.msra.mxu1 %v6704_v43 }
 0x157   : > { %6239 = vmatprep.subr.bf16.mxu0 %v8866_v29  ;;  %5611 = vmatprep.subr.bf16.mxu1 %v6705_v19 }
 0x15a   : > { %6241 = vmatpush3.bf16.msra.mxu0 %v7413_v31  ;;  %5612 = vmatpush3.bf16.msra.mxu1 %v6705_v19 }
 0x15b   : > { %6242 = vmatprep.subr.bf16.mxu0 %v8866_v29  ;;  %5613 = vmatprep.subr.bf16.mxu1 %v6706_v35 }
 0x15e   : > { %6244 = vmatpush3.bf16.msra.mxu0 %v7459_v4  ;;  %5614 = vmatpush3.bf16.msra.mxu1 %v6706_v35 }
 0x15f   : > { %6245 = vmatprep.subr.bf16.mxu0 %v8866_v29  ;;  %5615 = vmatprep.subr.bf16.mxu1 %v6707_v59 }
 0x162   : > { %6247 = vmatpush3.bf16.msra.mxu0 %v7500_v42  ;;  %5616 = vmatpush3.bf16.msra.mxu1 %v6707_v59 }
 0x163   : > { %6248 = vmatprep.subr.bf16.mxu0 %v8866_v29  ;;  %5617 = vmatprep.subr.bf16.mxu1 %v6708_v51 }
 0x166   : > { %6250 = vmatpush3.bf16.msra.mxu0 %v7520_v36  ;;  %5618 = vmatpush3.bf16.msra.mxu1 %v6708_v51 }
 0x167   : > { %6251 = vmatprep.subr.bf16.mxu0 %v8866_v29  ;;  %5619 = vmatprep.subr.bf16.mxu1 %v6709_v11 }
 0x169   : > { %5500 = vmatmul.mubr.f32.vlgmr.msra.gmra.mrb[16].mxu0 %v1161_v25  ;;  %v7688_v25 = vsub.s32 %v1750_v50, %v6897_v2  ;;  %v8910_v50 = vld [vmem:[#allocation6_spill] sm:$0xff] }
 0x16a   : > { %6253 = vmatpush3.bf16.msra.mxu0 %v7170_v58  ;;  %5534 = vmatprep.mubr.msk.f32.mxu0 %vm6800_vm14, %v8905_v55 }
 0x16b   : > { %6254 = vmatprep.subr.bf16.mxu0 %v8866_v29  ;;  %5620 = vmatpush3.bf16.msra.mxu1 %v6709_v11  ;;  %8906 = vst [vmem:[#allocation48_spill] sm:$0xff] %v7688_v25 }
 0x16c   : > { %5621 = vmatprep.subr.bf16.mxu1 %v6710_v6 }
 0x16e   : > { %6256 = vmatpush3.bf16.msra.mxu0 %v7232_v0 }
 0x16f   : > { %6257 = vmatprep.subr.bf16.mxu0 %v8866_v29  ;;  %5622 = vmatpush3.bf16.msra.mxu1 %v6710_v6 }
 0x170   : > { %6323 = vmatprep.subr.bf16.mxu1 %v8866_v29 }
 0x172   : > { %6259 = vmatpush3.bf16.msra.mxu0 %v7241_v16 }
 0x173   : > { %6260 = vmatprep.subr.bf16.mxu0 %v8866_v29 }
 0x176   : > { %6262 = vmatpush3.bf16.msra.mxu0 %v7329_v48 }
 0x177   : > { %6263 = vmatprep.subr.bf16.mxu0 %v8866_v29 }
 0x17a   : > { %6265 = vmatpush3.bf16.msra.mxu0 %v7386_v49 }
 0x17b   : > { %6266 = vmatprep.subr.bf16.mxu0 %v8866_v29 }
 0x17e   : > { %6268 = vmatpush3.bf16.msra.mxu0 %v7445_v22 }
 0x17f   : > { %6269 = vmatprep.subr.bf16.mxu0 %v8866_v29 }
 0x182   : > { %6271 = vmatpush3.bf16.msra.mxu0 %v7486_v23 }
 0x183   : > { %6272 = vmatprep.subr.bf16.mxu0 %v8866_v29 }
 0x186   : > { %6274 = vmatpush3.bf16.msra.mxu0 %v7511_v26 }
 0x187   : > { %6275 = vmatprep.subr.bf16.mxu0 %v8866_v29 }
 0x189   : > { %5535 = vmatmul.mubr.f32.vlgmr.msra.gmra.mrb[16].mxu0 %v1162_v60 }
 0x18a   : > { %6277 = vmatpush3.bf16.msra.mxu0 %v7535_v39  ;;  %5569 = vmatprep.mubr.msk.f32.mxu0 %vm6800_vm14, %v8905_v55 }
 0x18b   : > { %6278 = vmatprep.subr.bf16.mxu0 %v8866_v29 }
 0x18e   : > { %6280 = vmatpush3.bf16.msra.mxu0 %v7541_v21 }
 0x18f   : > { %6281 = vmatprep.subr.bf16.mxu0 %v8866_v29 }
 0x192   : > { %6283 = vmatpush3.bf16.msra.mxu0 %v7547_v46 }
 0x193   : > { %6284 = vmatprep.subr.bf16.mxu0 %v8866_v29 }
 0x196   : > { %6286 = vmatpush3.bf16.msra.mxu0 %v7553_v63 }
 0x197   : > { %6287 = vmatprep.subr.bf16.mxu0 %v8866_v29 }
 0x19a   : > { %6289 = vmatpush3.bf16.msra.mxu0 %v7559_v40  ;;  %v8916_v40 = vld [vmem:[#allocation15_spill] sm:$0xff] }
 0x19b   : > { %6290 = vmatprep.subr.bf16.mxu0 %v8866_v29 }
 0x19e   : > { %6292 = vmatpush3.bf16.msra.mxu0 %v7565_v12 }
 0x19f   : > { %6293 = vmatprep.subr.bf16.mxu0 %v8866_v29 }
 0x1a2   : > { %6295 = vmatpush3.bf16.msra.mxu0 %v7568_v62 }
 0x1a3   : > { %6296 = vmatprep.subr.bf16.mxu0 %v8866_v29 }
 0x1a6   : > { %6298 = vmatpush3.bf16.msra.mxu0 %v7570_v30 }
 0x1a7   : > { %6299 = vmatprep.subr.bf16.mxu0 %v8866_v29 }
 0x1a9   : > { %5570 = vmatmul.mubr.f32.vlgmr.msra.gmra.mrb[16].mxu0 %v7582_v38 }
 0x1aa   : > { %6301 = vmatpush3.bf16.msra.mxu0 %v7170_v58  ;;  %5604 = vmatprep.mubr.msk.f32.mxu0 %vm6800_vm14, %v8905_v55 }
 0x1ab   : > { %6302 = vmatprep.subr.bf16.mxu0 %v8866_v29 }
 0x1ae   : > { %6304 = vmatpush3.bf16.msra.mxu0 %v7232_v0 }
 0x1af   : > { %6305 = vmatprep.subr.bf16.mxu0 %v8866_v29 }
 0x1b2   : > { %6307 = vmatpush3.bf16.msra.mxu0 %v7241_v16 }
 0x1b3   : > { %6308 = vmatprep.subr.bf16.mxu0 %v8866_v29 }
 0x1b6   : > { %6310 = vmatpush3.bf16.msra.mxu0 %v7329_v48 }
 0x1b7   : > { %6311 = vmatprep.subr.bf16.mxu0 %v8866_v29 }
 0x1ba   : > { %6313 = vmatpush3.bf16.msra.mxu0 %v7386_v49 }
 0x1bb   : > { %6314 = vmatprep.subr.bf16.mxu0 %v8866_v29 }
 0x1be   : > { %6316 = vmatpush3.bf16.msra.mxu0 %v7445_v22 }
 0x1bf   : > { %6317 = vmatprep.subr.bf16.mxu0 %v8866_v29 }
 0x1c2   : > { %6319 = vmatpush3.bf16.msra.mxu0 %v7486_v23 }
 0x1c3   : > { %6320 = vmatprep.subr.bf16.mxu0 %v8866_v29 }
 0x1c6   : > { %6322 = vmatpush3.bf16.msra.mxu0 %v7511_v26 }
 0x1c9   : > { %5605 = vmatmul.mubr.f32.vlgmr.msra.gmra.mrb[16].mxu0 %v7582_v38 }
 0x224   : > { %v1166_v8 = vpop.f32.mrb[32].mxu1 }
 0x225   : > { %v5431_v13 = vpop.f32.mrb[33].mxu1 }
 0x29c   : > { %v1716_v1 = vpop.f32.mrb[16].mxu0 }
 0x29d   : > { %v6611_v45 = vadd.f32 %v1716_v1, %v1166_v8  ;;  %v5606_v28 = vpop.f32.mrb[17].mxu0  ;;  %v7694_v8 = vsub.s32 0, %v6897_v2 }
 0x29f   : > { %v1720_v33 = vmul.f32 0.00390625, %v6611_v45  ;;  %8907 = vst [vmem:[#allocation49_spill] sm:$0xff] %v7694_v8 }
 0x2a1   : > { %v1721_v7 = vmul.f32 %v1720_v33, %v1720_v33 }
 0x2a3   : > { %v1723_v14 = vrot.slane %v1721_v7, 4 }
 0x2a5   : > { %v1725_v15 = vsub.f32 %v1720_v33, %v1723_v14  ;;  %v8908_v14 = vld [vmem:[#allocation7_spill] sm:$0xff] }
 0x2a7   : > { %v1726_v10 = vmax.f32 %v1725_v15, 0.0 }
 0x2a9   : > { %v1727_v32 = vadd.f32 1e-05, %v1726_v10  ;;  %v8909_v10 = vld [vmem:[#allocation5_spill] sm:$0xff] }
 0x2ab   : > { %6727 = vrsqrt.f32 %v1727_v32 }
 0x2b5   : > { %v6728_v52 = vpop.eup %6727 }
 0x2b6   : > { %v1735_v38 = vmul.f32 %v6728_v52, %v4856_v24  ;;  %v8911_v52 = vld [vmem:[#allocation9_spill] sm:$0xff] }
 0x2b8   : > { %v1737_v60 = vrot.slane %v1735_v38, 4  ;;  %v1747_v54 = vcombine.high %v1735_v38, %v1735_v38 }
 0x2ba   : > { %v1739_v13 = vmul.f32 %v1737_v60, %v1720_v33  ;;  %v1754_v18 = vrot.slane %v1747_v54, %v7688_v25 }
 0x2bc   : > { %v1746_v43 = vsub.f32 %v4857_v27, %v1739_v13  ;;  %v1755_v19 = vcombine.high %v1754_v18, %v1754_v18  ;;  %v1762_v35 = vrot.slane %v1754_v18, %v7688_v25  ;;  %v8912_v27 = vld [vmem:[#allocation11_spill] sm:$0xff]  ;;  %v8913_v18 = vld [vmem:[#allocation8_spill] sm:$0xff] }
 0x2be   : > { %v1769_v59 = vrot.slane %v1755_v19, %v7688_v25  ;;  %v1770_v51 = vcombine.high %v1762_v35, %v1762_v35  ;;  %v1775_v11 = vrot.slane %v1762_v35, %v7694_v8  ;;  %v1831_v6 = vrot.slane %v1746_v43, %v7688_v25  ;;  %v8914_v35 = vld [vmem:[#allocation10_spill] sm:$0xff] }
 0x2c0   : > { %v1771_v1 = vcombine.high %v1769_v59, %v1769_v59  ;;  %v1779_v45 = vrot.slane %v1769_v59, %v7694_v8  ;;  %v7703_v2 = vrot.slane %v1770_v51, %v7694_v8  ;;  %v1832_v28 = vcombine.high %v1831_v6, %v1831_v6  ;;  %v8915_v51 = vld [vmem:[#allocation13_spill] sm:$0xff] }
 0x2c1   : > { %v1839_v33 = vrot.slane %v1831_v6, %v7688_v25  ;;  %v1792_v7 = vmul.f32 %v1775_v11, %v7111_v9  ;;  %v1793_v15 = vmul.f32 %v1775_v11, %v8908_v14  ;;  %v1794_v32 = vmul.f32 %v8909_v10, %v1775_v11 }
 0x2c2   : > { %v7710_v53 = vrot.slane %v1771_v1, %v7694_v8  ;;  %v1846_v3 = vrot.slane %v1832_v28, %v7688_v25  ;;  %v1795_v24 = vmul.f32 %v8910_v50, %v1775_v11  ;;  %v1796_v38 = vmul.f32 %v1775_v11, %v8911_v52 }
 0x2c3   : > { %v1847_v60 = vcombine.high %v1839_v33, %v1839_v33  ;;  %v1852_v54 = vrot.slane %v1839_v33, %v7694_v8  ;;  %v1797_v13 = vmul.f32 %v1775_v11, %v8912_v27  ;;  %v1798_v9 = vmul.f32 %v8913_v18, %v1775_v11 }
 0x2c4   : > { %v1848_v43 = vcombine.high %v1846_v3, %v1846_v3  ;;  %v1856_v19 = vrot.slane %v1846_v3, %v7694_v8  ;;  %v1799_v59 = vmul.f32 %v8914_v35, %v1775_v11  ;;  %v1800_v6 = vmul.f32 %v1779_v45, %v8915_v51 }
 0x2c5   : > { %v7722_v1 = vrot.slane %v1847_v60, %v7694_v8  ;;  %v1869_v28 = vadd.f32 %v1852_v54, %v1792_v7  ;;  %v1870_v14 = vadd.f32 %v1852_v54, %v1793_v15  ;;  %v1871_v10 = vadd.f32 %v1852_v54, %v1794_v32 }
 0x2c6   : > { %v7725_v50 = vrot.slane %v1848_v43, %v7694_v8  ;;  %v1872_v33 = vadd.f32 %v1852_v54, %v1795_v24  ;;  %v1873_v52 = vadd.f32 %v1852_v54, %v1796_v38  ;;  %v1874_v27 = vadd.f32 %v1852_v54, %v1797_v13  ;;  %v8917_v8 = vld [vmem:[#allocation12_spill] sm:$0xff] }
 0x2c7   : > { %v1901_v18 = vmax.f32 %v1869_v28, 0.0  ;;  %v1902_v25 = vmax.f32 %v1870_v14, 0.0  ;;  %v1903_v30 = vmax.f32 %v1871_v10, 0.0  ;;  %v1875_v3 = vadd.f32 %v1852_v54, %v1798_v9  ;;  %v8918_v28 = vld [vmem:[#allocation14_spill] sm:$0xff]  ;;  %v8919_v9 = vld [vmem:[#allocation17_spill] sm:$0xff] }
 0x2c8   : > { %v1904_v62 = vmax.f32 %v1872_v33, 0.0  ;;  %v1905_v11 = vmax.f32 %v1873_v52, 0.0  ;;  %v1906_v35 = vmax.f32 %v1874_v27, 0.0  ;;  %v1876_v51 = vadd.f32 %v1852_v54, %v1799_v59  ;;  %v8921_v52 = vld [vmem:[#allocation16_spill] sm:$0xff] }
 0x2c9   : > { %v1933_v12 = vpack.c.bf16 %v1902_v25, %v1901_v18  ;;  %v1907_v60 = vmax.f32 %v1875_v3, 0.0  ;;  %v1801_v7 = vmul.f32 %v1779_v45, %v8916_v40  ;;  %v1877_v15 = vadd.f32 %v1856_v19, %v1800_v6  ;;  %v8920_v25 = vld [vmem:[#allocation19_spill] sm:$0xff] }
 0x2ca   : > { %v1934_v32 = vpack.c.bf16 %v1904_v62, %v1903_v30  ;;  %v1935_v63 = vpack.c.bf16 %v1906_v35, %v1905_v11  ;;  %v1908_v43 = vmax.f32 %v1876_v51, 0.0  ;;  %v1802_v24 = vmul.f32 %v8917_v8, %v1779_v45  ;;  %v8923_v11 = vld [vmem:[#allocation21_spill] sm:$0xff] }
 0x2cb   : > { %5623 = vmatprep.mubr.bf16.mxu1 %v1933_v12  ;;  %v1878_v38 = vadd.f32 %v1856_v19, %v1801_v7  ;;  %v1909_v13 = vmax.f32 %v1877_v15, 0.0  ;;  %v1803_v14 = vmul.f32 %v8918_v28, %v1779_v45  ;;  %v1804_v10 = vmul.f32 %v1779_v45, %v8919_v9  ;;  %v8922_v12 = vld [vmem:[#allocation18_spill] sm:$0xff] }
 0x2cc   : > { %5624 = vmatmul.mubr.bf16.vlgmr.msra.gmra.mrb[36].mxu1 %v1934_v32  ;;  %v1936_v33 = vpack.c.bf16 %v1908_v43, %v1907_v60  ;;  %v1879_v54 = vadd.f32 %v1856_v19, %v1802_v24  ;;  %v1805_v59 = vmul.f32 %v1779_v45, %v8920_v25  ;;  %v1806_v40 = vmul.f32 %v8921_v52, %v1779_v45 }
 0x2cd   : > { %6325 = vmatpush3.bf16.msra.mxu1 %v7170_v58  ;;  %5627 = vmatprep.mubr.bf16.mxu1 %v1935_v63  ;;  %v1910_v62 = vmax.f32 %v1878_v38, 0.0  ;;  %v1880_v30 = vadd.f32 %v1856_v19, %v1803_v14  ;;  %v1881_v8 = vadd.f32 %v1856_v19, %v1804_v10  ;;  %v1807_v6 = vmul.f32 %v8922_v12, %v1779_v45  ;;  %v8924_v63 = vld [vmem:[#allocation23_spill] sm:$0xff]  ;;  %v8925_v14 = vld [vmem:[#allocation20_spill] sm:$0xff]  ;;  %v8926_v10 = vld [vmem:[#allocation22_spill] sm:$0xff] }
 0x2ce   : > { %6326 = vmatprep.subr.bf16.mxu1 %v8866_v29  ;;  %v1911_v27 = vmax.f32 %v1879_v54, 0.0  ;;  %v1882_v18 = vadd.f32 %v1856_v19, %v1805_v59  ;;  %v1883_v3 = vadd.f32 %v1856_v19, %v1806_v40  ;;  %v1808_v35 = vmul.f32 %v7703_v2, %v8923_v11  ;;  %v8927_v59 = vld [vmem:[#allocation26_spill] sm:$0xff]  ;;  %v8930_v11 = vld [vmem:[#allocation27_spill] sm:$0xff] }
 0x2cf   : > { %v1937_v51 = vpack.c.bf16 %v1910_v62, %v1909_v13  ;;  %v1912_v60 = vmax.f32 %v1880_v30, 0.0  ;;  %v1913_v7 = vmax.f32 %v1881_v8, 0.0  ;;  %v1884_v15 = vadd.f32 %v1856_v19, %v1807_v6  ;;  %v8928_v8 = vld [vmem:[#allocation28_spill] sm:$0xff] }
 0x2d0   : > { %v1914_v32 = vmax.f32 %v1882_v18, 0.0  ;;  %v1915_v43 = vmax.f32 %v1883_v3, 0.0  ;;  %v1809_v24 = vmul.f32 %v7703_v2, %v8924_v63  ;;  %v1885_v38 = vadd.f32 %v7722_v1, %v1808_v35  ;;  %v8929_v18 = vld [vmem:[#allocation24_spill] sm:$0xff] }
 0x2d1   : > { %6328 = vmatpush3.bf16.msra.mxu1 %v7232_v0  ;;  %v1938_v45 = vpack.c.bf16 %v1912_v60, %v1911_v27  ;;  %v1916_v28 = vmax.f32 %v1884_v15, 0.0  ;;  %v1810_v9 = vmul.f32 %v8925_v14, %v7703_v2  ;;  %v1811_v13 = vmul.f32 %v8926_v10, %v7703_v2  ;;  %v8932_v14 = vld [vmem:[#allocation33_spill] sm:$0xff] }
 0x2d2   : > { %6329 = vmatprep.subr.bf16.mxu1 %v8866_v29  ;;  %v1939_v19 = vpack.c.bf16 %v1914_v32, %v1913_v7  ;;  %v1886_v54 = vadd.f32 %v7722_v1, %v1809_v24  ;;  %v1917_v25 = vmax.f32 %v1885_v38, 0.0  ;;  %v1812_v52 = vmul.f32 %v7703_v2, %v8927_v59  ;;  %v8931_v32 = vld [vmem:[#allocation31_spill] sm:$0xff] }
 0x2d3   : > { %v1940_v40 = vpack.c.bf16 %v1916_v28, %v1915_v43  ;;  %v1887_v62 = vadd.f32 %v7722_v1, %v1810_v9  ;;  %v1888_v30 = vadd.f32 %v7722_v1, %v1811_v13  ;;  %v1813_v12 = vmul.f32 %v7703_v2, %v8928_v8  ;;  %v8935_v8 = vld [vmem:[#allocation37_spill] sm:$0xff] }
 0x2d4   : > { %5628 = vmatmul.mubr.bf16.gmra.mrb[40].mxu1 %v1936_v33  ;;  %v1918_v6 = vmax.f32 %v1886_v54, 0.0  ;;  %v1889_v27 = vadd.f32 %v7722_v1, %v1812_v52  ;;  %v1814_v3 = vmul.f32 %v8929_v18, %v7703_v2  ;;  %v1815_v35 = vmul.f32 %v8930_v11, %v7703_v2  ;;  %v8933_v54 = vld [vmem:[#allocation30_spill] sm:$0xff]  ;;  %v8934_v52 = vld [vmem:[#allocation32_spill] sm:$0xff] }
 0x2d5   : > { %6331 = vmatpush3.bf16.msra.mxu1 %v7241_v16  ;;  %5631 = vmatprep.mubr.bf16.mxu1 %v1937_v51  ;;  %v1919_v60 = vmax.f32 %v1887_v62, 0.0  ;;  %v1920_v7 = vmax.f32 %v1888_v30, 0.0  ;;  %v1890_v15 = vadd.f32 %v7722_v1, %v1813_v12  ;;  %v1816_v43 = vmul.f32 %v7710_v53, %v8931_v32 }
 0x2d6   : > { %6332 = vmatprep.subr.bf16.mxu1 %v8866_v29  ;;  %v1941_v33 = vpack.c.bf16 %v1918_v6, %v1917_v25  ;;  %v1921_v63 = vmax.f32 %v1889_v27, 0.0  ;;  %v1891_v24 = vadd.f32 %v7722_v1, %v1814_v3  ;;  %v1892_v38 = vadd.f32 %v7722_v1, %v1815_v35 }
 0x2d7   : > { %v1942_v28 = vpack.c.bf16 %v1920_v7, %v1919_v60  ;;  %v1922_v2 = vmax.f32 %v1890_v15, 0.0  ;;  %v1817_v51 = vmul.f32 %v7710_v53, %v8932_v14  ;;  %v1893_v9 = vadd.f32 %v7725_v50, %v1816_v43  ;;  %v8936_v60 = vld [vmem:[#allocation35_spill] sm:$0xff] }
 0x2d8   : > { %v1923_v10 = vmax.f32 %v1891_v24, 0.0  ;;  %v1924_v13 = vmax.f32 %v1892_v38, 0.0  ;;  %v1818_v59 = vmul.f32 %v8933_v54, %v7710_v53  ;;  %v1819_v25 = vmul.f32 %v8934_v52, %v7710_v53 }
 0x2d9   : > { %6334 = vmatpush3.bf16.msra.mxu1 %v7329_v48  ;;  %v1943_v62 = vpack.c.bf16 %v1922_v2, %v1921_v63  ;;  %v1894_v1 = vadd.f32 %v7725_v50, %v1817_v51  ;;  %v1925_v30 = vmax.f32 %v1893_v9, 0.0  ;;  %v1820_v12 = vmul.f32 %v7710_v53, %v8935_v8 }
 0x2da   : > { %6335 = vmatprep.subr.bf16.mxu1 %v8866_v29  ;;  %v1944_v6 = vpack.c.bf16 %v1924_v13, %v1923_v10  ;;  %v1895_v27 = vadd.f32 %v7725_v50, %v1818_v59  ;;  %v1896_v18 = vadd.f32 %v7725_v50, %v1819_v25  ;;  %v1821_v3 = vmul.f32 %v7710_v53, %v7478_v41 }
 0x2db   : > { %v1926_v11 = vmax.f32 %v1894_v1, 0.0  ;;  %v1897_v35 = vadd.f32 %v7725_v50, %v1820_v12  ;;  %v1822_v7 = vmul.f32 %v8936_v60, %v7710_v53  ;;  %v1823_v15 = vmul.f32 %v7469_v37, %v7710_v53 }
 0x2dc   : > { %5632 = vmatmul.mubr.bf16.gmra.mrb[44].mxu1 %v1938_v45  ;;  %v1927_v32 = vmax.f32 %v1895_v27, 0.0  ;;  %v1928_v43 = vmax.f32 %v1896_v18, 0.0  ;;  %v1898_v63 = vadd.f32 %v7725_v50, %v1821_v3 }
 0x2dd   : > { %6337 = vmatpush3.bf16.msra.mxu1 %v7386_v49  ;;  %5635 = vmatprep.mubr.bf16.mxu1 %v1939_v19  ;;  %v1945_v24 = vpack.c.bf16 %v1926_v11, %v1925_v30  ;;  %v1929_v38 = vmax.f32 %v1897_v35, 0.0  ;;  %v1899_v41 = vadd.f32 %v7725_v50, %v1822_v7  ;;  %v1900_v2 = vadd.f32 %v7725_v50, %v1823_v15 }
 0x2de   : > { %6338 = vmatprep.subr.bf16.mxu1 %v8866_v29  ;;  %v1946_v14 = vpack.c.bf16 %v1928_v43, %v1927_v32  ;;  %v1930_v51 = vmax.f32 %v1898_v63, 0.0 }
 0x2df   : > { %v1931_v9 = vmax.f32 %v1899_v41, 0.0  ;;  %v1932_v37 = vmax.f32 %v1900_v2, 0.0 }
 0x2e0   : > { %v1947_v53 = vpack.c.bf16 %v1930_v51, %v1929_v38 }
 0x2e1   : > { %6340 = vmatpush3.bf16.msra.mxu1 %v7445_v22  ;;  %v1948_v45 = vpack.c.bf16 %v1932_v37, %v1931_v9 }
 0x2e2   : > { %6341 = vmatprep.subr.bf16.mxu1 %v8866_v29 }
 0x2e4   : > { %5636 = vmatmul.mubr.bf16.gmra.mrb[48].mxu1 %v1940_v40 }
 0x2e5   : > { %6343 = vmatpush3.bf16.msra.mxu1 %v7486_v23  ;;  %5639 = vmatprep.mubr.bf16.mxu1 %v1941_v33 }
 0x2e6   : > { %6344 = vmatprep.subr.bf16.mxu1 %v8866_v29 }
 0x2e9   : > { %6346 = vmatpush3.bf16.msra.mxu1 %v7511_v26 }
 0x2ea   : > { %6347 = vmatprep.subr.bf16.mxu1 %v8866_v29 }
 0x2ec   : > { %5640 = vmatmul.mubr.bf16.gmra.mrb[52].mxu1 %v1942_v28 }
 0x2ed   : > { %5643 = vmatprep.mubr.bf16.mxu1 %v1943_v62 }
 0x2f4   : > { %5644 = vmatmul.mubr.bf16.gmra.mrb[56].mxu1 %v1944_v6 }
 0x2f5   : > { %5647 = vmatprep.mubr.bf16.mxu1 %v1945_v24 }
 0x2fc   : > { %5648 = vmatmul.mubr.bf16.gmra.mrb[60].mxu1 %v1946_v14 }
 0x2fd   : > { %5651 = vmatprep.mubr.bf16.mxu1 %v1947_v53 }
 0x304   : > { %5652 = vmatmul.mubr.bf16.gmra.mrb[64].mxu1 %v1948_v45 }
 0x305   : > { %5687 = vmatprep.mubr.msk.f32.mxu1 %vm6800_vm14, %v8905_v55 }
 0x39f   : > { %v7800_v50 = vpop.f32.mrb[36].mxu1 }
 0x3a0   : > { %v7802_v19 = vpop.f32.mrb[37].mxu1  ;;  %v2232_v54 = vmul.f32 %v7800_v50, %v7800_v50 }
 0x3a1   : > { %v7804_v40 = vpop.f32.mrb[38].mxu1  ;;  %v2230_v28 = vmul.f32 %v7802_v19, %v7802_v19 }
 0x3a2   : > { %v7806_v33 = vpop.f32.mrb[39].mxu1  ;;  %v2233_v25 = vmul.f32 %v7804_v40, %v7804_v40 }
 0x3a3   : > { %v2178_v10 = vadd.f32 %v7806_v33, %v7802_v19  ;;  %v2231_v13 = vmul.f32 %v7806_v33, %v7806_v33 }
 0x3a5   : > { %v2179_v59 = vadd.f32 %v7800_v50, %v2178_v10  ;;  %v2262_v52 = vadd.f32 %v2231_v13, %v2230_v28 }
 0x3a7   : > { %v2263_v62 = vadd.f32 %v2262_v52, %v2232_v54  ;;  %v7819_v1 = vpop.f32.mrb[40].mxu1  ;;  %v2180_v30 = vadd.f32 %v7804_v40, %v2179_v59 }
 0x3a8   : > { %v7822_v8 = vpop.f32.mrb[41].mxu1  ;;  %v2236_v7 = vmul.f32 %v7819_v1, %v7819_v1 }
 0x3a9   : > { %v2181_v12 = vadd.f32 %v2180_v30, %v7822_v8  ;;  %v2234_v6 = vmul.f32 %v7822_v8, %v7822_v8  ;;  %v2264_v27 = vadd.f32 %v2263_v62, %v2233_v25  ;;  %v7827_v18 = vpop.f32.mrb[42].mxu1 }
 0x3aa   : > { %v7829_v3 = vpop.f32.mrb[43].mxu1  ;;  %v2237_v43 = vmul.f32 %v7827_v18, %v7827_v18 }
 0x3ab   : > { %v2265_v11 = vadd.f32 %v2264_v27, %v2234_v6  ;;  %v2182_v35 = vadd.f32 %v2181_v12, %v7829_v3  ;;  %v2235_v60 = vmul.f32 %v7829_v3, %v7829_v3 }
 0x3ad   : > { %v2183_v15 = vadd.f32 %v7819_v1, %v2182_v35  ;;  %v2266_v32 = vadd.f32 %v2265_v11, %v2235_v60 }
 0x3af   : > { %v2184_v63 = vadd.f32 %v7827_v18, %v2183_v15  ;;  %v2267_v24 = vadd.f32 %v2266_v32, %v2236_v7  ;;  %v7840_v38 = vpop.f32.mrb[44].mxu1 }
 0x3b0   : > { %v7842_v41 = vpop.f32.mrb[45].mxu1  ;;  %v2240_v45 = vmul.f32 %v7840_v38, %v7840_v38 }
 0x3b1   : > { %v2268_v2 = vadd.f32 %v2267_v24, %v2237_v43  ;;  %v7844_v14 = vpop.f32.mrb[46].mxu1  ;;  %v2238_v9 = vmul.f32 %v7842_v41, %v7842_v41  ;;  %v2185_v13 = vrot.slane %v2184_v63, 4 }
 0x3b2   : > { %8937 = vst [vmem:[#allocation7_spill] sm:$0xff] %v7844_v14  ;;  %v7846_v51 = vpop.f32.mrb[47].mxu1  ;;  %v2241_v25 = vmul.f32 %v7844_v14, %v7844_v14 }
 0x3b3   : > { %v2191_v37 = vadd.f32 %v7846_v51, %v7842_v41  ;;  %v2239_v53 = vmul.f32 %v7846_v51, %v7846_v51  ;;  %v2186_v27 = vadd.f32 %v2185_v13, %v2184_v63  ;;  %v2269_v11 = vrot.slane %v2268_v2, 4 }
 0x3b5   : > { %v2192_v28 = vadd.f32 %v7840_v38, %v2191_v37  ;;  %v2275_v10 = vadd.f32 %v2239_v53, %v2238_v9  ;;  %v2187_v24 = vrot.slane %v2186_v27, 2  ;;  %v2270_v9 = vadd.f32 %v2269_v11, %v2268_v2 }
 0x3b7   : > { %v2276_v54 = vadd.f32 %v2275_v10, %v2240_v45  ;;  %v7857_v59 = vpop.f32.mrb[48].mxu1  ;;  %v2193_v52 = vadd.f32 %v7844_v14, %v2192_v28 }
 0x3b8   : > { %8938 = vst [vmem:[#allocation5_spill] sm:$0xff] %v7857_v59  ;;  %v7862_v62 = vpop.f32.mrb[49].mxu1  ;;  %v2244_v37 = vmul.f32 %v7857_v59, %v7857_v59 }
 0x3b9   : > { %8939 = vst [vmem:[#allocation6_spill] sm:$0xff] %v7862_v62  ;;  %v2194_v30 = vadd.f32 %v2193_v52, %v7862_v62  ;;  %v2242_v12 = vmul.f32 %v7862_v62, %v7862_v62  ;;  %v7867_v6 = vpop.f32.mrb[50].mxu1  ;;  %v2277_v35 = vadd.f32 %v2276_v54, %v2241_v25  ;;  %v2188_v25 = vadd.f32 %v2187_v24, %v2186_v27 }
 0x3ba   : > { %8940 = vst [vmem:[#allocation9_spill] sm:$0xff] %v7867_v6  ;;  %v7869_v60 = vpop.f32.mrb[51].mxu1  ;;  %v2245_v28 = vmul.f32 %v7867_v6, %v7867_v6 }
 0x3bb   : > { %8941 = vst [vmem:[#allocation11_spill] sm:$0xff] %v7869_v60  ;;  %v2195_v7 = vadd.f32 %v2194_v30, %v7869_v60  ;;  %v2243_v15 = vmul.f32 %v7869_v60, %v7869_v60  ;;  %v2278_v32 = vadd.f32 %v2277_v35, %v2242_v12  ;;  %v2271_v30 = vrot.slane %v2270_v9, 2 }
 0x3bd   : > { %v2196_v43 = vadd.f32 %v7857_v59, %v2195_v7  ;;  %v2279_v53 = vadd.f32 %v2278_v32, %v2243_v15 }
 0x3bf   : > { %v2197_v63 = vadd.f32 %v7867_v6, %v2196_v43  ;;  %v7878_v45 = vpop.f32.mrb[52].mxu1  ;;  %v2280_v10 = vadd.f32 %v2279_v53, %v2244_v37  ;;  %v2189_v53 = vrot.slane %v2188_v25, 1 }
 0x3c0   : > { %v7882_v13 = vpop.f32.mrb[53].mxu1  ;;  %v2248_v37 = vmul.f32 %v7878_v45, %v7878_v45 }
 0x3c1   : > { %8942 = vst [vmem:[#allocation8_spill] sm:$0xff] %v7882_v13  ;;  %v2198_v54 = vrot.slane %v2197_v63, 4  ;;  %v7884_v52 = vpop.f32.mrb[54].mxu1  ;;  %v2281_v2 = vadd.f32 %v2280_v10, %v2245_v28  ;;  %v2246_v35 = vmul.f32 %v7882_v13, %v7882_v13  ;;  %v2272_v28 = vadd.f32 %v2271_v30, %v2270_v9 }
 0x3c2   : > { %v7886_v12 = vpop.f32.mrb[55].mxu1 }
 0x3c3   : > { %8943 = vst [vmem:[#allocation10_spill] sm:$0xff] %v7886_v12  ;;  %v2199_v11 = vadd.f32 %v2198_v54, %v2197_v63  ;;  %v2204_v7 = vadd.f32 %v7886_v12, %v7882_v13  ;;  %v2247_v15 = vmul.f32 %v7886_v12, %v7886_v12  ;;  %v2282_v32 = vrot.slane %v2281_v2, 4 }
 0x3c4   : > { %v2249_v54 = vmul.f32 %v7884_v52, %v7884_v52 }
 0x3c5   : > { %v2200_v43 = vrot.slane %v2199_v11, 2  ;;  %v2205_v27 = vadd.f32 %v7878_v45, %v2204_v7  ;;  %v2288_v24 = vadd.f32 %v2247_v15, %v2246_v35  ;;  %v2283_v63 = vadd.f32 %v2282_v32, %v2281_v2 }
 0x3c6   : > { %v2190_v2 = vadd.f32 %v2189_v53, %v2188_v25 }
 0x3c7   : > { %v2201_v10 = vadd.f32 %v2200_v43, %v2199_v11  ;;  %v2289_v6 = vadd.f32 %v2288_v24, %v2248_v37  ;;  %v7899_v13 = vpop.f32.mrb[56].mxu1  ;;  %v2206_v12 = vadd.f32 %v7884_v52, %v2205_v27  ;;  %v2284_v59 = vrot.slane %v2283_v63, 2 }
 0x3c8   : > { %8944 = vst [vmem:[#allocation13_spill] sm:$0xff] %v7899_v13  ;;  %v7902_v60 = vpop.f32.mrb[57].mxu1  ;;  %v2273_v11 = vrot.slane %v2272_v28, 1 }
 0x3c9   : > { %8945 = vst [vmem:[#allocation15_spill] sm:$0xff] %v7902_v60  ;;  %v2202_v62 = vrot.slane %v2201_v10, 1  ;;  %v2207_v14 = vadd.f32 %v2206_v12, %v7902_v60  ;;  %v2250_v35 = vmul.f32 %v7902_v60, %v7902_v60  ;;  %v2290_v9 = vadd.f32 %v2289_v6, %v2249_v54  ;;  %v7907_v30 = vpop.f32.mrb[58].mxu1 }
 0x3ca   : > { %8946 = vst [vmem:[#allocation12_spill] sm:$0xff] %v7907_v30  ;;  %v2285_v7 = vadd.f32 %v2284_v59, %v2283_v63  ;;  %v7909_v15 = vpop.f32.mrb[59].mxu1  ;;  %v2252_v6 = vmul.f32 %v7899_v13, %v7899_v13  ;;  %v2274_v53 = vadd.f32 %v2273_v11, %v2272_v28 }
 0x3cb   : > { %8947 = vst [vmem:[#allocation14_spill] sm:$0xff] %v7909_v15  ;;  %v2203_v32 = vadd.f32 %v2202_v62, %v2201_v10  ;;  %v2291_v43 = vadd.f32 %v2290_v9, %v2250_v35  ;;  %v2208_v37 = vadd.f32 %v2207_v14, %v7909_v15  ;;  %v2251_v27 = vmul.f32 %v7909_v15, %v7909_v15 }
 0x3cc   : > { %v2286_v24 = vrot.slane %v2285_v7, 1  ;;  %v2253_v62 = vmul.f32 %v7907_v30, %v7907_v30 }
 0x3cd   : > { %v2318_v12 = vsel %vm1059_vm4, %v2203_v32, %v2190_v2  ;;  %v2209_v54 = vadd.f32 %v7899_v13, %v2208_v37  ;;  %v2292_v25 = vadd.f32 %v2291_v43, %v2251_v27 }
 0x3ce   : > { %v2287_v59 = vadd.f32 %v2286_v24, %v2285_v7 }
 0x3cf   : > { %v2210_v63 = vadd.f32 %v7907_v30, %v2209_v54  ;;  %v2293_v14 = vadd.f32 %v2292_v25, %v2252_v6  ;;  %v7921_v10 = vpop.f32.mrb[60].mxu1 }
 0x3d0   : > { %v2326_v35 = vsel %vm1070_vm1, %v2287_v59, %v2274_v53  ;;  %v7924_v9 = vpop.f32.mrb[61].mxu1  ;;  %v2256_v24 = vmul.f32 %v7921_v10, %v7921_v10 }
 0x3d1   : > { %8948 = vst [vmem:[#allocation17_spill] sm:$0xff] %v7924_v9  ;;  %v2211_v2 = vrot.slane %v2210_v63, 4  ;;  %v2294_v32 = vadd.f32 %v2293_v14, %v2253_v62  ;;  %v7926_v15 = vpop.f32.mrb[62].mxu1  ;;  %v2254_v28 = vmul.f32 %v7924_v9, %v7924_v9 }
 0x3d2   : > { %8949 = vst [vmem:[#allocation19_spill] sm:$0xff] %v7926_v15  ;;  %v7930_v11 = vpop.f32.mrb[63].mxu1 }
 0x3d3   : > { %8950 = vst [vmem:[#allocation16_spill] sm:$0xff] %v7930_v11  ;;  %v2212_v7 = vadd.f32 %v2211_v2, %v2210_v63  ;;  %v2295_v43 = vrot.slane %v2294_v32, 4  ;;  %v2217_v37 = vadd.f32 %v7930_v11, %v7924_v9  ;;  %v2255_v27 = vmul.f32 %v7930_v11, %v7930_v11 }
 0x3d4   : > { %v2257_v2 = vmul.f32 %v7926_v15, %v7926_v15 }
 0x3d5   : > { %v2213_v6 = vrot.slane %v2212_v7, 2  ;;  %v2296_v54 = vadd.f32 %v2295_v43, %v2294_v32  ;;  %v2218_v25 = vadd.f32 %v7921_v10, %v2217_v37  ;;  %v2301_v53 = vadd.f32 %v2255_v27, %v2254_v28 }
 0x3d7   : > { %v2214_v59 = vadd.f32 %v2213_v6, %v2212_v7  ;;  %v2297_v62 = vrot.slane %v2296_v54, 2  ;;  %v2302_v14 = vadd.f32 %v2301_v53, %v2256_v24  ;;  %v7939_v30 = vpop.f32.mrb[64].mxu1  ;;  %v2219_v63 = vadd.f32 %v7926_v15, %v2218_v25 }
 0x3d8   : > { %8951 = vst [vmem:[#allocation18_spill] sm:$0xff] %v7939_v30  ;;  %v7944_v9 = vpop.f32.mrb[65].mxu1 }
 0x3d9   : > { %8952 = vst [vmem:[#allocation21_spill] sm:$0xff] %v7944_v9  ;;  %v2215_v11 = vrot.slane %v2214_v59, 1  ;;  %v2298_v13 = vadd.f32 %v2297_v62, %v2296_v54  ;;  %v2220_v60 = vadd.f32 %v2219_v63, %v7944_v9  ;;  %v2258_v32 = vmul.f32 %v7944_v9, %v7944_v9  ;;  %v7949_v28 = vpop.f32.mrb[66].mxu1 }
 0x3da   : > { %v2303_v7 = vadd.f32 %v2302_v14, %v2257_v2  ;;  %v7951_v43 = vpop.f32.mrb[67].mxu1  ;;  %v2260_v63 = vmul.f32 %v7939_v30, %v7939_v30 }
 0x3db   : > { %8953 = vst [vmem:[#allocation23_spill] sm:$0xff] %v7951_v43  ;;  %v2216_v37 = vadd.f32 %v2215_v11, %v2214_v59  ;;  %v2299_v27 = vrot.slane %v2298_v13, 1  ;;  %v2221_v24 = vadd.f32 %v2220_v60, %v7951_v43  ;;  %v2259_v6 = vmul.f32 %v7951_v43, %v7951_v43 }
 0x3dc   : > { %v2304_v25 = vadd.f32 %v2303_v7, %v2258_v32  ;;  %v2261_v60 = vmul.f32 %v7949_v28, %v7949_v28 }
 0x3dd   : > { %v2300_v53 = vadd.f32 %v2299_v27, %v2298_v13  ;;  %v2319_v54 = vsel %vm1061_vm15, %v2216_v37, %v2318_v12  ;;  %v2222_v62 = vadd.f32 %v7939_v30, %v2221_v24 }
 0x3de   : > { %v2305_v9 = vadd.f32 %v2304_v25, %v2259_v6 }
 0x3df   : > { %v2327_v14 = vsel %vm1072_vm2, %v2300_v53, %v2326_v35  ;;  %v2223_v11 = vadd.f32 %v7949_v28, %v2222_v62 }
 0x3e0   : > { %v2306_v59 = vadd.f32 %v2305_v9, %v2260_v63 }
 0x3e1   : > { %v2224_v2 = vrot.slane %v2223_v11, 4 }
 0x3e2   : > { %v2307_v43 = vadd.f32 %v2306_v59, %v2261_v60  ;;  %v8954_v59 = vld [vmem:[#allocation25_spill] sm:$0xff] }
 0x3e3   : > { %v2225_v32 = vadd.f32 %v2224_v2, %v2223_v11  ;;  %v8959_v2 = vld [vmem:[#allocation45_spill] sm:$0xff] }
 0x3e4   : > { %v2308_v13 = vrot.slane %v2307_v43, 4 }
 0x3e5   : > { %v2226_v7 = vrot.slane %v2225_v32, 2 }
 0x3e6   : > { %v2309_v12 = vadd.f32 %v2308_v13, %v2307_v43  ;;  %v8961_v13 = vld [vmem:[#allocation47_spill] sm:$0xff] }
 0x3e7   : > { %v2227_v37 = vadd.f32 %v2226_v7, %v2225_v32  ;;  %v8960_v32 = vld [vmem:[#allocation46_spill] sm:$0xff]  ;;  %v6711_v7 = vld [vmem:[%s8703_s2 + $0x40] sm:$0xff]  }
 0x3e8   : > { %v2310_v27 = vrot.slane %v2309_v12, 2  ;;  %5865 = vmatprep.subr.bf16.mxu0 %v6711_v7 }
 0x3e9   : > { %v2228_v24 = vrot.slane %v2227_v37, 1  ;;  %5866 = vmatpush3.bf16.msra.mxu0 %v6711_v7 }
 0x3ea   : > { %v2311_v15 = vadd.f32 %v2310_v27, %v2309_v12  ;;  %v6712_v12 = vld [vmem:[%s8703_s2 + $0x48] sm:$0xff]   ;;  %v6714_v27 = vld [vmem:[%s8703_s2 + $0x58] sm:$0xff]  }
 0x3eb   : > { %v2229_v30 = vadd.f32 %v2228_v24, %v2227_v37  ;;  %5867 = vmatprep.subr.bf16.mxu0 %v6712_v12  ;;  %v6713_v37 = vld [vmem:[%s8703_s2 + $0x50] sm:$0xff]   ;;  %v6715_v24 = vld [vmem:[%s8703_s2 + $0x60] sm:$0xff]  }
 0x3ec   : > { %v2312_v6 = vrot.slane %v2311_v15, 1 }
 0x3ed   : > { %v2320_v35 = vsel %vm1063_vm3, %v2229_v30, %v2319_v54  ;;  %v8955_v30 = vld [vmem:[#allocation29_spill] sm:$0xff]  ;;  %v8957_v54 = vld [vmem:[#allocation43_spill] sm:$0xff]  ;;  %5868 = vmatpush3.bf16.msra.mxu0 %v6712_v12 }
 0x3ee   : > { %v2313_v25 = vadd.f32 %v2312_v6, %v2311_v15  ;;  %v8956_v15 = vld [vmem:[#allocation34_spill] sm:$0xff]  ;;  %5869 = vmatprep.subr.bf16.mxu0 %v6713_v37  ;;  %v4868_v12 = vld [vmem:[%s8704_s3 + $0x1] ss:$0 sm:$0xff] }
 0x3ef   : > { %v6716_v6 = vld [vmem:[%s8703_s2 + $0x68] sm:$0xff]  }
 0x3f0   : > { %v2328_v53 = vsel %vm1074_vm5, %v2313_v25, %v2327_v14  ;;  %v8958_v14 = vld [vmem:[#allocation44_spill] sm:$0xff] }
 0x3f1   : > { %v2330_v62 = vsel %vm1077_vm0, %v2320_v35, %v2328_v53  ;;  %5870 = vmatpush3.bf16.msra.mxu0 %v6713_v37  ;;  %v6717_v35 = vld [vmem:[%s8703_s2 + $0x70] sm:$0xff]   ;;  %v6718_v25 = vld [vmem:[%s8703_s2 + $0x78] sm:$0xff]  }
 0x3f2   : > { %v7967_v9 = vand.u32 4294901760, %v2330_v62  ;;  %5871 = vmatprep.subr.bf16.mxu0 %v6714_v27 }
 0x3f4   : > { %v2413_v63 = vsub.f32 %v2330_v62, %v7967_v9 }
 0x3f5   : > { %5872 = vmatpush3.bf16.msra.mxu0 %v6714_v27 }
 0x3f6   : > { %v2414_v11 = vand.u32 4294901760, %v2413_v63  ;;  %5873 = vmatprep.subr.bf16.mxu0 %v6715_v24 }
 0x3f8   : > { %v2415_v60 = vsub.f32 %v2413_v63, %v2414_v11 }
 0x3f9   : > { %5874 = vmatpush3.bf16.msra.mxu0 %v6715_v24 }
 0x3fa   : > { %v2416_v43 = vand.u32 4294901760, %v2415_v60  ;;  %5875 = vmatprep.subr.bf16.mxu0 %v6716_v6 }
 0x3fc   : > { %5688 = vmatmul.mubr.f32.vlgmr.msra.gmra.mrb[34].mxu1 %v2416_v43 }
 0x3fd   : > { %6349 = vmatpush3.bf16.msra.mxu1 %v8954_v59  ;;  %5722 = vmatprep.mubr.msk.f32.mxu1 %vm6800_vm14, %v8905_v55 }
 0x3fe   : > { %6350 = vmatprep.subr.bf16.mxu1 %v8866_v29  ;;  %5876 = vmatpush3.bf16.msra.mxu0 %v6716_v6 }
 0x3ff   : > { %5877 = vmatprep.subr.bf16.mxu0 %v6717_v35 }
 0x401   : > { %6352 = vmatpush3.bf16.msra.mxu1 %v8955_v30 }
 0x402   : > { %6353 = vmatprep.subr.bf16.mxu1 %v8866_v29  ;;  %5878 = vmatpush3.bf16.msra.mxu0 %v6717_v35  ;;  %v4869_v35 = vld [vmem:[%s8705_s4 + $0x1] ss:$0 sm:$0xff] }
 0x403   : > { %5879 = vmatprep.subr.bf16.mxu0 %v6718_v25 }
 0x405   : > { %6355 = vmatpush3.bf16.msra.mxu1 %v8956_v15 }
 0x406   : > { %6356 = vmatprep.subr.bf16.mxu1 %v8866_v29  ;;  %5880 = vmatpush3.bf16.msra.mxu0 %v6718_v25 }
 0x407   : > { %6467 = vmatprep.subr.bf16.mxu0 %v8866_v29 }
 0x409   : > { %6358 = vmatpush3.bf16.msra.mxu1 %v7496_v20 }
 0x40a   : > { %6359 = vmatprep.subr.bf16.mxu1 %v8866_v29 }
 0x40d   : > { %6361 = vmatpush3.bf16.msra.mxu1 %v7509_v47 }
 0x40e   : > { %6362 = vmatprep.subr.bf16.mxu1 %v8866_v29 }
 0x411   : > { %6364 = vmatpush3.bf16.msra.mxu1 %v7515_v57 }
 0x412   : > { %6365 = vmatprep.subr.bf16.mxu1 %v8866_v29 }
 0x415   : > { %6367 = vmatpush3.bf16.msra.mxu1 %v7529_v44 }
 0x416   : > { %6368 = vmatprep.subr.bf16.mxu1 %v8866_v29 }
 0x419   : > { %6370 = vmatpush3.bf16.msra.mxu1 %v7573_v17 }
 0x41a   : > { %6371 = vmatprep.subr.bf16.mxu1 %v8866_v29 }
 0x41c   : > { %5723 = vmatmul.mubr.f32.vlgmr.msra.gmra.mrb[34].mxu1 %v7967_v9 }
 0x41d   : > { %6373 = vmatpush3.bf16.msra.mxu1 %v7183_v5  ;;  %5757 = vmatprep.mubr.msk.f32.mxu1 %vm6800_vm14, %v8905_v55 }
 0x41e   : > { %6374 = vmatprep.subr.bf16.mxu1 %v8866_v29 }
 0x421   : > { %6376 = vmatpush3.bf16.msra.mxu1 %v7257_v34 }
 0x422   : > { %6377 = vmatprep.subr.bf16.mxu1 %v8866_v29 }
 0x425   : > { %6379 = vmatpush3.bf16.msra.mxu1 %v7280_v56 }
 0x426   : > { %6380 = vmatprep.subr.bf16.mxu1 %v8866_v29 }
 0x429   : > { %6382 = vmatpush3.bf16.msra.mxu1 %v7358_v61 }
 0x42a   : > { %6383 = vmatprep.subr.bf16.mxu1 %v8866_v29 }
 0x42d   : > { %6385 = vmatpush3.bf16.msra.mxu1 %v7413_v31 }
 0x42e   : > { %6386 = vmatprep.subr.bf16.mxu1 %v8866_v29 }
 0x431   : > { %6388 = vmatpush3.bf16.msra.mxu1 %v7459_v4 }
 0x432   : > { %6389 = vmatprep.subr.bf16.mxu1 %v8866_v29 }
 0x435   : > { %6391 = vmatpush3.bf16.msra.mxu1 %v7500_v42 }
 0x436   : > { %6392 = vmatprep.subr.bf16.mxu1 %v8866_v29 }
 0x439   : > { %6394 = vmatpush3.bf16.msra.mxu1 %v7520_v36 }
 0x43a   : > { %6395 = vmatprep.subr.bf16.mxu1 %v8866_v29 }
 0x43c   : > { %5758 = vmatmul.mubr.f32.vlgmr.msra.gmra.mrb[34].mxu1 %v2413_v63 }
 0x43d   : > { %6397 = vmatpush3.bf16.msra.mxu1 %v7170_v58  ;;  %5792 = vmatprep.mubr.msk.f32.mxu1 %vm6800_vm14, %v8905_v55 }
 0x43e   : > { %6398 = vmatprep.subr.bf16.mxu1 %v8866_v29 }
 0x441   : > { %6400 = vmatpush3.bf16.msra.mxu1 %v7232_v0 }
 0x442   : > { %6401 = vmatprep.subr.bf16.mxu1 %v8866_v29 }
 0x445   : > { %6403 = vmatpush3.bf16.msra.mxu1 %v7241_v16 }
 0x446   : > { %6404 = vmatprep.subr.bf16.mxu1 %v8866_v29 }
 0x449   : > { %6406 = vmatpush3.bf16.msra.mxu1 %v7329_v48 }
 0x44a   : > { %6407 = vmatprep.subr.bf16.mxu1 %v8866_v29 }
 0x44d   : > { %6409 = vmatpush3.bf16.msra.mxu1 %v7386_v49 }
 0x44e   : > { %6410 = vmatprep.subr.bf16.mxu1 %v8866_v29 }
 0x451   : > { %6412 = vmatpush3.bf16.msra.mxu1 %v7445_v22 }
 0x452   : > { %6413 = vmatprep.subr.bf16.mxu1 %v8866_v29 }
 0x455   : > { %6415 = vmatpush3.bf16.msra.mxu1 %v7486_v23 }
 0x456   : > { %6416 = vmatprep.subr.bf16.mxu1 %v8866_v29 }
 0x459   : > { %6418 = vmatpush3.bf16.msra.mxu1 %v7511_v26 }
 0x45a   : > { %6419 = vmatprep.subr.bf16.mxu1 %v8866_v29 }
 0x45c   : > { %5793 = vmatmul.mubr.f32.vlgmr.msra.gmra.mrb[34].mxu1 %v2414_v11 }
 0x45d   : > { %6421 = vmatpush3.bf16.msra.mxu1 %v7535_v39  ;;  %5827 = vmatprep.mubr.msk.f32.mxu1 %vm6800_vm14, %v8905_v55 }
 0x45e   : > { %6422 = vmatprep.subr.bf16.mxu1 %v8866_v29 }
 0x461   : > { %6424 = vmatpush3.bf16.msra.mxu1 %v7541_v21 }
 0x462   : > { %6425 = vmatprep.subr.bf16.mxu1 %v8866_v29 }
 0x465   : > { %6427 = vmatpush3.bf16.msra.mxu1 %v7547_v46 }
 0x466   : > { %6428 = vmatprep.subr.bf16.mxu1 %v8866_v29 }
 0x469   : > { %6430 = vmatpush3.bf16.msra.mxu1 %v8957_v54 }
 0x46a   : > { %6431 = vmatprep.subr.bf16.mxu1 %v8866_v29 }
 0x46d   : > { %6433 = vmatpush3.bf16.msra.mxu1 %v8958_v14 }
 0x46e   : > { %6434 = vmatprep.subr.bf16.mxu1 %v8866_v29 }
 0x471   : > { %6436 = vmatpush3.bf16.msra.mxu1 %v8959_v2 }
 0x472   : > { %6437 = vmatprep.subr.bf16.mxu1 %v8866_v29 }
 0x475   : > { %6439 = vmatpush3.bf16.msra.mxu1 %v8960_v32 }
 0x476   : > { %6440 = vmatprep.subr.bf16.mxu1 %v8866_v29 }
 0x479   : > { %6442 = vmatpush3.bf16.msra.mxu1 %v8961_v13  ;;  %v8963_v13 = vld [vmem:[#allocation49_spill] sm:$0xff] }
 0x47a   : > { %6443 = vmatprep.subr.bf16.mxu1 %v8866_v29 }
 0x47c   : > { %5828 = vmatmul.mubr.f32.vlgmr.msra.gmra.mrb[34].mxu1 %v7967_v9 }
 0x47d   : > { %6445 = vmatpush3.bf16.msra.mxu1 %v7170_v58  ;;  %5862 = vmatprep.mubr.msk.f32.mxu1 %vm6800_vm14, %v8905_v55 }
 0x47e   : > { %6446 = vmatprep.subr.bf16.mxu1 %v8866_v29 }
 0x481   : > { %6448 = vmatpush3.bf16.msra.mxu1 %v7232_v0 }
 0x482   : > { %6449 = vmatprep.subr.bf16.mxu1 %v8866_v29 }
 0x485   : > { %6451 = vmatpush3.bf16.msra.mxu1 %v7241_v16 }
 0x486   : > { %6452 = vmatprep.subr.bf16.mxu1 %v8866_v29 }
 0x489   : > { %6454 = vmatpush3.bf16.msra.mxu1 %v7329_v48 }
 0x48a   : > { %6455 = vmatprep.subr.bf16.mxu1 %v8866_v29 }
 0x48d   : > { %6457 = vmatpush3.bf16.msra.mxu1 %v7386_v49 }
 0x48e   : > { %6458 = vmatprep.subr.bf16.mxu1 %v8866_v29 }
 0x491   : > { %6460 = vmatpush3.bf16.msra.mxu1 %v7445_v22 }
 0x492   : > { %6461 = vmatprep.subr.bf16.mxu1 %v8866_v29 }
 0x495   : > { %6463 = vmatpush3.bf16.msra.mxu1 %v7486_v23 }
 0x496   : > { %6464 = vmatprep.subr.bf16.mxu1 %v8866_v29 }
 0x499   : > { %6466 = vmatpush3.bf16.msra.mxu1 %v7511_v26 }
 0x49c   : > { %5863 = vmatmul.mubr.f32.vlgmr.msra.gmra.mrb[34].mxu1 %v7967_v9 }
 0x56f   : > { %v2968_v53 = vpop.f32.mrb[34].mxu1 }
 0x570   : > { %v2972_v62 = vmul.f32 0.00390625, %v2968_v53  ;;  %v5864_v9 = vpop.f32.mrb[35].mxu1  ;;  %v8962_v53 = vld [vmem:[#allocation48_spill] sm:$0xff] }
 0x572   : > { %v2973_v63 = vmul.f32 %v2972_v62, %v2972_v62 }
 0x574   : > { %v2975_v11 = vrot.slane %v2973_v63, 4 }
 0x576   : > { %v2977_v60 = vsub.f32 %v2972_v62, %v2975_v11 }
 0x578   : > { %v2978_v43 = vmax.f32 %v2977_v60, 0.0 }
 0x57a   : > { %v2979_v7 = vadd.f32 1e-05, %v2978_v43 }
 0x57c   : > { %6729 = vrsqrt.f32 %v2979_v7 }
 0x586   : > { %v6730_v37 = vpop.eup %6729 }
 0x587   : > { %v2987_v27 = vmul.f32 %v6730_v37, %v4868_v12 }
 0x589   : > { %v2989_v24 = vrot.slane %v2987_v27, 4  ;;  %v2999_v6 = vcombine.high %v2987_v27, %v2987_v27 }
 0x58b   : > { %v2991_v25 = vmul.f32 %v2989_v24, %v2972_v62  ;;  %v3006_v9 = vrot.slane %v2999_v6, %v8962_v53 }
 0x58d   : > { %v2998_v63 = vsub.f32 %v4869_v35, %v2991_v25  ;;  %v3007_v11 = vcombine.high %v3006_v9, %v3006_v9  ;;  %v3014_v60 = vrot.slane %v3006_v9, %v8962_v53 }
 0x58f   : > { %v3021_v43 = vrot.slane %v3007_v11, %v8962_v53  ;;  %v3022_v7 = vcombine.high %v3014_v60, %v3014_v60  ;;  %v3027_v32 = vrot.slane %v3014_v60, %v8963_v13  ;;  %v3083_v12 = vrot.slane %v2998_v63, %v8962_v53 }
 0x591   : > { %v3023_v37 = vcombine.high %v3021_v43, %v3021_v43  ;;  %v3031_v27 = vrot.slane %v3021_v43, %v8963_v13  ;;  %v8100_v2 = vrot.slane %v3022_v7, %v8963_v13  ;;  %v3084_v62 = vcombine.high %v3083_v12, %v3083_v12 }
 0x592   : > { %v3091_v24 = vrot.slane %v3083_v12, %v8962_v53  ;;  %v3044_v6 = vmul.f32 %v3027_v32, %v7802_v19  ;;  %v3045_v35 = vmul.f32 %v3027_v32, %v7806_v33  ;;  %v3046_v25 = vmul.f32 %v7800_v50, %v3027_v32 }
 0x593   : > { %v8107_v9 = vrot.slane %v3023_v37, %v8963_v13  ;;  %v3098_v63 = vrot.slane %v3084_v62, %v8962_v53  ;;  %v3047_v11 = vmul.f32 %v7804_v40, %v3027_v32  ;;  %v3048_v60 = vmul.f32 %v3027_v32, %v7822_v8 }
 0x594   : > { %v3099_v43 = vcombine.high %v3091_v24, %v3091_v24  ;;  %v3104_v7 = vrot.slane %v3091_v24, %v8963_v13  ;;  %v3049_v12 = vmul.f32 %v3027_v32, %v7829_v3  ;;  %v3050_v19 = vmul.f32 %v7819_v1, %v3027_v32 }
 0x595   : > { %v3100_v14 = vcombine.high %v3098_v63, %v3098_v63  ;;  %v3108_v33 = vrot.slane %v3098_v63, %v8963_v13  ;;  %v3051_v50 = vmul.f32 %v7827_v18, %v3027_v32  ;;  %v3052_v37 = vmul.f32 %v3031_v27, %v7842_v41 }
 0x596   : > { %v8119_v62 = vrot.slane %v3099_v43, %v8963_v13  ;;  %v3121_v40 = vadd.f32 %v3104_v7, %v3044_v6  ;;  %v3122_v53 = vadd.f32 %v3104_v7, %v3045_v35  ;;  %v3123_v8 = vadd.f32 %v3104_v7, %v3046_v25 }
 0x597   : > { %v8122_v54 = vrot.slane %v3100_v14, %v8963_v13  ;;  %v3124_v24 = vadd.f32 %v3104_v7, %v3047_v11  ;;  %v3125_v3 = vadd.f32 %v3104_v7, %v3048_v60  ;;  %v3126_v46 = vadd.f32 %v3104_v7, %v3049_v12 }
 0x598   : > { %v3153_v1 = vmax.f32 %v3121_v40, 0.0  ;;  %v3154_v21 = vmax.f32 %v3122_v53, 0.0  ;;  %v3155_v39 = vmax.f32 %v3123_v8, 0.0  ;;  %v3127_v63 = vadd.f32 %v3104_v7, %v3050_v19  ;;  %v8964_v53 = vld [vmem:[#allocation7_spill] sm:$0xff]  ;;  %v8965_v19 = vld [vmem:[#allocation6_spill] sm:$0xff] }
 0x599   : > { %v3156_v36 = vmax.f32 %v3124_v24, 0.0  ;;  %v3157_v18 = vmax.f32 %v3125_v3, 0.0  ;;  %v3158_v32 = vmax.f32 %v3126_v46, 0.0  ;;  %v3128_v41 = vadd.f32 %v3104_v7, %v3051_v50  ;;  %v8967_v24 = vld [vmem:[#allocation5_spill] sm:$0xff] }
 0x59a   : > { %v3185_v42 = vpack.c.bf16 %v3154_v21, %v3153_v1  ;;  %v3159_v43 = vmax.f32 %v3127_v63, 0.0  ;;  %v3053_v6 = vmul.f32 %v3031_v27, %v7846_v51  ;;  %v3129_v35 = vadd.f32 %v3108_v33, %v3052_v37  ;;  %v8966_v21 = vld [vmem:[#allocation11_spill] sm:$0xff] }
 0x59b   : > { %v3186_v25 = vpack.c.bf16 %v3156_v36, %v3155_v39  ;;  %v3187_v4 = vpack.c.bf16 %v3158_v32, %v3157_v18  ;;  %v3160_v14 = vmax.f32 %v3128_v41, 0.0  ;;  %v3054_v11 = vmul.f32 %v7840_v38, %v3031_v27  ;;  %v8969_v18 = vld [vmem:[#allocation8_spill] sm:$0xff] }
 0x59c   : > { %5881 = vmatprep.mubr.bf16.mxu0 %v3185_v42  ;;  %v3130_v60 = vadd.f32 %v3108_v33, %v3053_v6  ;;  %v3161_v12 = vmax.f32 %v3129_v35, 0.0  ;;  %v3055_v40 = vmul.f32 %v8964_v53, %v3031_v27  ;;  %v3056_v8 = vmul.f32 %v3031_v27, %v8965_v19  ;;  %v8968_v42 = vld [vmem:[#allocation9_spill] sm:$0xff] }
 0x59d   : > { %5882 = vmatmul.mubr.bf16.vlgmr.msra.gmra.mrb[20].mxu0 %v3186_v25  ;;  %v3188_v46 = vpack.c.bf16 %v3160_v14, %v3159_v43  ;;  %v3131_v7 = vadd.f32 %v3108_v33, %v3054_v11  ;;  %v3057_v50 = vmul.f32 %v3031_v27, %v8966_v21  ;;  %v3058_v51 = vmul.f32 %v8967_v24, %v3031_v27 }
 0x59e   : > { %6469 = vmatpush3.bf16.msra.mxu0 %v7170_v58  ;;  %5885 = vmatprep.mubr.bf16.mxu0 %v3187_v4  ;;  %v3162_v36 = vmax.f32 %v3130_v60, 0.0  ;;  %v3132_v39 = vadd.f32 %v3108_v33, %v3055_v40  ;;  %v3133_v38 = vadd.f32 %v3108_v33, %v3056_v8  ;;  %v3059_v37 = vmul.f32 %v8968_v42, %v3031_v27  ;;  %v8970_v4 = vld [vmem:[#allocation10_spill] sm:$0xff] }
 0x59f   : > { %6470 = vmatprep.subr.bf16.mxu0 %v8866_v29  ;;  %v3163_v3 = vmax.f32 %v3131_v7, 0.0  ;;  %v3134_v1 = vadd.f32 %v3108_v33, %v3057_v50  ;;  %v3135_v63 = vadd.f32 %v3108_v33, %v3058_v51  ;;  %v3060_v32 = vmul.f32 %v8100_v2, %v8969_v18  ;;  %v8971_v7 = vld [vmem:[#allocation15_spill] sm:$0xff] }
 0x5a0   : > { %v3189_v41 = vpack.c.bf16 %v3162_v36, %v3161_v12  ;;  %v3164_v43 = vmax.f32 %v3132_v39, 0.0  ;;  %v3165_v6 = vmax.f32 %v3133_v38, 0.0  ;;  %v3136_v35 = vadd.f32 %v3108_v33, %v3059_v37  ;;  %v8972_v36 = vld [vmem:[#allocation14_spill] sm:$0xff]  ;;  %v8973_v38 = vld [vmem:[#allocation13_spill] sm:$0xff]  ;;  %v8974_v37 = vld [vmem:[#allocation12_spill] sm:$0xff] }
 0x5a1   : > { %v3166_v25 = vmax.f32 %v3134_v1, 0.0  ;;  %v3167_v14 = vmax.f32 %v3135_v63, 0.0  ;;  %v3061_v11 = vmul.f32 %v8100_v2, %v8970_v4  ;;  %v3137_v60 = vadd.f32 %v8119_v62, %v3060_v32  ;;  %v8975_v32 = vld [vmem:[#allocation17_spill] sm:$0xff]  ;;  %v8976_v4 = vld [vmem:[#allocation16_spill] sm:$0xff] }
 0x5a2   : > { %6472 = vmatpush3.bf16.msra.mxu0 %v7232_v0  ;;  %v3190_v27 = vpack.c.bf16 %v3164_v43, %v3163_v3  ;;  %v3168_v53 = vmax.f32 %v3136_v35, 0.0  ;;  %v3062_v40 = vmul.f32 %v7878_v45, %v8100_v2  ;;  %v3063_v12 = vmul.f32 %v7884_v52, %v8100_v2 }
 0x5a3   : > { %6473 = vmatprep.subr.bf16.mxu0 %v8866_v29  ;;  %v3191_v33 = vpack.c.bf16 %v3166_v25, %v3165_v6  ;;  %v3138_v19 = vadd.f32 %v8119_v62, %v3061_v11  ;;  %v3169_v8 = vmax.f32 %v3137_v60, 0.0  ;;  %v3064_v21 = vmul.f32 %v8100_v2, %v8971_v7 }
 0x5a4   : > { %v3192_v50 = vpack.c.bf16 %v3168_v53, %v3167_v14  ;;  %v3139_v24 = vadd.f32 %v8119_v62, %v3062_v40  ;;  %v3140_v51 = vadd.f32 %v8119_v62, %v3063_v12  ;;  %v3065_v45 = vmul.f32 %v8100_v2, %v8972_v36  ;;  %v8977_v12 = vld [vmem:[#allocation19_spill] sm:$0xff] }
 0x5a5   : > { %5886 = vmatmul.mubr.bf16.gmra.mrb[24].mxu0 %v3188_v46  ;;  %v3170_v39 = vmax.f32 %v3138_v19, 0.0  ;;  %v3141_v52 = vadd.f32 %v8119_v62, %v3064_v21  ;;  %v3066_v42 = vmul.f32 %v8973_v38, %v8100_v2  ;;  %v3067_v3 = vmul.f32 %v8974_v37, %v8100_v2  ;;  %v8978_v21 = vld [vmem:[#allocation21_spill] sm:$0xff] }
 0x5a6   : > { %6475 = vmatpush3.bf16.msra.mxu0 %v7241_v16  ;;  %5889 = vmatprep.mubr.bf16.mxu0 %v3189_v41  ;;  %v3171_v1 = vmax.f32 %v3139_v24, 0.0  ;;  %v3172_v63 = vmax.f32 %v3140_v51, 0.0  ;;  %v3142_v18 = vadd.f32 %v8119_v62, %v3065_v45  ;;  %v3068_v43 = vmul.f32 %v8107_v9, %v8975_v32 }
 0x5a7   : > { %6476 = vmatprep.subr.bf16.mxu0 %v8866_v29  ;;  %v3193_v46 = vpack.c.bf16 %v3170_v39, %v3169_v8  ;;  %v3173_v6 = vmax.f32 %v3141_v52, 0.0  ;;  %v3143_v35 = vadd.f32 %v8119_v62, %v3066_v42  ;;  %v3144_v25 = vadd.f32 %v8119_v62, %v3067_v3  ;;  %v8980_v42 = vld [vmem:[#allocation18_spill] sm:$0xff] }
 0x5a8   : > { %v3194_v14 = vpack.c.bf16 %v3172_v63, %v3171_v1  ;;  %v3174_v2 = vmax.f32 %v3142_v18, 0.0  ;;  %v3069_v41 = vmul.f32 %v8107_v9, %v8976_v4  ;;  %v3145_v11 = vadd.f32 %v8122_v54, %v3068_v43 }
 0x5a9   : > { %v3175_v60 = vmax.f32 %v3143_v35, 0.0  ;;  %v3176_v53 = vmax.f32 %v3144_v25, 0.0  ;;  %v3070_v40 = vmul.f32 %v7921_v10, %v8107_v9  ;;  %v3071_v19 = vmul.f32 %v8977_v12, %v8107_v9  ;;  %v8979_v10 = vld [vmem:[#allocation23_spill] sm:$0xff] }
 0x5aa   : > { %6478 = vmatpush3.bf16.msra.mxu0 %v7329_v48  ;;  %v3195_v8 = vpack.c.bf16 %v3174_v2, %v3173_v6  ;;  %v3146_v62 = vadd.f32 %v8122_v54, %v3069_v41  ;;  %v3177_v7 = vmax.f32 %v3145_v11, 0.0  ;;  %v3072_v24 = vmul.f32 %v8107_v9, %v8978_v21 }
 0x5ab   : > { %6479 = vmatprep.subr.bf16.mxu0 %v8866_v29  ;;  %v3196_v51 = vpack.c.bf16 %v3176_v53, %v3175_v60  ;;  %v3147_v36 = vadd.f32 %v8122_v54, %v3070_v40  ;;  %v3148_v45 = vadd.f32 %v8122_v54, %v3071_v19  ;;  %v3073_v39 = vmul.f32 %v8107_v9, %v8979_v10 }
 0x5ac   : > { %v3178_v52 = vmax.f32 %v3146_v62, 0.0  ;;  %v3149_v38 = vadd.f32 %v8122_v54, %v3072_v24  ;;  %v3074_v37 = vmul.f32 %v8980_v42, %v8107_v9  ;;  %v3075_v3 = vmul.f32 %v7949_v28, %v8107_v9 }
 0x5ad   : > { %5890 = vmatmul.mubr.bf16.gmra.mrb[28].mxu0 %v3190_v27  ;;  %v3179_v1 = vmax.f32 %v3147_v36, 0.0  ;;  %v3180_v63 = vmax.f32 %v3148_v45, 0.0  ;;  %v3150_v18 = vadd.f32 %v8122_v54, %v3073_v39 }
 0x5ae   : > { %6481 = vmatpush3.bf16.msra.mxu0 %v7386_v49  ;;  %5893 = vmatprep.mubr.bf16.mxu0 %v3191_v33  ;;  %v3197_v32 = vpack.c.bf16 %v3178_v52, %v3177_v7  ;;  %v3181_v43 = vmax.f32 %v3149_v38, 0.0  ;;  %v3151_v6 = vadd.f32 %v8122_v54, %v3074_v37  ;;  %v3152_v35 = vadd.f32 %v8122_v54, %v3075_v3 }
 0x5af   : > { %6482 = vmatprep.subr.bf16.mxu0 %v8866_v29  ;;  %v3198_v25 = vpack.c.bf16 %v3180_v63, %v3179_v1  ;;  %v3182_v2 = vmax.f32 %v3150_v18, 0.0 }
 0x5b0   : > { %v3183_v4 = vmax.f32 %v3151_v6, 0.0  ;;  %v3184_v28 = vmax.f32 %v3152_v35, 0.0 }
 0x5b1   : > { %v3199_v9 = vpack.c.bf16 %v3182_v2, %v3181_v43 }
 0x5b2   : > { %6484 = vmatpush3.bf16.msra.mxu0 %v7445_v22  ;;  %v3200_v27 = vpack.c.bf16 %v3184_v28, %v3183_v4 }
 0x5b3   : > { %6485 = vmatprep.subr.bf16.mxu0 %v8866_v29 }
 0x5b5   : > { %5894 = vmatmul.mubr.bf16.gmra.mrb[32].mxu0 %v3192_v50 }
 0x5b6   : > { %6487 = vmatpush3.bf16.msra.mxu0 %v7486_v23  ;;  %5897 = vmatprep.mubr.bf16.mxu0 %v3193_v46 }
 0x5b7   : > { %6488 = vmatprep.subr.bf16.mxu0 %v8866_v29 }
 0x5ba   : > { %6490 = vmatpush3.bf16.msra.mxu0 %v7511_v26 }
 0x5bb   : > { %6491 = vmatprep.subr.bf16.mxu0 %v8866_v29 }
 0x5bd   : > { %5898 = vmatmul.mubr.bf16.gmra.mrb[36].mxu0 %v3194_v14 }
 0x5be   : > { %5901 = vmatprep.mubr.bf16.mxu0 %v3195_v8 }
 0x5c5   : > { %5902 = vmatmul.mubr.bf16.gmra.mrb[40].mxu0 %v3196_v51 }
 0x5c6   : > { %5905 = vmatprep.mubr.bf16.mxu0 %v3197_v32 }
 0x5cd   : > { %5906 = vmatmul.mubr.bf16.gmra.mrb[44].mxu0 %v3198_v25 }
 0x5ce   : > { %5909 = vmatprep.mubr.bf16.mxu0 %v3199_v9 }
 0x5d5   : > { %5910 = vmatmul.mubr.bf16.gmra.mrb[48].mxu0 %v3200_v27 }
 0x5d6   : > { %5945 = vmatprep.mubr.msk.f32.mxu0 %vm6800_vm14, %v8905_v55 }
 0x670   : > { %v8197_v54 = vpop.f32.mrb[20].mxu0 }
 0x671   : > { %v8199_v33 = vpop.f32.mrb[21].mxu0  ;;  %v3485_v60 = vmul.f32 %v8197_v54, %v8197_v54 }
 0x672   : > { %v8201_v50 = vpop.f32.mrb[22].mxu0  ;;  %v3483_v14 = vmul.f32 %v8199_v33, %v8199_v33 }
 0x673   : > { %v8203_v46 = vpop.f32.mrb[23].mxu0  ;;  %v3486_v12 = vmul.f32 %v8201_v50, %v8201_v50 }
 0x674   : > { %v3431_v41 = vadd.f32 %v8203_v46, %v8199_v33  ;;  %v3484_v11 = vmul.f32 %v8203_v46, %v8203_v46 }
 0x676   : > { %v3432_v53 = vadd.f32 %v8197_v54, %v3431_v41  ;;  %v3515_v40 = vadd.f32 %v3484_v11, %v3483_v14 }
 0x678   : > { %v3516_v19 = vadd.f32 %v3515_v40, %v3485_v60  ;;  %v8216_v8 = vpop.f32.mrb[24].mxu0  ;;  %v3433_v62 = vadd.f32 %v8201_v50, %v3432_v53 }
 0x679   : > { %v8219_v7 = vpop.f32.mrb[25].mxu0  ;;  %v3489_v38 = vmul.f32 %v8216_v8, %v8216_v8 }
 0x67a   : > { %v3434_v21 = vadd.f32 %v3433_v62, %v8219_v7  ;;  %v3487_v24 = vmul.f32 %v8219_v7, %v8219_v7  ;;  %v3517_v51 = vadd.f32 %v3516_v19, %v3486_v12  ;;  %v8224_v36 = vpop.f32.mrb[26].mxu0 }
 0x67b   : > { %v8226_v45 = vpop.f32.mrb[27].mxu0  ;;  %v3490_v3 = vmul.f32 %v8224_v36, %v8224_v36 }
 0x67c   : > { %v3518_v10 = vadd.f32 %v3517_v51, %v3487_v24  ;;  %v3435_v39 = vadd.f32 %v3434_v21, %v8226_v45  ;;  %v3488_v52 = vmul.f32 %v8226_v45, %v8226_v45 }
 0x67e   : > { %v3436_v42 = vadd.f32 %v8216_v8, %v3435_v39  ;;  %v3519_v37 = vadd.f32 %v3518_v10, %v3488_v52 }
 0x680   : > { %v3437_v1 = vadd.f32 %v8224_v36, %v3436_v42  ;;  %v3520_v63 = vadd.f32 %v3519_v37, %v3489_v38  ;;  %v8237_v18 = vpop.f32.mrb[28].mxu0 }
 0x681   : > { %v8239_v32 = vpop.f32.mrb[29].mxu0  ;;  %v3493_v28 = vmul.f32 %v8237_v18, %v8237_v18 }
 0x682   : > { %v3521_v43 = vadd.f32 %v3520_v63, %v3490_v3  ;;  %v8241_v6 = vpop.f32.mrb[30].mxu0  ;;  %v3491_v25 = vmul.f32 %v8239_v32, %v8239_v32  ;;  %v3438_v14 = vrot.slane %v3437_v1, 4 }
 0x683   : > { %v8243_v35 = vpop.f32.mrb[31].mxu0  ;;  %v3494_v53 = vmul.f32 %v8241_v6, %v8241_v6 }
 0x684   : > { %v3444_v2 = vadd.f32 %v8243_v35, %v8239_v32  ;;  %v3492_v4 = vmul.f32 %v8243_v35, %v8243_v35  ;;  %v3439_v21 = vadd.f32 %v3438_v14, %v3437_v1  ;;  %v3522_v24 = vrot.slane %v3521_v43, 4 }
 0x686   : > { %v3445_v9 = vadd.f32 %v8237_v18, %v3444_v2  ;;  %v3528_v27 = vadd.f32 %v3492_v4, %v3491_v25  ;;  %v3440_v37 = vrot.slane %v3439_v21, 2  ;;  %v3523_v3 = vadd.f32 %v3522_v24, %v3521_v43 }
 0x688   : > { %v3529_v41 = vadd.f32 %v3528_v27, %v3493_v28  ;;  %v8254_v11 = vpop.f32.mrb[32].mxu0  ;;  %v3446_v60 = vadd.f32 %v8241_v6, %v3445_v9 }
 0x689   : > { %8981 = vst [vmem:[#allocation20_spill] sm:$0xff] %v8254_v11  ;;  %v8259_v40 = vpop.f32.mrb[33].mxu0  ;;  %v3497_v63 = vmul.f32 %v8254_v11, %v8254_v11 }
 0x68a   : > { %v3447_v12 = vadd.f32 %v3446_v60, %v8259_v40  ;;  %v3495_v19 = vmul.f32 %v8259_v40, %v8259_v40  ;;  %v8264_v62 = vpop.f32.mrb[34].mxu0  ;;  %v3530_v51 = vadd.f32 %v3529_v41, %v3494_v53  ;;  %v3441_v41 = vadd.f32 %v3440_v37, %v3439_v21 }
 0x68b   : > { %8982 = vst [vmem:[#allocation22_spill] sm:$0xff] %v8264_v62  ;;  %v8266_v10 = vpop.f32.mrb[35].mxu0  ;;  %v3498_v4 = vmul.f32 %v8264_v62, %v8264_v62  ;;  %v3524_v60 = vrot.slane %v3523_v3, 2 }
 0x68c   : > { %8983 = vst [vmem:[#allocation26_spill] sm:$0xff] %v8266_v10  ;;  %v3448_v39 = vadd.f32 %v3447_v12, %v8266_v10  ;;  %v3496_v52 = vmul.f32 %v8266_v10, %v8266_v10  ;;  %v3531_v38 = vadd.f32 %v3530_v51, %v3495_v19  ;;  %v3442_v37 = vrot.slane %v3441_v41, 1 }
 0x68e   : > { %v3449_v42 = vadd.f32 %v8254_v11, %v3448_v39  ;;  %v3532_v25 = vadd.f32 %v3531_v38, %v3496_v52 }
 0x690   : > { %v3450_v1 = vadd.f32 %v8264_v62, %v3449_v42  ;;  %v8275_v2 = vpop.f32.mrb[36].mxu0  ;;  %v3533_v28 = vadd.f32 %v3532_v25, %v3497_v63  ;;  %v3525_v63 = vadd.f32 %v3524_v60, %v3523_v3 }
 0x691   : > { %v8279_v9 = vpop.f32.mrb[37].mxu0  ;;  %v3501_v38 = vmul.f32 %v8275_v2, %v8275_v2 }
 0x692   : > { %8984 = vst [vmem:[#allocation28_spill] sm:$0xff] %v8279_v9  ;;  %v3451_v27 = vrot.slane %v3450_v1, 4  ;;  %v8281_v14 = vpop.f32.mrb[38].mxu0  ;;  %v3534_v43 = vadd.f32 %v3533_v28, %v3498_v4  ;;  %v3499_v19 = vmul.f32 %v8279_v9, %v8279_v9 }
 0x693   : > { %v8283_v53 = vpop.f32.mrb[39].mxu0  ;;  %v3502_v4 = vmul.f32 %v8281_v14, %v8281_v14 }
 0x694   : > { %8985 = vst [vmem:[#allocation24_spill] sm:$0xff] %v8283_v53  ;;  %v3452_v12 = vadd.f32 %v3451_v27, %v3450_v1  ;;  %v3457_v24 = vadd.f32 %v8283_v53, %v8279_v9  ;;  %v3500_v51 = vmul.f32 %v8283_v53, %v8283_v53  ;;  %v3535_v39 = vrot.slane %v3534_v43, 4 }
 0x696   : > { %v3453_v52 = vrot.slane %v3452_v12, 2  ;;  %v3458_v21 = vadd.f32 %v8275_v2, %v3457_v24  ;;  %v3541_v42 = vadd.f32 %v3500_v51, %v3499_v19  ;;  %v3536_v25 = vadd.f32 %v3535_v39, %v3534_v43 }
 0x697   : > { %v3443_v43 = vadd.f32 %v3442_v37, %v3441_v41 }
 0x698   : > { %v3454_v1 = vadd.f32 %v3453_v52, %v3452_v12  ;;  %v3542_v28 = vadd.f32 %v3541_v42, %v3501_v38  ;;  %v8296_v27 = vpop.f32.mrb[40].mxu0  ;;  %v3459_v53 = vadd.f32 %v8281_v14, %v3458_v21  ;;  %v3537_v9 = vrot.slane %v3536_v25, 2 }
 0x699   : > { %8986 = vst [vmem:[#allocation27_spill] sm:$0xff] %v8296_v27  ;;  %v8299_v62 = vpop.f32.mrb[41].mxu0  ;;  %v3526_v12 = vrot.slane %v3525_v63, 1 }
 0x69a   : > { %8987 = vst [vmem:[#allocation31_spill] sm:$0xff] %v8299_v62  ;;  %v3455_v11 = vrot.slane %v3454_v1, 1  ;;  %v3460_v10 = vadd.f32 %v3459_v53, %v8299_v62  ;;  %v3503_v19 = vmul.f32 %v8299_v62, %v8299_v62  ;;  %v3543_v3 = vadd.f32 %v3542_v28, %v3502_v4  ;;  %v8304_v60 = vpop.f32.mrb[42].mxu0 }
 0x69b   : > { %8988 = vst [vmem:[#allocation33_spill] sm:$0xff] %v8304_v60  ;;  %v3538_v24 = vadd.f32 %v3537_v9, %v3536_v25  ;;  %v8306_v51 = vpop.f32.mrb[43].mxu0  ;;  %v3505_v4 = vmul.f32 %v8296_v27, %v8296_v27  ;;  %v3527_v37 = vadd.f32 %v3526_v12, %v3525_v63 }
 0x69c   : > { %8989 = vst [vmem:[#allocation30_spill] sm:$0xff] %v8306_v51  ;;  %v3456_v39 = vadd.f32 %v3455_v11, %v3454_v1  ;;  %v3544_v52 = vadd.f32 %v3543_v3, %v3503_v19  ;;  %v3461_v38 = vadd.f32 %v3460_v10, %v8306_v51  ;;  %v3504_v21 = vmul.f32 %v8306_v51, %v8306_v51 }
 0x69d   : > { %v3539_v42 = vrot.slane %v3538_v24, 1  ;;  %v3506_v11 = vmul.f32 %v8304_v60, %v8304_v60 }
 0x69e   : > { %v3571_v53 = vsel %vm1059_vm4, %v3456_v39, %v3443_v43  ;;  %v3462_v28 = vadd.f32 %v8296_v27, %v3461_v38  ;;  %v3545_v41 = vadd.f32 %v3544_v52, %v3504_v21 }
 0x69f   : > { %v3540_v9 = vadd.f32 %v3539_v42, %v3538_v24 }
 0x6a0   : > { %v3463_v25 = vadd.f32 %v8304_v60, %v3462_v28  ;;  %v3546_v10 = vadd.f32 %v3545_v41, %v3505_v4  ;;  %v8318_v1 = vpop.f32.mrb[44].mxu0 }
 0x6a1   : > { %v3579_v19 = vsel %vm1070_vm1, %v3540_v9, %v3527_v37  ;;  %v8321_v3 = vpop.f32.mrb[45].mxu0  ;;  %v3509_v42 = vmul.f32 %v8318_v1, %v8318_v1 }
 0x6a2   : > { %8990 = vst [vmem:[#allocation32_spill] sm:$0xff] %v8321_v3  ;;  %v3464_v43 = vrot.slane %v3463_v25, 4  ;;  %v3547_v39 = vadd.f32 %v3546_v10, %v3506_v11  ;;  %v8323_v51 = vpop.f32.mrb[46].mxu0  ;;  %v3507_v63 = vmul.f32 %v8321_v3, %v8321_v3 }
 0x6a3   : > { %8991 = vst [vmem:[#allocation37_spill] sm:$0xff] %v8323_v51  ;;  %v8327_v12 = vpop.f32.mrb[47].mxu0 }
 0x6a4   : > { %8992 = vst [vmem:[#allocation35_spill] sm:$0xff] %v8327_v12  ;;  %v3465_v24 = vadd.f32 %v3464_v43, %v3463_v25  ;;  %v3548_v52 = vrot.slane %v3547_v39, 4  ;;  %v3470_v38 = vadd.f32 %v8327_v12, %v8321_v3  ;;  %v3508_v21 = vmul.f32 %v8327_v12, %v8327_v12 }
 0x6a5   : > { %v3510_v43 = vmul.f32 %v8323_v51, %v8323_v51 }
 0x6a6   : > { %v3466_v4 = vrot.slane %v3465_v24, 2  ;;  %v3549_v28 = vadd.f32 %v3548_v52, %v3547_v39  ;;  %v3471_v41 = vadd.f32 %v8318_v1, %v3470_v38  ;;  %v3554_v37 = vadd.f32 %v3508_v21, %v3507_v63 }
 0x6a8   : > { %v3467_v9 = vadd.f32 %v3466_v4, %v3465_v24  ;;  %v3550_v11 = vrot.slane %v3549_v28, 2  ;;  %v3555_v10 = vadd.f32 %v3554_v37, %v3509_v42  ;;  %v8336_v60 = vpop.f32.mrb[48].mxu0  ;;  %v3472_v25 = vadd.f32 %v8323_v51, %v3471_v41 }
 0x6a9   : > { %8993 = vst [vmem:[#allocation25_spill] sm:$0xff] %v8336_v60  ;;  %v8341_v3 = vpop.f32.mrb[49].mxu0 }
 0x6aa   : > { %8994 = vst [vmem:[#allocation29_spill] sm:$0xff] %v8341_v3  ;;  %v3468_v12 = vrot.slane %v3467_v9, 1  ;;  %v3551_v27 = vadd.f32 %v3550_v11, %v3549_v28  ;;  %v3473_v62 = vadd.f32 %v3472_v25, %v8341_v3  ;;  %v3511_v39 = vmul.f32 %v8341_v3, %v8341_v3  ;;  %v8346_v63 = vpop.f32.mrb[50].mxu0 }
 0x6ab   : > { %v3556_v24 = vadd.f32 %v3555_v10, %v3510_v43  ;;  %v8348_v52 = vpop.f32.mrb[51].mxu0  ;;  %v3513_v25 = vmul.f32 %v8336_v60, %v8336_v60 }
 0x6ac   : > { %8995 = vst [vmem:[#allocation34_spill] sm:$0xff] %v8348_v52  ;;  %v3469_v38 = vadd.f32 %v3468_v12, %v3467_v9  ;;  %v3552_v21 = vrot.slane %v3551_v27, 1  ;;  %v3474_v42 = vadd.f32 %v3473_v62, %v8348_v52  ;;  %v3512_v4 = vmul.f32 %v8348_v52, %v8348_v52 }
 0x6ad   : > { %v3557_v41 = vadd.f32 %v3556_v24, %v3511_v39  ;;  %v3514_v62 = vmul.f32 %v8346_v63, %v8346_v63 }
 0x6ae   : > { %v3553_v37 = vadd.f32 %v3552_v21, %v3551_v27  ;;  %v3572_v28 = vsel %vm1061_vm15, %v3469_v38, %v3571_v53  ;;  %v3475_v11 = vadd.f32 %v8336_v60, %v3474_v42 }
 0x6af   : > { %v3558_v3 = vadd.f32 %v3557_v41, %v3512_v4 }
 0x6b0   : > { %v3580_v10 = vsel %vm1072_vm2, %v3553_v37, %v3579_v19  ;;  %v3476_v12 = vadd.f32 %v8346_v63, %v3475_v11 }
 0x6b1   : > { %v3559_v9 = vadd.f32 %v3558_v3, %v3513_v25 }
 0x6b2   : > { %v3477_v43 = vrot.slane %v3476_v12, 4 }
 0x6b3   : > { %v3560_v52 = vadd.f32 %v3559_v9, %v3514_v62  ;;  %v4896_v9 = vld [vmem:[%s8704_s3 + $0x2] ss:$0 sm:$0xff] }
 0x6b4   : > { %v3478_v39 = vadd.f32 %v3477_v43, %v3476_v12 }
 0x6b5   : > { %v3561_v27 = vrot.slane %v3560_v52, 4 }
 0x6b6   : > { %v3479_v24 = vrot.slane %v3478_v39, 2 }
 0x6b7   : > { %v3562_v53 = vadd.f32 %v3561_v27, %v3560_v52 }
 0x6b8   : > { %v3480_v38 = vadd.f32 %v3479_v24, %v3478_v39 }
 0x6b9   : > { %v3563_v21 = vrot.slane %v3562_v53, 2 }
 0x6ba   : > { %v3481_v42 = vrot.slane %v3480_v38, 1 }
 0x6bb   : > { %v3564_v51 = vadd.f32 %v3563_v21, %v3562_v53  ;;  %v4897_v53 = vld [vmem:[%s8705_s4 + $0x2] ss:$0 sm:$0xff]  ;;  %v9007_v21 = vld [vmem:[#allocation48_spill] sm:$0xff] }
 0x6bc   : > { %v3482_v60 = vadd.f32 %v3481_v42, %v3480_v38 }
 0x6bd   : > { %v3565_v4 = vrot.slane %v3564_v51, 1 }
 0x6be   : > { %v3573_v19 = vsel %vm1063_vm3, %v3482_v60, %v3572_v28 }
 0x6bf   : > { %v3566_v41 = vadd.f32 %v3565_v4, %v3564_v51 }
 0x6c1   : > { %v3581_v37 = vsel %vm1074_vm5, %v3566_v41, %v3580_v10 }
 0x6c2   : > { %v3583_v11 = vsel %vm1077_vm0, %v3573_v19, %v3581_v37 }
 0x6c3   : > { %v8364_v3 = vand.u32 4294901760, %v3583_v11 }
 0x6c5   : > { %v3666_v25 = vsub.f32 %v3583_v11, %v8364_v3 }
 0x6c7   : > { %v3667_v12 = vand.u32 4294901760, %v3666_v25 }
 0x6c9   : > { %v3668_v62 = vsub.f32 %v3666_v25, %v3667_v12 }
 0x6cb   : > { %v3669_v52 = vand.u32 4294901760, %v3668_v62 }
 0x6cd   : > { %5946 = vmatmul.mubr.f32.vlgmr.msra.gmra.mrb[18].mxu0 %v3669_v52 }
 0x6ce   : > { %6493 = vmatpush3.bf16.msra.mxu0 %v8954_v59  ;;  %5980 = vmatprep.mubr.msk.f32.mxu0 %vm6800_vm14, %v8905_v55  ;;  %v9006_v59 = vld [vmem:[#allocation47_spill] sm:$0xff] }
 0x6cf   : > { %6494 = vmatprep.subr.bf16.mxu0 %v8866_v29 }
 0x6d2   : > { %6496 = vmatpush3.bf16.msra.mxu0 %v8955_v30 }
 0x6d3   : > { %6497 = vmatprep.subr.bf16.mxu0 %v8866_v29 }
 0x6d6   : > { %6499 = vmatpush3.bf16.msra.mxu0 %v8956_v15 }
 0x6d7   : > { %6500 = vmatprep.subr.bf16.mxu0 %v8866_v29 }
 0x6da   : > { %6502 = vmatpush3.bf16.msra.mxu0 %v7496_v20  ;;  %v8997_v20 = vld [vmem:[#allocation38_spill] sm:$0xff] }
 0x6db   : > { %6503 = vmatprep.subr.bf16.mxu0 %v8866_v29 }
 0x6de   : > { %6505 = vmatpush3.bf16.msra.mxu0 %v7509_v47  ;;  %v9002_v47 = vld [vmem:[#allocation43_spill] sm:$0xff] }
 0x6df   : > { %6506 = vmatprep.subr.bf16.mxu0 %v8866_v29 }
 0x6e2   : > { %6508 = vmatpush3.bf16.msra.mxu0 %v7515_v57  ;;  %v9003_v57 = vld [vmem:[#allocation44_spill] sm:$0xff] }
 0x6e3   : > { %6509 = vmatprep.subr.bf16.mxu0 %v8866_v29 }
 0x6e6   : > { %6511 = vmatpush3.bf16.msra.mxu0 %v7529_v44  ;;  %v9004_v44 = vld [vmem:[#allocation45_spill] sm:$0xff] }
 0x6e7   : > { %6512 = vmatprep.subr.bf16.mxu0 %v8866_v29 }
 0x6ea   : > { %6514 = vmatpush3.bf16.msra.mxu0 %v7573_v17  ;;  %v9005_v17 = vld [vmem:[#allocation46_spill] sm:$0xff] }
 0x6eb   : > { %6515 = vmatprep.subr.bf16.mxu0 %v8866_v29 }
 0x6ed   : > { %5981 = vmatmul.mubr.f32.vlgmr.msra.gmra.mrb[18].mxu0 %v8364_v3 }
 0x6ee   : > { %6517 = vmatpush3.bf16.msra.mxu0 %v7183_v5  ;;  %6015 = vmatprep.mubr.msk.f32.mxu0 %vm6800_vm14, %v8905_v55  ;;  %v8996_v5 = vld [vmem:[#allocation36_spill] sm:$0xff] }
 0x6ef   : > { %6518 = vmatprep.subr.bf16.mxu0 %v8866_v29 }
 0x6f2   : > { %6520 = vmatpush3.bf16.msra.mxu0 %v7257_v34  ;;  %v8998_v34 = vld [vmem:[#allocation39_spill] sm:$0xff] }
 0x6f3   : > { %6521 = vmatprep.subr.bf16.mxu0 %v8866_v29 }
 0x6f6   : > { %6523 = vmatpush3.bf16.msra.mxu0 %v7280_v56  ;;  %v8999_v56 = vld [vmem:[#allocation40_spill] sm:$0xff] }
 0x6f7   : > { %6524 = vmatprep.subr.bf16.mxu0 %v8866_v29 }
 0x6fa   : > { %6526 = vmatpush3.bf16.msra.mxu0 %v7358_v61  ;;  %v9000_v61 = vld [vmem:[#allocation41_spill] sm:$0xff] }
 0x6fb   : > { %6527 = vmatprep.subr.bf16.mxu0 %v8866_v29 }
 0x6fe   : > { %6529 = vmatpush3.bf16.msra.mxu0 %v7413_v31  ;;  %v9001_v31 = vld [vmem:[#allocation42_spill] sm:$0xff] }
 0x6ff   : > { %6530 = vmatprep.subr.bf16.mxu0 %v8866_v29 }
 0x702   : > { %6532 = vmatpush3.bf16.msra.mxu0 %v8996_v5 }
 0x703   : > { %6533 = vmatprep.subr.bf16.mxu0 %v8866_v29 }
 0x706   : > { %6535 = vmatpush3.bf16.msra.mxu0 %v8997_v20 }
 0x707   : > { %6536 = vmatprep.subr.bf16.mxu0 %v8866_v29 }
 0x70a   : > { %6538 = vmatpush3.bf16.msra.mxu0 %v8998_v34 }
 0x70b   : > { %6539 = vmatprep.subr.bf16.mxu0 %v8866_v29 }
 0x70d   : > { %6016 = vmatmul.mubr.f32.vlgmr.msra.gmra.mrb[18].mxu0 %v3666_v25 }
 0x70e   : > { %6541 = vmatpush3.bf16.msra.mxu0 %v7170_v58  ;;  %6050 = vmatprep.mubr.msk.f32.mxu0 %vm6800_vm14, %v8905_v55 }
 0x70f   : > { %6542 = vmatprep.subr.bf16.mxu0 %v8866_v29 }
 0x712   : > { %6544 = vmatpush3.bf16.msra.mxu0 %v7232_v0 }
 0x713   : > { %6545 = vmatprep.subr.bf16.mxu0 %v8866_v29 }
 0x716   : > { %6547 = vmatpush3.bf16.msra.mxu0 %v7241_v16 }
 0x717   : > { %6548 = vmatprep.subr.bf16.mxu0 %v8866_v29 }
 0x71a   : > { %6550 = vmatpush3.bf16.msra.mxu0 %v7329_v48 }
 0x71b   : > { %6551 = vmatprep.subr.bf16.mxu0 %v8866_v29 }
 0x71e   : > { %6553 = vmatpush3.bf16.msra.mxu0 %v7386_v49 }
 0x71f   : > { %6554 = vmatprep.subr.bf16.mxu0 %v8866_v29 }
 0x722   : > { %6556 = vmatpush3.bf16.msra.mxu0 %v7445_v22 }
 0x723   : > { %6557 = vmatprep.subr.bf16.mxu0 %v8866_v29 }
 0x726   : > { %6559 = vmatpush3.bf16.msra.mxu0 %v7486_v23 }
 0x727   : > { %6560 = vmatprep.subr.bf16.mxu0 %v8866_v29 }
 0x72a   : > { %6562 = vmatpush3.bf16.msra.mxu0 %v7511_v26 }
 0x72b   : > { %6563 = vmatprep.subr.bf16.mxu0 %v8866_v29 }
 0x72d   : > { %6051 = vmatmul.mubr.f32.vlgmr.msra.gmra.mrb[18].mxu0 %v3667_v12 }
 0x72e   : > { %6565 = vmatpush3.bf16.msra.mxu0 %v8999_v56  ;;  %6085 = vmatprep.mubr.msk.f32.mxu0 %vm6800_vm14, %v8905_v55 }
 0x72f   : > { %6566 = vmatprep.subr.bf16.mxu0 %v8866_v29 }
 0x732   : > { %6568 = vmatpush3.bf16.msra.mxu0 %v9000_v61 }
 0x733   : > { %6569 = vmatprep.subr.bf16.mxu0 %v8866_v29 }
 0x736   : > { %6571 = vmatpush3.bf16.msra.mxu0 %v9001_v31 }
 0x737   : > { %6572 = vmatprep.subr.bf16.mxu0 %v8866_v29 }
 0x73a   : > { %6574 = vmatpush3.bf16.msra.mxu0 %v9002_v47 }
 0x73b   : > { %6575 = vmatprep.subr.bf16.mxu0 %v8866_v29 }
 0x73e   : > { %6577 = vmatpush3.bf16.msra.mxu0 %v9003_v57 }
 0x73f   : > { %6578 = vmatprep.subr.bf16.mxu0 %v8866_v29 }
 0x742   : > { %6580 = vmatpush3.bf16.msra.mxu0 %v9004_v44 }
 0x743   : > { %6581 = vmatprep.subr.bf16.mxu0 %v8866_v29 }
 0x746   : > { %6583 = vmatpush3.bf16.msra.mxu0 %v9005_v17 }
 0x747   : > { %6584 = vmatprep.subr.bf16.mxu0 %v8866_v29 }
 0x74a   : > { %6586 = vmatpush3.bf16.msra.mxu0 %v9006_v59 }
 0x74b   : > { %6587 = vmatprep.subr.bf16.mxu0 %v8866_v29 }
 0x74d   : > { %6086 = vmatmul.mubr.f32.vlgmr.msra.gmra.mrb[18].mxu0 %v8364_v3 }
 0x74e   : > { %6589 = vmatpush3.bf16.msra.mxu0 %v7170_v58  ;;  %6120 = vmatprep.mubr.msk.f32.mxu0 %vm6800_vm14, %v8905_v55  ;;  %v6719_v58 = vld [vmem:[%s8706_s5] sm:$0xff]  }
 0x74f   : > { %6590 = vmatprep.subr.bf16.mxu0 %v8866_v29  ;;  %6123 = vmatprep.subr.bf16.mxu1 %v6719_v58 }
 0x750   : > { %6124 = vmatpush3.bf16.msra.mxu1 %v6719_v58 }
 0x752   : > { %6592 = vmatpush3.bf16.msra.mxu0 %v7232_v0  ;;  %v6721_v0 = vld [vmem:[%s8706_s5 + $0x10] sm:$0xff]  }
 0x753   : > { %6593 = vmatprep.subr.bf16.mxu0 %v8866_v29 }
 0x756   : > { %6595 = vmatpush3.bf16.msra.mxu0 %v7241_v16  ;;  %v6722_v16 = vld [vmem:[%s8706_s5 + $0x18] sm:$0xff]  }
 0x757   : > { %6596 = vmatprep.subr.bf16.mxu0 %v8866_v29 }
 0x75a   : > { %6598 = vmatpush3.bf16.msra.mxu0 %v7329_v48  ;;  %v6723_v48 = vld [vmem:[%s8706_s5 + $0x20] sm:$0xff]  }
 0x75b   : > { %6599 = vmatprep.subr.bf16.mxu0 %v8866_v29 }
 0x75e   : > { %6601 = vmatpush3.bf16.msra.mxu0 %v7386_v49  ;;  %v6725_v49 = vld [vmem:[%s8706_s5 + $0x30] sm:$0xff]  }
 0x75f   : > { %6602 = vmatprep.subr.bf16.mxu0 %v8866_v29 }
 0x762   : > { %6604 = vmatpush3.bf16.msra.mxu0 %v7445_v22  ;;  %v6720_v22 = vld [vmem:[%s8706_s5 + $0x8] sm:$0xff]  }
 0x763   : > { %6605 = vmatprep.subr.bf16.mxu0 %v8866_v29  ;;  %6125 = vmatprep.subr.bf16.mxu1 %v6720_v22 }
 0x764   : > { %6126 = vmatpush3.bf16.msra.mxu1 %v6720_v22 }
 0x765   : > { %6127 = vmatprep.subr.bf16.mxu1 %v6721_v0 }
 0x766   : > { %6607 = vmatpush3.bf16.msra.mxu0 %v7486_v23  ;;  %v6726_v23 = vld [vmem:[%s8706_s5 + $0x38] sm:$0xff]  }
 0x767   : > { %6608 = vmatprep.subr.bf16.mxu0 %v8866_v29  ;;  %v6724_v29 = vld [vmem:[%s8706_s5 + $0x28] sm:$0xff]  }
 0x768   : > { %6128 = vmatpush3.bf16.msra.mxu1 %v6721_v0 }
 0x769   : > { %6129 = vmatprep.subr.bf16.mxu1 %v6722_v16 }
 0x76a   : > { %6610 = vmatpush3.bf16.msra.mxu0 %v7511_v26 }
 0x76c   : > { %6130 = vmatpush3.bf16.msra.mxu1 %v6722_v16 }
 0x76d   : > { %6121 = vmatmul.mubr.f32.vlgmr.msra.gmra.mrb[18].mxu0 %v8364_v3  ;;  %6131 = vmatprep.subr.bf16.mxu1 %v6723_v48 }
 0x770   : > { %6132 = vmatpush3.bf16.msra.mxu1 %v6723_v48 }
 0x771   : > { %6133 = vmatprep.subr.bf16.mxu1 %v6724_v29 }
 0x774   : > { %6134 = vmatpush3.bf16.msra.mxu1 %v6724_v29 }
 0x775   : > { %6135 = vmatprep.subr.bf16.mxu1 %v6725_v49 }
 0x778   : > { %6136 = vmatpush3.bf16.msra.mxu1 %v6725_v49 }
 0x779   : > { %6137 = vmatprep.subr.bf16.mxu1 %v6726_v23 }
 0x77c   : > { %6138 = vmatpush3.bf16.msra.mxu1 %v6726_v23 }
 0x840   : > { %v4221_v26 = vpop.f32.mrb[18].mxu0 }
 0x841   : > { %v4225_v55 = vmul.f32 0.00390625, %v4221_v26  ;;  %v6122_v30 = vpop.f32.mrb[19].mxu0 }
 0x843   : > { %v4226_v15 = vmul.f32 %v4225_v55, %v4225_v55 }
 0x845   : > { %v4228_v60 = vrot.slane %v4226_v15, 4 }
 0x847   : > { %v4230_v51 = vsub.f32 %v4225_v55, %v4228_v60 }
 0x849   : > { %v4231_v28 = vmax.f32 %v4230_v51, 0.0 }
 0x84b   : > { %v4232_v10 = vadd.f32 1e-05, %v4231_v28 }
 0x84d   : > { %6731 = vrsqrt.f32 %v4232_v10 }
 0x857   : > { %v6732_v43 = vpop.eup %6731 }
 0x858   : > { %v4240_v39 = vmul.f32 %v6732_v43, %v4896_v9 }
 0x85a   : > { %v4242_v27 = vrot.slane %v4240_v39, 4  ;;  %v4252_v24 = vcombine.high %v4240_v39, %v4240_v39 }
 0x85c   : > { %v4244_v38 = vmul.f32 %v4242_v27, %v4225_v55  ;;  %v4259_v42 = vrot.slane %v4252_v24, %v9007_v21 }
 0x85e   : > { %v4251_v4 = vsub.f32 %v4897_v53, %v4244_v38  ;;  %v4260_v19 = vcombine.high %v4259_v42, %v4259_v42  ;;  %v4267_v41 = vrot.slane %v4259_v42, %v9007_v21 }
 0x860   : > { %v4274_v37 = vrot.slane %v4260_v19, %v9007_v21  ;;  %v4275_v11 = vcombine.high %v4267_v41, %v4267_v41  ;;  %v4280_v3 = vrot.slane %v4267_v41, %v8963_v13  ;;  %v4336_v25 = vrot.slane %v4251_v4, %v9007_v21  ;;  %v9008_v19 = vld [vmem:[#allocation26_spill] sm:$0xff] }
 0x862   : > { %v4276_v12 = vcombine.high %v4274_v37, %v4274_v37  ;;  %v4284_v62 = vrot.slane %v4274_v37, %v8963_v13  ;;  %v8496_v52 = vrot.slane %v4275_v11, %v8963_v13  ;;  %v4337_v5 = vcombine.high %v4336_v25, %v4336_v25  ;;  %v9009_v37 = vld [vmem:[#allocation20_spill] sm:$0xff] }
 0x863   : > { %v4344_v20 = vrot.slane %v4336_v25, %v9007_v21  ;;  %v4297_v34 = vmul.f32 %v4280_v3, %v8199_v33  ;;  %v4298_v56 = vmul.f32 %v4280_v3, %v8203_v46  ;;  %v4299_v61 = vmul.f32 %v8197_v54, %v4280_v3 }
 0x864   : > { %v8503_v31 = vrot.slane %v4276_v12, %v8963_v13  ;;  %v4351_v47 = vrot.slane %v4337_v5, %v9007_v21  ;;  %v4300_v57 = vmul.f32 %v8201_v50, %v4280_v3  ;;  %v4301_v44 = vmul.f32 %v4280_v3, %v8219_v7  ;;  %v9010_v12 = vld [vmem:[#allocation22_spill] sm:$0xff] }
 0x865   : > { %v4352_v17 = vcombine.high %v4344_v20, %v4344_v20  ;;  %v4357_v59 = vrot.slane %v4344_v20, %v8963_v13  ;;  %v4302_v58 = vmul.f32 %v4280_v3, %v8226_v45  ;;  %v4303_v33 = vmul.f32 %v8216_v8, %v4280_v3 }
 0x866   : > { %v4353_v22 = vcombine.high %v4351_v47, %v4351_v47  ;;  %v4361_v46 = vrot.slane %v4351_v47, %v8963_v13  ;;  %v4304_v54 = vmul.f32 %v8224_v36, %v4280_v3  ;;  %v4305_v0 = vmul.f32 %v4284_v62, %v8239_v32 }
 0x867   : > { %v8515_v16 = vrot.slane %v4352_v17, %v8963_v13  ;;  %v4374_v50 = vadd.f32 %v4357_v59, %v4297_v34  ;;  %v4375_v48 = vadd.f32 %v4357_v59, %v4298_v56  ;;  %v4376_v7 = vadd.f32 %v4357_v59, %v4299_v61  ;;  %v9011_v56 = vld [vmem:[#allocation28_spill] sm:$0xff] }
 0x868   : > { %v8518_v29 = vrot.slane %v4353_v22, %v8963_v13  ;;  %v4377_v49 = vadd.f32 %v4357_v59, %v4300_v57  ;;  %v4378_v45 = vadd.f32 %v4357_v59, %v4301_v44  ;;  %v4379_v23 = vadd.f32 %v4357_v59, %v4302_v58 }
 0x869   : > { %v4406_v8 = vmax.f32 %v4374_v50, 0.0  ;;  %v4407_v26 = vmax.f32 %v4375_v48, 0.0  ;;  %v4408_v55 = vmax.f32 %v4376_v7, 0.0  ;;  %v4380_v30 = vadd.f32 %v4357_v59, %v4303_v33 }
 0x86a   : > { %v4409_v15 = vmax.f32 %v4377_v49, 0.0  ;;  %v4410_v36 = vmax.f32 %v4378_v45, 0.0  ;;  %v4411_v60 = vmax.f32 %v4379_v23, 0.0  ;;  %v4381_v32 = vadd.f32 %v4357_v59, %v4304_v54  ;;  %v9012_v59 = vld [vmem:[#allocation24_spill] sm:$0xff] }
 0x86b   : > { %v4438_v51 = vpack.c.bf16 %v4407_v26, %v4406_v8  ;;  %v4412_v28 = vmax.f32 %v4380_v30, 0.0  ;;  %v4306_v10 = vmul.f32 %v4284_v62, %v8243_v35  ;;  %v4382_v9 = vadd.f32 %v4361_v46, %v4305_v0  ;;  %v9014_v26 = vld [vmem:[#allocation30_spill] sm:$0xff] }
 0x86c   : > { %v4439_v43 = vpack.c.bf16 %v4409_v15, %v4408_v55  ;;  %v4440_v39 = vpack.c.bf16 %v4411_v60, %v4410_v36  ;;  %v4413_v13 = vmax.f32 %v4381_v32, 0.0  ;;  %v4307_v27 = vmul.f32 %v8237_v18, %v4284_v62  ;;  %v9016_v36 = vld [vmem:[#allocation33_spill] sm:$0xff] }
 0x86d   : > { %6139 = vmatprep.mubr.bf16.mxu1 %v4438_v51  ;;  %v4383_v24 = vadd.f32 %v4361_v46, %v4306_v10  ;;  %v4414_v53 = vmax.f32 %v4382_v9, 0.0  ;;  %v4308_v38 = vmul.f32 %v8241_v6, %v4284_v62  ;;  %v4309_v21 = vmul.f32 %v4284_v62, %v8259_v40  ;;  %v9017_v10 = vld [vmem:[#allocation32_spill] sm:$0xff] }
 0x86e   : > { %6140 = vmatmul.mubr.bf16.vlgmr.msra.gmra.mrb[68].mxu1 %v4439_v43  ;;  %v4441_v42 = vpack.c.bf16 %v4413_v13, %v4412_v28  ;;  %v4384_v4 = vadd.f32 %v4361_v46, %v4307_v27  ;;  %v4310_v41 = vmul.f32 %v4284_v62, %v9008_v19  ;;  %v4311_v35 = vmul.f32 %v9009_v37, %v4284_v62 }
 0x86f   : > { %6143 = vmatprep.mubr.bf16.mxu1 %v4440_v39  ;;  %v4415_v11 = vmax.f32 %v4383_v24, 0.0  ;;  %v4385_v3 = vadd.f32 %v4361_v46, %v4308_v38  ;;  %v4386_v25 = vadd.f32 %v4361_v46, %v4309_v21  ;;  %v4312_v18 = vmul.f32 %v9010_v12, %v4284_v62  ;;  %v9018_v38 = vld [vmem:[#allocation35_spill] sm:$0xff] }
 0x870   : > { %v4416_v5 = vmax.f32 %v4384_v4, 0.0  ;;  %v4387_v20 = vadd.f32 %v4361_v46, %v4310_v41  ;;  %v4388_v34 = vadd.f32 %v4361_v46, %v4311_v35  ;;  %v4313_v6 = vmul.f32 %v8496_v52, %v9011_v56  ;;  %v9019_v41 = vld [vmem:[#allocation37_spill] sm:$0xff] }
 0x871   : > { %v4442_v40 = vpack.c.bf16 %v4415_v11, %v4414_v53  ;;  %v4417_v61 = vmax.f32 %v4385_v3, 0.0  ;;  %v4418_v47 = vmax.f32 %v4386_v25, 0.0  ;;  %v4389_v57 = vadd.f32 %v4361_v46, %v4312_v18  ;;  %v9013_v46 = vld [vmem:[#allocation31_spill] sm:$0xff] }
 0x872   : > { %v4419_v44 = vmax.f32 %v4387_v20, 0.0  ;;  %v4420_v17 = vmax.f32 %v4388_v34, 0.0  ;;  %v4314_v58 = vmul.f32 %v8496_v52, %v9012_v59  ;;  %v4390_v33 = vadd.f32 %v8515_v16, %v4313_v6  ;;  %v9021_v20 = vld [vmem:[#allocation34_spill] sm:$0xff]  ;;  %v9022_v6 = vld [vmem:[#allocation25_spill] sm:$0xff] }
 0x873   : > { %v4443_v22 = vpack.c.bf16 %v4417_v61, %v4416_v5  ;;  %v4421_v54 = vmax.f32 %v4389_v57, 0.0  ;;  %v4315_v62 = vmul.f32 %v8275_v2, %v8496_v52  ;;  %v4316_v0 = vmul.f32 %v8281_v14, %v8496_v52  ;;  %v9015_v14 = vld [vmem:[#allocation27_spill] sm:$0xff] }
 0x874   : > { %v4444_v50 = vpack.c.bf16 %v4419_v44, %v4418_v47  ;;  %v4391_v48 = vadd.f32 %v8515_v16, %v4314_v58  ;;  %v4422_v7 = vmax.f32 %v4390_v33, 0.0  ;;  %v4317_v49 = vmul.f32 %v8496_v52, %v9013_v46 }
 0x875   : > { %v4445_v45 = vpack.c.bf16 %v4421_v54, %v4420_v17  ;;  %v4392_v23 = vadd.f32 %v8515_v16, %v4315_v62  ;;  %v4393_v8 = vadd.f32 %v8515_v16, %v4316_v0  ;;  %v4318_v55 = vmul.f32 %v8496_v52, %v9014_v26 }
 0x876   : > { %6144 = vmatmul.mubr.bf16.gmra.mrb[72].mxu1 %v4441_v42  ;;  %v4423_v2 = vmax.f32 %v4391_v48, 0.0  ;;  %v4394_v30 = vadd.f32 %v8515_v16, %v4317_v49  ;;  %v4319_v15 = vmul.f32 %v9015_v14, %v8496_v52  ;;  %v4320_v60 = vmul.f32 %v9016_v36, %v8496_v52 }
 0x877   : > { %6147 = vmatprep.mubr.bf16.mxu1 %v4442_v40  ;;  %v4424_v32 = vmax.f32 %v4392_v23, 0.0  ;;  %v4425_v51 = vmax.f32 %v4393_v8, 0.0  ;;  %v4395_v28 = vadd.f32 %v8515_v16, %v4318_v55  ;;  %v4321_v9 = vmul.f32 %v8503_v31, %v9017_v10 }
 0x878   : > { %v4446_v43 = vpack.c.bf16 %v4423_v2, %v4422_v7  ;;  %v4426_v39 = vmax.f32 %v4394_v30, 0.0  ;;  %v4396_v13 = vadd.f32 %v8515_v16, %v4319_v15  ;;  %v4397_v27 = vadd.f32 %v8515_v16, %v4320_v60  ;;  %v9020_v16 = vld [vmem:[#allocation29_spill] sm:$0xff] }
 0x879   : > { %v4447_v24 = vpack.c.bf16 %v4425_v51, %v4424_v32  ;;  %v4427_v53 = vmax.f32 %v4395_v28, 0.0  ;;  %v4322_v21 = vmul.f32 %v8503_v31, %v9018_v38  ;;  %v4398_v52 = vadd.f32 %v8518_v29, %v4321_v9 }
 0x87a   : > { %v4428_v42 = vmax.f32 %v4396_v13, 0.0  ;;  %v4429_v4 = vmax.f32 %v4397_v27, 0.0  ;;  %v4323_v19 = vmul.f32 %v8318_v1, %v8503_v31  ;;  %v4324_v37 = vmul.f32 %v9019_v41, %v8503_v31 }
 0x87b   : > { %v4448_v35 = vpack.c.bf16 %v4427_v53, %v4426_v39  ;;  %v4399_v11 = vadd.f32 %v8518_v29, %v4322_v21  ;;  %v4430_v3 = vmax.f32 %v4398_v52, 0.0  ;;  %v4325_v25 = vmul.f32 %v8503_v31, %v9020_v16 }
 0x87c   : > { %v4449_v12 = vpack.c.bf16 %v4429_v4, %v4428_v42  ;;  %v4400_v18 = vadd.f32 %v8518_v29, %v4323_v19  ;;  %v4401_v5 = vadd.f32 %v8518_v29, %v4324_v37  ;;  %v4326_v34 = vmul.f32 %v8503_v31, %v9021_v20 }
 0x87d   : > { %v4431_v56 = vmax.f32 %v4399_v11, 0.0  ;;  %v4402_v1 = vadd.f32 %v8518_v29, %v4325_v25  ;;  %v4327_v40 = vmul.f32 %v9022_v6, %v8503_v31  ;;  %v4328_v61 = vmul.f32 %v8346_v63, %v8503_v31  ;;  %v8581_v31 = vld [vmem:[%s8707_s6] ss:$0 sm:$0xff] }
 0x87e   : > { %6148 = vmatmul.mubr.bf16.gmra.mrb[76].mxu1 %v4443_v22  ;;  %v4432_v47 = vmax.f32 %v4400_v18, 0.0  ;;  %v4433_v57 = vmax.f32 %v4401_v5, 0.0  ;;  %v4403_v44 = vadd.f32 %v8518_v29, %v4326_v34 }
 0x87f   : > { %6151 = vmatprep.mubr.bf16.mxu1 %v4444_v50  ;;  %v4450_v17 = vpack.c.bf16 %v4431_v56, %v4430_v3  ;;  %v4434_v59 = vmax.f32 %v4402_v1, 0.0  ;;  %v4404_v58 = vadd.f32 %v8518_v29, %v4327_v40  ;;  %v4405_v33 = vadd.f32 %v8518_v29, %v4328_v61 }
 0x880   : > { %v4451_v54 = vpack.c.bf16 %v4433_v57, %v4432_v47  ;;  %v4435_v62 = vmax.f32 %v4403_v44, 0.0 }
 0x881   : > { %v4436_v0 = vmax.f32 %v4404_v58, 0.0  ;;  %v4437_v48 = vmax.f32 %v4405_v33, 0.0 }
 0x882   : > { %v4452_v7 = vpack.c.bf16 %v4435_v62, %v4434_v59 }
 0x883   : > { %v4453_v63 = vpack.c.bf16 %v4437_v48, %v4436_v0 }
 0x886   : > { %6152 = vmatmul.mubr.bf16.gmra.mrb[80].mxu1 %v4445_v45 }
 0x887   : > { %6155 = vmatprep.mubr.bf16.mxu1 %v4446_v43 }
 0x88e   : > { %6156 = vmatmul.mubr.bf16.gmra.mrb[84].mxu1 %v4447_v24 }
 0x88f   : > { %6159 = vmatprep.mubr.bf16.mxu1 %v4448_v35 }
 0x896   : > { %6160 = vmatmul.mubr.bf16.gmra.mrb[88].mxu1 %v4449_v12 }
 0x897   : > { %6163 = vmatprep.mubr.bf16.mxu1 %v4450_v17 }
 0x89e   : > { %6164 = vmatmul.mubr.bf16.gmra.mrb[92].mxu1 %v4451_v54 }
 0x89f   : > { %6167 = vmatprep.mubr.bf16.mxu1 %v4452_v7 }
 0x8a6   : > { %6168 = vmatmul.mubr.bf16.gmra.mrb[96].mxu1 %v4453_v63 }
 0x941   : > { %v6141_v29 = vpop.f32.mrb[68].mxu1 }
 0x942   : > { %v4568_v22 = vadd.f32 %v6141_v29, %v8581_v31  ;;  %v4559_v50 = vpop.f32.mrb[69].mxu1 }
 0x943   : > { %v4560_v46 = vadd.f32 %v8581_v31, %v4559_v50  ;;  %v6142_v49 = vpop.f32.mrb[70].mxu1 }
 0x944   : > { %4688 = vst [vmem:[%s8585_s14 + $0x10] sm:$0xff] %v4568_v22  ;;  %v4571_v45 = vadd.f32 %v6142_v49, %v8581_v31  ;;  %v4562_v23 = vpop.f32.mrb[71].mxu1 }
 0x945   : > { %4686 = vst [vmem:[%s8585_s14] sm:$0xff] %v4560_v46  ;;  %v4563_v8 = vadd.f32 %v8581_v31, %v4562_v23 }
 0x946   : > { %4689 = vst [vmem:[%s8585_s14 + $0x18] sm:$0xff] %v4571_v45 }
 0x947   : > { %4687 = vst [vmem:[%s8585_s14 + $0x8] sm:$0xff] %v4563_v8 }
 0x949   : > { %v6145_v26 = vpop.f32.mrb[72].mxu1 }
 0x94a   : > { %v4584_v55 = vadd.f32 %v6145_v26, %v8581_v31  ;;  %v4575_v2 = vpop.f32.mrb[73].mxu1 }
 0x94b   : > { %v4576_v30 = vadd.f32 %v8581_v31, %v4575_v2  ;;  %v6146_v14 = vpop.f32.mrb[74].mxu1 }
 0x94c   : > { %4692 = vst [vmem:[%s8585_s14 + $0x30] sm:$0xff] %v4584_v55  ;;  %v4587_v15 = vadd.f32 %v6146_v14, %v8581_v31  ;;  %v4578_v36 = vpop.f32.mrb[75].mxu1 }
 0x94d   : > { %4690 = vst [vmem:[%s8585_s14 + $0x20] sm:$0xff] %v4576_v30  ;;  %v4579_v60 = vadd.f32 %v8581_v31, %v4578_v36 }
 0x94e   : > { %4693 = vst [vmem:[%s8585_s14 + $0x38] sm:$0xff] %v4587_v15 }
 0x94f   : > { %4691 = vst [vmem:[%s8585_s14 + $0x28] sm:$0xff] %v4579_v60 }
 0x951   : > { %v6149_v32 = vpop.f32.mrb[76].mxu1 }
 0x952   : > { %v4600_v51 = vadd.f32 %v6149_v32, %v8581_v31  ;;  %v4591_v28 = vpop.f32.mrb[77].mxu1 }
 0x953   : > { %v4592_v10 = vadd.f32 %v8581_v31, %v4591_v28  ;;  %v6150_v9 = vpop.f32.mrb[78].mxu1 }
 0x954   : > { %4696 = vst [vmem:[%s8585_s14 + $0x50] sm:$0xff] %v4600_v51  ;;  %v4603_v43 = vadd.f32 %v6150_v9, %v8581_v31  ;;  %v4594_v39 = vpop.f32.mrb[79].mxu1 }
 0x955   : > { %4694 = vst [vmem:[%s8585_s14 + $0x40] sm:$0xff] %v4592_v10  ;;  %v4595_v13 = vadd.f32 %v8581_v31, %v4594_v39 }
 0x956   : > { %4697 = vst [vmem:[%s8585_s14 + $0x58] sm:$0xff] %v4603_v43 }
 0x957   : > { %4695 = vst [vmem:[%s8585_s14 + $0x48] sm:$0xff] %v4595_v13 }
 0x959   : > { %v6153_v27 = vpop.f32.mrb[80].mxu1 }
 0x95a   : > { %v4616_v24 = vadd.f32 %v6153_v27, %v8581_v31  ;;  %v4607_v53 = vpop.f32.mrb[81].mxu1 }
 0x95b   : > { %v4608_v38 = vadd.f32 %v8581_v31, %v4607_v53  ;;  %v6154_v21 = vpop.f32.mrb[82].mxu1 }
 0x95c   : > { %4700 = vst [vmem:[%s8585_s14 + $0x70] sm:$0xff] %v4616_v24  ;;  %v4619_v52 = vadd.f32 %v6154_v21, %v8581_v31  ;;  %v4610_v42 = vpop.f32.mrb[83].mxu1 }
 0x95d   : > { %4698 = vst [vmem:[%s8585_s14 + $0x60] sm:$0xff] %v4608_v38  ;;  %v4611_v4 = vadd.f32 %v8581_v31, %v4610_v42 }
 0x95e   : > { %4701 = vst [vmem:[%s8585_s14 + $0x78] sm:$0xff] %v4619_v52 }
 0x95f   : > { %4699 = vst [vmem:[%s8585_s14 + $0x68] sm:$0xff] %v4611_v4 }
 0x961   : > { %v6157_v19 = vpop.f32.mrb[84].mxu1 }
 0x962   : > { %v4632_v41 = vadd.f32 %v6157_v19, %v8581_v31  ;;  %v4623_v37 = vpop.f32.mrb[85].mxu1 }
 0x963   : > { %v4624_v35 = vadd.f32 %v8581_v31, %v4623_v37  ;;  %v6158_v11 = vpop.f32.mrb[86].mxu1 }
 0x964   : > { %4704 = vst [vmem:[%s8585_s14 + $0x90] sm:$0xff] %v4632_v41  ;;  %v4635_v3 = vadd.f32 %v6158_v11, %v8581_v31  ;;  %v4626_v16 = vpop.f32.mrb[87].mxu1 }
 0x965   : > { %4702 = vst [vmem:[%s8585_s14 + $0x80] sm:$0xff] %v4624_v35  ;;  %v4627_v25 = vadd.f32 %v8581_v31, %v4626_v16 }
 0x966   : > { %4705 = vst [vmem:[%s8585_s14 + $0x98] sm:$0xff] %v4635_v3 }
 0x967   : > { %4703 = vst [vmem:[%s8585_s14 + $0x88] sm:$0xff] %v4627_v25 }
 0x969   : > { %v6161_v12 = vpop.f32.mrb[88].mxu1 }
 0x96a   : > { %v4648_v18 = vadd.f32 %v6161_v12, %v8581_v31  ;;  %v4639_v5 = vpop.f32.mrb[89].mxu1 }
 0x96b   : > { %v4640_v20 = vadd.f32 %v8581_v31, %v4639_v5  ;;  %v6162_v34 = vpop.f32.mrb[90].mxu1 }
 0x96c   : > { %4708 = vst [vmem:[%s8585_s14 + $0xb0] sm:$0xff] %v4648_v18  ;;  %v4651_v56 = vadd.f32 %v6162_v34, %v8581_v31  ;;  %v4642_v1 = vpop.f32.mrb[91].mxu1 }
 0x96d   : > { %4706 = vst [vmem:[%s8585_s14 + $0xa0] sm:$0xff] %v4640_v20  ;;  %v4643_v6 = vadd.f32 %v8581_v31, %v4642_v1 }
 0x96e   : > { %4709 = vst [vmem:[%s8585_s14 + $0xb8] sm:$0xff] %v4651_v56 }
 0x96f   : > { %4707 = vst [vmem:[%s8585_s14 + $0xa8] sm:$0xff] %v4643_v6 }
 0x971   : > { %v6165_v40 = vpop.f32.mrb[92].mxu1 }
 0x972   : > { %v4664_v61 = vadd.f32 %v6165_v40, %v8581_v31  ;;  %v4655_v47 = vpop.f32.mrb[93].mxu1 }
 0x973   : > { %v4656_v57 = vadd.f32 %v8581_v31, %v4655_v47  ;;  %v6166_v44 = vpop.f32.mrb[94].mxu1 }
 0x974   : > { %4712 = vst [vmem:[%s8585_s14 + $0xd0] sm:$0xff] %v4664_v61  ;;  %v4667_v17 = vadd.f32 %v6166_v44, %v8581_v31  ;;  %v4658_v59 = vpop.f32.mrb[95].mxu1 }
 0x975   : > { %4710 = vst [vmem:[%s8585_s14 + $0xc0] sm:$0xff] %v4656_v57  ;;  %v4659_v58 = vadd.f32 %v8581_v31, %v4658_v59 }
 0x976   : > { %4713 = vst [vmem:[%s8585_s14 + $0xd8] sm:$0xff] %v4667_v17 }
 0x977   : > { %4711 = vst [vmem:[%s8585_s14 + $0xc8] sm:$0xff] %v4659_v58 }
 0x979   : > { %v6169_v33 = vpop.f32.mrb[96].mxu1 }
 0x97a   : > { %v4680_v54 = vadd.f32 %v6169_v33, %v8581_v31  ;;  %v4671_v62 = vpop.f32.mrb[97].mxu1 }
 0x97b   : > { %v4672_v0 = vadd.f32 %v8581_v31, %v4671_v62  ;;  %v6170_v48 = vpop.f32.mrb[98].mxu1 }
 0x97c   : > { %4716 = vst [vmem:[%s8585_s14 + $0xf0] sm:$0xff] %v4680_v54  ;;  %v4683_v7 = vadd.f32 %v6170_v48, %v8581_v31  ;;  %v4674_v63 = vpop.f32.mrb[99].mxu1 }
 0x97d   : > { %4714 = vst [vmem:[%s8585_s14 + $0xe0] sm:$0xff] %v4672_v0  ;;  %v4675_v29 = vadd.f32 %v8581_v31, %v4674_v63 }
 0x97e   : > { %4717 = vst [vmem:[%s8585_s14 + $0xf8] sm:$0xff] %v4683_v7 }
 0x97f   : > { %4715 = vst [vmem:[%s8585_s14 + $0xe8] sm:$0xff] %v4675_v29 }
 0x980   : > { %6746 = shalt.err (!%p6743_p3)
}
 0x981   : > { %s6747_s29 = scalar_lea.hbm %s8650_s19, 4096  ;;  %s6751_s13 = scalar_lea.hbm %s8708_s7, 8192 }
 0x982   : > { %p6748_p4 = scmp.ne.s32.totalorder %s8650_s19, %s6747_s29  ;;  %p6752_p9 = scmp.lt.u32.totalorder %s8650_s19, %s8708_s7 }
 0x983   : > { %p6753_p10 = scmp.lt.u32.totalorder %s6751_s13, %s6747_s29  ;;  %p6755_p12 = scmp.lt.u32.totalorder %s6747_s29, %s8650_s19 }
 0x984   : > { %p6749_p7 = pnand %p6748_p4, %p6883_p5 }
 0x985   : > { %p6754_p11 = por %p6753_p10, %p6752_p9 }
 0x986   : > { %p6750_p8 = pneg %p6749_p7 }
 0x987   : > { %p6756_p13 = por %p6755_p12, %p6754_p11 }
 0x989   : > { %p6757_p0 = pnand %p6756_p13, %p6750_p8 }
 0x98b   : > { %6760 = shalt.err (!%p6757_p0)
}
 0x98c   : > { %s6803_s17 = smov 128   ;;  %s6804_s18 = smov 8  }
 0x98d   : > { %6640 = dma.vmem_to_hbm [thread:$0]  (%p6883_p5), %s8652_s16, 4096, %s8650_s19, %s8660_s28, %s6803_s17, %s6803_s17, %s6804_s18  }
 0x98e PF: > { %p6646_p1 = scmp.ge.s32.totalorder %s6795_s27, 2  ;;  %s4748_s20 = sand.u32 1, %s6783_s24  }
 0x98f   : > { %s4749_s21 = scalar_lea.sflag [#allocation3], %s4748_s20 }
 0x990   : > { %p6643_p2 = pnand %p6646_p1, %p6887_p6 }
 0x992   : > { %6778 = dma.done.wait (!%p6643_p2), %s4749_s21, 4096  }
 0x993   : > { %6780 = vsyncadd (!%p6643_p2), %s4749_s21, 4294963200  ;;  %p17_p3 = scmp.ge.s32.totalorder %s6870_s30, 4   ;;  %s9023_s24 = smov %s6787_s25 }
 0x994   : > { %s9024_s25 = smov %s6791_s26  ;;  %s9025_s26 = smov %s6881_s10 }
 0x995   : > { %s9026_s27 = smov %s6870_s30  ;;  %19 = sbr.rel (!%p17_p3) target bundleno = 3 (0x3), region = 88 }
 0x99c   :  { %4754 = vsyncpa [#allocation3], 1 }
 0x99d   :  { %4756 = vsyncpa [#allocation3 + $0x1], 1 }

// kernel: tpu_custom_call.1
= control target key start
LH: loop header
LB: loop body
LE: loop exit
PB: predicated region body
PF: predicated region fallthrough
CT: control target
= control target key end

     0   :  { %12 = vsyncpa [#allocation3], 0  ;;  %s8701_s0 = inlined_call_operand.vmem [shape: bf16[8,64,16], index: 0, kind: input, shape index: {}]   ;;  %s8702_s1 = inlined_call_operand.vmem [shape: bf16[16,128], index: 1, kind: input, shape index: {}]   ;;  %s8703_s2 = inlined_call_operand.vmem [shape: bf16[2,128,128], index: 2, kind: input, shape index: {}]   ;;  %s8704_s3 = inlined_call_operand.vmem [shape: f32[3,1,128], index: 3, kind: input, shape index: {}]   ;;  %s8705_s4 = inlined_call_operand.vmem [shape: f32[3,1,128], index: 4, kind: input, shape index: {}]   ;;  %s8706_s5 = inlined_call_operand.vmem [shape: bf16[128,128], index: 5, kind: input, shape index: {}]   ;;  %s8707_s6 = inlined_call_operand.vmem [shape: f32[1,128], index: 6, kind: input, shape index: {}]   ;;  %s8708_s7 = inlined_call_operand.hbm [shape: f32[8,64,128], index: 7, kind: output, shape index: {}]  }
   0x1   :  { %14 = vsyncpa [#allocation3 + $0x1], 0  ;;  %s6845_s24 = smov 0   ;;  %s6847_s25 = smov 0  }
   0x2   :  { %s6849_s26 = smov 0   ;;  %s6851_s27 = smov 0  }
   0x3 LB: > { %s6866_s28 = sadd.s32 4294967295, %s6795_s27   ;;  %s4795_s29 = sadd.s32 4294967294, %s6795_s27   ;;  %s6795_s27 = sphi %s6851_s27, %s9026_s27   ;;  %s6791_s26 = sphi %s6849_s26, %s9025_s26   ;;  %s6787_s25 = sphi %s6847_s25, %s9024_s25   ;;  %s6783_s24 = sphi %s6845_s24, %s9023_s24  }
   0x4   : > { %s6870_s30 = sadd.s32 1, %s6795_s27   ;;  %s179_s8 = sadd.s32 1, %s6791_s26 }
   0x5   : > { %s176_s9 = ssub.s32 %s6795_s27, %s6870_s30  ;;  %p189_p0 = scmp.ne.s32.totalorder %s6791_s26, %s6787_s25 }
   0x6   : > { %p177_p1 = scmp.eq.s32.totalorder %s176_s9, 0  ;;  %p190_p2 = scmp.eq.s32.totalorder %s6866_s28, 1 }
   0x7   : > { %p195_p3 = scmp.ne.s32.totalorder %s6787_s25, %s6783_s24  ;;  %p196_p4 = scmp.eq.s32.totalorder %s4795_s29, 1 }
   0x8   : > { %s6881_s10 = scalar_select %p177_p1, %s6791_s26, %s179_s8  }
   0x9   : > { %p6883_p5 = por %p190_p2, %p189_p0  ;;  %p6887_p6 = por %p196_p4, %p195_p3 }
   0xa   : > { %p4798_p7 = scmp.ge.s32.totalorder %s6795_s27, 1  ;;  %p242_p8 = scmp.lt.s32.totalorder %s6795_s27, 3 }
   0xc   : > { %p243_p9 = pnand %p4798_p7, %p242_p8 }
   0xe   : > { %246 = sbr.rel (%p243_p9) target bundleno = 2446 (0x98e), region = 48 }
  0x15   : > { %v6686_v0 = vld [vmem:[%s8702_s1] sm:$0xff]   ;;  %s4800_s15 = sshll.u32 %s6866_s28, 2  ;;  %v284_v1 = vlaneseq  ;;  %vm8709_vm0 = vcmask 130048   ;;  %v6797_v23 = vmov 1.0|1.0   ;;  %v8710_v29 = vmov 0.0  }
  0x16   : > { %p276_p10 = scmp.lt.s32.totalorder %s4800_s15, 7  ;;  %5363 = vmatprep.subr.bf16.mxu1 %v6686_v0  ;;  %s272_s29 = sand.u32 1, %s6787_s25  }
  0x17   : > { %v6897_v2 = vshrl.u32 %v284_v1, 7  ;;  %5364 = vmatpush3.bf16.msra.mxu1 %v6686_v0  ;;  %v302_v5 = vand.u32 127, %v284_v1  ;;  %s4799_s8 = sshll.u32 %s272_s29, 8  ;;  %s6802_s21 = smov [#allocation2]  }
  0x18   : > { %s9028_s15 = smov (!%p276_p10, %s4800_s15), 7  ;;  %s8585_s14 = scalar_lea.vmem [#allocation2], %s4799_s8 }
  0x19   : > { %v286_v3 = vadd.s32 8, %v6897_v2  ;;  %v369_v4 = vmul.u32 4, %v6897_v2  ;;  %s4913_s16 = sshll.u32 %s9028_s15, 5  ;;  %v6902_v6 = vadd.s32 16, %v6897_v2  ;;  %v6905_v7 = vadd.s32 24, %v6897_v2  ;;  %s4915_s15 = sshll.u32 %s6866_s28, 12 }
  0x1a   : > { %s6910_s19 = scalar_lea.vmem %s8701_s0, %s4913_s16  ;;  %v6919_v16 = vmul.u32 4, %v302_v5  ;;  %v289_v25 = vadd.s32 32, %v6897_v2  ;;  %v290_v27 = vadd.s32 40, %v6897_v2  ;;  %v291_v31 = vadd.s32 48, %v6897_v2  ;;  %s4733_s16 = sshll.u32 %s8585_s14, 4  ;;  %s8652_s16 = int_to_ptr.vmem [resolvable:$true] %s4733_s16 }
  0x1b   : > { %v370_v8 = vmul.u32 4, %v286_v3  ;;  %v377_v9 = vadd.s32 4, %v369_v4  ;;  %v6687_v10 = vld [vmem:[%s6910_s19] sm:$0xff]   ;;  %v371_v11 = vmul.u32 4, %v6902_v6  ;;  %v6688_v12 = vld [vmem:[%s6910_s19 + $0x8] sm:$0xff]   ;;  %v6689_v14 = vld [vmem:[%s6910_s19 + $0x10] sm:$0xff]   ;;  %vm373_vm1 = vcmp.ge.s32.totalorder %v302_v5, %v369_v4 }
  0x1c   : > { %5365 = vmatprep.mubr.msk.bf16.mxu1 %vm8709_vm0, %v6687_v10  ;;  %v372_v15 = vmul.u32 4, %v6905_v7  ;;  %v6690_v19 = vld [vmem:[%s6910_s19 + $0x18] sm:$0xff]   ;;  %v6691_v20 = vld [vmem:[%s6910_s19 + $0x20] sm:$0xff]   ;;  %v6925_v21 = vadd.s32 4, %v6919_v16  ;;  %vm304_vm13 = vcmp.ge.s32.totalorder %v6897_v2, %v6919_v16  ;;  %v6692_v28 = vld [vmem:[%s6910_s19 + $0x28] sm:$0xff]   ;;  %v292_v34 = vadd.s32 56, %v6897_v2 }
  0x1d   : > { %v378_v13 = vadd.s32 4, %v370_v8  ;;  %5366 = vmatmul.mubr.msk.bf16.vlgmr.msra.gmra.mrb[0].mxu1 %vm8709_vm0, %v6688_v12  ;;  %v379_v17 = vadd.s32 4, %v371_v11  ;;  %vm381_vm2 = vcmp.lt.s32.totalorder %v302_v5, %v377_v9  ;;  %vm374_vm3 = vcmp.ge.s32.totalorder %v302_v5, %v370_v8  ;;  %v6693_v32 = vld [vmem:[%s6910_s19 + $0x30] sm:$0xff]   ;;  %v6694_v42 = vld [vmem:[%s6910_s19 + $0x38] sm:$0xff]   ;;  %v6695_v44 = vld [vmem:[%s6910_s19 + $0x40] sm:$0xff]   ;;  %s8660_s28 = scalar_lea.sflag [#allocation3], %s272_s29 }
  0x1e   : > { %5369 = vmatprep.mubr.msk.bf16.mxu1 %vm8709_vm0, %v6689_v14  ;;  %v380_v18 = vadd.s32 4, %v372_v15  ;;  %vm6927_vm5 = vmand %vm373_vm1, %vm381_vm2  ;;  %vm375_vm6 = vcmp.ge.s32.totalorder %v302_v5, %v371_v11  ;;  %vm376_vm9 = vcmp.ge.s32.totalorder %v302_v5, %v372_v15  ;;  %vm321_vm14 = vcmp.lt.s32.totalorder %v6897_v2, %v6925_v21  ;;  %v6696_v55 = vld [vmem:[%s6910_s19 + $0x48] sm:$0xff]   ;;  %v6697_v58 = vld [vmem:[%s6910_s19 + $0x50] sm:$0xff]   ;;  %s6733_s20 = scalar_lea.vmem %s8652_s16, 4096  ;;  %s6737_s22 = sshll.u32 %s6802_s21, 4  ;;  %s6738_s22 = int_to_ptr.vmem [resolvable:$false] %s6737_s22 }
  0x1f   : > { %vm382_vm4 = vcmp.lt.s32.totalorder %v302_v5, %v378_v13  ;;  %vm383_vm7 = vcmp.lt.s32.totalorder %v302_v5, %v379_v17  ;;  %vm305_vm1 = vcmp.ge.s32.totalorder %v286_v3, %v6919_v16  ;;  %vm322_vm2 = vcmp.lt.s32.totalorder %v286_v3, %v6925_v21  ;;  %v6698_v62 = vld [vmem:[%s6910_s19 + $0x58] sm:$0xff]   ;;  %v6699_v63 = vld [vmem:[%s6910_s19 + $0x60] sm:$0xff]   ;;  %v6700_v4 = vld [vmem:[%s6910_s19 + $0x68] sm:$0xff]   ;;  %p6734_p11 = scmp.ne.s32.totalorder %s8652_s16, %s6733_s20  ;;  %s6739_s23 = scalar_lea.vmem %s6738_s22, 8192 }
  0x20   : > { %vm386_vm8 = vmand %vm374_vm3, %vm382_vm4  ;;  %vm384_vm10 = vcmp.lt.s32.totalorder %v302_v5, %v380_v18  ;;  %vm393_vm4 = vcmask 261120   ;;  %v293_v36 = vadd.s32 64, %v6897_v2  ;;  %v294_v38 = vadd.s32 72, %v6897_v2  ;;  %v6701_v5 = vld [vmem:[%s6910_s19 + $0x70] sm:$0xff]   ;;  %p6740_p0 = scmp.lt.s32.totalorder %s8652_s16, %s6738_s22  ;;  %p6741_p1 = scmp.lt.s32.totalorder %s6739_s23, %s6733_s20 }
  0x21   : > { %vm6171_vm11 = vmpackc.low %vm386_vm8, %vm6927_vm5  ;;  %vm306_vm5 = vcmp.ge.s32.totalorder %v6902_v6, %v6919_v16  ;;  %vm307_vm8 = vcmp.ge.s32.totalorder %v6905_v7, %v6919_v16  ;;  %v295_v39 = vadd.s32 80, %v6897_v2  ;;  %v296_v41 = vadd.s32 88, %v6897_v2  ;;  %p6735_p12 = pnand %p6734_p11, %p6883_p5 }
  0x22   : > { %6172 = vmatprep.subr.msk.bf16.mxu0 %vm6171_vm11, %v6797_v23  ;;  %vm6934_vm12 = vmand %vm375_vm6, %vm383_vm7  ;;  %vm323_vm6 = vcmp.lt.s32.totalorder %v6902_v6, %v6925_v21  ;;  %v297_v46 = vadd.s32 96, %v6897_v2  ;;  %v298_v51 = vadd.s32 104, %v6897_v2  ;;  %v299_v52 = vadd.s32 112, %v6897_v2  ;;  %v6702_v6 = vld [vmem:[%s6910_s19 + $0x78] sm:$0xff]   ;;  %s8650_s19 = scalar_lea.hbm %s8708_s7, %s4915_s15  ;;  %p6742_p2 = por %p6741_p1, %p6740_p0 }
  0x23   : > { %6174 = vmatpush3.bf16.msk.msra.mxu0 %vm6171_vm11, %v6797_v23  ;;  %vm6944_vm15 = vmand %vm376_vm9, %vm384_vm10  ;;  %vm324_vm9 = vcmp.lt.s32.totalorder %v6905_v7, %v6925_v21  ;;  %vm308_vm11 = vcmp.ge.s32.totalorder %v289_v25, %v6919_v16  ;;  %v300_v54 = vadd.s32 120, %v6897_v2  ;;  %v8724_v7 = vmov 0.0|0.0   ;;  %p6736_p13 = pneg %p6735_p12 }
  0x24   : > { %vm6175_vm3 = vmpackc.low %vm6944_vm15, %vm6934_vm12  ;;  %vm309_vm15 = vcmp.ge.s32.totalorder %v290_v27, %v6919_v16  ;;  %6179 = vmatprep.subr.bf16.mxu1 %v8724_v7 }
  0x25   : > { %5370 = vmatmul.mubr.msk.bf16.gmra.mrb[4].mxu1 %vm8709_vm0, %v6690_v19  ;;  %6176 = vmatprep.subr.msk.bf16.mxu0 %vm6175_vm3, %v6797_v23  ;;  %vm337_vm7 = vmand %vm304_vm13, %vm321_vm14  ;;  %p6743_p3 = pnand %p6742_p2, %p6736_p13 }
  0x26   : > { %5373 = vmatprep.mubr.msk.bf16.mxu1 %vm8709_vm0, %v6691_v20  ;;  %v353_v30 = vsel %vm337_vm7, 1.0, %v8710_v29  ;;  %vm338_vm10 = vmand %vm305_vm1, %vm322_vm2  ;;  %vm325_vm0 = vcmp.lt.s32.totalorder %v289_v25, %v6925_v21  ;;  %vm326_vm1 = vcmp.lt.s32.totalorder %v290_v27, %v6925_v21  ;;  %vm8823_vm2 = vcmask 130048  }
  0x27   : > { %6178 = vmatpush3.bf16.msk.msra.mxu0 %vm6175_vm3, %v6797_v23  ;;  %5339 = vmatprep.mubr.msk.f32.mxu0 %vm393_vm4, %v353_v30  ;;  %v354_v33 = vsel %vm338_vm10, 1.0, %v8710_v29  ;;  %vm339_vm13 = vmand %vm306_vm5, %vm323_vm6  ;;  %vm310_vm3 = vcmp.ge.s32.totalorder %v291_v31, %v6919_v16  ;;  %vm327_vm5 = vcmp.lt.s32.totalorder %v291_v31, %v6925_v21  ;;  %vm311_vm6 = vcmp.ge.s32.totalorder %v292_v34, %v6919_v16 }
  0x28   : > { %v355_v35 = vsel %vm339_vm13, 1.0, %v8710_v29  ;;  %vm340_vm12 = vmand %vm307_vm8, %vm324_vm9  ;;  %vm328_vm7 = vcmp.lt.s32.totalorder %v292_v34, %v6925_v21  ;;  %vm312_vm9 = vcmp.ge.s32.totalorder %v293_v36, %v6919_v16  ;;  %vm329_vm10 = vcmp.lt.s32.totalorder %v293_v36, %v6925_v21  ;;  %6203 = vmatprep.subr.bf16.mxu0 %v8724_v7 }
  0x29   : > { %vm6996_vm14 = vmand %vm308_vm11, %vm325_vm0  ;;  %v356_v40 = vsel %vm340_vm12, 1.0, %v8710_v29  ;;  %vm313_vm13 = vcmp.ge.s32.totalorder %v294_v38, %v6919_v16  ;;  %vm330_vm12 = vcmp.lt.s32.totalorder %v294_v38, %v6925_v21 }
  0x2a   : > { %5340 = vmatmul.mubr.msk.f32.vlgmr.msra.gmra.mrb[0].mxu0 %vm393_vm4, %v354_v33  ;;  %vm8824_vm0 = vmmov %vm8823_vm2  ;;  %v357_v43 = vsel %vm6996_vm14, 1.0, %v8710_v29 }
  0x2b   : > { %5342 = vmatprep.mubr.msk.f32.mxu0 %vm393_vm4, %v355_v35  ;;  %vm342_vm8 = vmand %vm309_vm15, %vm326_vm1  ;;  %vm314_vm15 = vcmp.ge.s32.totalorder %v295_v39, %v6919_v16  ;;  %vm331_vm1 = vcmp.lt.s32.totalorder %v295_v39, %v6925_v21 }
  0x2c   : > { %vm343_vm11 = vmand %vm310_vm3, %vm327_vm5  ;;  %v358_v47 = vsel %vm342_vm8, 1.0, %v8710_v29  ;;  %vm315_vm3 = vcmp.ge.s32.totalorder %v296_v41, %v6919_v16  ;;  %vm332_vm5 = vcmp.lt.s32.totalorder %v296_v41, %v6925_v21 }
  0x2d   : > { %5374 = vmatmul.mubr.msk.bf16.gmra.mrb[8].mxu1 %vm8823_vm2, %v6692_v28  ;;  %vm7030_vm14 = vmand %vm311_vm6, %vm328_vm7  ;;  %v359_v49 = vsel %vm343_vm11, 1.0, %v8710_v29  ;;  %vm8831_vm7 = vcmask 130048  }
  0x2e   : > { %5377 = vmatprep.mubr.msk.bf16.mxu1 %vm8824_vm0, %v6693_v32  ;;  %5343 = vmatmul.mubr.msk.f32.gmra.mrb[2].mxu0 %vm393_vm4, %v356_v40  ;;  %vm7039_vm2 = vmand %vm312_vm9, %vm329_vm10  ;;  %vm316_vm9 = vcmp.ge.s32.totalorder %v297_v46, %v6919_v16  ;;  %vm333_vm10 = vcmp.lt.s32.totalorder %v297_v46, %v6925_v21  ;;  %v360_v53 = vsel %vm7030_vm14, 1.0, %v8710_v29  ;;  %vm334_vm14 = vcmp.lt.s32.totalorder %v298_v51, %v6925_v21 }
  0x2f   : > { %5345 = vmatprep.mubr.msk.f32.mxu0 %vm393_vm4, %v357_v43  ;;  %vm346_vm0 = vmand %vm313_vm13, %vm330_vm12  ;;  %v361_v56 = vsel %vm7039_vm2, 1.0, %v8710_v29  ;;  %vm317_vm12 = vcmp.ge.s32.totalorder %v298_v51, %v6919_v16  ;;  %vm335_vm2 = vcmp.lt.s32.totalorder %v299_v52, %v6925_v21 }
  0x30   : > { %vm7046_vm6 = vmand %vm314_vm15, %vm331_vm1  ;;  %v362_v57 = vsel %vm346_vm0, 1.0, %v8710_v29  ;;  %vm318_vm1 = vcmp.ge.s32.totalorder %v299_v52, %v6919_v16 }
  0x31   : > { %vm348_vm8 = vmand %vm315_vm3, %vm332_vm5  ;;  %v363_v59 = vsel %vm7046_vm6, 1.0, %v8710_v29  ;;  %vm319_vm6 = vcmp.ge.s32.totalorder %v300_v54, %v6919_v16 }
  0x32   : > { %5346 = vmatmul.mubr.msk.f32.gmra.mrb[4].mxu0 %vm393_vm4, %v358_v47  ;;  %vm8832_vm11 = vmmov %vm8831_vm7  ;;  %v364_v60 = vsel %vm348_vm8, 1.0, %v8710_v29 }
  0x33   : > { %5348 = vmatprep.mubr.msk.f32.mxu0 %vm393_vm4, %v359_v49  ;;  %vm349_vm13 = vmand %vm316_vm9, %vm333_vm10 }
  0x34   : > { %vm8833_vm15 = vmmov %vm8831_vm7  ;;  %v365_v61 = vsel %vm349_vm13, 1.0, %v8710_v29 }
  0x35   : > { %5378 = vmatmul.mubr.msk.bf16.gmra.mrb[12].mxu1 %vm8831_vm7, %v6694_v42  ;;  %vm8834_vm3 = vmmov %vm8831_vm7  ;;  %vm336_vm7 = vcmp.lt.s32.totalorder %v300_v54, %v6925_v21 }
  0x36   : > { %5381 = vmatprep.mubr.msk.bf16.mxu1 %vm8832_vm11, %v6695_v44  ;;  %5349 = vmatmul.mubr.msk.f32.gmra.mrb[6].mxu0 %vm393_vm4, %v360_v53  ;;  %vm350_vm5 = vmand %vm317_vm12, %vm334_vm14  ;;  %vm6800_vm14 = vmmov 0  }
  0x37   : > { %5351 = vmatprep.mubr.msk.f32.mxu0 %vm393_vm4, %v361_v56  ;;  %vm351_vm0 = vmand %vm318_vm1, %vm335_vm2  ;;  %v366_v0 = vsel %vm350_vm5, 1.0, %v8710_v29  ;;  %vm1070_vm1 = vcmask 1045509   ;;  %vm1072_vm2 = vcmask 1046534   ;;  %vm1074_vm5 = vcmask 1047559  }
  0x38   : > { %v367_v1 = vsel %vm351_vm0, 1.0, %v8710_v29  ;;  %vm352_vm8 = vmand %vm319_vm6, %vm336_vm7  ;;  %vm1077_vm0 = vcmask 1043456  }
  0x39   : > { %vm8835_vm9 = vmmov %vm8834_vm3  ;;  %v368_v3 = vsel %vm352_vm8, 1.0, %v8710_v29 }
  0x3a   : > { %5352 = vmatmul.mubr.msk.f32.gmra.mrb[8].mxu0 %vm393_vm4, %v362_v57  ;;  %vm8836_vm10 = vmmov %vm8834_vm3 }
  0x3b   : > { %5354 = vmatprep.mubr.msk.f32.mxu0 %vm393_vm4, %v363_v59  ;;  %vm8837_vm11 = vmmov %vm8834_vm3 }
  0x3c   : > { %vm8838_vm13 = vmmov %vm8834_vm3 }
  0x3d   : > { %5382 = vmatmul.mubr.msk.bf16.gmra.mrb[16].mxu1 %vm8833_vm15, %v6696_v55  ;;  %vm8839_vm12 = vmmov %vm8834_vm3  ;;  %vm1061_vm15 = vcmask 1042434  }
  0x3e   : > { %5385 = vmatprep.mubr.msk.bf16.mxu1 %vm8834_vm3, %v6697_v58  ;;  %5355 = vmatmul.mubr.msk.f32.gmra.mrb[10].mxu0 %vm393_vm4, %v364_v60  ;;  %vm1063_vm3 = vcmask 1043459  }
  0x3f   : > { %5357 = vmatprep.mubr.msk.f32.mxu0 %vm393_vm4, %v365_v61 }
  0x42   : > { %5358 = vmatmul.mubr.msk.f32.gmra.mrb[12].mxu0 %vm393_vm4, %v366_v0 }
  0x43   : > { %5360 = vmatprep.mubr.msk.f32.mxu0 %vm393_vm4, %v367_v1 }
  0x45   : > { %5386 = vmatmul.mubr.msk.bf16.gmra.mrb[20].mxu1 %vm8835_vm9, %v6698_v62 }
  0x46   : > { %5389 = vmatprep.mubr.msk.bf16.mxu1 %vm8836_vm10, %v6699_v63  ;;  %5361 = vmatmul.mubr.msk.f32.gmra.mrb[14].mxu0 %vm393_vm4, %v368_v3  ;;  %vm1059_vm4 = vcmask 1041409  }
  0x47   : > { %5464 = vmatprep.mubr.msk.f32.mxu0 %vm6800_vm14, %v8710_v29 }
  0x4d   : > { %5390 = vmatmul.mubr.msk.bf16.gmra.mrb[24].mxu1 %vm8837_vm11, %v6700_v4 }
  0x4e   : > { %5393 = vmatprep.mubr.msk.bf16.mxu1 %vm8838_vm13, %v6701_v5 }
  0x55   : > { %5394 = vmatmul.mubr.msk.bf16.gmra.mrb[28].mxu1 %vm8839_vm12, %v6702_v6 }
  0x56   : > { %5429 = vmatprep.mubr.msk.f32.mxu1 %vm6800_vm14, %v8710_v29 }
  0xf0   : > { %v7109_v8 = vpop.f32.mrb[0].mxu1 }
  0xf1   : > { %8840 = vst [vmem:[#allocation5_spill] sm:$0xff] %v7109_v8  ;;  %v7111_v9 = vpop.f32.mrb[1].mxu1  ;;  %v973_v15 = vmul.f32 %v7109_v8, %v7109_v8 }
  0xf2   : > { %v7113_v10 = vpop.f32.mrb[2].mxu1  ;;  %v971_v12 = vmul.f32 %v7111_v9, %v7111_v9 }
  0xf3   : > { %8841 = vst [vmem:[#allocation6_spill] sm:$0xff] %v7113_v10  ;;  %v7115_v11 = vpop.f32.mrb[3].mxu1  ;;  %v974_v18 = vmul.f32 %v7113_v10, %v7113_v10 }
  0xf4   : > { %8842 = vst [vmem:[#allocation7_spill] sm:$0xff] %v7115_v11  ;;  %v919_v13 = vadd.f32 %v7115_v11, %v7111_v9  ;;  %v972_v14 = vmul.f32 %v7115_v11, %v7115_v11 }
  0xf6   : > { %v920_v16 = vadd.f32 %v7109_v8, %v919_v13  ;;  %v1003_v17 = vadd.f32 %v972_v14, %v971_v12 }
  0xf8   : > { %v1004_v19 = vadd.f32 %v1003_v17, %v973_v15  ;;  %v7128_v20 = vpop.f32.mrb[4].mxu1  ;;  %v921_v21 = vadd.f32 %v7113_v10, %v920_v16 }
  0xf9   : > { %8843 = vst [vmem:[#allocation8_spill] sm:$0xff] %v7128_v20  ;;  %v7131_v22 = vpop.f32.mrb[5].mxu1  ;;  %v977_v32 = vmul.f32 %v7128_v20, %v7128_v20 }
  0xfa   : > { %8844 = vst [vmem:[#allocation9_spill] sm:$0xff] %v7131_v22  ;;  %v922_v23 = vadd.f32 %v921_v21, %v7131_v22  ;;  %v975_v24 = vmul.f32 %v7131_v22, %v7131_v22  ;;  %v1005_v25 = vadd.f32 %v1004_v19, %v974_v18  ;;  %v7136_v26 = vpop.f32.mrb[6].mxu1 }
  0xfb   : > { %8845 = vst [vmem:[#allocation10_spill] sm:$0xff] %v7136_v26  ;;  %v7138_v27 = vpop.f32.mrb[7].mxu1  ;;  %v978_v35 = vmul.f32 %v7136_v26, %v7136_v26 }
  0xfc   : > { %8846 = vst [vmem:[#allocation11_spill] sm:$0xff] %v7138_v27  ;;  %v1006_v28 = vadd.f32 %v1005_v25, %v975_v24  ;;  %v923_v30 = vadd.f32 %v922_v23, %v7138_v27  ;;  %v976_v31 = vmul.f32 %v7138_v27, %v7138_v27 }
  0xfd   : > { %v5341_v39 = vpop.f32.mrb[0].mxu0 }
  0xfe   : > { %v924_v33 = vadd.f32 %v7128_v20, %v923_v30  ;;  %v1007_v34 = vadd.f32 %v1006_v28, %v976_v31  ;;  %v1083_v41 = vand.u32 4294901760, %v5341_v39  ;;  %v508_v42 = vpop.f32.mrb[1].mxu0 }
  0xff   : > { %v1080_v46 = vand.u32 4294901760, %v508_v42 }
 0x100   : > { %v925_v36 = vadd.f32 %v7136_v26, %v924_v33  ;;  %v1008_v37 = vadd.f32 %v1007_v34, %v977_v32  ;;  %v7149_v38 = vpop.f32.mrb[8].mxu1  ;;  %v7163_v51 = vsub.f32 %v5341_v39, %v1083_v41 }
 0x101   : > { %8847 = vst [vmem:[#allocation12_spill] sm:$0xff] %v7149_v38  ;;  %v7151_v40 = vpop.f32.mrb[9].mxu1  ;;  %v981_v47 = vmul.f32 %v7149_v38, %v7149_v38  ;;  %v5344_v56 = vpop.f32.mrb[2].mxu0  ;;  %v7170_v58 = vpack.c.bf16 %v1083_v41, %v1080_v46  ;;  %v7172_v59 = vsub.f32 %v508_v42, %v1080_v46 }
 0x102   : > { %8848 = vst [vmem:[#allocation13_spill] sm:$0xff] %v7151_v40  ;;  %v926_v43 = vrot.slane %v925_v36, 4  ;;  %v1009_v44 = vadd.f32 %v1008_v37, %v978_v35  ;;  %v7153_v45 = vpop.f32.mrb[10].mxu1  ;;  %v979_v48 = vmul.f32 %v7151_v40, %v7151_v40  ;;  %v8714_v57 = vand.u32 4294901760, %v7163_v51  ;;  %v518_v61 = vpop.f32.mrb[3].mxu0 }
 0x103   : > { %8849 = vst [vmem:[#allocation14_spill] sm:$0xff] %v7153_v45  ;;  %v982_v49 = vmul.f32 %v7153_v45, %v7153_v45  ;;  %v7161_v50 = vpop.f32.mrb[11].mxu1  ;;  %v1089_v60 = vand.u32 4294901760, %v5344_v56  ;;  %v8715_v4 = vand.u32 4294901760, %v7172_v59  ;;  %v7183_v5 = vpack.c.bf16 %v7163_v51, %v7172_v59  ;;  %6181 = vmatpush3.bf16.msra.mxu1 %v7170_v58 }
 0x104   : > { %8850 = vst [vmem:[#allocation15_spill] sm:$0xff] %v7161_v50  ;;  %v927_v52 = vadd.f32 %v926_v43, %v925_v36  ;;  %v1010_v53 = vrot.slane %v1009_v44, 4  ;;  %v932_v54 = vadd.f32 %v7161_v50, %v7151_v40  ;;  %v980_v55 = vmul.f32 %v7161_v50, %v7161_v50  ;;  %6182 = vmatprep.subr.bf16.mxu1 %v8724_v7 }
 0x105   : > { %v7178_v3 = vsub.f32 %v7163_v51, %v8714_v57  ;;  %v7185_v6 = vsub.f32 %v5344_v56, %v1089_v60  ;;  %v5347_v17 = vpop.f32.mrb[4].mxu0  ;;  %v7200_v23 = vsub.f32 %v7172_v59, %v8715_v4 }
 0x106   : > { %v928_v62 = vrot.slane %v927_v52, 2  ;;  %v1011_v63 = vadd.f32 %v1010_v53, %v1009_v44  ;;  %v933_v0 = vadd.f32 %v7149_v38, %v932_v54  ;;  %v1016_v1 = vadd.f32 %v980_v55, %v979_v48  ;;  %v528_v25 = vpop.f32.mrb[5].mxu0 }
 0x107   : > { %v8712_v24 = vand.u32 4294901760, %v7185_v6  ;;  %v1092_v56 = vand.u32 4294901760, %v528_v25 }
 0x108   : > { %v929_v12 = vadd.f32 %v928_v62, %v927_v52  ;;  %v1012_v13 = vrot.slane %v1011_v63, 2  ;;  %v1017_v14 = vadd.f32 %v1016_v1, %v981_v47  ;;  %v7188_v15 = vpop.f32.mrb[12].mxu1  ;;  %v934_v16 = vadd.f32 %v7153_v45, %v933_v0 }
 0x109   : > { %8851 = vst [vmem:[#allocation16_spill] sm:$0xff] %v7188_v15  ;;  %v985_v18 = vmul.f32 %v7188_v15, %v7188_v15  ;;  %v7194_v19 = vpop.f32.mrb[13].mxu1  ;;  %v7216_v39 = vsub.f32 %v7185_v6, %v8712_v24  ;;  %v7223_v46 = vpop.f32.mrb[6].mxu0  ;;  %v1095_v52 = vand.u32 4294901760, %v5347_v17 }
 0x10a   : > { %8852 = vst [vmem:[#allocation17_spill] sm:$0xff] %v7194_v19  ;;  %v930_v28 = vrot.slane %v929_v12, 1  ;;  %v1013_v30 = vadd.f32 %v1012_v13, %v1011_v63  ;;  %v935_v31 = vadd.f32 %v934_v16, %v7194_v19  ;;  %v983_v32 = vmul.f32 %v7194_v19, %v7194_v19  ;;  %v7206_v33 = vpop.f32.mrb[14].mxu1  ;;  %v7226_v53 = vpop.f32.mrb[7].mxu0 }
 0x10b   : > { %8853 = vst [vmem:[#allocation18_spill] sm:$0xff] %v7206_v33  ;;  %v1018_v34 = vadd.f32 %v1017_v14, %v982_v49  ;;  %v986_v35 = vmul.f32 %v7206_v33, %v7206_v33  ;;  %v7210_v36 = vpop.f32.mrb[15].mxu1  ;;  %v1086_v49 = vand.u32 4294901760, %v518_v61  ;;  %v1101_v62 = vand.u32 4294901760, %v7223_v46 }
 0x10c   : > { %8854 = vst [vmem:[#allocation19_spill] sm:$0xff] %v7210_v36  ;;  %v7218_v41 = vadd.f32 %v930_v28, %v929_v12  ;;  %v1014_v42 = vrot.slane %v1013_v30, 1  ;;  %v936_v43 = vadd.f32 %v935_v31, %v7210_v36  ;;  %v984_v44 = vmul.f32 %v7210_v36, %v7210_v36 }
 0x10d   : > { %v1019_v47 = vadd.f32 %v1018_v34, %v983_v32  ;;  %v7232_v0 = vpack.c.bf16 %v1089_v60, %v1086_v49  ;;  %v7234_v1 = vsub.f32 %v518_v61, %v1086_v49  ;;  %v7236_v12 = vsub.f32 %v5347_v17, %v1095_v52  ;;  %v7248_v31 = vpop.f32.mrb[8].mxu0 }
 0x10e   : > { %v7228_v54 = vadd.f32 %v1014_v42, %v1013_v30  ;;  %v937_v55 = vadd.f32 %v7188_v15, %v936_v43  ;;  %v7241_v16 = vpack.c.bf16 %v1095_v52, %v1092_v56  ;;  %v7243_v28 = vsub.f32 %v528_v25, %v1092_v56  ;;  %v7260_v25 = vpop.f32.mrb[9].mxu0 }
 0x10f   : > { %v1020_v63 = vadd.f32 %v1019_v47, %v984_v44  ;;  %v7246_v30 = vsub.f32 %v7223_v46, %v1101_v62  ;;  %v8713_v17 = vand.u32 4294901760, %v7234_v1  ;;  %v7257_v34 = vpack.c.bf16 %v7185_v6, %v7234_v1  ;;  %6184 = vmatpush3.bf16.msra.mxu1 %v7232_v0 }
 0x110   : > { %v938_v13 = vadd.f32 %v7206_v33, %v937_v55  ;;  %v7239_v14 = vpop.f32.mrb[16].mxu1  ;;  %v8716_v44 = vand.u32 4294901760, %v7236_v12  ;;  %v8718_v46 = vand.u32 4294901760, %v7243_v28  ;;  %6185 = vmatprep.subr.bf16.mxu1 %v8724_v7  ;;  %v7280_v56 = vpack.c.bf16 %v7236_v12, %v7243_v28 }
 0x111   : > { %8855 = vst [vmem:[#allocation20_spill] sm:$0xff] %v7239_v14  ;;  %v1021_v32 = vadd.f32 %v1020_v63, %v985_v18  ;;  %v989_v60 = vmul.f32 %v7239_v14, %v7239_v14  ;;  %v7252_v61 = vpop.f32.mrb[17].mxu1  ;;  %v7276_v55 = vsub.f32 %v7234_v1, %v8713_v17  ;;  %v7291_v24 = vpop.f32.mrb[10].mxu0  ;;  %v8867_v45 = vand.u32 4294901760, %v7216_v39 }
 0x112   : > { %8856 = vst [vmem:[#allocation21_spill] sm:$0xff] %v7252_v61  ;;  %v939_v42 = vrot.slane %v938_v13, 4  ;;  %v987_v43 = vmul.f32 %v7252_v61, %v7252_v61  ;;  %v7264_v18 = vpop.f32.mrb[18].mxu1  ;;  %v7301_v4 = vpop.f32.mrb[11].mxu0  ;;  %v1113_v39 = vand.u32 4294901760, %v7291_v24 }
 0x113   : > { %8857 = vst [vmem:[#allocation22_spill] sm:$0xff] %v7264_v18  ;;  %v1022_v47 = vadd.f32 %v1021_v32, %v986_v35  ;;  %v990_v49 = vmul.f32 %v7264_v18, %v7264_v18  ;;  %v7271_v52 = vpop.f32.mrb[19].mxu1  ;;  %v7289_v32 = vsub.f32 %v7236_v12, %v8716_v44  ;;  %v1189_v57 = vand.u32 4294901760, %v7276_v55  ;;  %6187 = vmatpush3.bf16.msra.mxu1 %v7241_v16 }
 0x114   : > { %8858 = vst [vmem:[#allocation23_spill] sm:$0xff] %v7271_v52  ;;  %v940_v63 = vadd.f32 %v939_v42, %v938_v13  ;;  %v945_v29 = vadd.f32 %v7271_v52, %v7252_v61  ;;  %v988_v35 = vmul.f32 %v7271_v52, %v7271_v52  ;;  %v7297_v13 = vsub.f32 %v7243_v28, %v8718_v46 }
 0x115   : > { %v1023_v17 = vrot.slane %v1022_v47, 4  ;;  %v8723_v42 = vand.u32 4294901760, %v7246_v30  ;;  %6188 = vmatprep.subr.bf16.mxu1 %v8724_v7  ;;  %v1098_v61 = vand.u32 4294901760, %v7226_v53  ;;  %v7381_v38 = vpack.c.bf16 %v8867_v45, %v1189_v57 }
 0x116   : > { %v941_v48 = vrot.slane %v940_v63, 2  ;;  %v946_v44 = vadd.f32 %v7239_v14, %v945_v29  ;;  %v1029_v21 = vadd.f32 %v988_v35, %v987_v43  ;;  %v8860_v43 = vand.u32 4294901760, %v7200_v23 }
 0x117   : > { %v1024_v55 = vadd.f32 %v1023_v17, %v1022_v47  ;;  %v7310_v46 = vsub.f32 %v7246_v30, %v8723_v42  ;;  %v8861_v35 = vand.u32 4294901760, %v7178_v3  ;;  %v7322_v47 = vpop.f32.mrb[12].mxu0  ;;  %8868 = vst [vmem:[#allocation29_spill] sm:$0xff] %v7381_v38  ;;  %v8874_v40 = vand.u32 4294901760, %v7297_v13 }
 0x118   : > { %v942_v33 = vadd.f32 %v941_v48, %v940_v63  ;;  %v1030_v15 = vadd.f32 %v1029_v21, %v989_v60  ;;  %v7313_v36 = vpop.f32.mrb[20].mxu1  ;;  %v947_v29 = vadd.f32 %v7264_v18, %v946_v44  ;;  %v7329_v48 = vpack.c.bf16 %v1101_v62, %v1098_v61  ;;  %v7331_v60 = vpop.f32.mrb[13].mxu0 }
 0x119   : > { %8859 = vst [vmem:[#allocation24_spill] sm:$0xff] %v7313_v36  ;;  %v7320_v17 = vpack.c.bf16 %v8861_v35, %v8860_v43  ;;  %v1025_v37 = vrot.slane %v1024_v55, 2  ;;  %v993_v42 = vmul.f32 %v7313_v36, %v7313_v36  ;;  %v7326_v52 = vpop.f32.mrb[21].mxu1  ;;  %v7344_v62 = vsub.f32 %v7226_v53, %v1098_v61 }
 0x11a   : > { %8863 = vst [vmem:[#allocation26_spill] sm:$0xff] %v7326_v52  ;;  %v943_v44 = vrot.slane %v942_v33, 1  ;;  %v948_v23 = vadd.f32 %v947_v29, %v7326_v52  ;;  %v991_v3 = vmul.f32 %v7326_v52, %v7326_v52  ;;  %v1031_v63 = vadd.f32 %v1030_v15, %v990_v49  ;;  %v7336_v43 = vpop.f32.mrb[22].mxu1  ;;  %6190 = vmatpush3.bf16.msra.mxu1 %v7329_v48 }
 0x11b   : > { %8862 = vst [vmem:[#allocation25_spill] sm:$0xff] %v7320_v17  ;;  %8864 = vst [vmem:[#allocation27_spill] sm:$0xff] %v7336_v43  ;;  %6205 = vmatpush3.bf16.msra.mxu0 %v7320_v17  ;;  %v1026_v35 = vadd.f32 %v1025_v37, %v1024_v55  ;;  %v994_v7 = vmul.f32 %v7336_v43, %v7336_v43  ;;  %v7341_v21 = vpop.f32.mrb[23].mxu1  ;;  %v1107_v18 = vand.u32 4294901760, %v7248_v31  ;;  %v8866_v29 = vmov 0.0|0.0   ;;  %v7353_v55 = vpop.f32.mrb[14].mxu0 }
 0x11c   : > { %8865 = vst [vmem:[#allocation28_spill] sm:$0xff] %v7341_v21  ;;  %6206 = vmatprep.subr.bf16.mxu0 %v8866_v29  ;;  %v944_v15 = vadd.f32 %v943_v44, %v942_v33  ;;  %v1032_v49 = vadd.f32 %v1031_v63, %v991_v3  ;;  %v949_v52 = vadd.f32 %v948_v23, %v7341_v21  ;;  %v8736_v53 = vand.u32 4294901760, %v7344_v62  ;;  %v7363_v33 = vpop.f32.mrb[15].mxu0 }
 0x11d   : > { %v992_v37 = vmul.f32 %v7341_v21, %v7341_v21  ;;  %6191 = vmatprep.subr.bf16.mxu1 %v8866_v29  ;;  %v1027_v17 = vrot.slane %v1026_v35, 1  ;;  %v7358_v61 = vpack.c.bf16 %v7246_v30, %v7344_v62  ;;  %v7361_v14 = vsub.f32 %v7248_v31, %v1107_v18 }
 0x11e   : > { %v7367_v44 = vsel %vm1059_vm4, %v944_v15, %v7218_v41  ;;  %v950_v23 = vadd.f32 %v7313_v36, %v949_v52  ;;  %v1104_v63 = vand.u32 4294901760, %v7260_v25  ;;  %v7376_v19 = vsub.f32 %v7344_v62, %v8736_v53 }
 0x11f   : > { %v1033_v3 = vadd.f32 %v1032_v49, %v992_v37  ;;  %v7371_v21 = vadd.f32 %v1027_v17, %v1026_v35  ;;  %v8735_v31 = vand.u32 4294901760, %v7361_v14  ;;  %6208 = vmatpush3.bf16.msra.mxu0 %v7381_v38  ;;  %v7420_v53 = vsub.f32 %v7291_v24, %v1113_v39 }
 0x120   : > { %v951_v41 = vadd.f32 %v7336_v43, %v950_v23  ;;  %v7384_v52 = vpop.f32.mrb[24].mxu1  ;;  %v7386_v49 = vpack.c.bf16 %v1107_v18, %v1104_v63  ;;  %v7389_v17 = vsub.f32 %v7260_v25, %v1104_v63  ;;  %6209 = vmatprep.subr.bf16.mxu0 %v8866_v29  ;;  %v1110_v24 = vand.u32 4294901760, %v7301_v4 }
 0x121   : > { %v1034_v15 = vadd.f32 %v1033_v3, %v993_v42  ;;  %8869 = vst [vmem:[#allocation30_spill] sm:$0xff] %v7384_v52  ;;  %v997_v37 = vmul.f32 %v7384_v52, %v7384_v52  ;;  %v7397_v45 = vsub.f32 %v7361_v14, %v8735_v31  ;;  %v7399_v57 = vpop.f32.mrb[25].mxu1  ;;  %v8750_v50 = vand.u32 4294901760, %v7420_v53 }
 0x122   : > { %8870 = vst [vmem:[#allocation31_spill] sm:$0xff] %v7399_v57  ;;  %v952_v18 = vrot.slane %v951_v41, 4  ;;  %v995_v25 = vmul.f32 %v7399_v57, %v7399_v57  ;;  %v7406_v3 = vpop.f32.mrb[26].mxu1  ;;  %6193 = vmatpush3.bf16.msra.mxu1 %v7386_v49  ;;  %v7413_v31 = vpack.c.bf16 %v7361_v14, %v7389_v17  ;;  %v8873_v38 = vand.u32 4294901760, %v7389_v17 }
 0x123   : > { %v1035_v42 = vadd.f32 %v1034_v15, %v994_v7  ;;  %8871 = vst [vmem:[#allocation32_spill] sm:$0xff] %v7406_v3  ;;  %v998_v7 = vmul.f32 %v7406_v3, %v7406_v3  ;;  %v7417_v15 = vpop.f32.mrb[27].mxu1  ;;  %6194 = vmatprep.subr.bf16.mxu1 %v8866_v29  ;;  %v7445_v22 = vpack.c.bf16 %v1113_v39, %v1110_v24 }
 0x124   : > { %8872 = vst [vmem:[#allocation33_spill] sm:$0xff] %v7417_v15  ;;  %v953_v35 = vadd.f32 %v952_v18, %v951_v41  ;;  %v7426_v63 = vsub.f32 %v7389_v17, %v8873_v38  ;;  %v958_v43 = vadd.f32 %v7417_v15, %v7399_v57  ;;  %v996_v36 = vmul.f32 %v7417_v15, %v7417_v15 }
 0x125   : > { %v1036_v23 = vrot.slane %v1035_v42, 4  ;;  %v8875_v41 = vand.u32 4294901760, %v7289_v32  ;;  %v1251_v15 = vsub.f32 %v7420_v53, %v8750_v50  ;;  %v7448_v10 = vsub.f32 %v7301_v4, %v1110_v24 }
 0x126   : > { %v954_v26 = vrot.slane %v953_v35, 2  ;;  %v1231_v38 = vand.u32 4294901760, %v7426_v63  ;;  %v959_v27 = vadd.f32 %v7384_v52, %v958_v43  ;;  %v1042_v57 = vadd.f32 %v996_v36, %v995_v25  ;;  %6196 = vmatpush3.bf16.msra.mxu1 %v7445_v22 }
 0x127   : > { %v7438_v18 = vpack.c.bf16 %v8875_v41, %v8874_v40  ;;  %v1037_v20 = vadd.f32 %v1036_v23, %v1035_v42  ;;  %v1119_v42 = vand.u32 4294901760, %v7322_v47  ;;  %v1252_v25 = vand.u32 4294901760, %v1251_v15  ;;  %6197 = vmatprep.subr.bf16.mxu1 %v8866_v29 }
 0x128   : > { %v955_v40 = vadd.f32 %v954_v26, %v953_v35  ;;  %v7451_v13 = vpop.f32.mrb[28].mxu1  ;;  %v960_v43 = vadd.f32 %v7406_v3, %v959_v27  ;;  %v1043_v36 = vadd.f32 %v1042_v57, %v997_v37  ;;  %v8756_v39 = vand.u32 4294901760, %v7448_v10 }
 0x129   : > { %8876 = vst [vmem:[#allocation34_spill] sm:$0xff] %v7438_v18  ;;  %6211 = vmatpush3.bf16.msra.mxu0 %v7438_v18  ;;  %v1038_v32 = vrot.slane %v1037_v20, 2  ;;  %8877 = vst [vmem:[#allocation35_spill] sm:$0xff] %v7451_v13  ;;  %v7459_v4 = vpack.c.bf16 %v7420_v53, %v7448_v10  ;;  %v7461_v23 = vpop.f32.mrb[29].mxu1  ;;  %v1001_v27 = vmul.f32 %v7451_v13, %v7451_v13  ;;  %v1116_v18 = vand.u32 4294901760, %v7331_v60 }
 0x12a   : > { %6212 = vmatprep.subr.bf16.mxu0 %v8866_v29  ;;  %8879 = vst [vmem:[#allocation37_spill] sm:$0xff] %v7461_v23  ;;  %v956_v26 = vrot.slane %v955_v40, 1  ;;  %v7467_v63 = vsub.f32 %v7322_v47, %v1119_v42  ;;  %v7469_v37 = vpop.f32.mrb[30].mxu1  ;;  %v1244_v57 = vsub.f32 %v7448_v10, %v8756_v39  ;;  %v961_v15 = vadd.f32 %v960_v43, %v7461_v23 }
 0x12b   : > { %8878 = vst [vmem:[#allocation36_spill] sm:$0xff] %v7459_v4  ;;  %v1039_v35 = vadd.f32 %v1038_v32, %v1037_v20  ;;  %v999_v20 = vmul.f32 %v7461_v23, %v7461_v23  ;;  %v1044_v24 = vadd.f32 %v1043_v36, %v998_v7  ;;  %v7478_v41 = vpop.f32.mrb[31].mxu1  ;;  %v1002_v8 = vmul.f32 %v7469_v37, %v7469_v37 }
 0x12c   : > { %v957_v32 = vadd.f32 %v956_v26, %v955_v40  ;;  %v1264_v50 = vand.u32 4294901760, %v7467_v63  ;;  %v1245_v3 = vand.u32 4294901760, %v1244_v57  ;;  %v962_v39 = vadd.f32 %v961_v15, %v7478_v41 }
 0x12d   : > { %v1040_v47 = vrot.slane %v1039_v35, 1  ;;  %v1045_v52 = vadd.f32 %v1044_v24, %v999_v20  ;;  %v7486_v23 = vpack.c.bf16 %v1119_v42, %v1116_v18  ;;  %v1256_v7 = vsub.f32 %v7331_v60, %v1116_v18 }
 0x12e   : > { %v1265_v11 = vsub.f32 %v7467_v63, %v1264_v50  ;;  %v963_v40 = vadd.f32 %v7451_v13, %v962_v39  ;;  %v1000_v36 = vmul.f32 %v7478_v41, %v7478_v41  ;;  %v8880_v26 = vand.u32 4294901760, %v7376_v19 }
 0x12f   : > { %v1041_v43 = vadd.f32 %v1040_v47, %v1039_v35  ;;  %v8881_v57 = vand.u32 4294901760, %v7310_v46  ;;  %v1125_v15 = vand.u32 4294901760, %v7353_v55  ;;  %v1257_v24 = vand.u32 4294901760, %v1256_v7  ;;  %6199 = vmatpush3.bf16.msra.mxu1 %v7486_v23 }
 0x130   : > { %v1266_v35 = vand.u32 4294901760, %v1265_v11  ;;  %v7500_v42 = vpack.c.bf16 %v7467_v63, %v1256_v7  ;;  %v1122_v60 = vand.u32 4294901760, %v7363_v33  ;;  %v964_v18 = vadd.f32 %v7469_v37, %v963_v40  ;;  %6200 = vmatprep.subr.bf16.mxu1 %v8866_v29 }
 0x131   : > { %v7496_v20 = vpack.c.bf16 %v8881_v57, %v8880_v26  ;;  %v1046_v39 = vadd.f32 %v1045_v52, %v1000_v36  ;;  %v1277_v19 = vsub.f32 %v7353_v55, %v1125_v15  ;;  %v8883_v46 = vand.u32 4294901760, %v7397_v45 }
 0x132   : > { %8882 = vst [vmem:[#allocation38_spill] sm:$0xff] %v7500_v42  ;;  %v1258_v11 = vsub.f32 %v1256_v7, %v1257_v24  ;;  %v7511_v26 = vpack.c.bf16 %v1125_v15, %v1122_v60  ;;  %v1270_v63 = vsub.f32 %v7363_v33, %v1122_v60  ;;  %v7515_v57 = vpack.c.bf16 %v1252_v25, %v1245_v3 }
 0x133   : > { %6214 = vmatpush3.bf16.msra.mxu0 %v7496_v20  ;;  %v7509_v47 = vpack.c.bf16 %v8883_v46, %v1231_v38  ;;  %v965_v13 = vrot.slane %v964_v18, 4  ;;  %v1047_v40 = vadd.f32 %v1046_v39, %v1001_v27  ;;  %v1278_v52 = vand.u32 4294901760, %v1277_v19 }
 0x134   : > { %6215 = vmatprep.subr.bf16.mxu0 %v8866_v29  ;;  %v1062_v55 = vsel %vm1061_vm15, %v957_v32, %v7367_v44  ;;  %v1259_v45 = vand.u32 4294901760, %v1258_v11  ;;  %v1271_v38 = vand.u32 4294901760, %v1270_v63  ;;  %v7520_v36 = vpack.c.bf16 %v1277_v19, %v1270_v63  ;;  %6202 = vmatpush3.bf16.msra.mxu1 %v7511_v26 }
 0x135   : > { %v1071_v33 = vsel %vm1070_vm1, %v7371_v21, %v7228_v54  ;;  %v966_v3 = vadd.f32 %v965_v13, %v964_v18  ;;  %v1048_v25 = vadd.f32 %v1047_v40, %v1002_v8  ;;  %v1279_v7 = vsub.f32 %v1277_v19, %v1278_v52 }
 0x136   : > { %8884 = vst [vmem:[#allocation39_spill] sm:$0xff] %v7520_v36  ;;  %v1073_v27 = vsel %vm1072_vm2, %v1041_v43, %v1071_v33  ;;  %v1272_v15 = vsub.f32 %v1270_v63, %v1271_v38  ;;  %v7529_v44 = vpack.c.bf16 %v1266_v35, %v1259_v45  ;;  %v8885_v32 = vand.u32 4294901760, %v7172_v59 }
 0x137   : > { %6217 = vmatpush3.bf16.msra.mxu0 %v7509_v47  ;;  %v8886_v60 = vand.u32 4294901760, %v7163_v51  ;;  %v8888_v54 = vand.u32 4294901760, %v7234_v1  ;;  %v8889_v8 = vand.u32 4294901760, %v7185_v6  ;;  %v967_v13 = vrot.slane %v966_v3, 2 }
 0x138   : > { %6218 = vmatprep.subr.bf16.mxu0 %v8866_v29  ;;  %v1049_v18 = vrot.slane %v1048_v25, 4  ;;  %v1280_v43 = vand.u32 4294901760, %v1279_v7  ;;  %v8891_v19 = vand.u32 4294901760, %v7243_v28  ;;  %v8892_v35 = vand.u32 4294901760, %v7236_v12 }
 0x139   : > { %v7535_v39 = vpack.c.bf16 %v8886_v60, %v8885_v32  ;;  %v7541_v21 = vpack.c.bf16 %v8889_v8, %v8888_v54  ;;  %v1273_v59 = vand.u32 4294901760, %v1272_v15  ;;  %v8894_v51 = vand.u32 4294901760, %v7344_v62 }
 0x13a   : > { %v7547_v46 = vpack.c.bf16 %v8892_v35, %v8891_v19  ;;  %v8895_v11 = vand.u32 4294901760, %v7246_v30  ;;  %v8897_v6 = vand.u32 4294901760, %v7389_v17  ;;  %v8898_v1 = vand.u32 4294901760, %v7361_v14  ;;  %v6705_v19 = vld [vmem:[%s8703_s2 + $0x10] sm:$0xff]   ;;  %v6706_v35 = vld [vmem:[%s8703_s2 + $0x18] sm:$0xff]  }
 0x13b   : > { %8887 = vst [vmem:[#allocation40_spill] sm:$0xff] %v7535_v39  ;;  %8890 = vst [vmem:[#allocation41_spill] sm:$0xff] %v7541_v21  ;;  %v8900_v45 = vand.u32 4294901760, %v7448_v10  ;;  %v8901_v28 = vand.u32 4294901760, %v7420_v53  ;;  %v968_v33 = vadd.f32 %v967_v13, %v966_v3  ;;  %v1050_v7 = vadd.f32 %v1049_v18, %v1048_v25  ;;  %6220 = vmatpush3.bf16.msra.mxu0 %v7515_v57  ;;  %v6703_v18 = vld [vmem:[%s8703_s2] sm:$0xff]  }
 0x13c   : > { %8893 = vst [vmem:[#allocation42_spill] sm:$0xff] %v7547_v46  ;;  %v7553_v63 = vpack.c.bf16 %v8895_v11, %v8894_v51  ;;  %v7559_v40 = vpack.c.bf16 %v8898_v1, %v8897_v6  ;;  %v7568_v62 = vpack.c.bf16 %v1264_v50, %v1257_v24  ;;  %v7570_v30 = vpack.c.bf16 %v1278_v52, %v1271_v38  ;;  %v6708_v51 = vld [vmem:[%s8703_s2 + $0x28] sm:$0xff]   ;;  %v6709_v11 = vld [vmem:[%s8703_s2 + $0x30] sm:$0xff]   ;;  %v6710_v6 = vld [vmem:[%s8703_s2 + $0x38] sm:$0xff]  }
 0x13d   : > { %v7565_v12 = vpack.c.bf16 %v8901_v28, %v8900_v45  ;;  %6221 = vmatprep.subr.bf16.mxu0 %v8866_v29  ;;  %v7573_v17 = vpack.c.bf16 %v1280_v43, %v1273_v59  ;;  %v969_v14 = vrot.slane %v968_v33, 1  ;;  %v1051_v15 = vrot.slane %v1050_v7, 2  ;;  %5607 = vmatprep.subr.bf16.mxu1 %v6703_v18  ;;  %v6704_v43 = vld [vmem:[%s8703_s2 + $0x8] sm:$0xff]   ;;  %v6707_v59 = vld [vmem:[%s8703_s2 + $0x20] sm:$0xff]  }
 0x13e   : > { %8896 = vst [vmem:[#allocation43_spill] sm:$0xff] %v7553_v63  ;;  %8899 = vst [vmem:[#allocation44_spill] sm:$0xff] %v7559_v40 }
 0x13f   : > { %8902 = vst [vmem:[#allocation45_spill] sm:$0xff] %v7565_v12  ;;  %8903 = vst [vmem:[#allocation46_spill] sm:$0xff] %v7568_v62  ;;  %v970_v10 = vadd.f32 %v969_v14, %v968_v33  ;;  %v1052_v32 = vadd.f32 %v1051_v15, %v1050_v7  ;;  %6223 = vmatpush3.bf16.msra.mxu0 %v7529_v44 }
 0x140   : > { %8904 = vst [vmem:[#allocation47_spill] sm:$0xff] %v7570_v30  ;;  %6224 = vmatprep.subr.bf16.mxu0 %v8866_v29 }
 0x141   : > { %v1053_v53 = vrot.slane %v1052_v32, 1  ;;  %v1064_v3 = vsel %vm1063_vm3, %v970_v10, %v1062_v55  ;;  %v8905_v55 = vmov 0.0  }
 0x143   : > { %v1054_v50 = vadd.f32 %v1053_v53, %v1052_v32  ;;  %6226 = vmatpush3.bf16.msra.mxu0 %v7573_v17  ;;  %v6801_v53 = vmov 1966171168  }
 0x144   : > { %6227 = vmatprep.subr.bf16.mxu0 %v8866_v29 }
 0x145   : > { %v1075_v24 = vsel %vm1074_vm5, %v1054_v50, %v1073_v27 }
 0x146   : > { %v1078_v52 = vsel %vm1077_vm0, %v1064_v3, %v1075_v24  ;;  %v1749_v3 = vunpack.c.l.s4 %v6801_v53  ;;  %v4856_v24 = vld [vmem:[%s8704_s3] ss:$0 sm:$0xff] }
 0x147   : > { %v7582_v38 = vand.u32 4294901760, %v1078_v52 }
 0x148   : > { %v1750_v50 = vunpack.c.0.s8 %v1749_v3 }
 0x149   : > { %v1161_v25 = vsub.f32 %v1078_v52, %v7582_v38  ;;  %5465 = vmatmul.mubr.f32.vlgmr.msra.gmra.mrb[16].mxu0 %v7582_v38 }
 0x14a   : > { %6229 = vmatpush3.bf16.msra.mxu0 %v7183_v5  ;;  %5499 = vmatprep.mubr.msk.f32.mxu0 %vm6800_vm14, %v8905_v55 }
 0x14b   : > { %6230 = vmatprep.subr.bf16.mxu0 %v8866_v29  ;;  %v1162_v60 = vand.u32 4294901760, %v1161_v25 }
 0x14d   : > { %v1163_v54 = vsub.f32 %v1161_v25, %v1162_v60 }
 0x14e   : > { %6232 = vmatpush3.bf16.msra.mxu0 %v7257_v34 }
 0x14f   : > { %6233 = vmatprep.subr.bf16.mxu0 %v8866_v29  ;;  %v1164_v27 = vand.u32 4294901760, %v1163_v54 }
 0x151   : > { %5430 = vmatmul.mubr.f32.vlgmr.msra.gmra.mrb[32].mxu1 %v1164_v27  ;;  %v4857_v27 = vld [vmem:[%s8705_s4] ss:$0 sm:$0xff] }
 0x152   : > { %6235 = vmatpush3.bf16.msra.mxu0 %v7280_v56  ;;  %5608 = vmatpush3.bf16.msra.mxu1 %v6703_v18 }
 0x153   : > { %6236 = vmatprep.subr.bf16.mxu0 %v8866_v29  ;;  %5609 = vmatprep.subr.bf16.mxu1 %v6704_v43 }
 0x156   : > { %6238 = vmatpush3.bf16.msra.mxu0 %v7358_v61  ;;  %5610 = vmatpush3.bf16.msra.mxu1 %v6704_v43 }
 0x157   : > { %6239 = vmatprep.subr.bf16.mxu0 %v8866_v29  ;;  %5611 = vmatprep.subr.bf16.mxu1 %v6705_v19 }
 0x15a   : > { %6241 = vmatpush3.bf16.msra.mxu0 %v7413_v31  ;;  %5612 = vmatpush3.bf16.msra.mxu1 %v6705_v19 }
 0x15b   : > { %6242 = vmatprep.subr.bf16.mxu0 %v8866_v29  ;;  %5613 = vmatprep.subr.bf16.mxu1 %v6706_v35 }
 0x15e   : > { %6244 = vmatpush3.bf16.msra.mxu0 %v7459_v4  ;;  %5614 = vmatpush3.bf16.msra.mxu1 %v6706_v35 }
 0x15f   : > { %6245 = vmatprep.subr.bf16.mxu0 %v8866_v29  ;;  %5615 = vmatprep.subr.bf16.mxu1 %v6707_v59 }
 0x162   : > { %6247 = vmatpush3.bf16.msra.mxu0 %v7500_v42  ;;  %5616 = vmatpush3.bf16.msra.mxu1 %v6707_v59 }
 0x163   : > { %6248 = vmatprep.subr.bf16.mxu0 %v8866_v29  ;;  %5617 = vmatprep.subr.bf16.mxu1 %v6708_v51 }
 0x166   : > { %6250 = vmatpush3.bf16.msra.mxu0 %v7520_v36  ;;  %5618 = vmatpush3.bf16.msra.mxu1 %v6708_v51 }
 0x167   : > { %6251 = vmatprep.subr.bf16.mxu0 %v8866_v29  ;;  %5619 = vmatprep.subr.bf16.mxu1 %v6709_v11 }
 0x169   : > { %5500 = vmatmul.mubr.f32.vlgmr.msra.gmra.mrb[16].mxu0 %v1161_v25  ;;  %v7688_v25 = vsub.s32 %v1750_v50, %v6897_v2  ;;  %v8910_v50 = vld [vmem:[#allocation6_spill] sm:$0xff] }
 0x16a   : > { %6253 = vmatpush3.bf16.msra.mxu0 %v7170_v58  ;;  %5534 = vmatprep.mubr.msk.f32.mxu0 %vm6800_vm14, %v8905_v55 }
 0x16b   : > { %6254 = vmatprep.subr.bf16.mxu0 %v8866_v29  ;;  %5620 = vmatpush3.bf16.msra.mxu1 %v6709_v11  ;;  %8906 = vst [vmem:[#allocation48_spill] sm:$0xff] %v7688_v25 }
 0x16c   : > { %5621 = vmatprep.subr.bf16.mxu1 %v6710_v6 }
 0x16e   : > { %6256 = vmatpush3.bf16.msra.mxu0 %v7232_v0 }
 0x16f   : > { %6257 = vmatprep.subr.bf16.mxu0 %v8866_v29  ;;  %5622 = vmatpush3.bf16.msra.mxu1 %v6710_v6 }
 0x170   : > { %6323 = vmatprep.subr.bf16.mxu1 %v8866_v29 }
 0x172   : > { %6259 = vmatpush3.bf16.msra.mxu0 %v7241_v16 }
 0x173   : > { %6260 = vmatprep.subr.bf16.mxu0 %v8866_v29 }
 0x176   : > { %6262 = vmatpush3.bf16.msra.mxu0 %v7329_v48 }
 0x177   : > { %6263 = vmatprep.subr.bf16.mxu0 %v8866_v29 }
 0x17a   : > { %6265 = vmatpush3.bf16.msra.mxu0 %v7386_v49 }
 0x17b   : > { %6266 = vmatprep.subr.bf16.mxu0 %v8866_v29 }
 0x17e   : > { %6268 = vmatpush3.bf16.msra.mxu0 %v7445_v22 }
 0x17f   : > { %6269 = vmatprep.subr.bf16.mxu0 %v8866_v29 }
 0x182   : > { %6271 = vmatpush3.bf16.msra.mxu0 %v7486_v23 }
 0x183   : > { %6272 = vmatprep.subr.bf16.mxu0 %v8866_v29 }
 0x186   : > { %6274 = vmatpush3.bf16.msra.mxu0 %v7511_v26 }
 0x187   : > { %6275 = vmatprep.subr.bf16.mxu0 %v8866_v29 }
 0x189   : > { %5535 = vmatmul.mubr.f32.vlgmr.msra.gmra.mrb[16].mxu0 %v1162_v60 }
 0x18a   : > { %6277 = vmatpush3.bf16.msra.mxu0 %v7535_v39  ;;  %5569 = vmatprep.mubr.msk.f32.mxu0 %vm6800_vm14, %v8905_v55 }
 0x18b   : > { %6278 = vmatprep.subr.bf16.mxu0 %v8866_v29 }
 0x18e   : > { %6280 = vmatpush3.bf16.msra.mxu0 %v7541_v21 }
 0x18f   : > { %6281 = vmatprep.subr.bf16.mxu0 %v8866_v29 }
 0x192   : > { %6283 = vmatpush3.bf16.msra.mxu0 %v7547_v46 }
 0x193   : > { %6284 = vmatprep.subr.bf16.mxu0 %v8866_v29 }
 0x196   : > { %6286 = vmatpush3.bf16.msra.mxu0 %v7553_v63 }
 0x197   : > { %6287 = vmatprep.subr.bf16.mxu0 %v8866_v29 }
 0x19a   : > { %6289 = vmatpush3.bf16.msra.mxu0 %v7559_v40  ;;  %v8916_v40 = vld [vmem:[#allocation15_spill] sm:$0xff] }
 0x19b   : > { %6290 = vmatprep.subr.bf16.mxu0 %v8866_v29 }
 0x19e   : > { %6292 = vmatpush3.bf16.msra.mxu0 %v7565_v12 }
 0x19f   : > { %6293 = vmatprep.subr.bf16.mxu0 %v8866_v29 }
 0x1a2   : > { %6295 = vmatpush3.bf16.msra.mxu0 %v7568_v62 }
 0x1a3   : > { %6296 = vmatprep.subr.bf16.mxu0 %v8866_v29 }
 0x1a6   : > { %6298 = vmatpush3.bf16.msra.mxu0 %v7570_v30 }
 0x1a7   : > { %6299 = vmatprep.subr.bf16.mxu0 %v8866_v29 }
 0x1a9   : > { %5570 = vmatmul.mubr.f32.vlgmr.msra.gmra.mrb[16].mxu0 %v7582_v38 }
 0x1aa   : > { %6301 = vmatpush3.bf16.msra.mxu0 %v7170_v58  ;;  %5604 = vmatprep.mubr.msk.f32.mxu0 %vm6800_vm14, %v8905_v55 }
 0x1ab   : > { %6302 = vmatprep.subr.bf16.mxu0 %v8866_v29 }
 0x1ae   : > { %6304 = vmatpush3.bf16.msra.mxu0 %v7232_v0 }
 0x1af   : > { %6305 = vmatprep.subr.bf16.mxu0 %v8866_v29 }
 0x1b2   : > { %6307 = vmatpush3.bf16.msra.mxu0 %v7241_v16 }
 0x1b3   : > { %6308 = vmatprep.subr.bf16.mxu0 %v8866_v29 }
 0x1b6   : > { %6310 = vmatpush3.bf16.msra.mxu0 %v7329_v48 }
 0x1b7   : > { %6311 = vmatprep.subr.bf16.mxu0 %v8866_v29 }
 0x1ba   : > { %6313 = vmatpush3.bf16.msra.mxu0 %v7386_v49 }
 0x1bb   : > { %6314 = vmatprep.subr.bf16.mxu0 %v8866_v29 }
 0x1be   : > { %6316 = vmatpush3.bf16.msra.mxu0 %v7445_v22 }
 0x1bf   : > { %6317 = vmatprep.subr.bf16.mxu0 %v8866_v29 }
 0x1c2   : > { %6319 = vmatpush3.bf16.msra.mxu0 %v7486_v23 }
 0x1c3   : > { %6320 = vmatprep.subr.bf16.mxu0 %v8866_v29 }
 0x1c6   : > { %6322 = vmatpush3.bf16.msra.mxu0 %v7511_v26 }
 0x1c9   : > { %5605 = vmatmul.mubr.f32.vlgmr.msra.gmra.mrb[16].mxu0 %v7582_v38 }
 0x224   : > { %v1166_v8 = vpop.f32.mrb[32].mxu1 }
 0x225   : > { %v5431_v13 = vpop.f32.mrb[33].mxu1 }
 0x29c   : > { %v1716_v1 = vpop.f32.mrb[16].mxu0 }
 0x29d   : > { %v6611_v45 = vadd.f32 %v1716_v1, %v1166_v8  ;;  %v5606_v28 = vpop.f32.mrb[17].mxu0  ;;  %v7694_v8 = vsub.s32 0, %v6897_v2 }
 0x29f   : > { %v1720_v33 = vmul.f32 0.00390625, %v6611_v45  ;;  %8907 = vst [vmem:[#allocation49_spill] sm:$0xff] %v7694_v8 }
 0x2a1   : > { %v1721_v7 = vmul.f32 %v1720_v33, %v1720_v33 }
 0x2a3   : > { %v1723_v14 = vrot.slane %v1721_v7, 4 }
 0x2a5   : > { %v1725_v15 = vsub.f32 %v1720_v33, %v1723_v14  ;;  %v8908_v14 = vld [vmem:[#allocation7_spill] sm:$0xff] }
 0x2a7   : > { %v1726_v10 = vmax.f32 %v1725_v15, 0.0 }
 0x2a9   : > { %v1727_v32 = vadd.f32 1e-05, %v1726_v10  ;;  %v8909_v10 = vld [vmem:[#allocation5_spill] sm:$0xff] }
 0x2ab   : > { %6727 = vrsqrt.f32 %v1727_v32 }
 0x2b5   : > { %v6728_v52 = vpop.eup %6727 }
 0x2b6   : > { %v1735_v38 = vmul.f32 %v6728_v52, %v4856_v24  ;;  %v8911_v52 = vld [vmem:[#allocation9_spill] sm:$0xff] }
 0x2b8   : > { %v1737_v60 = vrot.slane %v1735_v38, 4  ;;  %v1747_v54 = vcombine.high %v1735_v38, %v1735_v38 }
 0x2ba   : > { %v1739_v13 = vmul.f32 %v1737_v60, %v1720_v33  ;;  %v1754_v18 = vrot.slane %v1747_v54, %v7688_v25 }
 0x2bc   : > { %v1746_v43 = vsub.f32 %v4857_v27, %v1739_v13  ;;  %v1755_v19 = vcombine.high %v1754_v18, %v1754_v18  ;;  %v1762_v35 = vrot.slane %v1754_v18, %v7688_v25  ;;  %v8912_v27 = vld [vmem:[#allocation11_spill] sm:$0xff]  ;;  %v8913_v18 = vld [vmem:[#allocation8_spill] sm:$0xff] }
 0x2be   : > { %v1769_v59 = vrot.slane %v1755_v19, %v7688_v25  ;;  %v1770_v51 = vcombine.high %v1762_v35, %v1762_v35  ;;  %v1775_v11 = vrot.slane %v1762_v35, %v7694_v8  ;;  %v1831_v6 = vrot.slane %v1746_v43, %v7688_v25  ;;  %v8914_v35 = vld [vmem:[#allocation10_spill] sm:$0xff] }
 0x2c0   : > { %v1771_v1 = vcombine.high %v1769_v59, %v1769_v59  ;;  %v1779_v45 = vrot.slane %v1769_v59, %v7694_v8  ;;  %v7703_v2 = vrot.slane %v1770_v51, %v7694_v8  ;;  %v1832_v28 = vcombine.high %v1831_v6, %v1831_v6  ;;  %v8915_v51 = vld [vmem:[#allocation13_spill] sm:$0xff] }
 0x2c1   : > { %v1839_v33 = vrot.slane %v1831_v6, %v7688_v25  ;;  %v1792_v7 = vmul.f32 %v1775_v11, %v7111_v9  ;;  %v1793_v15 = vmul.f32 %v1775_v11, %v8908_v14  ;;  %v1794_v32 = vmul.f32 %v8909_v10, %v1775_v11 }
 0x2c2   : > { %v7710_v53 = vrot.slane %v1771_v1, %v7694_v8  ;;  %v1846_v3 = vrot.slane %v1832_v28, %v7688_v25  ;;  %v1795_v24 = vmul.f32 %v8910_v50, %v1775_v11  ;;  %v1796_v38 = vmul.f32 %v1775_v11, %v8911_v52 }
 0x2c3   : > { %v1847_v60 = vcombine.high %v1839_v33, %v1839_v33  ;;  %v1852_v54 = vrot.slane %v1839_v33, %v7694_v8  ;;  %v1797_v13 = vmul.f32 %v1775_v11, %v8912_v27  ;;  %v1798_v9 = vmul.f32 %v8913_v18, %v1775_v11 }
 0x2c4   : > { %v1848_v43 = vcombine.high %v1846_v3, %v1846_v3  ;;  %v1856_v19 = vrot.slane %v1846_v3, %v7694_v8  ;;  %v1799_v59 = vmul.f32 %v8914_v35, %v1775_v11  ;;  %v1800_v6 = vmul.f32 %v1779_v45, %v8915_v51 }
 0x2c5   : > { %v7722_v1 = vrot.slane %v1847_v60, %v7694_v8  ;;  %v1869_v28 = vadd.f32 %v1852_v54, %v1792_v7  ;;  %v1870_v14 = vadd.f32 %v1852_v54, %v1793_v15  ;;  %v1871_v10 = vadd.f32 %v1852_v54, %v1794_v32 }
 0x2c6   : > { %v7725_v50 = vrot.slane %v1848_v43, %v7694_v8  ;;  %v1872_v33 = vadd.f32 %v1852_v54, %v1795_v24  ;;  %v1873_v52 = vadd.f32 %v1852_v54, %v1796_v38  ;;  %v1874_v27 = vadd.f32 %v1852_v54, %v1797_v13  ;;  %v8917_v8 = vld [vmem:[#allocation12_spill] sm:$0xff] }
 0x2c7   : > { %v1901_v18 = vmax.f32 %v1869_v28, 0.0  ;;  %v1902_v25 = vmax.f32 %v1870_v14, 0.0  ;;  %v1903_v30 = vmax.f32 %v1871_v10, 0.0  ;;  %v1875_v3 = vadd.f32 %v1852_v54, %v1798_v9  ;;  %v8918_v28 = vld [vmem:[#allocation14_spill] sm:$0xff]  ;;  %v8919_v9 = vld [vmem:[#allocation17_spill] sm:$0xff] }
 0x2c8   : > { %v1904_v62 = vmax.f32 %v1872_v33, 0.0  ;;  %v1905_v11 = vmax.f32 %v1873_v52, 0.0  ;;  %v1906_v35 = vmax.f32 %v1874_v27, 0.0  ;;  %v1876_v51 = vadd.f32 %v1852_v54, %v1799_v59  ;;  %v8921_v52 = vld [vmem:[#allocation16_spill] sm:$0xff] }
 0x2c9   : > { %v1933_v12 = vpack.c.bf16 %v1902_v25, %v1901_v18  ;;  %v1907_v60 = vmax.f32 %v1875_v3, 0.0  ;;  %v1801_v7 = vmul.f32 %v1779_v45, %v8916_v40  ;;  %v1877_v15 = vadd.f32 %v1856_v19, %v1800_v6  ;;  %v8920_v25 = vld [vmem:[#allocation19_spill] sm:$0xff] }
 0x2ca   : > { %v1934_v32 = vpack.c.bf16 %v1904_v62, %v1903_v30  ;;  %v1935_v63 = vpack.c.bf16 %v1906_v35, %v1905_v11  ;;  %v1908_v43 = vmax.f32 %v1876_v51, 0.0  ;;  %v1802_v24 = vmul.f32 %v8917_v8, %v1779_v45  ;;  %v8923_v11 = vld [vmem:[#allocation21_spill] sm:$0xff] }
 0x2cb   : > { %5623 = vmatprep.mubr.bf16.mxu1 %v1933_v12  ;;  %v1878_v38 = vadd.f32 %v1856_v19, %v1801_v7  ;;  %v1909_v13 = vmax.f32 %v1877_v15, 0.0  ;;  %v1803_v14 = vmul.f32 %v8918_v28, %v1779_v45  ;;  %v1804_v10 = vmul.f32 %v1779_v45, %v8919_v9  ;;  %v8922_v12 = vld [vmem:[#allocation18_spill] sm:$0xff] }
 0x2cc   : > { %5624 = vmatmul.mubr.bf16.vlgmr.msra.gmra.mrb[36].mxu1 %v1934_v32  ;;  %v1936_v33 = vpack.c.bf16 %v1908_v43, %v1907_v60  ;;  %v1879_v54 = vadd.f32 %v1856_v19, %v1802_v24  ;;  %v1805_v59 = vmul.f32 %v1779_v45, %v8920_v25  ;;  %v1806_v40 = vmul.f32 %v8921_v52, %v1779_v45 }
 0x2cd   : > { %6325 = vmatpush3.bf16.msra.mxu1 %v7170_v58  ;;  %5627 = vmatprep.mubr.bf16.mxu1 %v1935_v63  ;;  %v1910_v62 = vmax.f32 %v1878_v38, 0.0  ;;  %v1880_v30 = vadd.f32 %v1856_v19, %v1803_v14  ;;  %v1881_v8 = vadd.f32 %v1856_v19, %v1804_v10  ;;  %v1807_v6 = vmul.f32 %v8922_v12, %v1779_v45  ;;  %v8924_v63 = vld [vmem:[#allocation23_spill] sm:$0xff]  ;;  %v8925_v14 = vld [vmem:[#allocation20_spill] sm:$0xff]  ;;  %v8926_v10 = vld [vmem:[#allocation22_spill] sm:$0xff] }
 0x2ce   : > { %6326 = vmatprep.subr.bf16.mxu1 %v8866_v29  ;;  %v1911_v27 = vmax.f32 %v1879_v54, 0.0  ;;  %v1882_v18 = vadd.f32 %v1856_v19, %v1805_v59  ;;  %v1883_v3 = vadd.f32 %v1856_v19, %v1806_v40  ;;  %v1808_v35 = vmul.f32 %v7703_v2, %v8923_v11  ;;  %v8927_v59 = vld [vmem:[#allocation26_spill] sm:$0xff]  ;;  %v8930_v11 = vld [vmem:[#allocation27_spill] sm:$0xff] }
 0x2cf   : > { %v1937_v51 = vpack.c.bf16 %v1910_v62, %v1909_v13  ;;  %v1912_v60 = vmax.f32 %v1880_v30, 0.0  ;;  %v1913_v7 = vmax.f32 %v1881_v8, 0.0  ;;  %v1884_v15 = vadd.f32 %v1856_v19, %v1807_v6  ;;  %v8928_v8 = vld [vmem:[#allocation28_spill] sm:$0xff] }
 0x2d0   : > { %v1914_v32 = vmax.f32 %v1882_v18, 0.0  ;;  %v1915_v43 = vmax.f32 %v1883_v3, 0.0  ;;  %v1809_v24 = vmul.f32 %v7703_v2, %v8924_v63  ;;  %v1885_v38 = vadd.f32 %v7722_v1, %v1808_v35  ;;  %v8929_v18 = vld [vmem:[#allocation24_spill] sm:$0xff] }
 0x2d1   : > { %6328 = vmatpush3.bf16.msra.mxu1 %v7232_v0  ;;  %v1938_v45 = vpack.c.bf16 %v1912_v60, %v1911_v27  ;;  %v1916_v28 = vmax.f32 %v1884_v15, 0.0  ;;  %v1810_v9 = vmul.f32 %v8925_v14, %v7703_v2  ;;  %v1811_v13 = vmul.f32 %v8926_v10, %v7703_v2  ;;  %v8932_v14 = vld [vmem:[#allocation33_spill] sm:$0xff] }
 0x2d2   : > { %6329 = vmatprep.subr.bf16.mxu1 %v8866_v29  ;;  %v1939_v19 = vpack.c.bf16 %v1914_v32, %v1913_v7  ;;  %v1886_v54 = vadd.f32 %v7722_v1, %v1809_v24  ;;  %v1917_v25 = vmax.f32 %v1885_v38, 0.0  ;;  %v1812_v52 = vmul.f32 %v7703_v2, %v8927_v59  ;;  %v8931_v32 = vld [vmem:[#allocation31_spill] sm:$0xff] }
 0x2d3   : > { %v1940_v40 = vpack.c.bf16 %v1916_v28, %v1915_v43  ;;  %v1887_v62 = vadd.f32 %v7722_v1, %v1810_v9  ;;  %v1888_v30 = vadd.f32 %v7722_v1, %v1811_v13  ;;  %v1813_v12 = vmul.f32 %v7703_v2, %v8928_v8  ;;  %v8935_v8 = vld [vmem:[#allocation37_spill] sm:$0xff] }
 0x2d4   : > { %5628 = vmatmul.mubr.bf16.gmra.mrb[40].mxu1 %v1936_v33  ;;  %v1918_v6 = vmax.f32 %v1886_v54, 0.0  ;;  %v1889_v27 = vadd.f32 %v7722_v1, %v1812_v52  ;;  %v1814_v3 = vmul.f32 %v8929_v18, %v7703_v2  ;;  %v1815_v35 = vmul.f32 %v8930_v11, %v7703_v2  ;;  %v8933_v54 = vld [vmem:[#allocation30_spill] sm:$0xff]  ;;  %v8934_v52 = vld [vmem:[#allocation32_spill] sm:$0xff] }
 0x2d5   : > { %6331 = vmatpush3.bf16.msra.mxu1 %v7241_v16  ;;  %5631 = vmatprep.mubr.bf16.mxu1 %v1937_v51  ;;  %v1919_v60 = vmax.f32 %v1887_v62, 0.0  ;;  %v1920_v7 = vmax.f32 %v1888_v30, 0.0  ;;  %v1890_v15 = vadd.f32 %v7722_v1, %v1813_v12  ;;  %v1816_v43 = vmul.f32 %v7710_v53, %v8931_v32 }
 0x2d6   : > { %6332 = vmatprep.subr.bf16.mxu1 %v8866_v29  ;;  %v1941_v33 = vpack.c.bf16 %v1918_v6, %v1917_v25  ;;  %v1921_v63 = vmax.f32 %v1889_v27, 0.0  ;;  %v1891_v24 = vadd.f32 %v7722_v1, %v1814_v3  ;;  %v1892_v38 = vadd.f32 %v7722_v1, %v1815_v35 }
 0x2d7   : > { %v1942_v28 = vpack.c.bf16 %v1920_v7, %v1919_v60  ;;  %v1922_v2 = vmax.f32 %v1890_v15, 0.0  ;;  %v1817_v51 = vmul.f32 %v7710_v53, %v8932_v14  ;;  %v1893_v9 = vadd.f32 %v7725_v50, %v1816_v43  ;;  %v8936_v60 = vld [vmem:[#allocation35_spill] sm:$0xff] }
 0x2d8   : > { %v1923_v10 = vmax.f32 %v1891_v24, 0.0  ;;  %v1924_v13 = vmax.f32 %v1892_v38, 0.0  ;;  %v1818_v59 = vmul.f32 %v8933_v54, %v7710_v53  ;;  %v1819_v25 = vmul.f32 %v8934_v52, %v7710_v53 }
 0x2d9   : > { %6334 = vmatpush3.bf16.msra.mxu1 %v7329_v48  ;;  %v1943_v62 = vpack.c.bf16 %v1922_v2, %v1921_v63  ;;  %v1894_v1 = vadd.f32 %v7725_v50, %v1817_v51  ;;  %v1925_v30 = vmax.f32 %v1893_v9, 0.0  ;;  %v1820_v12 = vmul.f32 %v7710_v53, %v8935_v8 }
 0x2da   : > { %6335 = vmatprep.subr.bf16.mxu1 %v8866_v29  ;;  %v1944_v6 = vpack.c.bf16 %v1924_v13, %v1923_v10  ;;  %v1895_v27 = vadd.f32 %v7725_v50, %v1818_v59  ;;  %v1896_v18 = vadd.f32 %v7725_v50, %v1819_v25  ;;  %v1821_v3 = vmul.f32 %v7710_v53, %v7478_v41 }
 0x2db   : > { %v1926_v11 = vmax.f32 %v1894_v1, 0.0  ;;  %v1897_v35 = vadd.f32 %v7725_v50, %v1820_v12  ;;  %v1822_v7 = vmul.f32 %v8936_v60, %v7710_v53  ;;  %v1823_v15 = vmul.f32 %v7469_v37, %v7710_v53 }
 0x2dc   : > { %5632 = vmatmul.mubr.bf16.gmra.mrb[44].mxu1 %v1938_v45  ;;  %v1927_v32 = vmax.f32 %v1895_v27, 0.0  ;;  %v1928_v43 = vmax.f32 %v1896_v18, 0.0  ;;  %v1898_v63 = vadd.f32 %v7725_v50, %v1821_v3 }
 0x2dd   : > { %6337 = vmatpush3.bf16.msra.mxu1 %v7386_v49  ;;  %5635 = vmatprep.mubr.bf16.mxu1 %v1939_v19  ;;  %v1945_v24 = vpack.c.bf16 %v1926_v11, %v1925_v30  ;;  %v1929_v38 = vmax.f32 %v1897_v35, 0.0  ;;  %v1899_v41 = vadd.f32 %v7725_v50, %v1822_v7  ;;  %v1900_v2 = vadd.f32 %v7725_v50, %v1823_v15 }
 0x2de   : > { %6338 = vmatprep.subr.bf16.mxu1 %v8866_v29  ;;  %v1946_v14 = vpack.c.bf16 %v1928_v43, %v1927_v32  ;;  %v1930_v51 = vmax.f32 %v1898_v63, 0.0 }
 0x2df   : > { %v1931_v9 = vmax.f32 %v1899_v41, 0.0  ;;  %v1932_v37 = vmax.f32 %v1900_v2, 0.0 }
 0x2e0   : > { %v1947_v53 = vpack.c.bf16 %v1930_v51, %v1929_v38 }
 0x2e1   : > { %6340 = vmatpush3.bf16.msra.mxu1 %v7445_v22  ;;  %v1948_v45 = vpack.c.bf16 %v1932_v37, %v1931_v9 }
 0x2e2   : > { %6341 = vmatprep.subr.bf16.mxu1 %v8866_v29 }
 0x2e4   : > { %5636 = vmatmul.mubr.bf16.gmra.mrb[48].mxu1 %v1940_v40 }
 0x2e5   : > { %6343 = vmatpush3.bf16.msra.mxu1 %v7486_v23  ;;  %5639 = vmatprep.mubr.bf16.mxu1 %v1941_v33 }
 0x2e6   : > { %6344 = vmatprep.subr.bf16.mxu1 %v8866_v29 }
 0x2e9   : > { %6346 = vmatpush3.bf16.msra.mxu1 %v7511_v26 }
 0x2ea   : > { %6347 = vmatprep.subr.bf16.mxu1 %v8866_v29 }
 0x2ec   : > { %5640 = vmatmul.mubr.bf16.gmra.mrb[52].mxu1 %v1942_v28 }
 0x2ed   : > { %5643 = vmatprep.mubr.bf16.mxu1 %v1943_v62 }
 0x2f4   : > { %5644 = vmatmul.mubr.bf16.gmra.mrb[56].mxu1 %v1944_v6 }
 0x2f5   : > { %5647 = vmatprep.mubr.bf16.mxu1 %v1945_v24 }
 0x2fc   : > { %5648 = vmatmul.mubr.bf16.gmra.mrb[60].mxu1 %v1946_v14 }
 0x2fd   : > { %5651 = vmatprep.mubr.bf16.mxu1 %v1947_v53 }
 0x304   : > { %5652 = vmatmul.mubr.bf16.gmra.mrb[64].mxu1 %v1948_v45 }
 0x305   : > { %5687 = vmatprep.mubr.msk.f32.mxu1 %vm6800_vm14, %v8905_v55 }
 0x39f   : > { %v7800_v50 = vpop.f32.mrb[36].mxu1 }
 0x3a0   : > { %v7802_v19 = vpop.f32.mrb[37].mxu1  ;;  %v2232_v54 = vmul.f32 %v7800_v50, %v7800_v50 }
 0x3a1   : > { %v7804_v40 = vpop.f32.mrb[38].mxu1  ;;  %v2230_v28 = vmul.f32 %v7802_v19, %v7802_v19 }
 0x3a2   : > { %v7806_v33 = vpop.f32.mrb[39].mxu1  ;;  %v2233_v25 = vmul.f32 %v7804_v40, %v7804_v40 }
 0x3a3   : > { %v2178_v10 = vadd.f32 %v7806_v33, %v7802_v19  ;;  %v2231_v13 = vmul.f32 %v7806_v33, %v7806_v33 }
 0x3a5   : > { %v2179_v59 = vadd.f32 %v7800_v50, %v2178_v10  ;;  %v2262_v52 = vadd.f32 %v2231_v13, %v2230_v28 }
 0x3a7   : > { %v2263_v62 = vadd.f32 %v2262_v52, %v2232_v54  ;;  %v7819_v1 = vpop.f32.mrb[40].mxu1  ;;  %v2180_v30 = vadd.f32 %v7804_v40, %v2179_v59 }
 0x3a8   : > { %v7822_v8 = vpop.f32.mrb[41].mxu1  ;;  %v2236_v7 = vmul.f32 %v7819_v1, %v7819_v1 }
 0x3a9   : > { %v2181_v12 = vadd.f32 %v2180_v30, %v7822_v8  ;;  %v2234_v6 = vmul.f32 %v7822_v8, %v7822_v8  ;;  %v2264_v27 = vadd.f32 %v2263_v62, %v2233_v25  ;;  %v7827_v18 = vpop.f32.mrb[42].mxu1 }
 0x3aa   : > { %v7829_v3 = vpop.f32.mrb[43].mxu1  ;;  %v2237_v43 = vmul.f32 %v7827_v18, %v7827_v18 }
 0x3ab   : > { %v2265_v11 = vadd.f32 %v2264_v27, %v2234_v6  ;;  %v2182_v35 = vadd.f32 %v2181_v12, %v7829_v3  ;;  %v2235_v60 = vmul.f32 %v7829_v3, %v7829_v3 }
 0x3ad   : > { %v2183_v15 = vadd.f32 %v7819_v1, %v2182_v35  ;;  %v2266_v32 = vadd.f32 %v2265_v11, %v2235_v60 }
 0x3af   : > { %v2184_v63 = vadd.f32 %v7827_v18, %v2183_v15  ;;  %v2267_v24 = vadd.f32 %v2266_v32, %v2236_v7  ;;  %v7840_v38 = vpop.f32.mrb[44].mxu1 }
 0x3b0   : > { %v7842_v41 = vpop.f32.mrb[45].mxu1  ;;  %v2240_v45 = vmul.f32 %v7840_v38, %v7840_v38 }
 0x3b1   : > { %v2268_v2 = vadd.f32 %v2267_v24, %v2237_v43  ;;  %v7844_v14 = vpop.f32.mrb[46].mxu1  ;;  %v2238_v9 = vmul.f32 %v7842_v41, %v7842_v41  ;;  %v2185_v13 = vrot.slane %v2184_v63, 4 }
 0x3b2   : > { %8937 = vst [vmem:[#allocation7_spill] sm:$0xff] %v7844_v14  ;;  %v7846_v51 = vpop.f32.mrb[47].mxu1  ;;  %v2241_v25 = vmul.f32 %v7844_v14, %v7844_v14 }
 0x3b3   : > { %v2191_v37 = vadd.f32 %v7846_v51, %v7842_v41  ;;  %v2239_v53 = vmul.f32 %v7846_v51, %v7846_v51  ;;  %v2186_v27 = vadd.f32 %v2185_v13, %v2184_v63  ;;  %v2269_v11 = vrot.slane %v2268_v2, 4 }
 0x3b5   : > { %v2192_v28 = vadd.f32 %v7840_v38, %v2191_v37  ;;  %v2275_v10 = vadd.f32 %v2239_v53, %v2238_v9  ;;  %v2187_v24 = vrot.slane %v2186_v27, 2  ;;  %v2270_v9 = vadd.f32 %v2269_v11, %v2268_v2 }
 0x3b7   : > { %v2276_v54 = vadd.f32 %v2275_v10, %v2240_v45  ;;  %v7857_v59 = vpop.f32.mrb[48].mxu1  ;;  %v2193_v52 = vadd.f32 %v7844_v14, %v2192_v28 }
 0x3b8   : > { %8938 = vst [vmem:[#allocation5_spill] sm:$0xff] %v7857_v59  ;;  %v7862_v62 = vpop.f32.mrb[49].mxu1  ;;  %v2244_v37 = vmul.f32 %v7857_v59, %v7857_v59 }
 0x3b9   : > { %8939 = vst [vmem:[#allocation6_spill] sm:$0xff] %v7862_v62  ;;  %v2194_v30 = vadd.f32 %v2193_v52, %v7862_v62  ;;  %v2242_v12 = vmul.f32 %v7862_v62, %v7862_v62  ;;  %v7867_v6 = vpop.f32.mrb[50].mxu1  ;;  %v2277_v35 = vadd.f32 %v2276_v54, %v2241_v25  ;;  %v2188_v25 = vadd.f32 %v2187_v24, %v2186_v27 }
 0x3ba   : > { %8940 = vst [vmem:[#allocation9_spill] sm:$0xff] %v7867_v6  ;;  %v7869_v60 = vpop.f32.mrb[51].mxu1  ;;  %v2245_v28 = vmul.f32 %v7867_v6, %v7867_v6 }
 0x3bb   : > { %8941 = vst [vmem:[#allocation11_spill] sm:$0xff] %v7869_v60  ;;  %v2195_v7 = vadd.f32 %v2194_v30, %v7869_v60  ;;  %v2243_v15 = vmul.f32 %v7869_v60, %v7869_v60  ;;  %v2278_v32 = vadd.f32 %v2277_v35, %v2242_v12  ;;  %v2271_v30 = vrot.slane %v2270_v9, 2 }
 0x3bd   : > { %v2196_v43 = vadd.f32 %v7857_v59, %v2195_v7  ;;  %v2279_v53 = vadd.f32 %v2278_v32, %v2243_v15 }
 0x3bf   : > { %v2197_v63 = vadd.f32 %v7867_v6, %v2196_v43  ;;  %v7878_v45 = vpop.f32.mrb[52].mxu1  ;;  %v2280_v10 = vadd.f32 %v2279_v53, %v2244_v37  ;;  %v2189_v53 = vrot.slane %v2188_v25, 1 }
 0x3c0   : > { %v7882_v13 = vpop.f32.mrb[53].mxu1  ;;  %v2248_v37 = vmul.f32 %v7878_v45, %v7878_v45 }
 0x3c1   : > { %8942 = vst [vmem:[#allocation8_spill] sm:$0xff] %v7882_v13  ;;  %v2198_v54 = vrot.slane %v2197_v63, 4  ;;  %v7884_v52 = vpop.f32.mrb[54].mxu1  ;;  %v2281_v2 = vadd.f32 %v2280_v10, %v2245_v28  ;;  %v2246_v35 = vmul.f32 %v7882_v13, %v7882_v13  ;;  %v2272_v28 = vadd.f32 %v2271_v30, %v2270_v9 }
 0x3c2   : > { %v7886_v12 = vpop.f32.mrb[55].mxu1 }
 0x3c3   : > { %8943 = vst [vmem:[#allocation10_spill] sm:$0xff] %v7886_v12  ;;  %v2199_v11 = vadd.f32 %v2198_v54, %v2197_v63  ;;  %v2204_v7 = vadd.f32 %v7886_v12, %v7882_v13  ;;  %v2247_v15 = vmul.f32 %v7886_v12, %v7886_v12  ;;  %v2282_v32 = vrot.slane %v2281_v2, 4 }
 0x3c4   : > { %v2249_v54 = vmul.f32 %v7884_v52, %v7884_v52 }
 0x3c5   : > { %v2200_v43 = vrot.slane %v2199_v11, 2  ;;  %v2205_v27 = vadd.f32 %v7878_v45, %v2204_v7  ;;  %v2288_v24 = vadd.f32 %v2247_v15, %v2246_v35  ;;  %v2283_v63 = vadd.f32 %v2282_v32, %v2281_v2 }
 0x3c6   : > { %v2190_v2 = vadd.f32 %v2189_v53, %v2188_v25 }
 0x3c7   : > { %v2201_v10 = vadd.f32 %v2200_v43, %v2199_v11  ;;  %v2289_v6 = vadd.f32 %v2288_v24, %v2248_v37  ;;  %v7899_v13 = vpop.f32.mrb[56].mxu1  ;;  %v2206_v12 = vadd.f32 %v7884_v52, %v2205_v27  ;;  %v2284_v59 = vrot.slane %v2283_v63, 2 }
 0x3c8   : > { %8944 = vst [vmem:[#allocation13_spill] sm:$0xff] %v7899_v13  ;;  %v7902_v60 = vpop.f32.mrb[57].mxu1  ;;  %v2273_v11 = vrot.slane %v2272_v28, 1 }
 0x3c9   : > { %8945 = vst [vmem:[#allocation15_spill] sm:$0xff] %v7902_v60  ;;  %v2202_v62 = vrot.slane %v2201_v10, 1  ;;  %v2207_v14 = vadd.f32 %v2206_v12, %v7902_v60  ;;  %v2250_v35 = vmul.f32 %v7902_v60, %v7902_v60  ;;  %v2290_v9 = vadd.f32 %v2289_v6, %v2249_v54  ;;  %v7907_v30 = vpop.f32.mrb[58].mxu1 }
 0x3ca   : > { %8946 = vst [vmem:[#allocation12_spill] sm:$0xff] %v7907_v30  ;;  %v2285_v7 = vadd.f32 %v2284_v59, %v2283_v63  ;;  %v7909_v15 = vpop.f32.mrb[59].mxu1  ;;  %v2252_v6 = vmul.f32 %v7899_v13, %v7899_v13  ;;  %v2274_v53 = vadd.f32 %v2273_v11, %v2272_v28 }
 0x3cb   : > { %8947 = vst [vmem:[#allocation14_spill] sm:$0xff] %v7909_v15  ;;  %v2203_v32 = vadd.f32 %v2202_v62, %v2201_v10  ;;  %v2291_v43 = vadd.f32 %v2290_v9, %v2250_v35  ;;  %v2208_v37 = vadd.f32 %v2207_v14, %v7909_v15  ;;  %v2251_v27 = vmul.f32 %v7909_v15, %v7909_v15 }
 0x3cc   : > { %v2286_v24 = vrot.slane %v2285_v7, 1  ;;  %v2253_v62 = vmul.f32 %v7907_v30, %v7907_v30 }
 0x3cd   : > { %v2318_v12 = vsel %vm1059_vm4, %v2203_v32, %v2190_v2  ;;  %v2209_v54 = vadd.f32 %v7899_v13, %v2208_v37  ;;  %v2292_v25 = vadd.f32 %v2291_v43, %v2251_v27 }
 0x3ce   : > { %v2287_v59 = vadd.f32 %v2286_v24, %v2285_v7 }
 0x3cf   : > { %v2210_v63 = vadd.f32 %v7907_v30, %v2209_v54  ;;  %v2293_v14 = vadd.f32 %v2292_v25, %v2252_v6  ;;  %v7921_v10 = vpop.f32.mrb[60].mxu1 }
 0x3d0   : > { %v2326_v35 = vsel %vm1070_vm1, %v2287_v59, %v2274_v53  ;;  %v7924_v9 = vpop.f32.mrb[61].mxu1  ;;  %v2256_v24 = vmul.f32 %v7921_v10, %v7921_v10 }
 0x3d1   : > { %8948 = vst [vmem:[#allocation17_spill] sm:$0xff] %v7924_v9  ;;  %v2211_v2 = vrot.slane %v2210_v63, 4  ;;  %v2294_v32 = vadd.f32 %v2293_v14, %v2253_v62  ;;  %v7926_v15 = vpop.f32.mrb[62].mxu1  ;;  %v2254_v28 = vmul.f32 %v7924_v9, %v7924_v9 }
 0x3d2   : > { %8949 = vst [vmem:[#allocation19_spill] sm:$0xff] %v7926_v15  ;;  %v7930_v11 = vpop.f32.mrb[63].mxu1 }
 0x3d3   : > { %8950 = vst [vmem:[#allocation16_spill] sm:$0xff] %v7930_v11  ;;  %v2212_v7 = vadd.f32 %v2211_v2, %v2210_v63  ;;  %v2295_v43 = vrot.slane %v2294_v32, 4  ;;  %v2217_v37 = vadd.f32 %v7930_v11, %v7924_v9  ;;  %v2255_v27 = vmul.f32 %v7930_v11, %v7930_v11 }
 0x3d4   : > { %v2257_v2 = vmul.f32 %v7926_v15, %v7926_v15 }
 0x3d5   : > { %v2213_v6 = vrot.slane %v2212_v7, 2  ;;  %v2296_v54 = vadd.f32 %v2295_v43, %v2294_v32  ;;  %v2218_v25 = vadd.f32 %v7921_v10, %v2217_v37  ;;  %v2301_v53 = vadd.f32 %v2255_v27, %v2254_v28 }
 0x3d7   : > { %v2214_v59 = vadd.f32 %v2213_v6, %v2212_v7  ;;  %v2297_v62 = vrot.slane %v2296_v54, 2  ;;  %v2302_v14 = vadd.f32 %v2301_v53, %v2256_v24  ;;  %v7939_v30 = vpop.f32.mrb[64].mxu1  ;;  %v2219_v63 = vadd.f32 %v7926_v15, %v2218_v25 }
 0x3d8   : > { %8951 = vst [vmem:[#allocation18_spill] sm:$0xff] %v7939_v30  ;;  %v7944_v9 = vpop.f32.mrb[65].mxu1 }
 0x3d9   : > { %8952 = vst [vmem:[#allocation21_spill] sm:$0xff] %v7944_v9  ;;  %v2215_v11 = vrot.slane %v2214_v59, 1  ;;  %v2298_v13 = vadd.f32 %v2297_v62, %v2296_v54  ;;  %v2220_v60 = vadd.f32 %v2219_v63, %v7944_v9  ;;  %v2258_v32 = vmul.f32 %v7944_v9, %v7944_v9  ;;  %v7949_v28 = vpop.f32.mrb[66].mxu1 }
 0x3da   : > { %v2303_v7 = vadd.f32 %v2302_v14, %v2257_v2  ;;  %v7951_v43 = vpop.f32.mrb[67].mxu1  ;;  %v2260_v63 = vmul.f32 %v7939_v30, %v7939_v30 }
 0x3db   : > { %8953 = vst [vmem:[#allocation23_spill] sm:$0xff] %v7951_v43  ;;  %v2216_v37 = vadd.f32 %v2215_v11, %v2214_v59  ;;  %v2299_v27 = vrot.slane %v2298_v13, 1  ;;  %v2221_v24 = vadd.f32 %v2220_v60, %v7951_v43  ;;  %v2259_v6 = vmul.f32 %v7951_v43, %v7951_v43 }
 0x3dc   : > { %v2304_v25 = vadd.f32 %v2303_v7, %v2258_v32  ;;  %v2261_v60 = vmul.f32 %v7949_v28, %v7949_v28 }
 0x3dd   : > { %v2300_v53 = vadd.f32 %v2299_v27, %v2298_v13  ;;  %v2319_v54 = vsel %vm1061_vm15, %v2216_v37, %v2318_v12  ;;  %v2222_v62 = vadd.f32 %v7939_v30, %v2221_v24 }
 0x3de   : > { %v2305_v9 = vadd.f32 %v2304_v25, %v2259_v6 }
 0x3df   : > { %v2327_v14 = vsel %vm1072_vm2, %v2300_v53, %v2326_v35  ;;  %v2223_v11 = vadd.f32 %v7949_v28, %v2222_v62 }
 0x3e0   : > { %v2306_v59 = vadd.f32 %v2305_v9, %v2260_v63 }
 0x3e1   : > { %v2224_v2 = vrot.slane %v2223_v11, 4 }
 0x3e2   : > { %v2307_v43 = vadd.f32 %v2306_v59, %v2261_v60  ;;  %v8954_v59 = vld [vmem:[#allocation25_spill] sm:$0xff] }
 0x3e3   : > { %v2225_v32 = vadd.f32 %v2224_v2, %v2223_v11  ;;  %v8959_v2 = vld [vmem:[#allocation45_spill] sm:$0xff] }
 0x3e4   : > { %v2308_v13 = vrot.slane %v2307_v43, 4 }
 0x3e5   : > { %v2226_v7 = vrot.slane %v2225_v32, 2 }
 0x3e6   : > { %v2309_v12 = vadd.f32 %v2308_v13, %v2307_v43  ;;  %v8961_v13 = vld [vmem:[#allocation47_spill] sm:$0xff] }
 0x3e7   : > { %v2227_v37 = vadd.f32 %v2226_v7, %v2225_v32  ;;  %v8960_v32 = vld [vmem:[#allocation46_spill] sm:$0xff]  ;;  %v6711_v7 = vld [vmem:[%s8703_s2 + $0x40] sm:$0xff]  }
 0x3e8   : > { %v2310_v27 = vrot.slane %v2309_v12, 2  ;;  %5865 = vmatprep.subr.bf16.mxu0 %v6711_v7 }
 0x3e9   : > { %v2228_v24 = vrot.slane %v2227_v37, 1  ;;  %5866 = vmatpush3.bf16.msra.mxu0 %v6711_v7 }
 0x3ea   : > { %v2311_v15 = vadd.f32 %v2310_v27, %v2309_v12  ;;  %v6712_v12 = vld [vmem:[%s8703_s2 + $0x48] sm:$0xff]   ;;  %v6714_v27 = vld [vmem:[%s8703_s2 + $0x58] sm:$0xff]  }
 0x3eb   : > { %v2229_v30 = vadd.f32 %v2228_v24, %v2227_v37  ;;  %5867 = vmatprep.subr.bf16.mxu0 %v6712_v12  ;;  %v6713_v37 = vld [vmem:[%s8703_s2 + $0x50] sm:$0xff]   ;;  %v6715_v24 = vld [vmem:[%s8703_s2 + $0x60] sm:$0xff]  }
 0x3ec   : > { %v2312_v6 = vrot.slane %v2311_v15, 1 }
 0x3ed   : > { %v2320_v35 = vsel %vm1063_vm3, %v2229_v30, %v2319_v54  ;;  %v8955_v30 = vld [vmem:[#allocation29_spill] sm:$0xff]  ;;  %v8957_v54 = vld [vmem:[#allocation43_spill] sm:$0xff]  ;;  %5868 = vmatpush3.bf16.msra.mxu0 %v6712_v12 }
 0x3ee   : > { %v2313_v25 = vadd.f32 %v2312_v6, %v2311_v15  ;;  %v8956_v15 = vld [vmem:[#allocation34_spill] sm:$0xff]  ;;  %5869 = vmatprep.subr.bf16.mxu0 %v6713_v37  ;;  %v4868_v12 = vld [vmem:[%s8704_s3 + $0x1] ss:$0 sm:$0xff] }
 0x3ef   : > { %v6716_v6 = vld [vmem:[%s8703_s2 + $0x68] sm:$0xff]  }
 0x3f0   : > { %v2328_v53 = vsel %vm1074_vm5, %v2313_v25, %v2327_v14  ;;  %v8958_v14 = vld [vmem:[#allocation44_spill] sm:$0xff] }
 0x3f1   : > { %v2330_v62 = vsel %vm1077_vm0, %v2320_v35, %v2328_v53  ;;  %5870 = vmatpush3.bf16.msra.mxu0 %v6713_v37  ;;  %v6717_v35 = vld [vmem:[%s8703_s2 + $0x70] sm:$0xff]   ;;  %v6718_v25 = vld [vmem:[%s8703_s2 + $0x78] sm:$0xff]  }
 0x3f2   : > { %v7967_v9 = vand.u32 4294901760, %v2330_v62  ;;  %5871 = vmatprep.subr.bf16.mxu0 %v6714_v27 }
 0x3f4   : > { %v2413_v63 = vsub.f32 %v2330_v62, %v7967_v9 }
 0x3f5   : > { %5872 = vmatpush3.bf16.msra.mxu0 %v6714_v27 }
 0x3f6   : > { %v2414_v11 = vand.u32 4294901760, %v2413_v63  ;;  %5873 = vmatprep.subr.bf16.mxu0 %v6715_v24 }
 0x3f8   : > { %v2415_v60 = vsub.f32 %v2413_v63, %v2414_v11 }
 0x3f9   : > { %5874 = vmatpush3.bf16.msra.mxu0 %v6715_v24 }
 0x3fa   : > { %v2416_v43 = vand.u32 4294901760, %v2415_v60  ;;  %5875 = vmatprep.subr.bf16.mxu0 %v6716_v6 }
 0x3fc   : > { %5688 = vmatmul.mubr.f32.vlgmr.msra.gmra.mrb[34].mxu1 %v2416_v43 }
 0x3fd   : > { %6349 = vmatpush3.bf16.msra.mxu1 %v8954_v59  ;;  %5722 = vmatprep.mubr.msk.f32.mxu1 %vm6800_vm14, %v8905_v55 }
 0x3fe   : > { %6350 = vmatprep.subr.bf16.mxu1 %v8866_v29  ;;  %5876 = vmatpush3.bf16.msra.mxu0 %v6716_v6 }
 0x3ff   : > { %5877 = vmatprep.subr.bf16.mxu0 %v6717_v35 }
 0x401   : > { %6352 = vmatpush3.bf16.msra.mxu1 %v8955_v30 }
 0x402   : > { %6353 = vmatprep.subr.bf16.mxu1 %v8866_v29  ;;  %5878 = vmatpush3.bf16.msra.mxu0 %v6717_v35  ;;  %v4869_v35 = vld [vmem:[%s8705_s4 + $0x1] ss:$0 sm:$0xff] }
 0x403   : > { %5879 = vmatprep.subr.bf16.mxu0 %v6718_v25 }
 0x405   : > { %6355 = vmatpush3.bf16.msra.mxu1 %v8956_v15 }
 0x406   : > { %6356 = vmatprep.subr.bf16.mxu1 %v8866_v29  ;;  %5880 = vmatpush3.bf16.msra.mxu0 %v6718_v25 }
 0x407   : > { %6467 = vmatprep.subr.bf16.mxu0 %v8866_v29 }
 0x409   : > { %6358 = vmatpush3.bf16.msra.mxu1 %v7496_v20 }
 0x40a   : > { %6359 = vmatprep.subr.bf16.mxu1 %v8866_v29 }
 0x40d   : > { %6361 = vmatpush3.bf16.msra.mxu1 %v7509_v47 }
 0x40e   : > { %6362 = vmatprep.subr.bf16.mxu1 %v8866_v29 }
 0x411   : > { %6364 = vmatpush3.bf16.msra.mxu1 %v7515_v57 }
 0x412   : > { %6365 = vmatprep.subr.bf16.mxu1 %v8866_v29 }
 0x415   : > { %6367 = vmatpush3.bf16.msra.mxu1 %v7529_v44 }
 0x416   : > { %6368 = vmatprep.subr.bf16.mxu1 %v8866_v29 }
 0x419   : > { %6370 = vmatpush3.bf16.msra.mxu1 %v7573_v17 }
 0x41a   : > { %6371 = vmatprep.subr.bf16.mxu1 %v8866_v29 }
 0x41c   : > { %5723 = vmatmul.mubr.f32.vlgmr.msra.gmra.mrb[34].mxu1 %v7967_v9 }
 0x41d   : > { %6373 = vmatpush3.bf16.msra.mxu1 %v7183_v5  ;;  %5757 = vmatprep.mubr.msk.f32.mxu1 %vm6800_vm14, %v8905_v55 }
 0x41e   : > { %6374 = vmatprep.subr.bf16.mxu1 %v8866_v29 }
 0x421   : > { %6376 = vmatpush3.bf16.msra.mxu1 %v7257_v34 }
 0x422   : > { %6377 = vmatprep.subr.bf16.mxu1 %v8866_v29 }
 0x425   : > { %6379 = vmatpush3.bf16.msra.mxu1 %v7280_v56 }
 0x426   : > { %6380 = vmatprep.subr.bf16.mxu1 %v8866_v29 }
 0x429   : > { %6382 = vmatpush3.bf16.msra.mxu1 %v7358_v61 }
 0x42a   : > { %6383 = vmatprep.subr.bf16.mxu1 %v8866_v29 }
 0x42d   : > { %6385 = vmatpush3.bf16.msra.mxu1 %v7413_v31 }
 0x42e   : > { %6386 = vmatprep.subr.bf16.mxu1 %v8866_v29 }
 0x431   : > { %6388 = vmatpush3.bf16.msra.mxu1 %v7459_v4 }
 0x432   : > { %6389 = vmatprep.subr.bf16.mxu1 %v8866_v29 }
 0x435   : > { %6391 = vmatpush3.bf16.msra.mxu1 %v7500_v42 }
 0x436   : > { %6392 = vmatprep.subr.bf16.mxu1 %v8866_v29 }
 0x439   : > { %6394 = vmatpush3.bf16.msra.mxu1 %v7520_v36 }
 0x43a   : > { %6395 = vmatprep.subr.bf16.mxu1 %v8866_v29 }
 0x43c   : > { %5758 = vmatmul.mubr.f32.vlgmr.msra.gmra.mrb[34].mxu1 %v2413_v63 }
 0x43d   : > { %6397 = vmatpush3.bf16.msra.mxu1 %v7170_v58  ;;  %5792 = vmatprep.mubr.msk.f32.mxu1 %vm6800_vm14, %v8905_v55 }
 0x43e   : > { %6398 = vmatprep.subr.bf16.mxu1 %v8866_v29 }
 0x441   : > { %6400 = vmatpush3.bf16.msra.mxu1 %v7232_v0 }
 0x442   : > { %6401 = vmatprep.subr.bf16.mxu1 %v8866_v29 }
 0x445   : > { %6403 = vmatpush3.bf16.msra.mxu1 %v7241_v16 }
 0x446   : > { %6404 = vmatprep.subr.bf16.mxu1 %v8866_v29 }
 0x449   : > { %6406 = vmatpush3.bf16.msra.mxu1 %v7329_v48 }
 0x44a   : > { %6407 = vmatprep.subr.bf16.mxu1 %v8866_v29 }
 0x44d   : > { %6409 = vmatpush3.bf16.msra.mxu1 %v7386_v49 }
 0x44e   : > { %6410 = vmatprep.subr.bf16.mxu1 %v8866_v29 }
 0x451   : > { %6412 = vmatpush3.bf16.msra.mxu1 %v7445_v22 }
 0x452   : > { %6413 = vmatprep.subr.bf16.mxu1 %v8866_v29 }
 0x455   : > { %6415 = vmatpush3.bf16.msra.mxu1 %v7486_v23 }
 0x456   : > { %6416 = vmatprep.subr.bf16.mxu1 %v8866_v29 }
 0x459   : > { %6418 = vmatpush3.bf16.msra.mxu1 %v7511_v26 }
 0x45a   : > { %6419 = vmatprep.subr.bf16.mxu1 %v8866_v29 }
 0x45c   : > { %5793 = vmatmul.mubr.f32.vlgmr.msra.gmra.mrb[34].mxu1 %v2414_v11 }
 0x45d   : > { %6421 = vmatpush3.bf16.msra.mxu1 %v7535_v39  ;;  %5827 = vmatprep.mubr.msk.f32.mxu1 %vm6800_vm14, %v8905_v55 }
 0x45e   : > { %6422 = vmatprep.subr.bf16.mxu1 %v8866_v29 }
 0x461   : > { %6424 = vmatpush3.bf16.msra.mxu1 %v7541_v21 }
 0x462   : > { %6425 = vmatprep.subr.bf16.mxu1 %v8866_v29 }
 0x465   : > { %6427 = vmatpush3.bf16.msra.mxu1 %v7547_v46 }
 0x466   : > { %6428 = vmatprep.subr.bf16.mxu1 %v8866_v29 }
 0x469   : > { %6430 = vmatpush3.bf16.msra.mxu1 %v8957_v54 }
 0x46a   : > { %6431 = vmatprep.subr.bf16.mxu1 %v8866_v29 }
 0x46d   : > { %6433 = vmatpush3.bf16.msra.mxu1 %v8958_v14 }
 0x46e   : > { %6434 = vmatprep.subr.bf16.mxu1 %v8866_v29 }
 0x471   : > { %6436 = vmatpush3.bf16.msra.mxu1 %v8959_v2 }
 0x472   : > { %6437 = vmatprep.subr.bf16.mxu1 %v8866_v29 }
 0x475   : > { %6439 = vmatpush3.bf16.msra.mxu1 %v8960_v32 }
 0x476   : > { %6440 = vmatprep.subr.bf16.mxu1 %v8866_v29 }
 0x479   : > { %6442 = vmatpush3.bf16.msra.mxu1 %v8961_v13  ;;  %v8963_v13 = vld [vmem:[#allocation49_spill] sm:$0xff] }
 0x47a   : > { %6443 = vmatprep.subr.bf16.mxu1 %v8866_v29 }
 0x47c   : > { %5828 = vmatmul.mubr.f32.vlgmr.msra.gmra.mrb[34].mxu1 %v7967_v9 }
 0x47d   : > { %6445 = vmatpush3.bf16.msra.mxu1 %v7170_v58  ;;  %5862 = vmatprep.mubr.msk.f32.mxu1 %vm6800_vm14, %v8905_v55 }
 0x47e   : > { %6446 = vmatprep.subr.bf16.mxu1 %v8866_v29 }
 0x481   : > { %6448 = vmatpush3.bf16.msra.mxu1 %v7232_v0 }
 0x482   : > { %6449 = vmatprep.subr.bf16.mxu1 %v8866_v29 }
 0x485   : > { %6451 = vmatpush3.bf16.msra.mxu1 %v7241_v16 }
 0x486   : > { %6452 = vmatprep.subr.bf16.mxu1 %v8866_v29 }
 0x489   : > { %6454 = vmatpush3.bf16.msra.mxu1 %v7329_v48 }
 0x48a   : > { %6455 = vmatprep.subr.bf16.mxu1 %v8866_v29 }
 0x48d   : > { %6457 = vmatpush3.bf16.msra.mxu1 %v7386_v49 }
 0x48e   : > { %6458 = vmatprep.subr.bf16.mxu1 %v8866_v29 }
 0x491   : > { %6460 = vmatpush3.bf16.msra.mxu1 %v7445_v22 }
 0x492   : > { %6461 = vmatprep.subr.bf16.mxu1 %v8866_v29 }
 0x495   : > { %6463 = vmatpush3.bf16.msra.mxu1 %v7486_v23 }
 0x496   : > { %6464 = vmatprep.subr.bf16.mxu1 %v8866_v29 }
 0x499   : > { %6466 = vmatpush3.bf16.msra.mxu1 %v7511_v26 }
 0x49c   : > { %5863 = vmatmul.mubr.f32.vlgmr.msra.gmra.mrb[34].mxu1 %v7967_v9 }
 0x56f   : > { %v2968_v53 = vpop.f32.mrb[34].mxu1 }
 0x570   : > { %v2972_v62 = vmul.f32 0.00390625, %v2968_v53  ;;  %v5864_v9 = vpop.f32.mrb[35].mxu1  ;;  %v8962_v53 = vld [vmem:[#allocation48_spill] sm:$0xff] }
 0x572   : > { %v2973_v63 = vmul.f32 %v2972_v62, %v2972_v62 }
 0x574   : > { %v2975_v11 = vrot.slane %v2973_v63, 4 }
 0x576   : > { %v2977_v60 = vsub.f32 %v2972_v62, %v2975_v11 }
 0x578   : > { %v2978_v43 = vmax.f32 %v2977_v60, 0.0 }
 0x57a   : > { %v2979_v7 = vadd.f32 1e-05, %v2978_v43 }
 0x57c   : > { %6729 = vrsqrt.f32 %v2979_v7 }
 0x586   : > { %v6730_v37 = vpop.eup %6729 }
 0x587   : > { %v2987_v27 = vmul.f32 %v6730_v37, %v4868_v12 }
 0x589   : > { %v2989_v24 = vrot.slane %v2987_v27, 4  ;;  %v2999_v6 = vcombine.high %v2987_v27, %v2987_v27 }
 0x58b   : > { %v2991_v25 = vmul.f32 %v2989_v24, %v2972_v62  ;;  %v3006_v9 = vrot.slane %v2999_v6, %v8962_v53 }
 0x58d   : > { %v2998_v63 = vsub.f32 %v4869_v35, %v2991_v25  ;;  %v3007_v11 = vcombine.high %v3006_v9, %v3006_v9  ;;  %v3014_v60 = vrot.slane %v3006_v9, %v8962_v53 }
 0x58f   : > { %v3021_v43 = vrot.slane %v3007_v11, %v8962_v53  ;;  %v3022_v7 = vcombine.high %v3014_v60, %v3014_v60  ;;  %v3027_v32 = vrot.slane %v3014_v60, %v8963_v13  ;;  %v3083_v12 = vrot.slane %v2998_v63, %v8962_v53 }
 0x591   : > { %v3023_v37 = vcombine.high %v3021_v43, %v3021_v43  ;;  %v3031_v27 = vrot.slane %v3021_v43, %v8963_v13  ;;  %v8100_v2 = vrot.slane %v3022_v7, %v8963_v13  ;;  %v3084_v62 = vcombine.high %v3083_v12, %v3083_v12 }
 0x592   : > { %v3091_v24 = vrot.slane %v3083_v12, %v8962_v53  ;;  %v3044_v6 = vmul.f32 %v3027_v32, %v7802_v19  ;;  %v3045_v35 = vmul.f32 %v3027_v32, %v7806_v33  ;;  %v3046_v25 = vmul.f32 %v7800_v50, %v3027_v32 }
 0x593   : > { %v8107_v9 = vrot.slane %v3023_v37, %v8963_v13  ;;  %v3098_v63 = vrot.slane %v3084_v62, %v8962_v53  ;;  %v3047_v11 = vmul.f32 %v7804_v40, %v3027_v32  ;;  %v3048_v60 = vmul.f32 %v3027_v32, %v7822_v8 }
 0x594   : > { %v3099_v43 = vcombine.high %v3091_v24, %v3091_v24  ;;  %v3104_v7 = vrot.slane %v3091_v24, %v8963_v13  ;;  %v3049_v12 = vmul.f32 %v3027_v32, %v7829_v3  ;;  %v3050_v19 = vmul.f32 %v7819_v1, %v3027_v32 }
 0x595   : > { %v3100_v14 = vcombine.high %v3098_v63, %v3098_v63  ;;  %v3108_v33 = vrot.slane %v3098_v63, %v8963_v13  ;;  %v3051_v50 = vmul.f32 %v7827_v18, %v3027_v32  ;;  %v3052_v37 = vmul.f32 %v3031_v27, %v7842_v41 }
 0x596   : > { %v8119_v62 = vrot.slane %v3099_v43, %v8963_v13  ;;  %v3121_v40 = vadd.f32 %v3104_v7, %v3044_v6  ;;  %v3122_v53 = vadd.f32 %v3104_v7, %v3045_v35  ;;  %v3123_v8 = vadd.f32 %v3104_v7, %v3046_v25 }
 0x597   : > { %v8122_v54 = vrot.slane %v3100_v14, %v8963_v13  ;;  %v3124_v24 = vadd.f32 %v3104_v7, %v3047_v11  ;;  %v3125_v3 = vadd.f32 %v3104_v7, %v3048_v60  ;;  %v3126_v46 = vadd.f32 %v3104_v7, %v3049_v12 }
 0x598   : > { %v3153_v1 = vmax.f32 %v3121_v40, 0.0  ;;  %v3154_v21 = vmax.f32 %v3122_v53, 0.0  ;;  %v3155_v39 = vmax.f32 %v3123_v8, 0.0  ;;  %v3127_v63 = vadd.f32 %v3104_v7, %v3050_v19  ;;  %v8964_v53 = vld [vmem:[#allocation7_spill] sm:$0xff]  ;;  %v8965_v19 = vld [vmem:[#allocation6_spill] sm:$0xff] }
 0x599   : > { %v3156_v36 = vmax.f32 %v3124_v24, 0.0  ;;  %v3157_v18 = vmax.f32 %v3125_v3, 0.0  ;;  %v3158_v32 = vmax.f32 %v3126_v46, 0.0  ;;  %v3128_v41 = vadd.f32 %v3104_v7, %v3051_v50  ;;  %v8967_v24 = vld [vmem:[#allocation5_spill] sm:$0xff] }
 0x59a   : > { %v3185_v42 = vpack.c.bf16 %v3154_v21, %v3153_v1  ;;  %v3159_v43 = vmax.f32 %v3127_v63, 0.0  ;;  %v3053_v6 = vmul.f32 %v3031_v27, %v7846_v51  ;;  %v3129_v35 = vadd.f32 %v3108_v33, %v3052_v37  ;;  %v8966_v21 = vld [vmem:[#allocation11_spill] sm:$0xff] }
 0x59b   : > { %v3186_v25 = vpack.c.bf16 %v3156_v36, %v3155_v39  ;;  %v3187_v4 = vpack.c.bf16 %v3158_v32, %v3157_v18  ;;  %v3160_v14 = vmax.f32 %v3128_v41, 0.0  ;;  %v3054_v11 = vmul.f32 %v7840_v38, %v3031_v27  ;;  %v8969_v18 = vld [vmem:[#allocation8_spill] sm:$0xff] }
 0x59c   : > { %5881 = vmatprep.mubr.bf16.mxu0 %v3185_v42  ;;  %v3130_v60 = vadd.f32 %v3108_v33, %v3053_v6  ;;  %v3161_v12 = vmax.f32 %v3129_v35, 0.0  ;;  %v3055_v40 = vmul.f32 %v8964_v53, %v3031_v27  ;;  %v3056_v8 = vmul.f32 %v3031_v27, %v8965_v19  ;;  %v8968_v42 = vld [vmem:[#allocation9_spill] sm:$0xff] }
 0x59d   : > { %5882 = vmatmul.mubr.bf16.vlgmr.msra.gmra.mrb[20].mxu0 %v3186_v25  ;;  %v3188_v46 = vpack.c.bf16 %v3160_v14, %v3159_v43  ;;  %v3131_v7 = vadd.f32 %v3108_v33, %v3054_v11  ;;  %v3057_v50 = vmul.f32 %v3031_v27, %v8966_v21  ;;  %v3058_v51 = vmul.f32 %v8967_v24, %v3031_v27 }
 0x59e   : > { %6469 = vmatpush3.bf16.msra.mxu0 %v7170_v58  ;;  %5885 = vmatprep.mubr.bf16.mxu0 %v3187_v4  ;;  %v3162_v36 = vmax.f32 %v3130_v60, 0.0  ;;  %v3132_v39 = vadd.f32 %v3108_v33, %v3055_v40  ;;  %v3133_v38 = vadd.f32 %v3108_v33, %v3056_v8  ;;  %v3059_v37 = vmul.f32 %v8968_v42, %v3031_v27  ;;  %v8970_v4 = vld [vmem:[#allocation10_spill] sm:$0xff] }
 0x59f   : > { %6470 = vmatprep.subr.bf16.mxu0 %v8866_v29  ;;  %v3163_v3 = vmax.f32 %v3131_v7, 0.0  ;;  %v3134_v1 = vadd.f32 %v3108_v33, %v3057_v50  ;;  %v3135_v63 = vadd.f32 %v3108_v33, %v3058_v51  ;;  %v3060_v32 = vmul.f32 %v8100_v2, %v8969_v18  ;;  %v8971_v7 = vld [vmem:[#allocation15_spill] sm:$0xff] }
 0x5a0   : > { %v3189_v41 = vpack.c.bf16 %v3162_v36, %v3161_v12  ;;  %v3164_v43 = vmax.f32 %v3132_v39, 0.0  ;;  %v3165_v6 = vmax.f32 %v3133_v38, 0.0  ;;  %v3136_v35 = vadd.f32 %v3108_v33, %v3059_v37  ;;  %v8972_v36 = vld [vmem:[#allocation14_spill] sm:$0xff]  ;;  %v8973_v38 = vld [vmem:[#allocation13_spill] sm:$0xff]  ;;  %v8974_v37 = vld [vmem:[#allocation12_spill] sm:$0xff] }
 0x5a1   : > { %v3166_v25 = vmax.f32 %v3134_v1, 0.0  ;;  %v3167_v14 = vmax.f32 %v3135_v63, 0.0  ;;  %v3061_v11 = vmul.f32 %v8100_v2, %v8970_v4  ;;  %v3137_v60 = vadd.f32 %v8119_v62, %v3060_v32  ;;  %v8975_v32 = vld [vmem:[#allocation17_spill] sm:$0xff]  ;;  %v8976_v4 = vld [vmem:[#allocation16_spill] sm:$0xff] }
 0x5a2   : > { %6472 = vmatpush3.bf16.msra.mxu0 %v7232_v0  ;;  %v3190_v27 = vpack.c.bf16 %v3164_v43, %v3163_v3  ;;  %v3168_v53 = vmax.f32 %v3136_v35, 0.0  ;;  %v3062_v40 = vmul.f32 %v7878_v45, %v8100_v2  ;;  %v3063_v12 = vmul.f32 %v7884_v52, %v8100_v2 }
 0x5a3   : > { %6473 = vmatprep.subr.bf16.mxu0 %v8866_v29  ;;  %v3191_v33 = vpack.c.bf16 %v3166_v25, %v3165_v6  ;;  %v3138_v19 = vadd.f32 %v8119_v62, %v3061_v11  ;;  %v3169_v8 = vmax.f32 %v3137_v60, 0.0  ;;  %v3064_v21 = vmul.f32 %v8100_v2, %v8971_v7 }
 0x5a4   : > { %v3192_v50 = vpack.c.bf16 %v3168_v53, %v3167_v14  ;;  %v3139_v24 = vadd.f32 %v8119_v62, %v3062_v40  ;;  %v3140_v51 = vadd.f32 %v8119_v62, %v3063_v12  ;;  %v3065_v45 = vmul.f32 %v8100_v2, %v8972_v36  ;;  %v8977_v12 = vld [vmem:[#allocation19_spill] sm:$0xff] }
 0x5a5   : > { %5886 = vmatmul.mubr.bf16.gmra.mrb[24].mxu0 %v3188_v46  ;;  %v3170_v39 = vmax.f32 %v3138_v19, 0.0  ;;  %v3141_v52 = vadd.f32 %v8119_v62, %v3064_v21  ;;  %v3066_v42 = vmul.f32 %v8973_v38, %v8100_v2  ;;  %v3067_v3 = vmul.f32 %v8974_v37, %v8100_v2  ;;  %v8978_v21 = vld [vmem:[#allocation21_spill] sm:$0xff] }
 0x5a6   : > { %6475 = vmatpush3.bf16.msra.mxu0 %v7241_v16  ;;  %5889 = vmatprep.mubr.bf16.mxu0 %v3189_v41  ;;  %v3171_v1 = vmax.f32 %v3139_v24, 0.0  ;;  %v3172_v63 = vmax.f32 %v3140_v51, 0.0  ;;  %v3142_v18 = vadd.f32 %v8119_v62, %v3065_v45  ;;  %v3068_v43 = vmul.f32 %v8107_v9, %v8975_v32 }
 0x5a7   : > { %6476 = vmatprep.subr.bf16.mxu0 %v8866_v29  ;;  %v3193_v46 = vpack.c.bf16 %v3170_v39, %v3169_v8  ;;  %v3173_v6 = vmax.f32 %v3141_v52, 0.0  ;;  %v3143_v35 = vadd.f32 %v8119_v62, %v3066_v42  ;;  %v3144_v25 = vadd.f32 %v8119_v62, %v3067_v3  ;;  %v8980_v42 = vld [vmem:[#allocation18_spill] sm:$0xff] }
 0x5a8   : > { %v3194_v14 = vpack.c.bf16 %v3172_v63, %v3171_v1  ;;  %v3174_v2 = vmax.f32 %v3142_v18, 0.0  ;;  %v3069_v41 = vmul.f32 %v8107_v9, %v8976_v4  ;;  %v3145_v11 = vadd.f32 %v8122_v54, %v3068_v43 }
 0x5a9   : > { %v3175_v60 = vmax.f32 %v3143_v35, 0.0  ;;  %v3176_v53 = vmax.f32 %v3144_v25, 0.0  ;;  %v3070_v40 = vmul.f32 %v7921_v10, %v8107_v9  ;;  %v3071_v19 = vmul.f32 %v8977_v12, %v8107_v9  ;;  %v8979_v10 = vld [vmem:[#allocation23_spill] sm:$0xff] }
 0x5aa   : > { %6478 = vmatpush3.bf16.msra.mxu0 %v7329_v48  ;;  %v3195_v8 = vpack.c.bf16 %v3174_v2, %v3173_v6  ;;  %v3146_v62 = vadd.f32 %v8122_v54, %v3069_v41  ;;  %v3177_v7 = vmax.f32 %v3145_v11, 0.0  ;;  %v3072_v24 = vmul.f32 %v8107_v9, %v8978_v21 }
 0x5ab   : > { %6479 = vmatprep.subr.bf16.mxu0 %v8866_v29  ;;  %v3196_v51 = vpack.c.bf16 %v3176_v53, %v3175_v60  ;;  %v3147_v36 = vadd.f32 %v8122_v54, %v3070_v40  ;;  %v3148_v45 = vadd.f32 %v8122_v54, %v3071_v19  ;;  %v3073_v39 = vmul.f32 %v8107_v9, %v8979_v10 }
 0x5ac   : > { %v3178_v52 = vmax.f32 %v3146_v62, 0.0  ;;  %v3149_v38 = vadd.f32 %v8122_v54, %v3072_v24  ;;  %v3074_v37 = vmul.f32 %v8980_v42, %v8107_v9  ;;  %v3075_v3 = vmul.f32 %v7949_v28, %v8107_v9 }
 0x5ad   : > { %5890 = vmatmul.mubr.bf16.gmra.mrb[28].mxu0 %v3190_v27  ;;  %v3179_v1 = vmax.f32 %v3147_v36, 0.0  ;;  %v3180_v63 = vmax.f32 %v3148_v45, 0.0  ;;  %v3150_v18 = vadd.f32 %v8122_v54, %v3073_v39 }
 0x5ae   : > { %6481 = vmatpush3.bf16.msra.mxu0 %v7386_v49  ;;  %5893 = vmatprep.mubr.bf16.mxu0 %v3191_v33  ;;  %v3197_v32 = vpack.c.bf16 %v3178_v52, %v3177_v7  ;;  %v3181_v43 = vmax.f32 %v3149_v38, 0.0  ;;  %v3151_v6 = vadd.f32 %v8122_v54, %v3074_v37  ;;  %v3152_v35 = vadd.f32 %v8122_v54, %v3075_v3 }
 0x5af   : > { %6482 = vmatprep.subr.bf16.mxu0 %v8866_v29  ;;  %v3198_v25 = vpack.c.bf16 %v3180_v63, %v3179_v1  ;;  %v3182_v2 = vmax.f32 %v3150_v18, 0.0 }
 0x5b0   : > { %v3183_v4 = vmax.f32 %v3151_v6, 0.0  ;;  %v3184_v28 = vmax.f32 %v3152_v35, 0.0 }
 0x5b1   : > { %v3199_v9 = vpack.c.bf16 %v3182_v2, %v3181_v43 }
 0x5b2   : > { %6484 = vmatpush3.bf16.msra.mxu0 %v7445_v22  ;;  %v3200_v27 = vpack.c.bf16 %v3184_v28, %v3183_v4 }
 0x5b3   : > { %6485 = vmatprep.subr.bf16.mxu0 %v8866_v29 }
 0x5b5   : > { %5894 = vmatmul.mubr.bf16.gmra.mrb[32].mxu0 %v3192_v50 }
 0x5b6   : > { %6487 = vmatpush3.bf16.msra.mxu0 %v7486_v23  ;;  %5897 = vmatprep.mubr.bf16.mxu0 %v3193_v46 }
 0x5b7   : > { %6488 = vmatprep.subr.bf16.mxu0 %v8866_v29 }
 0x5ba   : > { %6490 = vmatpush3.bf16.msra.mxu0 %v7511_v26 }
 0x5bb   : > { %6491 = vmatprep.subr.bf16.mxu0 %v8866_v29 }
 0x5bd   : > { %5898 = vmatmul.mubr.bf16.gmra.mrb[36].mxu0 %v3194_v14 }
 0x5be   : > { %5901 = vmatprep.mubr.bf16.mxu0 %v3195_v8 }
 0x5c5   : > { %5902 = vmatmul.mubr.bf16.gmra.mrb[40].mxu0 %v3196_v51 }
 0x5c6   : > { %5905 = vmatprep.mubr.bf16.mxu0 %v3197_v32 }
 0x5cd   : > { %5906 = vmatmul.mubr.bf16.gmra.mrb[44].mxu0 %v3198_v25 }
 0x5ce   : > { %5909 = vmatprep.mubr.bf16.mxu0 %v3199_v9 }
 0x5d5   : > { %5910 = vmatmul.mubr.bf16.gmra.mrb[48].mxu0 %v3200_v27 }
 0x5d6   : > { %5945 = vmatprep.mubr.msk.f32.mxu0 %vm6800_vm14, %v8905_v55 }
 0x670   : > { %v8197_v54 = vpop.f32.mrb[20].mxu0 }
 0x671   : > { %v8199_v33 = vpop.f32.mrb[21].mxu0  ;;  %v3485_v60 = vmul.f32 %v8197_v54, %v8197_v54 }
 0x672   : > { %v8201_v50 = vpop.f32.mrb[22].mxu0  ;;  %v3483_v14 = vmul.f32 %v8199_v33, %v8199_v33 }
 0x673   : > { %v8203_v46 = vpop.f32.mrb[23].mxu0  ;;  %v3486_v12 = vmul.f32 %v8201_v50, %v8201_v50 }
 0x674   : > { %v3431_v41 = vadd.f32 %v8203_v46, %v8199_v33  ;;  %v3484_v11 = vmul.f32 %v8203_v46, %v8203_v46 }
 0x676   : > { %v3432_v53 = vadd.f32 %v8197_v54, %v3431_v41  ;;  %v3515_v40 = vadd.f32 %v3484_v11, %v3483_v14 }
 0x678   : > { %v3516_v19 = vadd.f32 %v3515_v40, %v3485_v60  ;;  %v8216_v8 = vpop.f32.mrb[24].mxu0  ;;  %v3433_v62 = vadd.f32 %v8201_v50, %v3432_v53 }
 0x679   : > { %v8219_v7 = vpop.f32.mrb[25].mxu0  ;;  %v3489_v38 = vmul.f32 %v8216_v8, %v8216_v8 }
 0x67a   : > { %v3434_v21 = vadd.f32 %v3433_v62, %v8219_v7  ;;  %v3487_v24 = vmul.f32 %v8219_v7, %v8219_v7  ;;  %v3517_v51 = vadd.f32 %v3516_v19, %v3486_v12  ;;  %v8224_v36 = vpop.f32.mrb[26].mxu0 }
 0x67b   : > { %v8226_v45 = vpop.f32.mrb[27].mxu0  ;;  %v3490_v3 = vmul.f32 %v8224_v36, %v8224_v36 }
 0x67c   : > { %v3518_v10 = vadd.f32 %v3517_v51, %v3487_v24  ;;  %v3435_v39 = vadd.f32 %v3434_v21, %v8226_v45  ;;  %v3488_v52 = vmul.f32 %v8226_v45, %v8226_v45 }
 0x67e   : > { %v3436_v42 = vadd.f32 %v8216_v8, %v3435_v39  ;;  %v3519_v37 = vadd.f32 %v3518_v10, %v3488_v52 }
 0x680   : > { %v3437_v1 = vadd.f32 %v8224_v36, %v3436_v42  ;;  %v3520_v63 = vadd.f32 %v3519_v37, %v3489_v38  ;;  %v8237_v18 = vpop.f32.mrb[28].mxu0 }
 0x681   : > { %v8239_v32 = vpop.f32.mrb[29].mxu0  ;;  %v3493_v28 = vmul.f32 %v8237_v18, %v8237_v18 }
 0x682   : > { %v3521_v43 = vadd.f32 %v3520_v63, %v3490_v3  ;;  %v8241_v6 = vpop.f32.mrb[30].mxu0  ;;  %v3491_v25 = vmul.f32 %v8239_v32, %v8239_v32  ;;  %v3438_v14 = vrot.slane %v3437_v1, 4 }
 0x683   : > { %v8243_v35 = vpop.f32.mrb[31].mxu0  ;;  %v3494_v53 = vmul.f32 %v8241_v6, %v8241_v6 }
 0x684   : > { %v3444_v2 = vadd.f32 %v8243_v35, %v8239_v32  ;;  %v3492_v4 = vmul.f32 %v8243_v35, %v8243_v35  ;;  %v3439_v21 = vadd.f32 %v3438_v14, %v3437_v1  ;;  %v3522_v24 = vrot.slane %v3521_v43, 4 }
 0x686   : > { %v3445_v9 = vadd.f32 %v8237_v18, %v3444_v2  ;;  %v3528_v27 = vadd.f32 %v3492_v4, %v3491_v25  ;;  %v3440_v37 = vrot.slane %v3439_v21, 2  ;;  %v3523_v3 = vadd.f32 %v3522_v24, %v3521_v43 }
 0x688   : > { %v3529_v41 = vadd.f32 %v3528_v27, %v3493_v28  ;;  %v8254_v11 = vpop.f32.mrb[32].mxu0  ;;  %v3446_v60 = vadd.f32 %v8241_v6, %v3445_v9 }
 0x689   : > { %8981 = vst [vmem:[#allocation20_spill] sm:$0xff] %v8254_v11  ;;  %v8259_v40 = vpop.f32.mrb[33].mxu0  ;;  %v3497_v63 = vmul.f32 %v8254_v11, %v8254_v11 }
 0x68a   : > { %v3447_v12 = vadd.f32 %v3446_v60, %v8259_v40  ;;  %v3495_v19 = vmul.f32 %v8259_v40, %v8259_v40  ;;  %v8264_v62 = vpop.f32.mrb[34].mxu0  ;;  %v3530_v51 = vadd.f32 %v3529_v41, %v3494_v53  ;;  %v3441_v41 = vadd.f32 %v3440_v37, %v3439_v21 }
 0x68b   : > { %8982 = vst [vmem:[#allocation22_spill] sm:$0xff] %v8264_v62  ;;  %v8266_v10 = vpop.f32.mrb[35].mxu0  ;;  %v3498_v4 = vmul.f32 %v8264_v62, %v8264_v62  ;;  %v3524_v60 = vrot.slane %v3523_v3, 2 }
 0x68c   : > { %8983 = vst [vmem:[#allocation26_spill] sm:$0xff] %v8266_v10  ;;  %v3448_v39 = vadd.f32 %v3447_v12, %v8266_v10  ;;  %v3496_v52 = vmul.f32 %v8266_v10, %v8266_v10  ;;  %v3531_v38 = vadd.f32 %v3530_v51, %v3495_v19  ;;  %v3442_v37 = vrot.slane %v3441_v41, 1 }
 0x68e   : > { %v3449_v42 = vadd.f32 %v8254_v11, %v3448_v39  ;;  %v3532_v25 = vadd.f32 %v3531_v38, %v3496_v52 }
 0x690   : > { %v3450_v1 = vadd.f32 %v8264_v62, %v3449_v42  ;;  %v8275_v2 = vpop.f32.mrb[36].mxu0  ;;  %v3533_v28 = vadd.f32 %v3532_v25, %v3497_v63  ;;  %v3525_v63 = vadd.f32 %v3524_v60, %v3523_v3 }
 0x691   : > { %v8279_v9 = vpop.f32.mrb[37].mxu0  ;;  %v3501_v38 = vmul.f32 %v8275_v2, %v8275_v2 }
 0x692   : > { %8984 = vst [vmem:[#allocation28_spill] sm:$0xff] %v8279_v9  ;;  %v3451_v27 = vrot.slane %v3450_v1, 4  ;;  %v8281_v14 = vpop.f32.mrb[38].mxu0  ;;  %v3534_v43 = vadd.f32 %v3533_v28, %v3498_v4  ;;  %v3499_v19 = vmul.f32 %v8279_v9, %v8279_v9 }
 0x693   : > { %v8283_v53 = vpop.f32.mrb[39].mxu0  ;;  %v3502_v4 = vmul.f32 %v8281_v14, %v8281_v14 }
 0x694   : > { %8985 = vst [vmem:[#allocation24_spill] sm:$0xff] %v8283_v53  ;;  %v3452_v12 = vadd.f32 %v3451_v27, %v3450_v1  ;;  %v3457_v24 = vadd.f32 %v8283_v53, %v8279_v9  ;;  %v3500_v51 = vmul.f32 %v8283_v53, %v8283_v53  ;;  %v3535_v39 = vrot.slane %v3534_v43, 4 }
 0x696   : > { %v3453_v52 = vrot.slane %v3452_v12, 2  ;;  %v3458_v21 = vadd.f32 %v8275_v2, %v3457_v24  ;;  %v3541_v42 = vadd.f32 %v3500_v51, %v3499_v19  ;;  %v3536_v25 = vadd.f32 %v3535_v39, %v3534_v43 }
 0x697   : > { %v3443_v43 = vadd.f32 %v3442_v37, %v3441_v41 }
 0x698   : > { %v3454_v1 = vadd.f32 %v3453_v52, %v3452_v12  ;;  %v3542_v28 = vadd.f32 %v3541_v42, %v3501_v38  ;;  %v8296_v27 = vpop.f32.mrb[40].mxu0  ;;  %v3459_v53 = vadd.f32 %v8281_v14, %v3458_v21  ;;  %v3537_v9 = vrot.slane %v3536_v25, 2 }
 0x699   : > { %8986 = vst [vmem:[#allocation27_spill] sm:$0xff] %v8296_v27  ;;  %v8299_v62 = vpop.f32.mrb[41].mxu0  ;;  %v3526_v12 = vrot.slane %v3525_v63, 1 }
 0x69a   : > { %8987 = vst [vmem:[#allocation31_spill] sm:$0xff] %v8299_v62  ;;  %v3455_v11 = vrot.slane %v3454_v1, 1  ;;  %v3460_v10 = vadd.f32 %v3459_v53, %v8299_v62  ;;  %v3503_v19 = vmul.f32 %v8299_v62, %v8299_v62  ;;  %v3543_v3 = vadd.f32 %v3542_v28, %v3502_v4  ;;  %v8304_v60 = vpop.f32.mrb[42].mxu0 }
 0x69b   : > { %8988 = vst [vmem:[#allocation33_spill] sm:$0xff] %v8304_v60  ;;  %v3538_v24 = vadd.f32 %v3537_v9, %v3536_v25  ;;  %v8306_v51 = vpop.f32.mrb[43].mxu0  ;;  %v3505_v4 = vmul.f32 %v8296_v27, %v8296_v27  ;;  %v3527_v37 = vadd.f32 %v3526_v12, %v3525_v63 }
 0x69c   : > { %8989 = vst [vmem:[#allocation30_spill] sm:$0xff] %v8306_v51  ;;  %v3456_v39 = vadd.f32 %v3455_v11, %v3454_v1  ;;  %v3544_v52 = vadd.f32 %v3543_v3, %v3503_v19  ;;  %v3461_v38 = vadd.f32 %v3460_v10, %v8306_v51  ;;  %v3504_v21 = vmul.f32 %v8306_v51, %v8306_v51 }
 0x69d   : > { %v3539_v42 = vrot.slane %v3538_v24, 1  ;;  %v3506_v11 = vmul.f32 %v8304_v60, %v8304_v60 }
 0x69e   : > { %v3571_v53 = vsel %vm1059_vm4, %v3456_v39, %v3443_v43  ;;  %v3462_v28 = vadd.f32 %v8296_v27, %v3461_v38  ;;  %v3545_v41 = vadd.f32 %v3544_v52, %v3504_v21 }
 0x69f   : > { %v3540_v9 = vadd.f32 %v3539_v42, %v3538_v24 }
 0x6a0   : > { %v3463_v25 = vadd.f32 %v8304_v60, %v3462_v28  ;;  %v3546_v10 = vadd.f32 %v3545_v41, %v3505_v4  ;;  %v8318_v1 = vpop.f32.mrb[44].mxu0 }
 0x6a1   : > { %v3579_v19 = vsel %vm1070_vm1, %v3540_v9, %v3527_v37  ;;  %v8321_v3 = vpop.f32.mrb[45].mxu0  ;;  %v3509_v42 = vmul.f32 %v8318_v1, %v8318_v1 }
 0x6a2   : > { %8990 = vst [vmem:[#allocation32_spill] sm:$0xff] %v8321_v3  ;;  %v3464_v43 = vrot.slane %v3463_v25, 4  ;;  %v3547_v39 = vadd.f32 %v3546_v10, %v3506_v11  ;;  %v8323_v51 = vpop.f32.mrb[46].mxu0  ;;  %v3507_v63 = vmul.f32 %v8321_v3, %v8321_v3 }
 0x6a3   : > { %8991 = vst [vmem:[#allocation37_spill] sm:$0xff] %v8323_v51  ;;  %v8327_v12 = vpop.f32.mrb[47].mxu0 }
 0x6a4   : > { %8992 = vst [vmem:[#allocation35_spill] sm:$0xff] %v8327_v12  ;;  %v3465_v24 = vadd.f32 %v3464_v43, %v3463_v25  ;;  %v3548_v52 = vrot.slane %v3547_v39, 4  ;;  %v3470_v38 = vadd.f32 %v8327_v12, %v8321_v3  ;;  %v3508_v21 = vmul.f32 %v8327_v12, %v8327_v12 }
 0x6a5   : > { %v3510_v43 = vmul.f32 %v8323_v51, %v8323_v51 }
 0x6a6   : > { %v3466_v4 = vrot.slane %v3465_v24, 2  ;;  %v3549_v28 = vadd.f32 %v3548_v52, %v3547_v39  ;;  %v3471_v41 = vadd.f32 %v8318_v1, %v3470_v38  ;;  %v3554_v37 = vadd.f32 %v3508_v21, %v3507_v63 }
 0x6a8   : > { %v3467_v9 = vadd.f32 %v3466_v4, %v3465_v24  ;;  %v3550_v11 = vrot.slane %v3549_v28, 2  ;;  %v3555_v10 = vadd.f32 %v3554_v37, %v3509_v42  ;;  %v8336_v60 = vpop.f32.mrb[48].mxu0  ;;  %v3472_v25 = vadd.f32 %v8323_v51, %v3471_v41 }
 0x6a9   : > { %8993 = vst [vmem:[#allocation25_spill] sm:$0xff] %v8336_v60  ;;  %v8341_v3 = vpop.f32.mrb[49].mxu0 }
 0x6aa   : > { %8994 = vst [vmem:[#allocation29_spill] sm:$0xff] %v8341_v3  ;;  %v3468_v12 = vrot.slane %v3467_v9, 1  ;;  %v3551_v27 = vadd.f32 %v3550_v11, %v3549_v28  ;;  %v3473_v62 = vadd.f32 %v3472_v25, %v8341_v3  ;;  %v3511_v39 = vmul.f32 %v8341_v3, %v8341_v3  ;;  %v8346_v63 = vpop.f32.mrb[50].mxu0 }
 0x6ab   : > { %v3556_v24 = vadd.f32 %v3555_v10, %v3510_v43  ;;  %v8348_v52 = vpop.f32.mrb[51].mxu0  ;;  %v3513_v25 = vmul.f32 %v8336_v60, %v8336_v60 }
 0x6ac   : > { %8995 = vst [vmem:[#allocation34_spill] sm:$0xff] %v8348_v52  ;;  %v3469_v38 = vadd.f32 %v3468_v12, %v3467_v9  ;;  %v3552_v21 = vrot.slane %v3551_v27, 1  ;;  %v3474_v42 = vadd.f32 %v3473_v62, %v8348_v52  ;;  %v3512_v4 = vmul.f32 %v8348_v52, %v8348_v52 }
 0x6ad   : > { %v3557_v41 = vadd.f32 %v3556_v24, %v3511_v39  ;;  %v3514_v62 = vmul.f32 %v8346_v63, %v8346_v63 }
 0x6ae   : > { %v3553_v37 = vadd.f32 %v3552_v21, %v3551_v27  ;;  %v3572_v28 = vsel %vm1061_vm15, %v3469_v38, %v3571_v53  ;;  %v3475_v11 = vadd.f32 %v8336_v60, %v3474_v42 }
 0x6af   : > { %v3558_v3 = vadd.f32 %v3557_v41, %v3512_v4 }
 0x6b0   : > { %v3580_v10 = vsel %vm1072_vm2, %v3553_v37, %v3579_v19  ;;  %v3476_v12 = vadd.f32 %v8346_v63, %v3475_v11 }
 0x6b1   : > { %v3559_v9 = vadd.f32 %v3558_v3, %v3513_v25 }
 0x6b2   : > { %v3477_v43 = vrot.slane %v3476_v12, 4 }
 0x6b3   : > { %v3560_v52 = vadd.f32 %v3559_v9, %v3514_v62  ;;  %v4896_v9 = vld [vmem:[%s8704_s3 + $0x2] ss:$0 sm:$0xff] }
 0x6b4   : > { %v3478_v39 = vadd.f32 %v3477_v43, %v3476_v12 }
 0x6b5   : > { %v3561_v27 = vrot.slane %v3560_v52, 4 }
 0x6b6   : > { %v3479_v24 = vrot.slane %v3478_v39, 2 }
 0x6b7   : > { %v3562_v53 = vadd.f32 %v3561_v27, %v3560_v52 }
 0x6b8   : > { %v3480_v38 = vadd.f32 %v3479_v24, %v3478_v39 }
 0x6b9   : > { %v3563_v21 = vrot.slane %v3562_v53, 2 }
 0x6ba   : > { %v3481_v42 = vrot.slane %v3480_v38, 1 }
 0x6bb   : > { %v3564_v51 = vadd.f32 %v3563_v21, %v3562_v53  ;;  %v4897_v53 = vld [vmem:[%s8705_s4 + $0x2] ss:$0 sm:$0xff]  ;;  %v9007_v21 = vld [vmem:[#allocation48_spill] sm:$0xff] }
 0x6bc   : > { %v3482_v60 = vadd.f32 %v3481_v42, %v3480_v38 }
 0x6bd   : > { %v3565_v4 = vrot.slane %v3564_v51, 1 }
 0x6be   : > { %v3573_v19 = vsel %vm1063_vm3, %v3482_v60, %v3572_v28 }
 0x6bf   : > { %v3566_v41 = vadd.f32 %v3565_v4, %v3564_v51 }
 0x6c1   : > { %v3581_v37 = vsel %vm1074_vm5, %v3566_v41, %v3580_v10 }
 0x6c2   : > { %v3583_v11 = vsel %vm1077_vm0, %v3573_v19, %v3581_v37 }
 0x6c3   : > { %v8364_v3 = vand.u32 4294901760, %v3583_v11 }
 0x6c5   : > { %v3666_v25 = vsub.f32 %v3583_v11, %v8364_v3 }
 0x6c7   : > { %v3667_v12 = vand.u32 4294901760, %v3666_v25 }
 0x6c9   : > { %v3668_v62 = vsub.f32 %v3666_v25, %v3667_v12 }
 0x6cb   : > { %v3669_v52 = vand.u32 4294901760, %v3668_v62 }
 0x6cd   : > { %5946 = vmatmul.mubr.f32.vlgmr.msra.gmra.mrb[18].mxu0 %v3669_v52 }
 0x6ce   : > { %6493 = vmatpush3.bf16.msra.mxu0 %v8954_v59  ;;  %5980 = vmatprep.mubr.msk.f32.mxu0 %vm6800_vm14, %v8905_v55  ;;  %v9006_v59 = vld [vmem:[#allocation47_spill] sm:$0xff] }
 0x6cf   : > { %6494 = vmatprep.subr.bf16.mxu0 %v8866_v29 }
 0x6d2   : > { %6496 = vmatpush3.bf16.msra.mxu0 %v8955_v30 }
 0x6d3   : > { %6497 = vmatprep.subr.bf16.mxu0 %v8866_v29 }
 0x6d6   : > { %6499 = vmatpush3.bf16.msra.mxu0 %v8956_v15 }
 0x6d7   : > { %6500 = vmatprep.subr.bf16.mxu0 %v8866_v29 }
 0x6da   : > { %6502 = vmatpush3.bf16.msra.mxu0 %v7496_v20  ;;  %v8997_v20 = vld [vmem:[#allocation38_spill] sm:$0xff] }
 0x6db   : > { %6503 = vmatprep.subr.bf16.mxu0 %v8866_v29 }
 0x6de   : > { %6505 = vmatpush3.bf16.msra.mxu0 %v7509_v47  ;;  %v9002_v47 = vld [vmem:[#allocation43_spill] sm:$0xff] }
 0x6df   : > { %6506 = vmatprep.subr.bf16.mxu0 %v8866_v29 }
 0x6e2   : > { %6508 = vmatpush3.bf16.msra.mxu0 %v7515_v57  ;;  %v9003_v57 = vld [vmem:[#allocation44_spill] sm:$0xff] }
 0x6e3   : > { %6509 = vmatprep.subr.bf16.mxu0 %v8866_v29 }
 0x6e6   : > { %6511 = vmatpush3.bf16.msra.mxu0 %v7529_v44  ;;  %v9004_v44 = vld [vmem:[#allocation45_spill] sm:$0xff] }
 0x6e7   : > { %6512 = vmatprep.subr.bf16.mxu0 %v8866_v29 }
 0x6ea   : > { %6514 = vmatpush3.bf16.msra.mxu0 %v7573_v17  ;;  %v9005_v17 = vld [vmem:[#allocation46_spill] sm:$0xff] }
 0x6eb   : > { %6515 = vmatprep.subr.bf16.mxu0 %v8866_v29 }
 0x6ed   : > { %5981 = vmatmul.mubr.f32.vlgmr.msra.gmra.mrb[18].mxu0 %v8364_v3 }
 0x6ee   : > { %6517 = vmatpush3.bf16.msra.mxu0 %v7183_v5  ;;  %6015 = vmatprep.mubr.msk.f32.mxu0 %vm6800_vm14, %v8905_v55  ;;  %v8996_v5 = vld [vmem:[#allocation36_spill] sm:$0xff] }
 0x6ef   : > { %6518 = vmatprep.subr.bf16.mxu0 %v8866_v29 }
 0x6f2   : > { %6520 = vmatpush3.bf16.msra.mxu0 %v7257_v34  ;;  %v8998_v34 = vld [vmem:[#allocation39_spill] sm:$0xff] }
 0x6f3   : > { %6521 = vmatprep.subr.bf16.mxu0 %v8866_v29 }
 0x6f6   : > { %6523 = vmatpush3.bf16.msra.mxu0 %v7280_v56  ;;  %v8999_v56 = vld [vmem:[#allocation40_spill] sm:$0xff] }
 0x6f7   : > { %6524 = vmatprep.subr.bf16.mxu0 %v8866_v29 }
 0x6fa   : > { %6526 = vmatpush3.bf16.msra.mxu0 %v7358_v61  ;;  %v9000_v61 = vld [vmem:[#allocation41_spill] sm:$0xff] }
 0x6fb   : > { %6527 = vmatprep.subr.bf16.mxu0 %v8866_v29 }
 0x6fe   : > { %6529 = vmatpush3.bf16.msra.mxu0 %v7413_v31  ;;  %v9001_v31 = vld [vmem:[#allocation42_spill] sm:$0xff] }
 0x6ff   : > { %6530 = vmatprep.subr.bf16.mxu0 %v8866_v29 }
 0x702   : > { %6532 = vmatpush3.bf16.msra.mxu0 %v8996_v5 }
 0x703   : > { %6533 = vmatprep.subr.bf16.mxu0 %v8866_v29 }
 0x706   : > { %6535 = vmatpush3.bf16.msra.mxu0 %v8997_v20 }
 0x707   : > { %6536 = vmatprep.subr.bf16.mxu0 %v8866_v29 }
 0x70a   : > { %6538 = vmatpush3.bf16.msra.mxu0 %v8998_v34 }
 0x70b   : > { %6539 = vmatprep.subr.bf16.mxu0 %v8866_v29 }
 0x70d   : > { %6016 = vmatmul.mubr.f32.vlgmr.msra.gmra.mrb[18].mxu0 %v3666_v25 }
 0x70e   : > { %6541 = vmatpush3.bf16.msra.mxu0 %v7170_v58  ;;  %6050 = vmatprep.mubr.msk.f32.mxu0 %vm6800_vm14, %v8905_v55 }
 0x70f   : > { %6542 = vmatprep.subr.bf16.mxu0 %v8866_v29 }
 0x712   : > { %6544 = vmatpush3.bf16.msra.mxu0 %v7232_v0 }
 0x713   : > { %6545 = vmatprep.subr.bf16.mxu0 %v8866_v29 }
 0x716   : > { %6547 = vmatpush3.bf16.msra.mxu0 %v7241_v16 }
 0x717   : > { %6548 = vmatprep.subr.bf16.mxu0 %v8866_v29 }
 0x71a   : > { %6550 = vmatpush3.bf16.msra.mxu0 %v7329_v48 }
 0x71b   : > { %6551 = vmatprep.subr.bf16.mxu0 %v8866_v29 }
 0x71e   : > { %6553 = vmatpush3.bf16.msra.mxu0 %v7386_v49 }
 0x71f   : > { %6554 = vmatprep.subr.bf16.mxu0 %v8866_v29 }
 0x722   : > { %6556 = vmatpush3.bf16.msra.mxu0 %v7445_v22 }
 0x723   : > { %6557 = vmatprep.subr.bf16.mxu0 %v8866_v29 }
 0x726   : > { %6559 = vmatpush3.bf16.msra.mxu0 %v7486_v23 }
 0x727   : > { %6560 = vmatprep.subr.bf16.mxu0 %v8866_v29 }
 0x72a   : > { %6562 = vmatpush3.bf16.msra.mxu0 %v7511_v26 }
 0x72b   : > { %6563 = vmatprep.subr.bf16.mxu0 %v8866_v29 }
 0x72d   : > { %6051 = vmatmul.mubr.f32.vlgmr.msra.gmra.mrb[18].mxu0 %v3667_v12 }
 0x72e   : > { %6565 = vmatpush3.bf16.msra.mxu0 %v8999_v56  ;;  %6085 = vmatprep.mubr.msk.f32.mxu0 %vm6800_vm14, %v8905_v55 }
 0x72f   : > { %6566 = vmatprep.subr.bf16.mxu0 %v8866_v29 }
 0x732   : > { %6568 = vmatpush3.bf16.msra.mxu0 %v9000_v61 }
 0x733   : > { %6569 = vmatprep.subr.bf16.mxu0 %v8866_v29 }
 0x736   : > { %6571 = vmatpush3.bf16.msra.mxu0 %v9001_v31 }
 0x737   : > { %6572 = vmatprep.subr.bf16.mxu0 %v8866_v29 }
 0x73a   : > { %6574 = vmatpush3.bf16.msra.mxu0 %v9002_v47 }
 0x73b   : > { %6575 = vmatprep.subr.bf16.mxu0 %v8866_v29 }
 0x73e   : > { %6577 = vmatpush3.bf16.msra.mxu0 %v9003_v57 }
 0x73f   : > { %6578 = vmatprep.subr.bf16.mxu0 %v8866_v29 }
 0x742   : > { %6580 = vmatpush3.bf16.msra.mxu0 %v9004_v44 }
 0x743   : > { %6581 = vmatprep.subr.bf16.mxu0 %v8866_v29 }
 0x746   : > { %6583 = vmatpush3.bf16.msra.mxu0 %v9005_v17 }
 0x747   : > { %6584 = vmatprep.subr.bf16.mxu0 %v8866_v29 }
 0x74a   : > { %6586 = vmatpush3.bf16.msra.mxu0 %v9006_v59 }
 0x74b   : > { %6587 = vmatprep.subr.bf16.mxu0 %v8866_v29 }
 0x74d   : > { %6086 = vmatmul.mubr.f32.vlgmr.msra.gmra.mrb[18].mxu0 %v8364_v3 }
 0x74e   : > { %6589 = vmatpush3.bf16.msra.mxu0 %v7170_v58  ;;  %6120 = vmatprep.mubr.msk.f32.mxu0 %vm6800_vm14, %v8905_v55  ;;  %v6719_v58 = vld [vmem:[%s8706_s5] sm:$0xff]  }
 0x74f   : > { %6590 = vmatprep.subr.bf16.mxu0 %v8866_v29  ;;  %6123 = vmatprep.subr.bf16.mxu1 %v6719_v58 }
 0x750   : > { %6124 = vmatpush3.bf16.msra.mxu1 %v6719_v58 }
 0x752   : > { %6592 = vmatpush3.bf16.msra.mxu0 %v7232_v0  ;;  %v6721_v0 = vld [vmem:[%s8706_s5 + $0x10] sm:$0xff]  }
 0x753   : > { %6593 = vmatprep.subr.bf16.mxu0 %v8866_v29 }
 0x756   : > { %6595 = vmatpush3.bf16.msra.mxu0 %v7241_v16  ;;  %v6722_v16 = vld [vmem:[%s8706_s5 + $0x18] sm:$0xff]  }
 0x757   : > { %6596 = vmatprep.subr.bf16.mxu0 %v8866_v29 }
 0x75a   : > { %6598 = vmatpush3.bf16.msra.mxu0 %v7329_v48  ;;  %v6723_v48 = vld [vmem:[%s8706_s5 + $0x20] sm:$0xff]  }
 0x75b   : > { %6599 = vmatprep.subr.bf16.mxu0 %v8866_v29 }
 0x75e   : > { %6601 = vmatpush3.bf16.msra.mxu0 %v7386_v49  ;;  %v6725_v49 = vld [vmem:[%s8706_s5 + $0x30] sm:$0xff]  }
 0x75f   : > { %6602 = vmatprep.subr.bf16.mxu0 %v8866_v29 }
 0x762   : > { %6604 = vmatpush3.bf16.msra.mxu0 %v7445_v22  ;;  %v6720_v22 = vld [vmem:[%s8706_s5 + $0x8] sm:$0xff]  }
 0x763   : > { %6605 = vmatprep.subr.bf16.mxu0 %v8866_v29  ;;  %6125 = vmatprep.subr.bf16.mxu1 %v6720_v22 }
 0x764   : > { %6126 = vmatpush3.bf16.msra.mxu1 %v6720_v22 }
 0x765   : > { %6127 = vmatprep.subr.bf16.mxu1 %v6721_v0 }
 0x766   : > { %6607 = vmatpush3.bf16.msra.mxu0 %v7486_v23  ;;  %v6726_v23 = vld [vmem:[%s8706_s5 + $0x38] sm:$0xff]  }
 0x767   : > { %6608 = vmatprep.subr.bf16.mxu0 %v8866_v29  ;;  %v6724_v29 = vld [vmem:[%s8706_s5 + $0x28] sm:$0xff]  }
 0x768   : > { %6128 = vmatpush3.bf16.msra.mxu1 %v6721_v0 }
 0x769   : > { %6129 = vmatprep.subr.bf16.mxu1 %v6722_v16 }
 0x76a   : > { %6610 = vmatpush3.bf16.msra.mxu0 %v7511_v26 }
 0x76c   : > { %6130 = vmatpush3.bf16.msra.mxu1 %v6722_v16 }
 0x76d   : > { %6121 = vmatmul.mubr.f32.vlgmr.msra.gmra.mrb[18].mxu0 %v8364_v3  ;;  %6131 = vmatprep.subr.bf16.mxu1 %v6723_v48 }
 0x770   : > { %6132 = vmatpush3.bf16.msra.mxu1 %v6723_v48 }
 0x771   : > { %6133 = vmatprep.subr.bf16.mxu1 %v6724_v29 }
 0x774   : > { %6134 = vmatpush3.bf16.msra.mxu1 %v6724_v29 }
 0x775   : > { %6135 = vmatprep.subr.bf16.mxu1 %v6725_v49 }
 0x778   : > { %6136 = vmatpush3.bf16.msra.mxu1 %v6725_v49 }
 0x779   : > { %6137 = vmatprep.subr.bf16.mxu1 %v6726_v23 }
 0x77c   : > { %6138 = vmatpush3.bf16.msra.mxu1 %v6726_v23 }
 0x840   : > { %v4221_v26 = vpop.f32.mrb[18].mxu0 }
 0x841   : > { %v4225_v55 = vmul.f32 0.00390625, %v4221_v26  ;;  %v6122_v30 = vpop.f32.mrb[19].mxu0 }
 0x843   : > { %v4226_v15 = vmul.f32 %v4225_v55, %v4225_v55 }
 0x845   : > { %v4228_v60 = vrot.slane %v4226_v15, 4 }
 0x847   : > { %v4230_v51 = vsub.f32 %v4225_v55, %v4228_v60 }
 0x849   : > { %v4231_v28 = vmax.f32 %v4230_v51, 0.0 }
 0x84b   : > { %v4232_v10 = vadd.f32 1e-05, %v4231_v28 }
 0x84d   : > { %6731 = vrsqrt.f32 %v4232_v10 }
 0x857   : > { %v6732_v43 = vpop.eup %6731 }
 0x858   : > { %v4240_v39 = vmul.f32 %v6732_v43, %v4896_v9 }
 0x85a   : > { %v4242_v27 = vrot.slane %v4240_v39, 4  ;;  %v4252_v24 = vcombine.high %v4240_v39, %v4240_v39 }
 0x85c   : > { %v4244_v38 = vmul.f32 %v4242_v27, %v4225_v55  ;;  %v4259_v42 = vrot.slane %v4252_v24, %v9007_v21 }
 0x85e   : > { %v4251_v4 = vsub.f32 %v4897_v53, %v4244_v38  ;;  %v4260_v19 = vcombine.high %v4259_v42, %v4259_v42  ;;  %v4267_v41 = vrot.slane %v4259_v42, %v9007_v21 }
 0x860   : > { %v4274_v37 = vrot.slane %v4260_v19, %v9007_v21  ;;  %v4275_v11 = vcombine.high %v4267_v41, %v4267_v41  ;;  %v4280_v3 = vrot.slane %v4267_v41, %v8963_v13  ;;  %v4336_v25 = vrot.slane %v4251_v4, %v9007_v21  ;;  %v9008_v19 = vld [vmem:[#allocation26_spill] sm:$0xff] }
 0x862   : > { %v4276_v12 = vcombine.high %v4274_v37, %v4274_v37  ;;  %v4284_v62 = vrot.slane %v4274_v37, %v8963_v13  ;;  %v8496_v52 = vrot.slane %v4275_v11, %v8963_v13  ;;  %v4337_v5 = vcombine.high %v4336_v25, %v4336_v25  ;;  %v9009_v37 = vld [vmem:[#allocation20_spill] sm:$0xff] }
 0x863   : > { %v4344_v20 = vrot.slane %v4336_v25, %v9007_v21  ;;  %v4297_v34 = vmul.f32 %v4280_v3, %v8199_v33  ;;  %v4298_v56 = vmul.f32 %v4280_v3, %v8203_v46  ;;  %v4299_v61 = vmul.f32 %v8197_v54, %v4280_v3 }
 0x864   : > { %v8503_v31 = vrot.slane %v4276_v12, %v8963_v13  ;;  %v4351_v47 = vrot.slane %v4337_v5, %v9007_v21  ;;  %v4300_v57 = vmul.f32 %v8201_v50, %v4280_v3  ;;  %v4301_v44 = vmul.f32 %v4280_v3, %v8219_v7  ;;  %v9010_v12 = vld [vmem:[#allocation22_spill] sm:$0xff] }
 0x865   : > { %v4352_v17 = vcombine.high %v4344_v20, %v4344_v20  ;;  %v4357_v59 = vrot.slane %v4344_v20, %v8963_v13  ;;  %v4302_v58 = vmul.f32 %v4280_v3, %v8226_v45  ;;  %v4303_v33 = vmul.f32 %v8216_v8, %v4280_v3 }
 0x866   : > { %v4353_v22 = vcombine.high %v4351_v47, %v4351_v47  ;;  %v4361_v46 = vrot.slane %v4351_v47, %v8963_v13  ;;  %v4304_v54 = vmul.f32 %v8224_v36, %v4280_v3  ;;  %v4305_v0 = vmul.f32 %v4284_v62, %v8239_v32 }
 0x867   : > { %v8515_v16 = vrot.slane %v4352_v17, %v8963_v13  ;;  %v4374_v50 = vadd.f32 %v4357_v59, %v4297_v34  ;;  %v4375_v48 = vadd.f32 %v4357_v59, %v4298_v56  ;;  %v4376_v7 = vadd.f32 %v4357_v59, %v4299_v61  ;;  %v9011_v56 = vld [vmem:[#allocation28_spill] sm:$0xff] }
 0x868   : > { %v8518_v29 = vrot.slane %v4353_v22, %v8963_v13  ;;  %v4377_v49 = vadd.f32 %v4357_v59, %v4300_v57  ;;  %v4378_v45 = vadd.f32 %v4357_v59, %v4301_v44  ;;  %v4379_v23 = vadd.f32 %v4357_v59, %v4302_v58 }
 0x869   : > { %v4406_v8 = vmax.f32 %v4374_v50, 0.0  ;;  %v4407_v26 = vmax.f32 %v4375_v48, 0.0  ;;  %v4408_v55 = vmax.f32 %v4376_v7, 0.0  ;;  %v4380_v30 = vadd.f32 %v4357_v59, %v4303_v33 }
 0x86a   : > { %v4409_v15 = vmax.f32 %v4377_v49, 0.0  ;;  %v4410_v36 = vmax.f32 %v4378_v45, 0.0  ;;  %v4411_v60 = vmax.f32 %v4379_v23, 0.0  ;;  %v4381_v32 = vadd.f32 %v4357_v59, %v4304_v54  ;;  %v9012_v59 = vld [vmem:[#allocation24_spill] sm:$0xff] }
 0x86b   : > { %v4438_v51 = vpack.c.bf16 %v4407_v26, %v4406_v8  ;;  %v4412_v28 = vmax.f32 %v4380_v30, 0.0  ;;  %v4306_v10 = vmul.f32 %v4284_v62, %v8243_v35  ;;  %v4382_v9 = vadd.f32 %v4361_v46, %v4305_v0  ;;  %v9014_v26 = vld [vmem:[#allocation30_spill] sm:$0xff] }
 0x86c   : > { %v4439_v43 = vpack.c.bf16 %v4409_v15, %v4408_v55  ;;  %v4440_v39 = vpack.c.bf16 %v4411_v60, %v4410_v36  ;;  %v4413_v13 = vmax.f32 %v4381_v32, 0.0  ;;  %v4307_v27 = vmul.f32 %v8237_v18, %v4284_v62  ;;  %v9016_v36 = vld [vmem:[#allocation33_spill] sm:$0xff] }
 0x86d   : > { %6139 = vmatprep.mubr.bf16.mxu1 %v4438_v51  ;;  %v4383_v24 = vadd.f32 %v4361_v46, %v4306_v10  ;;  %v4414_v53 = vmax.f32 %v4382_v9, 0.0  ;;  %v4308_v38 = vmul.f32 %v8241_v6, %v4284_v62  ;;  %v4309_v21 = vmul.f32 %v4284_v62, %v8259_v40  ;;  %v9017_v10 = vld [vmem:[#allocation32_spill] sm:$0xff] }
 0x86e   : > { %6140 = vmatmul.mubr.bf16.vlgmr.msra.gmra.mrb[68].mxu1 %v4439_v43  ;;  %v4441_v42 = vpack.c.bf16 %v4413_v13, %v4412_v28  ;;  %v4384_v4 = vadd.f32 %v4361_v46, %v4307_v27  ;;  %v4310_v41 = vmul.f32 %v4284_v62, %v9008_v19  ;;  %v4311_v35 = vmul.f32 %v9009_v37, %v4284_v62 }
 0x86f   : > { %6143 = vmatprep.mubr.bf16.mxu1 %v4440_v39  ;;  %v4415_v11 = vmax.f32 %v4383_v24, 0.0  ;;  %v4385_v3 = vadd.f32 %v4361_v46, %v4308_v38  ;;  %v4386_v25 = vadd.f32 %v4361_v46, %v4309_v21  ;;  %v4312_v18 = vmul.f32 %v9010_v12, %v4284_v62  ;;  %v9018_v38 = vld [vmem:[#allocation35_spill] sm:$0xff] }
 0x870   : > { %v4416_v5 = vmax.f32 %v4384_v4, 0.0  ;;  %v4387_v20 = vadd.f32 %v4361_v46, %v4310_v41  ;;  %v4388_v34 = vadd.f32 %v4361_v46, %v4311_v35  ;;  %v4313_v6 = vmul.f32 %v8496_v52, %v9011_v56  ;;  %v9019_v41 = vld [vmem:[#allocation37_spill] sm:$0xff] }
 0x871   : > { %v4442_v40 = vpack.c.bf16 %v4415_v11, %v4414_v53  ;;  %v4417_v61 = vmax.f32 %v4385_v3, 0.0  ;;  %v4418_v47 = vmax.f32 %v4386_v25, 0.0  ;;  %v4389_v57 = vadd.f32 %v4361_v46, %v4312_v18  ;;  %v9013_v46 = vld [vmem:[#allocation31_spill] sm:$0xff] }
 0x872   : > { %v4419_v44 = vmax.f32 %v4387_v20, 0.0  ;;  %v4420_v17 = vmax.f32 %v4388_v34, 0.0  ;;  %v4314_v58 = vmul.f32 %v8496_v52, %v9012_v59  ;;  %v4390_v33 = vadd.f32 %v8515_v16, %v4313_v6  ;;  %v9021_v20 = vld [vmem:[#allocation34_spill] sm:$0xff]  ;;  %v9022_v6 = vld [vmem:[#allocation25_spill] sm:$0xff] }
 0x873   : > { %v4443_v22 = vpack.c.bf16 %v4417_v61, %v4416_v5  ;;  %v4421_v54 = vmax.f32 %v4389_v57, 0.0  ;;  %v4315_v62 = vmul.f32 %v8275_v2, %v8496_v52  ;;  %v4316_v0 = vmul.f32 %v8281_v14, %v8496_v52  ;;  %v9015_v14 = vld [vmem:[#allocation27_spill] sm:$0xff] }
 0x874   : > { %v4444_v50 = vpack.c.bf16 %v4419_v44, %v4418_v47  ;;  %v4391_v48 = vadd.f32 %v8515_v16, %v4314_v58  ;;  %v4422_v7 = vmax.f32 %v4390_v33, 0.0  ;;  %v4317_v49 = vmul.f32 %v8496_v52, %v9013_v46 }
 0x875   : > { %v4445_v45 = vpack.c.bf16 %v4421_v54, %v4420_v17  ;;  %v4392_v23 = vadd.f32 %v8515_v16, %v4315_v62  ;;  %v4393_v8 = vadd.f32 %v8515_v16, %v4316_v0  ;;  %v4318_v55 = vmul.f32 %v8496_v52, %v9014_v26 }
 0x876   : > { %6144 = vmatmul.mubr.bf16.gmra.mrb[72].mxu1 %v4441_v42  ;;  %v4423_v2 = vmax.f32 %v4391_v48, 0.0  ;;  %v4394_v30 = vadd.f32 %v8515_v16, %v4317_v49  ;;  %v4319_v15 = vmul.f32 %v9015_v14, %v8496_v52  ;;  %v4320_v60 = vmul.f32 %v9016_v36, %v8496_v52 }
 0x877   : > { %6147 = vmatprep.mubr.bf16.mxu1 %v4442_v40  ;;  %v4424_v32 = vmax.f32 %v4392_v23, 0.0  ;;  %v4425_v51 = vmax.f32 %v4393_v8, 0.0  ;;  %v4395_v28 = vadd.f32 %v8515_v16, %v4318_v55  ;;  %v4321_v9 = vmul.f32 %v8503_v31, %v9017_v10 }
 0x878   : > { %v4446_v43 = vpack.c.bf16 %v4423_v2, %v4422_v7  ;;  %v4426_v39 = vmax.f32 %v4394_v30, 0.0  ;;  %v4396_v13 = vadd.f32 %v8515_v16, %v4319_v15  ;;  %v4397_v27 = vadd.f32 %v8515_v16, %v4320_v60  ;;  %v9020_v16 = vld [vmem:[#allocation29_spill] sm:$0xff] }
 0x879   : > { %v4447_v24 = vpack.c.bf16 %v4425_v51, %v4424_v32  ;;  %v4427_v53 = vmax.f32 %v4395_v28, 0.0  ;;  %v4322_v21 = vmul.f32 %v8503_v31, %v9018_v38  ;;  %v4398_v52 = vadd.f32 %v8518_v29, %v4321_v9 }
 0x87a   : > { %v4428_v42 = vmax.f32 %v4396_v13, 0.0  ;;  %v4429_v4 = vmax.f32 %v4397_v27, 0.0  ;;  %v4323_v19 = vmul.f32 %v8318_v1, %v8503_v31  ;;  %v4324_v37 = vmul.f32 %v9019_v41, %v8503_v31 }
 0x87b   : > { %v4448_v35 = vpack.c.bf16 %v4427_v53, %v4426_v39  ;;  %v4399_v11 = vadd.f32 %v8518_v29, %v4322_v21  ;;  %v4430_v3 = vmax.f32 %v4398_v52, 0.0  ;;  %v4325_v25 = vmul.f32 %v8503_v31, %v9020_v16 }
 0x87c   : > { %v4449_v12 = vpack.c.bf16 %v4429_v4, %v4428_v42  ;;  %v4400_v18 = vadd.f32 %v8518_v29, %v4323_v19  ;;  %v4401_v5 = vadd.f32 %v8518_v29, %v4324_v37  ;;  %v4326_v34 = vmul.f32 %v8503_v31, %v9021_v20 }
 0x87d   : > { %v4431_v56 = vmax.f32 %v4399_v11, 0.0  ;;  %v4402_v1 = vadd.f32 %v8518_v29, %v4325_v25  ;;  %v4327_v40 = vmul.f32 %v9022_v6, %v8503_v31  ;;  %v4328_v61 = vmul.f32 %v8346_v63, %v8503_v31  ;;  %v8581_v31 = vld [vmem:[%s8707_s6] ss:$0 sm:$0xff] }
 0x87e   : > { %6148 = vmatmul.mubr.bf16.gmra.mrb[76].mxu1 %v4443_v22  ;;  %v4432_v47 = vmax.f32 %v4400_v18, 0.0  ;;  %v4433_v57 = vmax.f32 %v4401_v5, 0.0  ;;  %v4403_v44 = vadd.f32 %v8518_v29, %v4326_v34 }
 0x87f   : > { %6151 = vmatprep.mubr.bf16.mxu1 %v4444_v50  ;;  %v4450_v17 = vpack.c.bf16 %v4431_v56, %v4430_v3  ;;  %v4434_v59 = vmax.f32 %v4402_v1, 0.0  ;;  %v4404_v58 = vadd.f32 %v8518_v29, %v4327_v40  ;;  %v4405_v33 = vadd.f32 %v8518_v29, %v4328_v61 }
 0x880   : > { %v4451_v54 = vpack.c.bf16 %v4433_v57, %v4432_v47  ;;  %v4435_v62 = vmax.f32 %v4403_v44, 0.0 }
 0x881   : > { %v4436_v0 = vmax.f32 %v4404_v58, 0.0  ;;  %v4437_v48 = vmax.f32 %v4405_v33, 0.0 }
 0x882   : > { %v4452_v7 = vpack.c.bf16 %v4435_v62, %v4434_v59 }
 0x883   : > { %v4453_v63 = vpack.c.bf16 %v4437_v48, %v4436_v0 }
 0x886   : > { %6152 = vmatmul.mubr.bf16.gmra.mrb[80].mxu1 %v4445_v45 }
 0x887   : > { %6155 = vmatprep.mubr.bf16.mxu1 %v4446_v43 }
 0x88e   : > { %6156 = vmatmul.mubr.bf16.gmra.mrb[84].mxu1 %v4447_v24 }
 0x88f   : > { %6159 = vmatprep.mubr.bf16.mxu1 %v4448_v35 }
 0x896   : > { %6160 = vmatmul.mubr.bf16.gmra.mrb[88].mxu1 %v4449_v12 }
 0x897   : > { %6163 = vmatprep.mubr.bf16.mxu1 %v4450_v17 }
 0x89e   : > { %6164 = vmatmul.mubr.bf16.gmra.mrb[92].mxu1 %v4451_v54 }
 0x89f   : > { %6167 = vmatprep.mubr.bf16.mxu1 %v4452_v7 }
 0x8a6   : > { %6168 = vmatmul.mubr.bf16.gmra.mrb[96].mxu1 %v4453_v63 }
 0x941   : > { %v6141_v29 = vpop.f32.mrb[68].mxu1 }
 0x942   : > { %v4568_v22 = vadd.f32 %v6141_v29, %v8581_v31  ;;  %v4559_v50 = vpop.f32.mrb[69].mxu1 }
 0x943   : > { %v4560_v46 = vadd.f32 %v8581_v31, %v4559_v50  ;;  %v6142_v49 = vpop.f32.mrb[70].mxu1 }
 0x944   : > { %4688 = vst [vmem:[%s8585_s14 + $0x10] sm:$0xff] %v4568_v22  ;;  %v4571_v45 = vadd.f32 %v6142_v49, %v8581_v31  ;;  %v4562_v23 = vpop.f32.mrb[71].mxu1 }
 0x945   : > { %4686 = vst [vmem:[%s8585_s14] sm:$0xff] %v4560_v46  ;;  %v4563_v8 = vadd.f32 %v8581_v31, %v4562_v23 }
 0x946   : > { %4689 = vst [vmem:[%s8585_s14 + $0x18] sm:$0xff] %v4571_v45 }
 0x947   : > { %4687 = vst [vmem:[%s8585_s14 + $0x8] sm:$0xff] %v4563_v8 }
 0x949   : > { %v6145_v26 = vpop.f32.mrb[72].mxu1 }
 0x94a   : > { %v4584_v55 = vadd.f32 %v6145_v26, %v8581_v31  ;;  %v4575_v2 = vpop.f32.mrb[73].mxu1 }
 0x94b   : > { %v4576_v30 = vadd.f32 %v8581_v31, %v4575_v2  ;;  %v6146_v14 = vpop.f32.mrb[74].mxu1 }
 0x94c   : > { %4692 = vst [vmem:[%s8585_s14 + $0x30] sm:$0xff] %v4584_v55  ;;  %v4587_v15 = vadd.f32 %v6146_v14, %v8581_v31  ;;  %v4578_v36 = vpop.f32.mrb[75].mxu1 }
 0x94d   : > { %4690 = vst [vmem:[%s8585_s14 + $0x20] sm:$0xff] %v4576_v30  ;;  %v4579_v60 = vadd.f32 %v8581_v31, %v4578_v36 }
 0x94e   : > { %4693 = vst [vmem:[%s8585_s14 + $0x38] sm:$0xff] %v4587_v15 }
 0x94f   : > { %4691 = vst [vmem:[%s8585_s14 + $0x28] sm:$0xff] %v4579_v60 }
 0x951   : > { %v6149_v32 = vpop.f32.mrb[76].mxu1 }
 0x952   : > { %v4600_v51 = vadd.f32 %v6149_v32, %v8581_v31  ;;  %v4591_v28 = vpop.f32.mrb[77].mxu1 }
 0x953   : > { %v4592_v10 = vadd.f32 %v8581_v31, %v4591_v28  ;;  %v6150_v9 = vpop.f32.mrb[78].mxu1 }
 0x954   : > { %4696 = vst [vmem:[%s8585_s14 + $0x50] sm:$0xff] %v4600_v51  ;;  %v4603_v43 = vadd.f32 %v6150_v9, %v8581_v31  ;;  %v4594_v39 = vpop.f32.mrb[79].mxu1 }
 0x955   : > { %4694 = vst [vmem:[%s8585_s14 + $0x40] sm:$0xff] %v4592_v10  ;;  %v4595_v13 = vadd.f32 %v8581_v31, %v4594_v39 }
 0x956   : > { %4697 = vst [vmem:[%s8585_s14 + $0x58] sm:$0xff] %v4603_v43 }
 0x957   : > { %4695 = vst [vmem:[%s8585_s14 + $0x48] sm:$0xff] %v4595_v13 }
 0x959   : > { %v6153_v27 = vpop.f32.mrb[80].mxu1 }
 0x95a   : > { %v4616_v24 = vadd.f32 %v6153_v27, %v8581_v31  ;;  %v4607_v53 = vpop.f32.mrb[81].mxu1 }
 0x95b   : > { %v4608_v38 = vadd.f32 %v8581_v31, %v4607_v53  ;;  %v6154_v21 = vpop.f32.mrb[82].mxu1 }
 0x95c   : > { %4700 = vst [vmem:[%s8585_s14 + $0x70] sm:$0xff] %v4616_v24  ;;  %v4619_v52 = vadd.f32 %v6154_v21, %v8581_v31  ;;  %v4610_v42 = vpop.f32.mrb[83].mxu1 }
 0x95d   : > { %4698 = vst [vmem:[%s8585_s14 + $0x60] sm:$0xff] %v4608_v38  ;;  %v4611_v4 = vadd.f32 %v8581_v31, %v4610_v42 }
 0x95e   : > { %4701 = vst [vmem:[%s8585_s14 + $0x78] sm:$0xff] %v4619_v52 }
 0x95f   : > { %4699 = vst [vmem:[%s8585_s14 + $0x68] sm:$0xff] %v4611_v4 }
 0x961   : > { %v6157_v19 = vpop.f32.mrb[84].mxu1 }
 0x962   : > { %v4632_v41 = vadd.f32 %v6157_v19, %v8581_v31  ;;  %v4623_v37 = vpop.f32.mrb[85].mxu1 }
 0x963   : > { %v4624_v35 = vadd.f32 %v8581_v31, %v4623_v37  ;;  %v6158_v11 = vpop.f32.mrb[86].mxu1 }
 0x964   : > { %4704 = vst [vmem:[%s8585_s14 + $0x90] sm:$0xff] %v4632_v41  ;;  %v4635_v3 = vadd.f32 %v6158_v11, %v8581_v31  ;;  %v4626_v16 = vpop.f32.mrb[87].mxu1 }
 0x965   : > { %4702 = vst [vmem:[%s8585_s14 + $0x80] sm:$0xff] %v4624_v35  ;;  %v4627_v25 = vadd.f32 %v8581_v31, %v4626_v16 }
 0x966   : > { %4705 = vst [vmem:[%s8585_s14 + $0x98] sm:$0xff] %v4635_v3 }
 0x967   : > { %4703 = vst [vmem:[%s8585_s14 + $0x88] sm:$0xff] %v4627_v25 }
 0x969   : > { %v6161_v12 = vpop.f32.mrb[88].mxu1 }
 0x96a   : > { %v4648_v18 = vadd.f32 %v6161_v12, %v8581_v31  ;;  %v4639_v5 = vpop.f32.mrb[89].mxu1 }
 0x96b   : > { %v4640_v20 = vadd.f32 %v8581_v31, %v4639_v5  ;;  %v6162_v34 = vpop.f32.mrb[90].mxu1 }
 0x96c   : > { %4708 = vst [vmem:[%s8585_s14 + $0xb0] sm:$0xff] %v4648_v18  ;;  %v4651_v56 = vadd.f32 %v6162_v34, %v8581_v31  ;;  %v4642_v1 = vpop.f32.mrb[91].mxu1 }
 0x96d   : > { %4706 = vst [vmem:[%s8585_s14 + $0xa0] sm:$0xff] %v4640_v20  ;;  %v4643_v6 = vadd.f32 %v8581_v31, %v4642_v1 }
 0x96e   : > { %4709 = vst [vmem:[%s8585_s14 + $0xb8] sm:$0xff] %v4651_v56 }
 0x96f   : > { %4707 = vst [vmem:[%s8585_s14 + $0xa8] sm:$0xff] %v4643_v6 }
 0x971   : > { %v6165_v40 = vpop.f32.mrb[92].mxu1 }
 0x972   : > { %v4664_v61 = vadd.f32 %v6165_v40, %v8581_v31  ;;  %v4655_v47 = vpop.f32.mrb[93].mxu1 }
 0x973   : > { %v4656_v57 = vadd.f32 %v8581_v31, %v4655_v47  ;;  %v6166_v44 = vpop.f32.mrb[94].mxu1 }
 0x974   : > { %4712 = vst [vmem:[%s8585_s14 + $0xd0] sm:$0xff] %v4664_v61  ;;  %v4667_v17 = vadd.f32 %v6166_v44, %v8581_v31  ;;  %v4658_v59 = vpop.f32.mrb[95].mxu1 }
 0x975   : > { %4710 = vst [vmem:[%s8585_s14 + $0xc0] sm:$0xff] %v4656_v57  ;;  %v4659_v58 = vadd.f32 %v8581_v31, %v4658_v59 }
 0x976   : > { %4713 = vst [vmem:[%s8585_s14 + $0xd8] sm:$0xff] %v4667_v17 }
 0x977   : > { %4711 = vst [vmem:[%s8585_s14 + $0xc8] sm:$0xff] %v4659_v58 }
 0x979   : > { %v6169_v33 = vpop.f32.mrb[96].mxu1 }
 0x97a   : > { %v4680_v54 = vadd.f32 %v6169_v33, %v8581_v31  ;;  %v4671_v62 = vpop.f32.mrb[97].mxu1 }
 0x97b   : > { %v4672_v0 = vadd.f32 %v8581_v31, %v4671_v62  ;;  %v6170_v48 = vpop.f32.mrb[98].mxu1 }
 0x97c   : > { %4716 = vst [vmem:[%s8585_s14 + $0xf0] sm:$0xff] %v4680_v54  ;;  %v4683_v7 = vadd.f32 %v6170_v48, %v8581_v31  ;;  %v4674_v63 = vpop.f32.mrb[99].mxu1 }
 0x97d   : > { %4714 = vst [vmem:[%s8585_s14 + $0xe0] sm:$0xff] %v4672_v0  ;;  %v4675_v29 = vadd.f32 %v8581_v31, %v4674_v63 }
 0x97e   : > { %4717 = vst [vmem:[%s8585_s14 + $0xf8] sm:$0xff] %v4683_v7 }
 0x97f   : > { %4715 = vst [vmem:[%s8585_s14 + $0xe8] sm:$0xff] %v4675_v29 }
 0x980   : > { %6746 = shalt.err (!%p6743_p3)
}
 0x981   : > { %s6747_s29 = scalar_lea.hbm %s8650_s19, 4096  ;;  %s6751_s13 = scalar_lea.hbm %s8708_s7, 8192 }
 0x982   : > { %p6748_p4 = scmp.ne.s32.totalorder %s8650_s19, %s6747_s29  ;;  %p6752_p9 = scmp.lt.u32.totalorder %s8650_s19, %s8708_s7 }
 0x983   : > { %p6753_p10 = scmp.lt.u32.totalorder %s6751_s13, %s6747_s29  ;;  %p6755_p12 = scmp.lt.u32.totalorder %s6747_s29, %s8650_s19 }
 0x984   : > { %p6749_p7 = pnand %p6748_p4, %p6883_p5 }
 0x985   : > { %p6754_p11 = por %p6753_p10, %p6752_p9 }
 0x986   : > { %p6750_p8 = pneg %p6749_p7 }
 0x987   : > { %p6756_p13 = por %p6755_p12, %p6754_p11 }
 0x989   : > { %p6757_p0 = pnand %p6756_p13, %p6750_p8 }
 0x98b   : > { %6760 = shalt.err (!%p6757_p0)
}
 0x98c   : > { %s6803_s17 = smov 128   ;;  %s6804_s18 = smov 8  }
 0x98d   : > { %6640 = dma.vmem_to_hbm [thread:$0]  (%p6883_p5), %s8652_s16, 4096, %s8650_s19, %s8660_s28, %s6803_s17, %s6803_s17, %s6804_s18  }
 0x98e PF: > { %p6646_p1 = scmp.ge.s32.totalorder %s6795_s27, 2  ;;  %s4748_s20 = sand.u32 1, %s6783_s24  }
 0x98f   : > { %s4749_s21 = scalar_lea.sflag [#allocation3], %s4748_s20 }
 0x990   : > { %p6643_p2 = pnand %p6646_p1, %p6887_p6 }
 0x992   : > { %6778 = dma.done.wait (!%p6643_p2), %s4749_s21, 4096  }
 0x993   : > { %6780 = vsyncadd (!%p6643_p2), %s4749_s21, 4294963200  ;;  %p17_p3 = scmp.ge.s32.totalorder %s6870_s30, 4   ;;  %s9023_s24 = smov %s6787_s25 }
 0x994   : > { %s9024_s25 = smov %s6791_s26  ;;  %s9025_s26 = smov %s6881_s10 }
 0x995   : > { %s9026_s27 = smov %s6870_s30  ;;  %19 = sbr.rel (!%p17_p3) target bundleno = 3 (0x3), region = 88 }
 0x99c   :  { %4754 = vsyncpa [#allocation3], 1 }
 0x99d   :  { %4756 = vsyncpa [#allocation3 + $0x1], 1 }

</bundles_post_ra>
